<compile_context>
chip_gen: v7x
topology: tpu7x:2x2x1
jax: 0.10.0
libtpu: 0.0.40
codegen_flags: <defaults>
</compile_context>

<pallas_src>
import functools

import jax
import jax.numpy as jnp
from jax.experimental import pallas as pl
from jax.experimental.pallas import tpu as pltpu

VMEM_SPEC = pl.BlockSpec(memory_space=pltpu.MemorySpace.VMEM)

# (cin, cout, stride) for the 8 BasicBlocks of ResNet-18 (static config).
BLOCK_CONFIG = [
    (64, 64, 1), (64, 64, 1),
    (64, 128, 2), (128, 128, 1),
    (128, 256, 2), (256, 256, 1),
    (256, 512, 2), (512, 512, 1),
]

NUM_CLASSES = 7
FC_IN_DIM = 512


def _round_up(x, m):
    return (x + m - 1) // m * m


# --------------------------- fused tiled matmul ------------------------------

def _mm_kernel(a_ref, b_ref, s_ref, c_ref, *rest, relu, has_res):
    """Tiled matmul with K-accumulation and fused BN-affine / residual / ReLU.

    grid = (n_tiles, m_tiles, k_tiles);  rest = ([res_ref,] o_ref, acc_ref).
    """
    if has_res:
        res_ref, o_ref, acc_ref = rest
    else:
        o_ref, acc_ref = rest
    k = pl.program_id(2)

    @pl.when(k == 0)
    def _init():
        acc_ref[...] = jnp.zeros_like(acc_ref)

    acc_ref[...] += jnp.dot(a_ref[...], b_ref[...],
                            preferred_element_type=jnp.float32)

    @pl.when(k == pl.num_programs(2) - 1)
    def _finalize():
        out = acc_ref[...] * s_ref[...] + c_ref[...]
        if has_res:
            out = out + res_ref[...].astype(jnp.float32)
        if relu:
            out = jnp.maximum(out, 0.0)
        o_ref[...] = out.astype(o_ref.dtype)


def fused_matmul(a, b, scale, bias, *, relu, residual=None,
                 out_dtype=jnp.bfloat16):
    """out = act((A @ B) * scale + bias [+ residual]); A,B cast to bf16."""
    m, k = a.shape
    _, n = b.shape

    # ---- tile selection (v7x-safe VMEM budget; lane-dense where possible) ---
    mp = _round_up(m, 8)
    tm = 256 if mp > 256 else mp
    mp = _round_up(mp, tm)

    if n < 128:
        np_, tn = n, n                      # full-extent minor block (allowed)
    else:
        np_ = _round_up(n, 128)
        tn = 256 if (np_ % 256 == 0 and np_ >= 256) else 128

    kp = _round_up(k, 128)
    nk = -(-kp // 768)                      # cap K-tile at 768
    tk = _round_up(-(-kp // nk), 128)
    kp = nk * tk

    a_p = jnp.pad(a.astype(jnp.bfloat16), ((0, mp - m), (0, kp - k)))
    b_p = jnp.pad(b.astype(jnp.bfloat16), ((0, kp - k), (0, np_ - n)))
    s_p = jnp.pad(scale.astype(jnp.float32).reshape(1, n), ((0, 0), (0, np_ - n)))
    c_p = jnp.pad(bias.astype(jnp.float32).reshape(1, n), ((0, 0), (0, np_ - n)))

    operands = [a_p, b_p, s_p, c_p]
    in_specs = [
        pl.BlockSpec((tm, tk), lambda j, i, kk: (i, kk)),
        pl.BlockSpec((tk, tn), lambda j, i, kk: (kk, j)),
        pl.BlockSpec((1, tn), lambda j, i, kk: (0, j)),
        pl.BlockSpec((1, tn), lambda j, i, kk: (0, j)),
    ]
    has_res = residual is not None
    if has_res:
        r_p = jnp.pad(residual.astype(jnp.bfloat16),
                      ((0, mp - m), (0, np_ - n)))
        operands.append(r_p)
        in_specs.append(pl.BlockSpec((tm, tn), lambda j, i, kk: (i, j)))

    out = pl.pallas_call(
        functools.partial(_mm_kernel, relu=relu, has_res=has_res),
        out_shape=jax.ShapeDtypeStruct((mp, np_), out_dtype),
        grid=(np_ // tn, mp // tm, kp // tk),
        in_specs=in_specs,
        out_specs=pl.BlockSpec((tm, tn), lambda j, i, kk: (i, j)),
        scratch_shapes=[pltpu.VMEM((tm, tn), jnp.float32)],
        compiler_params=pltpu.CompilerParams(
            dimension_semantics=("parallel", "parallel", "arbitrary"),
            vmem_limit_bytes=32 * 1024 * 1024),
    )(*operands)
    return out[:m, :n]


# --------------------------- other kernels -----------------------------------

def _max_reduce_kernel(p_ref, o_ref):
    # p: [9, tm, C] -> max over the 9 pooling-window taps.
    o_ref[...] = jnp.max(p_ref[...], axis=0)


def _mean_reduce_kernel(x_ref, o_ref):
    # x: [N, HW, C] -> adaptive avg pool to 1x1 == mean over spatial (f32 acc).
    o_ref[...] = jnp.mean(x_ref[...].astype(jnp.float32), axis=1)


def _head_kernel(x_ref, w_ref, b_ref, alpha_ref, out_ref):
    """Single fused matmul: z = x @ [Wfc | Wa] + [bfc | ba];
    alpha = sigmoid(z[:, -1:]); out = alpha * z[:, :num_classes]."""
    z = jnp.dot(x_ref[...], w_ref[...],
                preferred_element_type=jnp.float32) + b_ref[...]
    logits = z[:, :NUM_CLASSES]
    za = z[:, NUM_CLASSES:NUM_CLASSES + 1]
    # numerically stable sigmoid
    alpha = jnp.where(za >= 0.0,
                      1.0 / (1.0 + jnp.exp(-za)),
                      jnp.exp(za) / (1.0 + jnp.exp(za)))
    alpha_ref[...] = alpha
    out_ref[...] = alpha * logits


# --------------------------- conv / pool wrappers ----------------------------

def conv_bn(x, w_hwio, scale, bias, *, stride, pad, relu, residual=None):
    """Conv2d (no bias) + folded BatchNorm + optional residual + ReLU.

    x: [N, H, W, Cin] bf16 NHWC.  w_hwio: [kh, kw, Cin, Cout].
    Lowered to im2col (JAX glue) + tiled Pallas fused matmul.
    """
    kh, kw, cin, cout = w_hwio.shape
    xpad = jnp.pad(x, ((0, 0), (pad, pad), (pad, pad), (0, 0)))
    n, hp, wp, _ = xpad.shape
    ho = (hp - kh) // stride + 1
    wo = (wp - kw) // stride + 1
    taps = []
    for i in range(kh):
        for j in range(kw):
            taps.append(
                jax.lax.slice(
                    xpad,
                    (0, i, j, 0),
                    (n, i + (ho - 1) * stride + 1, j + (wo - 1) * stride + 1, cin),
                    (1, stride, stride, 1),
                )
            )
    # [M, kh*kw*Cin], tap-major / channel-minor -> matches w_hwio.reshape below.
    pmat = jnp.concatenate(taps, axis=-1).reshape(n * ho * wo, kh * kw * cin)
    wmat = w_hwio.reshape(kh * kw * cin, cout)
    res_flat = None
    if residual is not None:
        res_flat = residual.reshape(n * ho * wo, cout)
    out = fused_matmul(pmat, wmat, scale, bias, relu=relu, residual=res_flat)
    return out.reshape(n, ho, wo, cout)


def maxpool3x3_s2_p1(x):
    n, h, w, c = x.shape
    xpad = jnp.pad(x, ((0, 0), (1, 1), (1, 1), (0, 0)),
                   constant_values=-jnp.inf)
    hp, wp = h + 2, w + 2
    ho = (hp - 3) // 2 + 1
    wo = (wp - 3) // 2 + 1
    taps = []
    for i in range(3):
        for j in range(3):
            taps.append(
                jax.lax.slice(
                    xpad,
                    (0, i, j, 0),
                    (n, i + (ho - 1) * 2 + 1, j + (wo - 1) * 2 + 1, c),
                    (1, 2, 2, 1),
                )
            )
    m = n * ho * wo
    p = jnp.stack(taps, axis=0).reshape(9, m, c)
    mp = _round_up(m, 8)
    tm = 512 if mp > 512 else mp
    mp = _round_up(mp, tm)
    p = jnp.pad(p, ((0, 0), (0, mp - m), (0, 0)))
    out = pl.pallas_call(
        _max_reduce_kernel,
        out_shape=jax.ShapeDtypeStruct((mp, c), x.dtype),
        grid=(mp // tm,),
        in_specs=[pl.BlockSpec((9, tm, c), lambda i: (0, i, 0))],
        out_specs=pl.BlockSpec((tm, c), lambda i: (i, 0)),
        compiler_params=pltpu.CompilerParams(
            dimension_semantics=("parallel",)),
    )(p)
    return out[:m].reshape(n, ho, wo, c)


def global_avg_pool(x):
    n, h, w, c = x.shape
    xr = x.reshape(n, h * w, c)
    return pl.pallas_call(
        _mean_reduce_kernel,
        out_shape=jax.ShapeDtypeStruct((n, c), jnp.float32),
        in_specs=[VMEM_SPEC],
        out_specs=VMEM_SPEC,
    )(xr)


# --------------------------- parameters --------------------------------------

def init_conv_bn(key, kh, kw, cin, cout):
    kw_, kg, kb, km, kv = jax.random.split(key, 5)
    fan_in = kh * kw * cin
    w = jax.random.normal(kw_, (kh, kw, cin, cout), jnp.float32) * (2.0 / fan_in) ** 0.5
    gamma = 1.0 + 0.1 * jax.random.normal(kg, (cout,), jnp.float32)
    beta = 0.1 * jax.random.normal(kb, (cout,), jnp.float32)
    mean = 0.1 * jax.random.normal(km, (cout,), jnp.float32)
    var = 1.0 + 0.1 * jax.random.uniform(kv, (cout,), jnp.float32)
    eps = 1e-5
    scale = gamma / jnp.sqrt(var + eps)
    bias = beta - mean * scale
    return {"w": w, "scale": scale, "bias": bias}


def init_params(key):
    keys = list(jax.random.split(key, 2 + 3 * len(BLOCK_CONFIG) + 1))
    ki = iter(keys)
    params = {"conv1": init_conv_bn(next(ki), 7, 7, 3, 64)}
    blocks = []
    for cin, cout, stride in BLOCK_CONFIG:
        blk = {
            "conv1": init_conv_bn(next(ki), 3, 3, cin, cout),
            "conv2": init_conv_bn(next(ki), 3, 3, cout, cout),
        }
        if stride != 1 or cin != cout:
            blk["down"] = init_conv_bn(next(ki), 1, 1, cin, cout)
        else:
            _ = next(ki)  # keep key consumption uniform
        blocks.append(blk)
    params["blocks"] = blocks
    kf1, kf2, ka1, ka2 = jax.random.split(next(ki), 4)
    params["fc_w"] = 0.05 * jax.random.normal(kf1, (FC_IN_DIM, NUM_CLASSES), jnp.float32)
    params["fc_b"] = 0.05 * jax.random.normal(kf2, (NUM_CLASSES,), jnp.float32)
    params["alpha_w"] = 0.05 * jax.random.normal(ka1, (FC_IN_DIM, 1), jnp.float32)
    params["alpha_b"] = 0.05 * jax.random.normal(ka2, (1,), jnp.float32)
    return params


# --------------------------- forward ------------------------------------------

def res18_feature_forward(params, x_nchw):
    """Matches Res18Feature.forward: returns (attention_weights, out)."""
    # NCHW (PyTorch) -> NHWC bf16 for all internal conv compute.
    x = jnp.transpose(x_nchw, (0, 2, 3, 1)).astype(jnp.bfloat16)

    c1 = params["conv1"]
    x = conv_bn(x, c1["w"], c1["scale"], c1["bias"],
                stride=2, pad=3, relu=True)
    x = maxpool3x3_s2_p1(x)

    for (cin, cout, stride), blk in zip(BLOCK_CONFIG, params["blocks"]):
        identity = x
        if "down" in blk:
            identity = conv_bn(x, blk["down"]["w"], blk["down"]["scale"],
                               blk["down"]["bias"], stride=stride, pad=0,
                               relu=False)
        y = conv_bn(x, blk["conv1"]["w"], blk["conv1"]["scale"],
                    blk["conv1"]["bias"], stride=stride, pad=1, relu=True)
        # residual add + ReLU fused into the second conv's matmul epilogue.
        x = conv_bn(y, blk["conv2"]["w"], blk["conv2"]["scale"],
                    blk["conv2"]["bias"], stride=1, pad=1, relu=True,
                    residual=identity)

    feat = global_avg_pool(x)  # [B, 512] f32

    b = feat.shape[0]
    # Fused head: one matmul against [fc_w | alpha_w].
    w_all = jnp.concatenate([params["fc_w"], params["alpha_w"]], axis=1)
    b_all = jnp.concatenate([params["fc_b"], params["alpha_b"]]
                            ).reshape(1, NUM_CLASSES + 1)
    alpha, out = pl.pallas_call(
        _head_kernel,
        out_shape=(jax.ShapeDtypeStruct((b, 1), jnp.float32),
                   jax.ShapeDtypeStruct((b, NUM_CLASSES), jnp.float32)),
        in_specs=[VMEM_SPEC, VMEM_SPEC, VMEM_SPEC],
        out_specs=(VMEM_SPEC, VMEM_SPEC),
    )(feat, w_all, b_all)
    return alpha, out


# --------------------------- main ---------------------------------------------

if __name__ == "__main__":
    key = jax.random.PRNGKey(0)
    pkey, xkey = jax.random.split(key)
    params = init_params(pkey)
    # Small but structurally valid input: batch=2, channels=3 (ResNet), 32x32.
    x = jax.random.normal(xkey, (2, 3, 32, 32), jnp.float32)

    fwd = jax.jit(res18_feature_forward)
    attention_weights, out = fwd(params, x)
    jax.block_until_ready((attention_weights, out))

    assert attention_weights.shape == (2, 1), attention_weights.shape
    assert out.shape == (2, NUM_CLASSES), out.shape
    assert bool(jnp.all(jnp.isfinite(attention_weights)))
    assert bool(jnp.all(jnp.isfinite(out)))
    print("KERNEL_OK")
</pallas_src>

<mosaic_0001>
module attributes {stable_mosaic.version = 11 : i64} {
  func.func @_mm_kernel(%arg0: i32, %arg1: i32, %arg2: i32, %arg3: memref<256x256xbf16, #tpu.memory_space<vmem>>, %arg4: memref<256x64xbf16, #tpu.memory_space<vmem>>, %arg5: memref<1x64xf32, #tpu.memory_space<vmem>>, %arg6: memref<1x64xf32, #tpu.memory_space<vmem>>, %arg7: memref<256x64xbf16, #tpu.memory_space<vmem>>, %arg8: memref<256x64xf32, #tpu.memory_space<vmem>>) attributes {dimension_semantics = [#tpu.dimension_semantics<parallel>, #tpu.dimension_semantics<parallel>, #tpu.dimension_semantics<arbitrary>], iteration_bounds = array<i64: 1, 2, 1>, scalar_prefetch = 0 : i64, scratch_operands = 1 : i64, tpu.core_type = #tpu.core_type<tc>, window_params = [{transform_indices = @transform_0, window_bounds = array<i64: 256, 256>}, {transform_indices = @transform_1, window_bounds = array<i64: 256, 64>}, {transform_indices = @transform_2, window_bounds = array<i64: 1, 64>}, {transform_indices = @transform_3, window_bounds = array<i64: 1, 64>}, {transform_indices = @transform_4, window_bounds = array<i64: 256, 64>}]} {
    %c0_i32 = arith.constant 0 : i32
    %0 = arith.cmpi eq, %arg2, %c0_i32 : i32
    %1 = arith.extui %0 : i1 to i32
    %c0_i32_0 = arith.constant 0 : i32
    %2 = arith.cmpi ne, %1, %c0_i32_0 : i32
    scf.if %2 {
      %cst_10 = arith.constant 0.000000e+00 : f32
      %12 = vector.broadcast %cst_10 : f32 to vector<256x64xf32>
      %c0_11 = arith.constant 0 : index
      %c0_12 = arith.constant 0 : index
      %13 = vector.load %arg8[%c0_11, %c0_12] : memref<256x64xf32, #tpu.memory_space<vmem>>, vector<256x64xf32>
      tpu.vector_store %arg8[%c0_11, %c0_12], %12 {strides = array<i32>} : memref<256x64xf32, #tpu.memory_space<vmem>>, vector<256x64xf32>,
    } else {
    }
    %c0 = arith.constant 0 : index
    %c0_1 = arith.constant 0 : index
    %3 = vector.load %arg8[%c0, %c0_1] : memref<256x64xf32, #tpu.memory_space<vmem>>, vector<256x64xf32>
    %c0_2 = arith.constant 0 : index
    %c0_3 = arith.constant 0 : index
    %4 = vector.load %arg3[%c0_2, %c0_3] : memref<256x256xbf16, #tpu.memory_space<vmem>>, vector<256x256xbf16>
    %c0_4 = arith.constant 0 : index
    %c0_5 = arith.constant 0 : index
    %5 = vector.load %arg4[%c0_4, %c0_5] : memref<256x64xbf16, #tpu.memory_space<vmem>>, vector<256x64xbf16>
    %cst = arith.constant dense<0.000000e+00> : vector<256x64xf32>
    %6 = tpu.matmul %4, %5, %cst {dimension_numbers = #tpu.dot_dimension_numbers<[1], [0], [0], [1], [0, 0, 1, 1], [], []>} : vector<256x256xbf16>, vector<256x64xbf16>, vector<256x64xf32> -> vector<256x64xf32>
    %7 = arith.addf %3, %6 : vector<256x64xf32>
    %c0_6 = arith.constant 0 : index
    %c0_7 = arith.constant 0 : index
    %8 = vector.load %arg8[%c0_6, %c0_7] : memref<256x64xf32, #tpu.memory_space<vmem>>, vector<256x64xf32>
    tpu.vector_store %arg8[%c0_6, %c0_7], %7 {strides = array<i32>} : memref<256x64xf32, #tpu.memory_space<vmem>>, vector<256x64xf32>,
    %c0_i32_8 = arith.constant 0 : i32
    %9 = arith.cmpi eq, %arg2, %c0_i32_8 : i32
    %10 = arith.extui %9 : i1 to i32
    %c0_i32_9 = arith.constant 0 : i32
    %11 = arith.cmpi ne, %10, %c0_i32_9 : i32
    scf.if %11 {
      %c0_10 = arith.constant 0 : index
      %c0_11 = arith.constant 0 : index
      %12 = vector.load %arg8[%c0_10, %c0_11] : memref<256x64xf32, #tpu.memory_space<vmem>>, vector<256x64xf32>
      %c0_12 = arith.constant 0 : index
      %c0_13 = arith.constant 0 : index
      %13 = vector.load %arg5[%c0_12, %c0_13] : memref<1x64xf32, #tpu.memory_space<vmem>>, vector<1x64xf32>
      %14 = vector.broadcast %13 : vector<1x64xf32> to vector<256x64xf32>
      %15 = arith.mulf %12, %14 : vector<256x64xf32>
      %c0_14 = arith.constant 0 : index
      %c0_15 = arith.constant 0 : index
      %16 = vector.load %arg6[%c0_14, %c0_15] : memref<1x64xf32, #tpu.memory_space<vmem>>, vector<1x64xf32>
      %17 = vector.broadcast %16 : vector<1x64xf32> to vector<256x64xf32>
      %18 = arith.addf %15, %17 : vector<256x64xf32>
      %cst_16 = arith.constant 0.000000e+00 : f32
      %19 = vector.broadcast %cst_16 : f32 to vector<256x64xf32>
      %20 = arith.maximumf %18, %19 : vector<256x64xf32>
      %21 = arith.truncf %20 : vector<256x64xf32> to vector<256x64xbf16>
      %c0_17 = arith.constant 0 : index
      %c0_18 = arith.constant 0 : index
      %22 = vector.load %arg7[%c0_17, %c0_18] : memref<256x64xbf16, #tpu.memory_space<vmem>>, vector<256x64xbf16>
      tpu.vector_store %arg7[%c0_17, %c0_18], %21 {strides = array<i32>} : memref<256x64xbf16, #tpu.memory_space<vmem>>, vector<256x64xbf16>,
    } else {
    }
    return
  }
  func.func @transform_0(%arg0: i32, %arg1: i32, %arg2: i32) -> (i32, i32) {
    %c0_i32 = arith.constant 0 : i32
    return %arg1, %arg2 : i32, i32
  }
  func.func @transform_1(%arg0: i32, %arg1: i32, %arg2: i32) -> (i32, i32) {
    %c0_i32 = arith.constant 0 : i32
    return %arg2, %arg0 : i32, i32
  }
  func.func @transform_2(%arg0: i32, %arg1: i32, %arg2: i32) -> (i32, i32) {
    %c0_i32 = arith.constant 0 : i32
    %c0_i32_0 = arith.constant 0 : i32
    return %c0_i32, %arg0 : i32, i32
  }
  func.func @transform_3(%arg0: i32, %arg1: i32, %arg2: i32) -> (i32, i32) {
    %c0_i32 = arith.constant 0 : i32
    %c0_i32_0 = arith.constant 0 : i32
    return %c0_i32, %arg0 : i32, i32
  }
  func.func @transform_4(%arg0: i32, %arg1: i32, %arg2: i32) -> (i32, i32) {
    %c0_i32 = arith.constant 0 : i32
    return %arg1, %arg0 : i32, i32
  }
}

module attributes {stable_mosaic.version = 11 : i64} {
  func.func @_max_reduce_kernel(%arg0: i32, %arg1: memref<9x128x64xbf16, #tpu.memory_space<vmem>>, %arg2: memref<128x64xbf16, #tpu.memory_space<vmem>>) attributes {dimension_semantics = [#tpu.dimension_semantics<parallel>], iteration_bounds = array<i64: 1>, scalar_prefetch = 0 : i64, scratch_operands = 0 : i64, tpu.core_type = #tpu.core_type<tc>, window_params = [{transform_indices = @transform_0, window_bounds = array<i64: 9, 128, 64>}, {transform_indices = @transform_1, window_bounds = array<i64: 128, 64>}]} {
    %c0 = arith.constant 0 : index
    %c0_0 = arith.constant 0 : index
    %c0_1 = arith.constant 0 : index
    %0 = vector.load %arg1[%c0, %c0_0, %c0_1] : memref<9x128x64xbf16, #tpu.memory_space<vmem>>, vector<9x128x64xbf16>
    %cst = arith.constant dense<0xFF80> : vector<128x64xbf16>
    %1 = vector.multi_reduction <maximumf>, %0, %cst [0] : vector<9x128x64xbf16> to vector<128x64xbf16>
    %c0_2 = arith.constant 0 : index
    %c0_3 = arith.constant 0 : index
    %2 = vector.load %arg2[%c0_2, %c0_3] : memref<128x64xbf16, #tpu.memory_space<vmem>>, vector<128x64xbf16>
    tpu.vector_store %arg2[%c0_2, %c0_3], %1 {strides = array<i32>} : memref<128x64xbf16, #tpu.memory_space<vmem>>, vector<128x64xbf16>,
    return
  }
  func.func @transform_0(%arg0: i32) -> (i32, i32, i32) {
    %c0_i32 = arith.constant 0 : i32
    %c0_i32_0 = arith.constant 0 : i32
    %c0_i32_1 = arith.constant 0 : i32
    return %c0_i32, %arg0, %c0_i32_0 : i32, i32, i32
  }
  func.func @transform_1(%arg0: i32) -> (i32, i32) {
    %c0_i32 = arith.constant 0 : i32
    %c0_i32_0 = arith.constant 0 : i32
    return %arg0, %c0_i32 : i32, i32
  }
}

module attributes {stable_mosaic.version = 11 : i64} {
  func.func @_mm_kernel(%arg0: i32, %arg1: i32, %arg2: i32, %arg3: memref<128x640xbf16, #tpu.memory_space<vmem>>, %arg4: memref<640x64xbf16, #tpu.memory_space<vmem>>, %arg5: memref<1x64xf32, #tpu.memory_space<vmem>>, %arg6: memref<1x64xf32, #tpu.memory_space<vmem>>, %arg7: memref<128x64xbf16, #tpu.memory_space<vmem>>, %arg8: memref<128x64xf32, #tpu.memory_space<vmem>>) attributes {dimension_semantics = [#tpu.dimension_semantics<parallel>, #tpu.dimension_semantics<parallel>, #tpu.dimension_semantics<arbitrary>], iteration_bounds = array<i64: 1, 1, 1>, scalar_prefetch = 0 : i64, scratch_operands = 1 : i64, tpu.core_type = #tpu.core_type<tc>, window_params = [{transform_indices = @transform_0, window_bounds = array<i64: 128, 640>}, {transform_indices = @transform_1, window_bounds = array<i64: 640, 64>}, {transform_indices = @transform_2, window_bounds = array<i64: 1, 64>}, {transform_indices = @transform_3, window_bounds = array<i64: 1, 64>}, {transform_indices = @transform_4, window_bounds = array<i64: 128, 64>}]} {
    %c0_i32 = arith.constant 0 : i32
    %0 = arith.cmpi eq, %arg2, %c0_i32 : i32
    %1 = arith.extui %0 : i1 to i32
    %c0_i32_0 = arith.constant 0 : i32
    %2 = arith.cmpi ne, %1, %c0_i32_0 : i32
    scf.if %2 {
      %cst_10 = arith.constant 0.000000e+00 : f32
      %12 = vector.broadcast %cst_10 : f32 to vector<128x64xf32>
      %c0_11 = arith.constant 0 : index
      %c0_12 = arith.constant 0 : index
      %13 = vector.load %arg8[%c0_11, %c0_12] : memref<128x64xf32, #tpu.memory_space<vmem>>, vector<128x64xf32>
      tpu.vector_store %arg8[%c0_11, %c0_12], %12 {strides = array<i32>} : memref<128x64xf32, #tpu.memory_space<vmem>>, vector<128x64xf32>,
    } else {
    }
    %c0 = arith.constant 0 : index
    %c0_1 = arith.constant 0 : index
    %3 = vector.load %arg8[%c0, %c0_1] : memref<128x64xf32, #tpu.memory_space<vmem>>, vector<128x64xf32>
    %c0_2 = arith.constant 0 : index
    %c0_3 = arith.constant 0 : index
    %4 = vector.load %arg3[%c0_2, %c0_3] : memref<128x640xbf16, #tpu.memory_space<vmem>>, vector<128x640xbf16>
    %c0_4 = arith.constant 0 : index
    %c0_5 = arith.constant 0 : index
    %5 = vector.load %arg4[%c0_4, %c0_5] : memref<640x64xbf16, #tpu.memory_space<vmem>>, vector<640x64xbf16>
    %cst = arith.constant dense<0.000000e+00> : vector<128x64xf32>
    %6 = tpu.matmul %4, %5, %cst {dimension_numbers = #tpu.dot_dimension_numbers<[1], [0], [0], [1], [0, 0, 1, 1], [], []>} : vector<128x640xbf16>, vector<640x64xbf16>, vector<128x64xf32> -> vector<128x64xf32>
    %7 = arith.addf %3, %6 : vector<128x64xf32>
    %c0_6 = arith.constant 0 : index
    %c0_7 = arith.constant 0 : index
    %8 = vector.load %arg8[%c0_6, %c0_7] : memref<128x64xf32, #tpu.memory_space<vmem>>, vector<128x64xf32>
    tpu.vector_store %arg8[%c0_6, %c0_7], %7 {strides = array<i32>} : memref<128x64xf32, #tpu.memory_space<vmem>>, vector<128x64xf32>,
    %c0_i32_8 = arith.constant 0 : i32
    %9 = arith.cmpi eq, %arg2, %c0_i32_8 : i32
    %10 = arith.extui %9 : i1 to i32
    %c0_i32_9 = arith.constant 0 : i32
    %11 = arith.cmpi ne, %10, %c0_i32_9 : i32
    scf.if %11 {
      %c0_10 = arith.constant 0 : index
      %c0_11 = arith.constant 0 : index
      %12 = vector.load %arg8[%c0_10, %c0_11] : memref<128x64xf32, #tpu.memory_space<vmem>>, vector<128x64xf32>
      %c0_12 = arith.constant 0 : index
      %c0_13 = arith.constant 0 : index
      %13 = vector.load %arg5[%c0_12, %c0_13] : memref<1x64xf32, #tpu.memory_space<vmem>>, vector<1x64xf32>
      %14 = vector.broadcast %13 : vector<1x64xf32> to vector<128x64xf32>
      %15 = arith.mulf %12, %14 : vector<128x64xf32>
      %c0_14 = arith.constant 0 : index
      %c0_15 = arith.constant 0 : index
      %16 = vector.load %arg6[%c0_14, %c0_15] : memref<1x64xf32, #tpu.memory_space<vmem>>, vector<1x64xf32>
      %17 = vector.broadcast %16 : vector<1x64xf32> to vector<128x64xf32>
      %18 = arith.addf %15, %17 : vector<128x64xf32>
      %cst_16 = arith.constant 0.000000e+00 : f32
      %19 = vector.broadcast %cst_16 : f32 to vector<128x64xf32>
      %20 = arith.maximumf %18, %19 : vector<128x64xf32>
      %21 = arith.truncf %20 : vector<128x64xf32> to vector<128x64xbf16>
      %c0_17 = arith.constant 0 : index
      %c0_18 = arith.constant 0 : index
      %22 = vector.load %arg7[%c0_17, %c0_18] : memref<128x64xbf16, #tpu.memory_space<vmem>>, vector<128x64xbf16>
      tpu.vector_store %arg7[%c0_17, %c0_18], %21 {strides = array<i32>} : memref<128x64xbf16, #tpu.memory_space<vmem>>, vector<128x64xbf16>,
    } else {
    }
    return
  }
  func.func @transform_0(%arg0: i32, %arg1: i32, %arg2: i32) -> (i32, i32) {
    %c0_i32 = arith.constant 0 : i32
    return %arg1, %arg2 : i32, i32
  }
  func.func @transform_1(%arg0: i32, %arg1: i32, %arg2: i32) -> (i32, i32) {
    %c0_i32 = arith.constant 0 : i32
    return %arg2, %arg0 : i32, i32
  }
  func.func @transform_2(%arg0: i32, %arg1: i32, %arg2: i32) -> (i32, i32) {
    %c0_i32 = arith.constant 0 : i32
    %c0_i32_0 = arith.constant 0 : i32
    return %c0_i32, %arg0 : i32, i32
  }
  func.func @transform_3(%arg0: i32, %arg1: i32, %arg2: i32) -> (i32, i32) {
    %c0_i32 = arith.constant 0 : i32
    %c0_i32_0 = arith.constant 0 : i32
    return %c0_i32, %arg0 : i32, i32
  }
  func.func @transform_4(%arg0: i32, %arg1: i32, %arg2: i32) -> (i32, i32) {
    %c0_i32 = arith.constant 0 : i32
    return %arg1, %arg0 : i32, i32
  }
}

module attributes {stable_mosaic.version = 11 : i64} {
  func.func @_mm_kernel(%arg0: i32, %arg1: i32, %arg2: i32, %arg3: memref<128x640xbf16, #tpu.memory_space<vmem>>, %arg4: memref<640x64xbf16, #tpu.memory_space<vmem>>, %arg5: memref<1x64xf32, #tpu.memory_space<vmem>>, %arg6: memref<1x64xf32, #tpu.memory_space<vmem>>, %arg7: memref<128x64xbf16, #tpu.memory_space<vmem>>, %arg8: memref<128x64xbf16, #tpu.memory_space<vmem>>, %arg9: memref<128x64xf32, #tpu.memory_space<vmem>>) attributes {dimension_semantics = [#tpu.dimension_semantics<parallel>, #tpu.dimension_semantics<parallel>, #tpu.dimension_semantics<arbitrary>], iteration_bounds = array<i64: 1, 1, 1>, scalar_prefetch = 0 : i64, scratch_operands = 1 : i64, tpu.core_type = #tpu.core_type<tc>, window_params = [{transform_indices = @transform_0, window_bounds = array<i64: 128, 640>}, {transform_indices = @transform_1, window_bounds = array<i64: 640, 64>}, {transform_indices = @transform_2, window_bounds = array<i64: 1, 64>}, {transform_indices = @transform_3, window_bounds = array<i64: 1, 64>}, {transform_indices = @transform_4, window_bounds = array<i64: 128, 64>}, {transform_indices = @transform_5, window_bounds = array<i64: 128, 64>}]} {
    %c0_i32 = arith.constant 0 : i32
    %0 = arith.cmpi eq, %arg2, %c0_i32 : i32
    %1 = arith.extui %0 : i1 to i32
    %c0_i32_0 = arith.constant 0 : i32
    %2 = arith.cmpi ne, %1, %c0_i32_0 : i32
    scf.if %2 {
      %cst_10 = arith.constant 0.000000e+00 : f32
      %12 = vector.broadcast %cst_10 : f32 to vector<128x64xf32>
      %c0_11 = arith.constant 0 : index
      %c0_12 = arith.constant 0 : index
      %13 = vector.load %arg9[%c0_11, %c0_12] : memref<128x64xf32, #tpu.memory_space<vmem>>, vector<128x64xf32>
      tpu.vector_store %arg9[%c0_11, %c0_12], %12 {strides = array<i32>} : memref<128x64xf32, #tpu.memory_space<vmem>>, vector<128x64xf32>,
    } else {
    }
    %c0 = arith.constant 0 : index
    %c0_1 = arith.constant 0 : index
    %3 = vector.load %arg9[%c0, %c0_1] : memref<128x64xf32, #tpu.memory_space<vmem>>, vector<128x64xf32>
    %c0_2 = arith.constant 0 : index
    %c0_3 = arith.constant 0 : index
    %4 = vector.load %arg3[%c0_2, %c0_3] : memref<128x640xbf16, #tpu.memory_space<vmem>>, vector<128x640xbf16>
    %c0_4 = arith.constant 0 : index
    %c0_5 = arith.constant 0 : index
    %5 = vector.load %arg4[%c0_4, %c0_5] : memref<640x64xbf16, #tpu.memory_space<vmem>>, vector<640x64xbf16>
    %cst = arith.constant dense<0.000000e+00> : vector<128x64xf32>
    %6 = tpu.matmul %4, %5, %cst {dimension_numbers = #tpu.dot_dimension_numbers<[1], [0], [0], [1], [0, 0, 1, 1], [], []>} : vector<128x640xbf16>, vector<640x64xbf16>, vector<128x64xf32> -> vector<128x64xf32>
    %7 = arith.addf %3, %6 : vector<128x64xf32>
    %c0_6 = arith.constant 0 : index
    %c0_7 = arith.constant 0 : index
    %8 = vector.load %arg9[%c0_6, %c0_7] : memref<128x64xf32, #tpu.memory_space<vmem>>, vector<128x64xf32>
    tpu.vector_store %arg9[%c0_6, %c0_7], %7 {strides = array<i32>} : memref<128x64xf32, #tpu.memory_space<vmem>>, vector<128x64xf32>,
    %c0_i32_8 = arith.constant 0 : i32
    %9 = arith.cmpi eq, %arg2, %c0_i32_8 : i32
    %10 = arith.extui %9 : i1 to i32
    %c0_i32_9 = arith.constant 0 : i32
    %11 = arith.cmpi ne, %10, %c0_i32_9 : i32
    scf.if %11 {
      %c0_10 = arith.constant 0 : index
      %c0_11 = arith.constant 0 : index
      %12 = vector.load %arg9[%c0_10, %c0_11] : memref<128x64xf32, #tpu.memory_space<vmem>>, vector<128x64xf32>
      %c0_12 = arith.constant 0 : index
      %c0_13 = arith.constant 0 : index
      %13 = vector.load %arg5[%c0_12, %c0_13] : memref<1x64xf32, #tpu.memory_space<vmem>>, vector<1x64xf32>
      %14 = vector.broadcast %13 : vector<1x64xf32> to vector<128x64xf32>
      %15 = arith.mulf %12, %14 : vector<128x64xf32>
      %c0_14 = arith.constant 0 : index
      %c0_15 = arith.constant 0 : index
      %16 = vector.load %arg6[%c0_14, %c0_15] : memref<1x64xf32, #tpu.memory_space<vmem>>, vector<1x64xf32>
      %17 = vector.broadcast %16 : vector<1x64xf32> to vector<128x64xf32>
      %18 = arith.addf %15, %17 : vector<128x64xf32>
      %c0_16 = arith.constant 0 : index
      %c0_17 = arith.constant 0 : index
      %19 = vector.load %arg7[%c0_16, %c0_17] : memref<128x64xbf16, #tpu.memory_space<vmem>>, vector<128x64xbf16>
      %20 = arith.extf %19 : vector<128x64xbf16> to vector<128x64xf32>
      %21 = arith.addf %18, %20 : vector<128x64xf32>
      %cst_18 = arith.constant 0.000000e+00 : f32
      %22 = vector.broadcast %cst_18 : f32 to vector<128x64xf32>
      %23 = arith.maximumf %21, %22 : vector<128x64xf32>
      %24 = arith.truncf %23 : vector<128x64xf32> to vector<128x64xbf16>
      %c0_19 = arith.constant 0 : index
      %c0_20 = arith.constant 0 : index
      %25 = vector.load %arg8[%c0_19, %c0_20] : memref<128x64xbf16, #tpu.memory_space<vmem>>, vector<128x64xbf16>
      tpu.vector_store %arg8[%c0_19, %c0_20], %24 {strides = array<i32>} : memref<128x64xbf16, #tpu.memory_space<vmem>>, vector<128x64xbf16>,
    } else {
    }
    return
  }
  func.func @transform_0(%arg0: i32, %arg1: i32, %arg2: i32) -> (i32, i32) {
    %c0_i32 = arith.constant 0 : i32
    return %arg1, %arg2 : i32, i32
  }
  func.func @transform_1(%arg0: i32, %arg1: i32, %arg2: i32) -> (i32, i32) {
    %c0_i32 = arith.constant 0 : i32
    return %arg2, %arg0 : i32, i32
  }
  func.func @transform_2(%arg0: i32, %arg1: i32, %arg2: i32) -> (i32, i32) {
    %c0_i32 = arith.constant 0 : i32
    %c0_i32_0 = arith.constant 0 : i32
    return %c0_i32, %arg0 : i32, i32
  }
  func.func @transform_3(%arg0: i32, %arg1: i32, %arg2: i32) -> (i32, i32) {
    %c0_i32 = arith.constant 0 : i32
    %c0_i32_0 = arith.constant 0 : i32
    return %c0_i32, %arg0 : i32, i32
  }
  func.func @transform_4(%arg0: i32, %arg1: i32, %arg2: i32) -> (i32, i32) {
    %c0_i32 = arith.constant 0 : i32
    return %arg1, %arg0 : i32, i32
  }
  func.func @transform_5(%arg0: i32, %arg1: i32, %arg2: i32) -> (i32, i32) {
    %c0_i32 = arith.constant 0 : i32
    return %arg1, %arg0 : i32, i32
  }
}

module attributes {stable_mosaic.version = 11 : i64} {
  func.func @_mm_kernel(%arg0: i32, %arg1: i32, %arg2: i32, %arg3: memref<32x640xbf16, #tpu.memory_space<vmem>>, %arg4: memref<640x128xbf16, #tpu.memory_space<vmem>>, %arg5: memref<1x128xf32, #tpu.memory_space<vmem>>, %arg6: memref<1x128xf32, #tpu.memory_space<vmem>>, %arg7: memref<32x128xbf16, #tpu.memory_space<vmem>>, %arg8: memref<32x128xf32, #tpu.memory_space<vmem>>) attributes {dimension_semantics = [#tpu.dimension_semantics<parallel>, #tpu.dimension_semantics<parallel>, #tpu.dimension_semantics<arbitrary>], iteration_bounds = array<i64: 1, 1, 1>, scalar_prefetch = 0 : i64, scratch_operands = 1 : i64, tpu.core_type = #tpu.core_type<tc>, window_params = [{transform_indices = @transform_0, window_bounds = array<i64: 32, 640>}, {transform_indices = @transform_1, window_bounds = array<i64: 640, 128>}, {transform_indices = @transform_2, window_bounds = array<i64: 1, 128>}, {transform_indices = @transform_3, window_bounds = array<i64: 1, 128>}, {transform_indices = @transform_4, window_bounds = array<i64: 32, 128>}]} {
    %c0_i32 = arith.constant 0 : i32
    %0 = arith.cmpi eq, %arg2, %c0_i32 : i32
    %1 = arith.extui %0 : i1 to i32
    %c0_i32_0 = arith.constant 0 : i32
    %2 = arith.cmpi ne, %1, %c0_i32_0 : i32
    scf.if %2 {
      %cst_10 = arith.constant 0.000000e+00 : f32
      %12 = vector.broadcast %cst_10 : f32 to vector<32x128xf32>
      %c0_11 = arith.constant 0 : index
      %c0_12 = arith.constant 0 : index
      %13 = vector.load %arg8[%c0_11, %c0_12] : memref<32x128xf32, #tpu.memory_space<vmem>>, vector<32x128xf32>
      tpu.vector_store %arg8[%c0_11, %c0_12], %12 {strides = array<i32>} : memref<32x128xf32, #tpu.memory_space<vmem>>, vector<32x128xf32>,
    } else {
    }
    %c0 = arith.constant 0 : index
    %c0_1 = arith.constant 0 : index
    %3 = vector.load %arg8[%c0, %c0_1] : memref<32x128xf32, #tpu.memory_space<vmem>>, vector<32x128xf32>
    %c0_2 = arith.constant 0 : index
    %c0_3 = arith.constant 0 : index
    %4 = vector.load %arg3[%c0_2, %c0_3] : memref<32x640xbf16, #tpu.memory_space<vmem>>, vector<32x640xbf16>
    %c0_4 = arith.constant 0 : index
    %c0_5 = arith.constant 0 : index
    %5 = vector.load %arg4[%c0_4, %c0_5] : memref<640x128xbf16, #tpu.memory_space<vmem>>, vector<640x128xbf16>
    %cst = arith.constant dense<0.000000e+00> : vector<32x128xf32>
    %6 = tpu.matmul %4, %5, %cst {dimension_numbers = #tpu.dot_dimension_numbers<[1], [0], [0], [1], [0, 0, 1, 1], [], []>} : vector<32x640xbf16>, vector<640x128xbf16>, vector<32x128xf32> -> vector<32x128xf32>
    %7 = arith.addf %3, %6 : vector<32x128xf32>
    %c0_6 = arith.constant 0 : index
    %c0_7 = arith.constant 0 : index
    %8 = vector.load %arg8[%c0_6, %c0_7] : memref<32x128xf32, #tpu.memory_space<vmem>>, vector<32x128xf32>
    tpu.vector_store %arg8[%c0_6, %c0_7], %7 {strides = array<i32>} : memref<32x128xf32, #tpu.memory_space<vmem>>, vector<32x128xf32>,
    %c0_i32_8 = arith.constant 0 : i32
    %9 = arith.cmpi eq, %arg2, %c0_i32_8 : i32
    %10 = arith.extui %9 : i1 to i32
    %c0_i32_9 = arith.constant 0 : i32
    %11 = arith.cmpi ne, %10, %c0_i32_9 : i32
    scf.if %11 {
      %c0_10 = arith.constant 0 : index
      %c0_11 = arith.constant 0 : index
      %12 = vector.load %arg8[%c0_10, %c0_11] : memref<32x128xf32, #tpu.memory_space<vmem>>, vector<32x128xf32>
      %c0_12 = arith.constant 0 : index
      %c0_13 = arith.constant 0 : index
      %13 = vector.load %arg5[%c0_12, %c0_13] : memref<1x128xf32, #tpu.memory_space<vmem>>, vector<1x128xf32>
      %14 = vector.broadcast %13 : vector<1x128xf32> to vector<32x128xf32>
      %15 = arith.mulf %12, %14 : vector<32x128xf32>
      %c0_14 = arith.constant 0 : index
      %c0_15 = arith.constant 0 : index
      %16 = vector.load %arg6[%c0_14, %c0_15] : memref<1x128xf32, #tpu.memory_space<vmem>>, vector<1x128xf32>
      %17 = vector.broadcast %16 : vector<1x128xf32> to vector<32x128xf32>
      %18 = arith.addf %15, %17 : vector<32x128xf32>
      %cst_16 = arith.constant 0.000000e+00 : f32
      %19 = vector.broadcast %cst_16 : f32 to vector<32x128xf32>
      %20 = arith.maximumf %18, %19 : vector<32x128xf32>
      %21 = arith.truncf %20 : vector<32x128xf32> to vector<32x128xbf16>
      %c0_17 = arith.constant 0 : index
      %c0_18 = arith.constant 0 : index
      %22 = vector.load %arg7[%c0_17, %c0_18] : memref<32x128xbf16, #tpu.memory_space<vmem>>, vector<32x128xbf16>
      tpu.vector_store %arg7[%c0_17, %c0_18], %21 {strides = array<i32>} : memref<32x128xbf16, #tpu.memory_space<vmem>>, vector<32x128xbf16>,
    } else {
    }
    return
  }
  func.func @transform_0(%arg0: i32, %arg1: i32, %arg2: i32) -> (i32, i32) {
    %c0_i32 = arith.constant 0 : i32
    return %arg1, %arg2 : i32, i32
  }
  func.func @transform_1(%arg0: i32, %arg1: i32, %arg2: i32) -> (i32, i32) {
    %c0_i32 = arith.constant 0 : i32
    return %arg2, %arg0 : i32, i32
  }
  func.func @transform_2(%arg0: i32, %arg1: i32, %arg2: i32) -> (i32, i32) {
    %c0_i32 = arith.constant 0 : i32
    %c0_i32_0 = arith.constant 0 : i32
    return %c0_i32, %arg0 : i32, i32
  }
  func.func @transform_3(%arg0: i32, %arg1: i32, %arg2: i32) -> (i32, i32) {
    %c0_i32 = arith.constant 0 : i32
    %c0_i32_0 = arith.constant 0 : i32
    return %c0_i32, %arg0 : i32, i32
  }
  func.func @transform_4(%arg0: i32, %arg1: i32, %arg2: i32) -> (i32, i32) {
    %c0_i32 = arith.constant 0 : i32
    return %arg1, %arg0 : i32, i32
  }
}

module attributes {stable_mosaic.version = 11 : i64} {
  func.func @_mm_kernel(%arg0: i32, %arg1: i32, %arg2: i32, %arg3: memref<32x128xbf16, #tpu.memory_space<vmem>>, %arg4: memref<128x128xbf16, #tpu.memory_space<vmem>>, %arg5: memref<1x128xf32, #tpu.memory_space<vmem>>, %arg6: memref<1x128xf32, #tpu.memory_space<vmem>>, %arg7: memref<32x128xbf16, #tpu.memory_space<vmem>>, %arg8: memref<32x128xf32, #tpu.memory_space<vmem>>) attributes {dimension_semantics = [#tpu.dimension_semantics<parallel>, #tpu.dimension_semantics<parallel>, #tpu.dimension_semantics<arbitrary>], iteration_bounds = array<i64: 1, 1, 1>, scalar_prefetch = 0 : i64, scratch_operands = 1 : i64, tpu.core_type = #tpu.core_type<tc>, window_params = [{transform_indices = @transform_0, window_bounds = array<i64: 32, 128>}, {transform_indices = @transform_1, window_bounds = array<i64: 128, 128>}, {transform_indices = @transform_2, window_bounds = array<i64: 1, 128>}, {transform_indices = @transform_3, window_bounds = array<i64: 1, 128>}, {transform_indices = @transform_4, window_bounds = array<i64: 32, 128>}]} {
    %c0_i32 = arith.constant 0 : i32
    %0 = arith.cmpi eq, %arg2, %c0_i32 : i32
    %1 = arith.extui %0 : i1 to i32
    %c0_i32_0 = arith.constant 0 : i32
    %2 = arith.cmpi ne, %1, %c0_i32_0 : i32
    scf.if %2 {
      %cst_10 = arith.constant 0.000000e+00 : f32
      %12 = vector.broadcast %cst_10 : f32 to vector<32x128xf32>
      %c0_11 = arith.constant 0 : index
      %c0_12 = arith.constant 0 : index
      %13 = vector.load %arg8[%c0_11, %c0_12] : memref<32x128xf32, #tpu.memory_space<vmem>>, vector<32x128xf32>
      tpu.vector_store %arg8[%c0_11, %c0_12], %12 {strides = array<i32>} : memref<32x128xf32, #tpu.memory_space<vmem>>, vector<32x128xf32>,
    } else {
    }
    %c0 = arith.constant 0 : index
    %c0_1 = arith.constant 0 : index
    %3 = vector.load %arg8[%c0, %c0_1] : memref<32x128xf32, #tpu.memory_space<vmem>>, vector<32x128xf32>
    %c0_2 = arith.constant 0 : index
    %c0_3 = arith.constant 0 : index
    %4 = vector.load %arg3[%c0_2, %c0_3] : memref<32x128xbf16, #tpu.memory_space<vmem>>, vector<32x128xbf16>
    %c0_4 = arith.constant 0 : index
    %c0_5 = arith.constant 0 : index
    %5 = vector.load %arg4[%c0_4, %c0_5] : memref<128x128xbf16, #tpu.memory_space<vmem>>, vector<128x128xbf16>
    %cst = arith.constant dense<0.000000e+00> : vector<32x128xf32>
    %6 = tpu.matmul %4, %5, %cst {dimension_numbers = #tpu.dot_dimension_numbers<[1], [0], [0], [1], [0, 0, 1, 1], [], []>} : vector<32x128xbf16>, vector<128x128xbf16>, vector<32x128xf32> -> vector<32x128xf32>
    %7 = arith.addf %3, %6 : vector<32x128xf32>
    %c0_6 = arith.constant 0 : index
    %c0_7 = arith.constant 0 : index
    %8 = vector.load %arg8[%c0_6, %c0_7] : memref<32x128xf32, #tpu.memory_space<vmem>>, vector<32x128xf32>
    tpu.vector_store %arg8[%c0_6, %c0_7], %7 {strides = array<i32>} : memref<32x128xf32, #tpu.memory_space<vmem>>, vector<32x128xf32>,
    %c0_i32_8 = arith.constant 0 : i32
    %9 = arith.cmpi eq, %arg2, %c0_i32_8 : i32
    %10 = arith.extui %9 : i1 to i32
    %c0_i32_9 = arith.constant 0 : i32
    %11 = arith.cmpi ne, %10, %c0_i32_9 : i32
    scf.if %11 {
      %c0_10 = arith.constant 0 : index
      %c0_11 = arith.constant 0 : index
      %12 = vector.load %arg8[%c0_10, %c0_11] : memref<32x128xf32, #tpu.memory_space<vmem>>, vector<32x128xf32>
      %c0_12 = arith.constant 0 : index
      %c0_13 = arith.constant 0 : index
      %13 = vector.load %arg5[%c0_12, %c0_13] : memref<1x128xf32, #tpu.memory_space<vmem>>, vector<1x128xf32>
      %14 = vector.broadcast %13 : vector<1x128xf32> to vector<32x128xf32>
      %15 = arith.mulf %12, %14 : vector<32x128xf32>
      %c0_14 = arith.constant 0 : index
      %c0_15 = arith.constant 0 : index
      %16 = vector.load %arg6[%c0_14, %c0_15] : memref<1x128xf32, #tpu.memory_space<vmem>>, vector<1x128xf32>
      %17 = vector.broadcast %16 : vector<1x128xf32> to vector<32x128xf32>
      %18 = arith.addf %15, %17 : vector<32x128xf32>
      %19 = arith.truncf %18 : vector<32x128xf32> to vector<32x128xbf16>
      %c0_16 = arith.constant 0 : index
      %c0_17 = arith.constant 0 : index
      %20 = vector.load %arg7[%c0_16, %c0_17] : memref<32x128xbf16, #tpu.memory_space<vmem>>, vector<32x128xbf16>
      tpu.vector_store %arg7[%c0_16, %c0_17], %19 {strides = array<i32>} : memref<32x128xbf16, #tpu.memory_space<vmem>>, vector<32x128xbf16>,
    } else {
    }
    return
  }
  func.func @transform_0(%arg0: i32, %arg1: i32, %arg2: i32) -> (i32, i32) {
    %c0_i32 = arith.constant 0 : i32
    return %arg1, %arg2 : i32, i32
  }
  func.func @transform_1(%arg0: i32, %arg1: i32, %arg2: i32) -> (i32, i32) {
    %c0_i32 = arith.constant 0 : i32
    return %arg2, %arg0 : i32, i32
  }
  func.func @transform_2(%arg0: i32, %arg1: i32, %arg2: i32) -> (i32, i32) {
    %c0_i32 = arith.constant 0 : i32
    %c0_i32_0 = arith.constant 0 : i32
    return %c0_i32, %arg0 : i32, i32
  }
  func.func @transform_3(%arg0: i32, %arg1: i32, %arg2: i32) -> (i32, i32) {
    %c0_i32 = arith.constant 0 : i32
    %c0_i32_0 = arith.constant 0 : i32
    return %c0_i32, %arg0 : i32, i32
  }
  func.func @transform_4(%arg0: i32, %arg1: i32, %arg2: i32) -> (i32, i32) {
    %c0_i32 = arith.constant 0 : i32
    return %arg1, %arg0 : i32, i32
  }
}

module attributes {stable_mosaic.version = 11 : i64} {
  func.func @_mm_kernel(%arg0: i32, %arg1: i32, %arg2: i32, %arg3: memref<32x640xbf16, #tpu.memory_space<vmem>>, %arg4: memref<640x128xbf16, #tpu.memory_space<vmem>>, %arg5: memref<1x128xf32, #tpu.memory_space<vmem>>, %arg6: memref<1x128xf32, #tpu.memory_space<vmem>>, %arg7: memref<32x128xbf16, #tpu.memory_space<vmem>>, %arg8: memref<32x128xf32, #tpu.memory_space<vmem>>) attributes {dimension_semantics = [#tpu.dimension_semantics<parallel>, #tpu.dimension_semantics<parallel>, #tpu.dimension_semantics<arbitrary>], iteration_bounds = array<i64: 1, 1, 2>, scalar_prefetch = 0 : i64, scratch_operands = 1 : i64, tpu.core_type = #tpu.core_type<tc>, window_params = [{transform_indices = @transform_0, window_bounds = array<i64: 32, 640>}, {transform_indices = @transform_1, window_bounds = array<i64: 640, 128>}, {transform_indices = @transform_2, window_bounds = array<i64: 1, 128>}, {transform_indices = @transform_3, window_bounds = array<i64: 1, 128>}, {transform_indices = @transform_4, window_bounds = array<i64: 32, 128>}]} {
    %c0_i32 = arith.constant 0 : i32
    %0 = arith.cmpi eq, %arg2, %c0_i32 : i32
    %1 = arith.extui %0 : i1 to i32
    %c0_i32_0 = arith.constant 0 : i32
    %2 = arith.cmpi ne, %1, %c0_i32_0 : i32
    scf.if %2 {
      %cst_9 = arith.constant 0.000000e+00 : f32
      %12 = vector.broadcast %cst_9 : f32 to vector<32x128xf32>
      %c0_10 = arith.constant 0 : index
      %c0_11 = arith.constant 0 : index
      %13 = vector.load %arg8[%c0_10, %c0_11] : memref<32x128xf32, #tpu.memory_space<vmem>>, vector<32x128xf32>
      tpu.vector_store %arg8[%c0_10, %c0_11], %12 {strides = array<i32>} : memref<32x128xf32, #tpu.memory_space<vmem>>, vector<32x128xf32>,
    } else {
    }
    %c0 = arith.constant 0 : index
    %c0_1 = arith.constant 0 : index
    %3 = vector.load %arg8[%c0, %c0_1] : memref<32x128xf32, #tpu.memory_space<vmem>>, vector<32x128xf32>
    %c0_2 = arith.constant 0 : index
    %c0_3 = arith.constant 0 : index
    %4 = vector.load %arg3[%c0_2, %c0_3] : memref<32x640xbf16, #tpu.memory_space<vmem>>, vector<32x640xbf16>
    %c0_4 = arith.constant 0 : index
    %c0_5 = arith.constant 0 : index
    %5 = vector.load %arg4[%c0_4, %c0_5] : memref<640x128xbf16, #tpu.memory_space<vmem>>, vector<640x128xbf16>
    %cst = arith.constant dense<0.000000e+00> : vector<32x128xf32>
    %6 = tpu.matmul %4, %5, %cst {dimension_numbers = #tpu.dot_dimension_numbers<[1], [0], [0], [1], [0, 0, 1, 1], [], []>} : vector<32x640xbf16>, vector<640x128xbf16>, vector<32x128xf32> -> vector<32x128xf32>
    %7 = arith.addf %3, %6 : vector<32x128xf32>
    %c0_6 = arith.constant 0 : index
    %c0_7 = arith.constant 0 : index
    %8 = vector.load %arg8[%c0_6, %c0_7] : memref<32x128xf32, #tpu.memory_space<vmem>>, vector<32x128xf32>
    tpu.vector_store %arg8[%c0_6, %c0_7], %7 {strides = array<i32>} : memref<32x128xf32, #tpu.memory_space<vmem>>, vector<32x128xf32>,
    %c1_i32 = arith.constant 1 : i32
    %9 = arith.cmpi eq, %arg2, %c1_i32 : i32
    %10 = arith.extui %9 : i1 to i32
    %c0_i32_8 = arith.constant 0 : i32
    %11 = arith.cmpi ne, %10, %c0_i32_8 : i32
    scf.if %11 {
      %c0_9 = arith.constant 0 : index
      %c0_10 = arith.constant 0 : index
      %12 = vector.load %arg8[%c0_9, %c0_10] : memref<32x128xf32, #tpu.memory_space<vmem>>, vector<32x128xf32>
      %c0_11 = arith.constant 0 : index
      %c0_12 = arith.constant 0 : index
      %13 = vector.load %arg5[%c0_11, %c0_12] : memref<1x128xf32, #tpu.memory_space<vmem>>, vector<1x128xf32>
      %14 = vector.broadcast %13 : vector<1x128xf32> to vector<32x128xf32>
      %15 = arith.mulf %12, %14 : vector<32x128xf32>
      %c0_13 = arith.constant 0 : index
      %c0_14 = arith.constant 0 : index
      %16 = vector.load %arg6[%c0_13, %c0_14] : memref<1x128xf32, #tpu.memory_space<vmem>>, vector<1x128xf32>
      %17 = vector.broadcast %16 : vector<1x128xf32> to vector<32x128xf32>
      %18 = arith.addf %15, %17 : vector<32x128xf32>
      %cst_15 = arith.constant 0.000000e+00 : f32
      %19 = vector.broadcast %cst_15 : f32 to vector<32x128xf32>
      %20 = arith.maximumf %18, %19 : vector<32x128xf32>
      %21 = arith.truncf %20 : vector<32x128xf32> to vector<32x128xbf16>
      %c0_16 = arith.constant 0 : index
      %c0_17 = arith.constant 0 : index
      %22 = vector.load %arg7[%c0_16, %c0_17] : memref<32x128xbf16, #tpu.memory_space<vmem>>, vector<32x128xbf16>
      tpu.vector_store %arg7[%c0_16, %c0_17], %21 {strides = array<i32>} : memref<32x128xbf16, #tpu.memory_space<vmem>>, vector<32x128xbf16>,
    } else {
    }
    return
  }
  func.func @transform_0(%arg0: i32, %arg1: i32, %arg2: i32) -> (i32, i32) {
    %c0_i32 = arith.constant 0 : i32
    return %arg1, %arg2 : i32, i32
  }
  func.func @transform_1(%arg0: i32, %arg1: i32, %arg2: i32) -> (i32, i32) {
    %c0_i32 = arith.constant 0 : i32
    return %arg2, %arg0 : i32, i32
  }
  func.func @transform_2(%arg0: i32, %arg1: i32, %arg2: i32) -> (i32, i32) {
    %c0_i32 = arith.constant 0 : i32
    %c0_i32_0 = arith.constant 0 : i32
    return %c0_i32, %arg0 : i32, i32
  }
  func.func @transform_3(%arg0: i32, %arg1: i32, %arg2: i32) -> (i32, i32) {
    %c0_i32 = arith.constant 0 : i32
    %c0_i32_0 = arith.constant 0 : i32
    return %c0_i32, %arg0 : i32, i32
  }
  func.func @transform_4(%arg0: i32, %arg1: i32, %arg2: i32) -> (i32, i32) {
    %c0_i32 = arith.constant 0 : i32
    return %arg1, %arg0 : i32, i32
  }
}

module attributes {stable_mosaic.version = 11 : i64} {
  func.func @_mm_kernel(%arg0: i32, %arg1: i32, %arg2: i32, %arg3: memref<32x640xbf16, #tpu.memory_space<vmem>>, %arg4: memref<640x128xbf16, #tpu.memory_space<vmem>>, %arg5: memref<1x128xf32, #tpu.memory_space<vmem>>, %arg6: memref<1x128xf32, #tpu.memory_space<vmem>>, %arg7: memref<32x128xbf16, #tpu.memory_space<vmem>>, %arg8: memref<32x128xbf16, #tpu.memory_space<vmem>>, %arg9: memref<32x128xf32, #tpu.memory_space<vmem>>) attributes {dimension_semantics = [#tpu.dimension_semantics<parallel>, #tpu.dimension_semantics<parallel>, #tpu.dimension_semantics<arbitrary>], iteration_bounds = array<i64: 1, 1, 2>, scalar_prefetch = 0 : i64, scratch_operands = 1 : i64, tpu.core_type = #tpu.core_type<tc>, window_params = [{transform_indices = @transform_0, window_bounds = array<i64: 32, 640>}, {transform_indices = @transform_1, window_bounds = array<i64: 640, 128>}, {transform_indices = @transform_2, window_bounds = array<i64: 1, 128>}, {transform_indices = @transform_3, window_bounds = array<i64: 1, 128>}, {transform_indices = @transform_4, window_bounds = array<i64: 32, 128>}, {transform_indices = @transform_5, window_bounds = array<i64: 32, 128>}]} {
    %c0_i32 = arith.constant 0 : i32
    %0 = arith.cmpi eq, %arg2, %c0_i32 : i32
    %1 = arith.extui %0 : i1 to i32
    %c0_i32_0 = arith.constant 0 : i32
    %2 = arith.cmpi ne, %1, %c0_i32_0 : i32
    scf.if %2 {
      %cst_9 = arith.constant 0.000000e+00 : f32
      %12 = vector.broadcast %cst_9 : f32 to vector<32x128xf32>
      %c0_10 = arith.constant 0 : index
      %c0_11 = arith.constant 0 : index
      %13 = vector.load %arg9[%c0_10, %c0_11] : memref<32x128xf32, #tpu.memory_space<vmem>>, vector<32x128xf32>
      tpu.vector_store %arg9[%c0_10, %c0_11], %12 {strides = array<i32>} : memref<32x128xf32, #tpu.memory_space<vmem>>, vector<32x128xf32>,
    } else {
    }
    %c0 = arith.constant 0 : index
    %c0_1 = arith.constant 0 : index
    %3 = vector.load %arg9[%c0, %c0_1] : memref<32x128xf32, #tpu.memory_space<vmem>>, vector<32x128xf32>
    %c0_2 = arith.constant 0 : index
    %c0_3 = arith.constant 0 : index
    %4 = vector.load %arg3[%c0_2, %c0_3] : memref<32x640xbf16, #tpu.memory_space<vmem>>, vector<32x640xbf16>
    %c0_4 = arith.constant 0 : index
    %c0_5 = arith.constant 0 : index
    %5 = vector.load %arg4[%c0_4, %c0_5] : memref<640x128xbf16, #tpu.memory_space<vmem>>, vector<640x128xbf16>
    %cst = arith.constant dense<0.000000e+00> : vector<32x128xf32>
    %6 = tpu.matmul %4, %5, %cst {dimension_numbers = #tpu.dot_dimension_numbers<[1], [0], [0], [1], [0, 0, 1, 1], [], []>} : vector<32x640xbf16>, vector<640x128xbf16>, vector<32x128xf32> -> vector<32x128xf32>
    %7 = arith.addf %3, %6 : vector<32x128xf32>
    %c0_6 = arith.constant 0 : index
    %c0_7 = arith.constant 0 : index
    %8 = vector.load %arg9[%c0_6, %c0_7] : memref<32x128xf32, #tpu.memory_space<vmem>>, vector<32x128xf32>
    tpu.vector_store %arg9[%c0_6, %c0_7], %7 {strides = array<i32>} : memref<32x128xf32, #tpu.memory_space<vmem>>, vector<32x128xf32>,
    %c1_i32 = arith.constant 1 : i32
    %9 = arith.cmpi eq, %arg2, %c1_i32 : i32
    %10 = arith.extui %9 : i1 to i32
    %c0_i32_8 = arith.constant 0 : i32
    %11 = arith.cmpi ne, %10, %c0_i32_8 : i32
    scf.if %11 {
      %c0_9 = arith.constant 0 : index
      %c0_10 = arith.constant 0 : index
      %12 = vector.load %arg9[%c0_9, %c0_10] : memref<32x128xf32, #tpu.memory_space<vmem>>, vector<32x128xf32>
      %c0_11 = arith.constant 0 : index
      %c0_12 = arith.constant 0 : index
      %13 = vector.load %arg5[%c0_11, %c0_12] : memref<1x128xf32, #tpu.memory_space<vmem>>, vector<1x128xf32>
      %14 = vector.broadcast %13 : vector<1x128xf32> to vector<32x128xf32>
      %15 = arith.mulf %12, %14 : vector<32x128xf32>
      %c0_13 = arith.constant 0 : index
      %c0_14 = arith.constant 0 : index
      %16 = vector.load %arg6[%c0_13, %c0_14] : memref<1x128xf32, #tpu.memory_space<vmem>>, vector<1x128xf32>
      %17 = vector.broadcast %16 : vector<1x128xf32> to vector<32x128xf32>
      %18 = arith.addf %15, %17 : vector<32x128xf32>
      %c0_15 = arith.constant 0 : index
      %c0_16 = arith.constant 0 : index
      %19 = vector.load %arg7[%c0_15, %c0_16] : memref<32x128xbf16, #tpu.memory_space<vmem>>, vector<32x128xbf16>
      %20 = arith.extf %19 : vector<32x128xbf16> to vector<32x128xf32>
      %21 = arith.addf %18, %20 : vector<32x128xf32>
      %cst_17 = arith.constant 0.000000e+00 : f32
      %22 = vector.broadcast %cst_17 : f32 to vector<32x128xf32>
      %23 = arith.maximumf %21, %22 : vector<32x128xf32>
      %24 = arith.truncf %23 : vector<32x128xf32> to vector<32x128xbf16>
      %c0_18 = arith.constant 0 : index
      %c0_19 = arith.constant 0 : index
      %25 = vector.load %arg8[%c0_18, %c0_19] : memref<32x128xbf16, #tpu.memory_space<vmem>>, vector<32x128xbf16>
      tpu.vector_store %arg8[%c0_18, %c0_19], %24 {strides = array<i32>} : memref<32x128xbf16, #tpu.memory_space<vmem>>, vector<32x128xbf16>,
    } else {
    }
    return
  }
  func.func @transform_0(%arg0: i32, %arg1: i32, %arg2: i32) -> (i32, i32) {
    %c0_i32 = arith.constant 0 : i32
    return %arg1, %arg2 : i32, i32
  }
  func.func @transform_1(%arg0: i32, %arg1: i32, %arg2: i32) -> (i32, i32) {
    %c0_i32 = arith.constant 0 : i32
    return %arg2, %arg0 : i32, i32
  }
  func.func @transform_2(%arg0: i32, %arg1: i32, %arg2: i32) -> (i32, i32) {
    %c0_i32 = arith.constant 0 : i32
    %c0_i32_0 = arith.constant 0 : i32
    return %c0_i32, %arg0 : i32, i32
  }
  func.func @transform_3(%arg0: i32, %arg1: i32, %arg2: i32) -> (i32, i32) {
    %c0_i32 = arith.constant 0 : i32
    %c0_i32_0 = arith.constant 0 : i32
    return %c0_i32, %arg0 : i32, i32
  }
  func.func @transform_4(%arg0: i32, %arg1: i32, %arg2: i32) -> (i32, i32) {
    %c0_i32 = arith.constant 0 : i32
    return %arg1, %arg0 : i32, i32
  }
  func.func @transform_5(%arg0: i32, %arg1: i32, %arg2: i32) -> (i32, i32) {
    %c0_i32 = arith.constant 0 : i32
    return %arg1, %arg0 : i32, i32
  }
}

module attributes {stable_mosaic.version = 11 : i64} {
  func.func @_mm_kernel(%arg0: i32, %arg1: i32, %arg2: i32, %arg3: memref<8x640xbf16, #tpu.memory_space<vmem>>, %arg4: memref<640x256xbf16, #tpu.memory_space<vmem>>, %arg5: memref<1x256xf32, #tpu.memory_space<vmem>>, %arg6: memref<1x256xf32, #tpu.memory_space<vmem>>, %arg7: memref<8x256xbf16, #tpu.memory_space<vmem>>, %arg8: memref<8x256xf32, #tpu.memory_space<vmem>>) attributes {dimension_semantics = [#tpu.dimension_semantics<parallel>, #tpu.dimension_semantics<parallel>, #tpu.dimension_semantics<arbitrary>], iteration_bounds = array<i64: 1, 1, 2>, scalar_prefetch = 0 : i64, scratch_operands = 1 : i64, tpu.core_type = #tpu.core_type<tc>, window_params = [{transform_indices = @transform_0, window_bounds = array<i64: 8, 640>}, {transform_indices = @transform_1, window_bounds = array<i64: 640, 256>}, {transform_indices = @transform_2, window_bounds = array<i64: 1, 256>}, {transform_indices = @transform_3, window_bounds = array<i64: 1, 256>}, {transform_indices = @transform_4, window_bounds = array<i64: 8, 256>}]} {
    %c0_i32 = arith.constant 0 : i32
    %0 = arith.cmpi eq, %arg2, %c0_i32 : i32
    %1 = arith.extui %0 : i1 to i32
    %c0_i32_0 = arith.constant 0 : i32
    %2 = arith.cmpi ne, %1, %c0_i32_0 : i32
    scf.if %2 {
      %cst_9 = arith.constant 0.000000e+00 : f32
      %12 = vector.broadcast %cst_9 : f32 to vector<8x256xf32>
      %c0_10 = arith.constant 0 : index
      %c0_11 = arith.constant 0 : index
      %13 = vector.load %arg8[%c0_10, %c0_11] : memref<8x256xf32, #tpu.memory_space<vmem>>, vector<8x256xf32>
      tpu.vector_store %arg8[%c0_10, %c0_11], %12 {strides = array<i32>} : memref<8x256xf32, #tpu.memory_space<vmem>>, vector<8x256xf32>,
    } else {
    }
    %c0 = arith.constant 0 : index
    %c0_1 = arith.constant 0 : index
    %3 = vector.load %arg8[%c0, %c0_1] : memref<8x256xf32, #tpu.memory_space<vmem>>, vector<8x256xf32>
    %c0_2 = arith.constant 0 : index
    %c0_3 = arith.constant 0 : index
    %4 = vector.load %arg3[%c0_2, %c0_3] : memref<8x640xbf16, #tpu.memory_space<vmem>>, vector<8x640xbf16>
    %c0_4 = arith.constant 0 : index
    %c0_5 = arith.constant 0 : index
    %5 = vector.load %arg4[%c0_4, %c0_5] : memref<640x256xbf16, #tpu.memory_space<vmem>>, vector<640x256xbf16>
    %cst = arith.constant dense<0.000000e+00> : vector<8x256xf32>
    %6 = tpu.matmul %4, %5, %cst {dimension_numbers = #tpu.dot_dimension_numbers<[1], [0], [0], [1], [0, 0, 1, 1], [], []>} : vector<8x640xbf16>, vector<640x256xbf16>, vector<8x256xf32> -> vector<8x256xf32>
    %7 = arith.addf %3, %6 : vector<8x256xf32>
    %c0_6 = arith.constant 0 : index
    %c0_7 = arith.constant 0 : index
    %8 = vector.load %arg8[%c0_6, %c0_7] : memref<8x256xf32, #tpu.memory_space<vmem>>, vector<8x256xf32>
    tpu.vector_store %arg8[%c0_6, %c0_7], %7 {strides = array<i32>} : memref<8x256xf32, #tpu.memory_space<vmem>>, vector<8x256xf32>,
    %c1_i32 = arith.constant 1 : i32
    %9 = arith.cmpi eq, %arg2, %c1_i32 : i32
    %10 = arith.extui %9 : i1 to i32
    %c0_i32_8 = arith.constant 0 : i32
    %11 = arith.cmpi ne, %10, %c0_i32_8 : i32
    scf.if %11 {
      %c0_9 = arith.constant 0 : index
      %c0_10 = arith.constant 0 : index
      %12 = vector.load %arg8[%c0_9, %c0_10] : memref<8x256xf32, #tpu.memory_space<vmem>>, vector<8x256xf32>
      %c0_11 = arith.constant 0 : index
      %c0_12 = arith.constant 0 : index
      %13 = vector.load %arg5[%c0_11, %c0_12] : memref<1x256xf32, #tpu.memory_space<vmem>>, vector<1x256xf32>
      %14 = vector.broadcast %13 : vector<1x256xf32> to vector<8x256xf32>
      %15 = arith.mulf %12, %14 : vector<8x256xf32>
      %c0_13 = arith.constant 0 : index
      %c0_14 = arith.constant 0 : index
      %16 = vector.load %arg6[%c0_13, %c0_14] : memref<1x256xf32, #tpu.memory_space<vmem>>, vector<1x256xf32>
      %17 = vector.broadcast %16 : vector<1x256xf32> to vector<8x256xf32>
      %18 = arith.addf %15, %17 : vector<8x256xf32>
      %cst_15 = arith.constant 0.000000e+00 : f32
      %19 = vector.broadcast %cst_15 : f32 to vector<8x256xf32>
      %20 = arith.maximumf %18, %19 : vector<8x256xf32>
      %21 = arith.truncf %20 : vector<8x256xf32> to vector<8x256xbf16>
      %c0_16 = arith.constant 0 : index
      %c0_17 = arith.constant 0 : index
      %22 = vector.load %arg7[%c0_16, %c0_17] : memref<8x256xbf16, #tpu.memory_space<vmem>>, vector<8x256xbf16>
      tpu.vector_store %arg7[%c0_16, %c0_17], %21 {strides = array<i32>} : memref<8x256xbf16, #tpu.memory_space<vmem>>, vector<8x256xbf16>,
    } else {
    }
    return
  }
  func.func @transform_0(%arg0: i32, %arg1: i32, %arg2: i32) -> (i32, i32) {
    %c0_i32 = arith.constant 0 : i32
    return %arg1, %arg2 : i32, i32
  }
  func.func @transform_1(%arg0: i32, %arg1: i32, %arg2: i32) -> (i32, i32) {
    %c0_i32 = arith.constant 0 : i32
    return %arg2, %arg0 : i32, i32
  }
  func.func @transform_2(%arg0: i32, %arg1: i32, %arg2: i32) -> (i32, i32) {
    %c0_i32 = arith.constant 0 : i32
    %c0_i32_0 = arith.constant 0 : i32
    return %c0_i32, %arg0 : i32, i32
  }
  func.func @transform_3(%arg0: i32, %arg1: i32, %arg2: i32) -> (i32, i32) {
    %c0_i32 = arith.constant 0 : i32
    %c0_i32_0 = arith.constant 0 : i32
    return %c0_i32, %arg0 : i32, i32
  }
  func.func @transform_4(%arg0: i32, %arg1: i32, %arg2: i32) -> (i32, i32) {
    %c0_i32 = arith.constant 0 : i32
    return %arg1, %arg0 : i32, i32
  }
}

module attributes {stable_mosaic.version = 11 : i64} {
  func.func @_mm_kernel(%arg0: i32, %arg1: i32, %arg2: i32, %arg3: memref<8x128xbf16, #tpu.memory_space<vmem>>, %arg4: memref<128x256xbf16, #tpu.memory_space<vmem>>, %arg5: memref<1x256xf32, #tpu.memory_space<vmem>>, %arg6: memref<1x256xf32, #tpu.memory_space<vmem>>, %arg7: memref<8x256xbf16, #tpu.memory_space<vmem>>, %arg8: memref<8x256xf32, #tpu.memory_space<vmem>>) attributes {dimension_semantics = [#tpu.dimension_semantics<parallel>, #tpu.dimension_semantics<parallel>, #tpu.dimension_semantics<arbitrary>], iteration_bounds = array<i64: 1, 1, 1>, scalar_prefetch = 0 : i64, scratch_operands = 1 : i64, tpu.core_type = #tpu.core_type<tc>, window_params = [{transform_indices = @transform_0, window_bounds = array<i64: 8, 128>}, {transform_indices = @transform_1, window_bounds = array<i64: 128, 256>}, {transform_indices = @transform_2, window_bounds = array<i64: 1, 256>}, {transform_indices = @transform_3, window_bounds = array<i64: 1, 256>}, {transform_indices = @transform_4, window_bounds = array<i64: 8, 256>}]} {
    %c0_i32 = arith.constant 0 : i32
    %0 = arith.cmpi eq, %arg2, %c0_i32 : i32
    %1 = arith.extui %0 : i1 to i32
    %c0_i32_0 = arith.constant 0 : i32
    %2 = arith.cmpi ne, %1, %c0_i32_0 : i32
    scf.if %2 {
      %cst_10 = arith.constant 0.000000e+00 : f32
      %12 = vector.broadcast %cst_10 : f32 to vector<8x256xf32>
      %c0_11 = arith.constant 0 : index
      %c0_12 = arith.constant 0 : index
      %13 = vector.load %arg8[%c0_11, %c0_12] : memref<8x256xf32, #tpu.memory_space<vmem>>, vector<8x256xf32>
      tpu.vector_store %arg8[%c0_11, %c0_12], %12 {strides = array<i32>} : memref<8x256xf32, #tpu.memory_space<vmem>>, vector<8x256xf32>,
    } else {
    }
    %c0 = arith.constant 0 : index
    %c0_1 = arith.constant 0 : index
    %3 = vector.load %arg8[%c0, %c0_1] : memref<8x256xf32, #tpu.memory_space<vmem>>, vector<8x256xf32>
    %c0_2 = arith.constant 0 : index
    %c0_3 = arith.constant 0 : index
    %4 = vector.load %arg3[%c0_2, %c0_3] : memref<8x128xbf16, #tpu.memory_space<vmem>>, vector<8x128xbf16>
    %c0_4 = arith.constant 0 : index
    %c0_5 = arith.constant 0 : index
    %5 = vector.load %arg4[%c0_4, %c0_5] : memref<128x256xbf16, #tpu.memory_space<vmem>>, vector<128x256xbf16>
    %cst = arith.constant dense<0.000000e+00> : vector<8x256xf32>
    %6 = tpu.matmul %4, %5, %cst {dimension_numbers = #tpu.dot_dimension_numbers<[1], [0], [0], [1], [0, 0, 1, 1], [], []>} : vector<8x128xbf16>, vector<128x256xbf16>, vector<8x256xf32> -> vector<8x256xf32>
    %7 = arith.addf %3, %6 : vector<8x256xf32>
    %c0_6 = arith.constant 0 : index
    %c0_7 = arith.constant 0 : index
    %8 = vector.load %arg8[%c0_6, %c0_7] : memref<8x256xf32, #tpu.memory_space<vmem>>, vector<8x256xf32>
    tpu.vector_store %arg8[%c0_6, %c0_7], %7 {strides = array<i32>} : memref<8x256xf32, #tpu.memory_space<vmem>>, vector<8x256xf32>,
    %c0_i32_8 = arith.constant 0 : i32
    %9 = arith.cmpi eq, %arg2, %c0_i32_8 : i32
    %10 = arith.extui %9 : i1 to i32
    %c0_i32_9 = arith.constant 0 : i32
    %11 = arith.cmpi ne, %10, %c0_i32_9 : i32
    scf.if %11 {
      %c0_10 = arith.constant 0 : index
      %c0_11 = arith.constant 0 : index
      %12 = vector.load %arg8[%c0_10, %c0_11] : memref<8x256xf32, #tpu.memory_space<vmem>>, vector<8x256xf32>
      %c0_12 = arith.constant 0 : index
      %c0_13 = arith.constant 0 : index
      %13 = vector.load %arg5[%c0_12, %c0_13] : memref<1x256xf32, #tpu.memory_space<vmem>>, vector<1x256xf32>
      %14 = vector.broadcast %13 : vector<1x256xf32> to vector<8x256xf32>
      %15 = arith.mulf %12, %14 : vector<8x256xf32>
      %c0_14 = arith.constant 0 : index
      %c0_15 = arith.constant 0 : index
      %16 = vector.load %arg6[%c0_14, %c0_15] : memref<1x256xf32, #tpu.memory_space<vmem>>, vector<1x256xf32>
      %17 = vector.broadcast %16 : vector<1x256xf32> to vector<8x256xf32>
      %18 = arith.addf %15, %17 : vector<8x256xf32>
      %19 = arith.truncf %18 : vector<8x256xf32> to vector<8x256xbf16>
      %c0_16 = arith.constant 0 : index
      %c0_17 = arith.constant 0 : index
      %20 = vector.load %arg7[%c0_16, %c0_17] : memref<8x256xbf16, #tpu.memory_space<vmem>>, vector<8x256xbf16>
      tpu.vector_store %arg7[%c0_16, %c0_17], %19 {strides = array<i32>} : memref<8x256xbf16, #tpu.memory_space<vmem>>, vector<8x256xbf16>,
    } else {
    }
    return
  }
  func.func @transform_0(%arg0: i32, %arg1: i32, %arg2: i32) -> (i32, i32) {
    %c0_i32 = arith.constant 0 : i32
    return %arg1, %arg2 : i32, i32
  }
  func.func @transform_1(%arg0: i32, %arg1: i32, %arg2: i32) -> (i32, i32) {
    %c0_i32 = arith.constant 0 : i32
    return %arg2, %arg0 : i32, i32
  }
  func.func @transform_2(%arg0: i32, %arg1: i32, %arg2: i32) -> (i32, i32) {
    %c0_i32 = arith.constant 0 : i32
    %c0_i32_0 = arith.constant 0 : i32
    return %c0_i32, %arg0 : i32, i32
  }
  func.func @transform_3(%arg0: i32, %arg1: i32, %arg2: i32) -> (i32, i32) {
    %c0_i32 = arith.constant 0 : i32
    %c0_i32_0 = arith.constant 0 : i32
    return %c0_i32, %arg0 : i32, i32
  }
  func.func @transform_4(%arg0: i32, %arg1: i32, %arg2: i32) -> (i32, i32) {
    %c0_i32 = arith.constant 0 : i32
    return %arg1, %arg0 : i32, i32
  }
}

module attributes {stable_mosaic.version = 11 : i64} {
  func.func @_mm_kernel(%arg0: i32, %arg1: i32, %arg2: i32, %arg3: memref<8x768xbf16, #tpu.memory_space<vmem>>, %arg4: memref<768x256xbf16, #tpu.memory_space<vmem>>, %arg5: memref<1x256xf32, #tpu.memory_space<vmem>>, %arg6: memref<1x256xf32, #tpu.memory_space<vmem>>, %arg7: memref<8x256xbf16, #tpu.memory_space<vmem>>, %arg8: memref<8x256xbf16, #tpu.memory_space<vmem>>, %arg9: memref<8x256xf32, #tpu.memory_space<vmem>>) attributes {dimension_semantics = [#tpu.dimension_semantics<parallel>, #tpu.dimension_semantics<parallel>, #tpu.dimension_semantics<arbitrary>], iteration_bounds = array<i64: 1, 1, 3>, scalar_prefetch = 0 : i64, scratch_operands = 1 : i64, tpu.core_type = #tpu.core_type<tc>, window_params = [{transform_indices = @transform_0, window_bounds = array<i64: 8, 768>}, {transform_indices = @transform_1, window_bounds = array<i64: 768, 256>}, {transform_indices = @transform_2, window_bounds = array<i64: 1, 256>}, {transform_indices = @transform_3, window_bounds = array<i64: 1, 256>}, {transform_indices = @transform_4, window_bounds = array<i64: 8, 256>}, {transform_indices = @transform_5, window_bounds = array<i64: 8, 256>}]} {
    %c0_i32 = arith.constant 0 : i32
    %0 = arith.cmpi eq, %arg2, %c0_i32 : i32
    %1 = arith.extui %0 : i1 to i32
    %c0_i32_0 = arith.constant 0 : i32
    %2 = arith.cmpi ne, %1, %c0_i32_0 : i32
    scf.if %2 {
      %cst_9 = arith.constant 0.000000e+00 : f32
      %12 = vector.broadcast %cst_9 : f32 to vector<8x256xf32>
      %c0_10 = arith.constant 0 : index
      %c0_11 = arith.constant 0 : index
      %13 = vector.load %arg9[%c0_10, %c0_11] : memref<8x256xf32, #tpu.memory_space<vmem>>, vector<8x256xf32>
      tpu.vector_store %arg9[%c0_10, %c0_11], %12 {strides = array<i32>} : memref<8x256xf32, #tpu.memory_space<vmem>>, vector<8x256xf32>,
    } else {
    }
    %c0 = arith.constant 0 : index
    %c0_1 = arith.constant 0 : index
    %3 = vector.load %arg9[%c0, %c0_1] : memref<8x256xf32, #tpu.memory_space<vmem>>, vector<8x256xf32>
    %c0_2 = arith.constant 0 : index
    %c0_3 = arith.constant 0 : index
    %4 = vector.load %arg3[%c0_2, %c0_3] : memref<8x768xbf16, #tpu.memory_space<vmem>>, vector<8x768xbf16>
    %c0_4 = arith.constant 0 : index
    %c0_5 = arith.constant 0 : index
    %5 = vector.load %arg4[%c0_4, %c0_5] : memref<768x256xbf16, #tpu.memory_space<vmem>>, vector<768x256xbf16>
    %cst = arith.constant dense<0.000000e+00> : vector<8x256xf32>
    %6 = tpu.matmul %4, %5, %cst {dimension_numbers = #tpu.dot_dimension_numbers<[1], [0], [0], [1], [0, 0, 1, 1], [], []>} : vector<8x768xbf16>, vector<768x256xbf16>, vector<8x256xf32> -> vector<8x256xf32>
    %7 = arith.addf %3, %6 : vector<8x256xf32>
    %c0_6 = arith.constant 0 : index
    %c0_7 = arith.constant 0 : index
    %8 = vector.load %arg9[%c0_6, %c0_7] : memref<8x256xf32, #tpu.memory_space<vmem>>, vector<8x256xf32>
    tpu.vector_store %arg9[%c0_6, %c0_7], %7 {strides = array<i32>} : memref<8x256xf32, #tpu.memory_space<vmem>>, vector<8x256xf32>,
    %c2_i32 = arith.constant 2 : i32
    %9 = arith.cmpi eq, %arg2, %c2_i32 : i32
    %10 = arith.extui %9 : i1 to i32
    %c0_i32_8 = arith.constant 0 : i32
    %11 = arith.cmpi ne, %10, %c0_i32_8 : i32
    scf.if %11 {
      %c0_9 = arith.constant 0 : index
      %c0_10 = arith.constant 0 : index
      %12 = vector.load %arg9[%c0_9, %c0_10] : memref<8x256xf32, #tpu.memory_space<vmem>>, vector<8x256xf32>
      %c0_11 = arith.constant 0 : index
      %c0_12 = arith.constant 0 : index
      %13 = vector.load %arg5[%c0_11, %c0_12] : memref<1x256xf32, #tpu.memory_space<vmem>>, vector<1x256xf32>
      %14 = vector.broadcast %13 : vector<1x256xf32> to vector<8x256xf32>
      %15 = arith.mulf %12, %14 : vector<8x256xf32>
      %c0_13 = arith.constant 0 : index
      %c0_14 = arith.constant 0 : index
      %16 = vector.load %arg6[%c0_13, %c0_14] : memref<1x256xf32, #tpu.memory_space<vmem>>, vector<1x256xf32>
      %17 = vector.broadcast %16 : vector<1x256xf32> to vector<8x256xf32>
      %18 = arith.addf %15, %17 : vector<8x256xf32>
      %c0_15 = arith.constant 0 : index
      %c0_16 = arith.constant 0 : index
      %19 = vector.load %arg7[%c0_15, %c0_16] : memref<8x256xbf16, #tpu.memory_space<vmem>>, vector<8x256xbf16>
      %20 = arith.extf %19 : vector<8x256xbf16> to vector<8x256xf32>
      %21 = arith.addf %18, %20 : vector<8x256xf32>
      %cst_17 = arith.constant 0.000000e+00 : f32
      %22 = vector.broadcast %cst_17 : f32 to vector<8x256xf32>
      %23 = arith.maximumf %21, %22 : vector<8x256xf32>
      %24 = arith.truncf %23 : vector<8x256xf32> to vector<8x256xbf16>
      %c0_18 = arith.constant 0 : index
      %c0_19 = arith.constant 0 : index
      %25 = vector.load %arg8[%c0_18, %c0_19] : memref<8x256xbf16, #tpu.memory_space<vmem>>, vector<8x256xbf16>
      tpu.vector_store %arg8[%c0_18, %c0_19], %24 {strides = array<i32>} : memref<8x256xbf16, #tpu.memory_space<vmem>>, vector<8x256xbf16>,
    } else {
    }
    return
  }
  func.func @transform_0(%arg0: i32, %arg1: i32, %arg2: i32) -> (i32, i32) {
    %c0_i32 = arith.constant 0 : i32
    return %arg1, %arg2 : i32, i32
  }
  func.func @transform_1(%arg0: i32, %arg1: i32, %arg2: i32) -> (i32, i32) {
    %c0_i32 = arith.constant 0 : i32
    return %arg2, %arg0 : i32, i32
  }
  func.func @transform_2(%arg0: i32, %arg1: i32, %arg2: i32) -> (i32, i32) {
    %c0_i32 = arith.constant 0 : i32
    %c0_i32_0 = arith.constant 0 : i32
    return %c0_i32, %arg0 : i32, i32
  }
  func.func @transform_3(%arg0: i32, %arg1: i32, %arg2: i32) -> (i32, i32) {
    %c0_i32 = arith.constant 0 : i32
    %c0_i32_0 = arith.constant 0 : i32
    return %c0_i32, %arg0 : i32, i32
  }
  func.func @transform_4(%arg0: i32, %arg1: i32, %arg2: i32) -> (i32, i32) {
    %c0_i32 = arith.constant 0 : i32
    return %arg1, %arg0 : i32, i32
  }
  func.func @transform_5(%arg0: i32, %arg1: i32, %arg2: i32) -> (i32, i32) {
    %c0_i32 = arith.constant 0 : i32
    return %arg1, %arg0 : i32, i32
  }
}

module attributes {stable_mosaic.version = 11 : i64} {
  func.func @_mm_kernel(%arg0: i32, %arg1: i32, %arg2: i32, %arg3: memref<8x768xbf16, #tpu.memory_space<vmem>>, %arg4: memref<768x256xbf16, #tpu.memory_space<vmem>>, %arg5: memref<1x256xf32, #tpu.memory_space<vmem>>, %arg6: memref<1x256xf32, #tpu.memory_space<vmem>>, %arg7: memref<8x256xbf16, #tpu.memory_space<vmem>>, %arg8: memref<8x256xf32, #tpu.memory_space<vmem>>) attributes {dimension_semantics = [#tpu.dimension_semantics<parallel>, #tpu.dimension_semantics<parallel>, #tpu.dimension_semantics<arbitrary>], iteration_bounds = array<i64: 1, 1, 3>, scalar_prefetch = 0 : i64, scratch_operands = 1 : i64, tpu.core_type = #tpu.core_type<tc>, window_params = [{transform_indices = @transform_0, window_bounds = array<i64: 8, 768>}, {transform_indices = @transform_1, window_bounds = array<i64: 768, 256>}, {transform_indices = @transform_2, window_bounds = array<i64: 1, 256>}, {transform_indices = @transform_3, window_bounds = array<i64: 1, 256>}, {transform_indices = @transform_4, window_bounds = array<i64: 8, 256>}]} {
    %c0_i32 = arith.constant 0 : i32
    %0 = arith.cmpi eq, %arg2, %c0_i32 : i32
    %1 = arith.extui %0 : i1 to i32
    %c0_i32_0 = arith.constant 0 : i32
    %2 = arith.cmpi ne, %1, %c0_i32_0 : i32
    scf.if %2 {
      %cst_9 = arith.constant 0.000000e+00 : f32
      %12 = vector.broadcast %cst_9 : f32 to vector<8x256xf32>
      %c0_10 = arith.constant 0 : index
      %c0_11 = arith.constant 0 : index
      %13 = vector.load %arg8[%c0_10, %c0_11] : memref<8x256xf32, #tpu.memory_space<vmem>>, vector<8x256xf32>
      tpu.vector_store %arg8[%c0_10, %c0_11], %12 {strides = array<i32>} : memref<8x256xf32, #tpu.memory_space<vmem>>, vector<8x256xf32>,
    } else {
    }
    %c0 = arith.constant 0 : index
    %c0_1 = arith.constant 0 : index
    %3 = vector.load %arg8[%c0, %c0_1] : memref<8x256xf32, #tpu.memory_space<vmem>>, vector<8x256xf32>
    %c0_2 = arith.constant 0 : index
    %c0_3 = arith.constant 0 : index
    %4 = vector.load %arg3[%c0_2, %c0_3] : memref<8x768xbf16, #tpu.memory_space<vmem>>, vector<8x768xbf16>
    %c0_4 = arith.constant 0 : index
    %c0_5 = arith.constant 0 : index
    %5 = vector.load %arg4[%c0_4, %c0_5] : memref<768x256xbf16, #tpu.memory_space<vmem>>, vector<768x256xbf16>
    %cst = arith.constant dense<0.000000e+00> : vector<8x256xf32>
    %6 = tpu.matmul %4, %5, %cst {dimension_numbers = #tpu.dot_dimension_numbers<[1], [0], [0], [1], [0, 0, 1, 1], [], []>} : vector<8x768xbf16>, vector<768x256xbf16>, vector<8x256xf32> -> vector<8x256xf32>
    %7 = arith.addf %3, %6 : vector<8x256xf32>
    %c0_6 = arith.constant 0 : index
    %c0_7 = arith.constant 0 : index
    %8 = vector.load %arg8[%c0_6, %c0_7] : memref<8x256xf32, #tpu.memory_space<vmem>>, vector<8x256xf32>
    tpu.vector_store %arg8[%c0_6, %c0_7], %7 {strides = array<i32>} : memref<8x256xf32, #tpu.memory_space<vmem>>, vector<8x256xf32>,
    %c2_i32 = arith.constant 2 : i32
    %9 = arith.cmpi eq, %arg2, %c2_i32 : i32
    %10 = arith.extui %9 : i1 to i32
    %c0_i32_8 = arith.constant 0 : i32
    %11 = arith.cmpi ne, %10, %c0_i32_8 : i32
    scf.if %11 {
      %c0_9 = arith.constant 0 : index
      %c0_10 = arith.constant 0 : index
      %12 = vector.load %arg8[%c0_9, %c0_10] : memref<8x256xf32, #tpu.memory_space<vmem>>, vector<8x256xf32>
      %c0_11 = arith.constant 0 : index
      %c0_12 = arith.constant 0 : index
      %13 = vector.load %arg5[%c0_11, %c0_12] : memref<1x256xf32, #tpu.memory_space<vmem>>, vector<1x256xf32>
      %14 = vector.broadcast %13 : vector<1x256xf32> to vector<8x256xf32>
      %15 = arith.mulf %12, %14 : vector<8x256xf32>
      %c0_13 = arith.constant 0 : index
      %c0_14 = arith.constant 0 : index
      %16 = vector.load %arg6[%c0_13, %c0_14] : memref<1x256xf32, #tpu.memory_space<vmem>>, vector<1x256xf32>
      %17 = vector.broadcast %16 : vector<1x256xf32> to vector<8x256xf32>
      %18 = arith.addf %15, %17 : vector<8x256xf32>
      %cst_15 = arith.constant 0.000000e+00 : f32
      %19 = vector.broadcast %cst_15 : f32 to vector<8x256xf32>
      %20 = arith.maximumf %18, %19 : vector<8x256xf32>
      %21 = arith.truncf %20 : vector<8x256xf32> to vector<8x256xbf16>
      %c0_16 = arith.constant 0 : index
      %c0_17 = arith.constant 0 : index
      %22 = vector.load %arg7[%c0_16, %c0_17] : memref<8x256xbf16, #tpu.memory_space<vmem>>, vector<8x256xbf16>
      tpu.vector_store %arg7[%c0_16, %c0_17], %21 {strides = array<i32>} : memref<8x256xbf16, #tpu.memory_space<vmem>>, vector<8x256xbf16>,
    } else {
    }
    return
  }
  func.func @transform_0(%arg0: i32, %arg1: i32, %arg2: i32) -> (i32, i32) {
    %c0_i32 = arith.constant 0 : i32
    return %arg1, %arg2 : i32, i32
  }
  func.func @transform_1(%arg0: i32, %arg1: i32, %arg2: i32) -> (i32, i32) {
    %c0_i32 = arith.constant 0 : i32
    return %arg2, %arg0 : i32, i32
  }
  func.func @transform_2(%arg0: i32, %arg1: i32, %arg2: i32) -> (i32, i32) {
    %c0_i32 = arith.constant 0 : i32
    %c0_i32_0 = arith.constant 0 : i32
    return %c0_i32, %arg0 : i32, i32
  }
  func.func @transform_3(%arg0: i32, %arg1: i32, %arg2: i32) -> (i32, i32) {
    %c0_i32 = arith.constant 0 : i32
    %c0_i32_0 = arith.constant 0 : i32
    return %c0_i32, %arg0 : i32, i32
  }
  func.func @transform_4(%arg0: i32, %arg1: i32, %arg2: i32) -> (i32, i32) {
    %c0_i32 = arith.constant 0 : i32
    return %arg1, %arg0 : i32, i32
  }
}

module attributes {stable_mosaic.version = 11 : i64} {
  func.func @_mm_kernel(%arg0: i32, %arg1: i32, %arg2: i32, %arg3: memref<8x768xbf16, #tpu.memory_space<vmem>>, %arg4: memref<768x256xbf16, #tpu.memory_space<vmem>>, %arg5: memref<1x256xf32, #tpu.memory_space<vmem>>, %arg6: memref<1x256xf32, #tpu.memory_space<vmem>>, %arg7: memref<8x256xbf16, #tpu.memory_space<vmem>>, %arg8: memref<8x256xf32, #tpu.memory_space<vmem>>) attributes {dimension_semantics = [#tpu.dimension_semantics<parallel>, #tpu.dimension_semantics<parallel>, #tpu.dimension_semantics<arbitrary>], iteration_bounds = array<i64: 2, 1, 3>, scalar_prefetch = 0 : i64, scratch_operands = 1 : i64, tpu.core_type = #tpu.core_type<tc>, window_params = [{transform_indices = @transform_0, window_bounds = array<i64: 8, 768>}, {transform_indices = @transform_1, window_bounds = array<i64: 768, 256>}, {transform_indices = @transform_2, window_bounds = array<i64: 1, 256>}, {transform_indices = @transform_3, window_bounds = array<i64: 1, 256>}, {transform_indices = @transform_4, window_bounds = array<i64: 8, 256>}]} {
    %c0_i32 = arith.constant 0 : i32
    %0 = arith.cmpi eq, %arg2, %c0_i32 : i32
    %1 = arith.extui %0 : i1 to i32
    %c0_i32_0 = arith.constant 0 : i32
    %2 = arith.cmpi ne, %1, %c0_i32_0 : i32
    scf.if %2 {
      %cst_9 = arith.constant 0.000000e+00 : f32
      %12 = vector.broadcast %cst_9 : f32 to vector<8x256xf32>
      %c0_10 = arith.constant 0 : index
      %c0_11 = arith.constant 0 : index
      %13 = vector.load %arg8[%c0_10, %c0_11] : memref<8x256xf32, #tpu.memory_space<vmem>>, vector<8x256xf32>
      tpu.vector_store %arg8[%c0_10, %c0_11], %12 {strides = array<i32>} : memref<8x256xf32, #tpu.memory_space<vmem>>, vector<8x256xf32>,
    } else {
    }
    %c0 = arith.constant 0 : index
    %c0_1 = arith.constant 0 : index
    %3 = vector.load %arg8[%c0, %c0_1] : memref<8x256xf32, #tpu.memory_space<vmem>>, vector<8x256xf32>
    %c0_2 = arith.constant 0 : index
    %c0_3 = arith.constant 0 : index
    %4 = vector.load %arg3[%c0_2, %c0_3] : memref<8x768xbf16, #tpu.memory_space<vmem>>, vector<8x768xbf16>
    %c0_4 = arith.constant 0 : index
    %c0_5 = arith.constant 0 : index
    %5 = vector.load %arg4[%c0_4, %c0_5] : memref<768x256xbf16, #tpu.memory_space<vmem>>, vector<768x256xbf16>
    %cst = arith.constant dense<0.000000e+00> : vector<8x256xf32>
    %6 = tpu.matmul %4, %5, %cst {dimension_numbers = #tpu.dot_dimension_numbers<[1], [0], [0], [1], [0, 0, 1, 1], [], []>} : vector<8x768xbf16>, vector<768x256xbf16>, vector<8x256xf32> -> vector<8x256xf32>
    %7 = arith.addf %3, %6 : vector<8x256xf32>
    %c0_6 = arith.constant 0 : index
    %c0_7 = arith.constant 0 : index
    %8 = vector.load %arg8[%c0_6, %c0_7] : memref<8x256xf32, #tpu.memory_space<vmem>>, vector<8x256xf32>
    tpu.vector_store %arg8[%c0_6, %c0_7], %7 {strides = array<i32>} : memref<8x256xf32, #tpu.memory_space<vmem>>, vector<8x256xf32>,
    %c2_i32 = arith.constant 2 : i32
    %9 = arith.cmpi eq, %arg2, %c2_i32 : i32
    %10 = arith.extui %9 : i1 to i32
    %c0_i32_8 = arith.constant 0 : i32
    %11 = arith.cmpi ne, %10, %c0_i32_8 : i32
    scf.if %11 {
      %c0_9 = arith.constant 0 : index
      %c0_10 = arith.constant 0 : index
      %12 = vector.load %arg8[%c0_9, %c0_10] : memref<8x256xf32, #tpu.memory_space<vmem>>, vector<8x256xf32>
      %c0_11 = arith.constant 0 : index
      %c0_12 = arith.constant 0 : index
      %13 = vector.load %arg5[%c0_11, %c0_12] : memref<1x256xf32, #tpu.memory_space<vmem>>, vector<1x256xf32>
      %14 = vector.broadcast %13 : vector<1x256xf32> to vector<8x256xf32>
      %15 = arith.mulf %12, %14 : vector<8x256xf32>
      %c0_13 = arith.constant 0 : index
      %c0_14 = arith.constant 0 : index
      %16 = vector.load %arg6[%c0_13, %c0_14] : memref<1x256xf32, #tpu.memory_space<vmem>>, vector<1x256xf32>
      %17 = vector.broadcast %16 : vector<1x256xf32> to vector<8x256xf32>
      %18 = arith.addf %15, %17 : vector<8x256xf32>
      %cst_15 = arith.constant 0.000000e+00 : f32
      %19 = vector.broadcast %cst_15 : f32 to vector<8x256xf32>
      %20 = arith.maximumf %18, %19 : vector<8x256xf32>
      %21 = arith.truncf %20 : vector<8x256xf32> to vector<8x256xbf16>
      %c0_16 = arith.constant 0 : index
      %c0_17 = arith.constant 0 : index
      %22 = vector.load %arg7[%c0_16, %c0_17] : memref<8x256xbf16, #tpu.memory_space<vmem>>, vector<8x256xbf16>
      tpu.vector_store %arg7[%c0_16, %c0_17], %21 {strides = array<i32>} : memref<8x256xbf16, #tpu.memory_space<vmem>>, vector<8x256xbf16>,
    } else {
    }
    return
  }
  func.func @transform_0(%arg0: i32, %arg1: i32, %arg2: i32) -> (i32, i32) {
    %c0_i32 = arith.constant 0 : i32
    return %arg1, %arg2 : i32, i32
  }
  func.func @transform_1(%arg0: i32, %arg1: i32, %arg2: i32) -> (i32, i32) {
    %c0_i32 = arith.constant 0 : i32
    return %arg2, %arg0 : i32, i32
  }
  func.func @transform_2(%arg0: i32, %arg1: i32, %arg2: i32) -> (i32, i32) {
    %c0_i32 = arith.constant 0 : i32
    %c0_i32_0 = arith.constant 0 : i32
    return %c0_i32, %arg0 : i32, i32
  }
  func.func @transform_3(%arg0: i32, %arg1: i32, %arg2: i32) -> (i32, i32) {
    %c0_i32 = arith.constant 0 : i32
    %c0_i32_0 = arith.constant 0 : i32
    return %c0_i32, %arg0 : i32, i32
  }
  func.func @transform_4(%arg0: i32, %arg1: i32, %arg2: i32) -> (i32, i32) {
    %c0_i32 = arith.constant 0 : i32
    return %arg1, %arg0 : i32, i32
  }
}

module attributes {stable_mosaic.version = 11 : i64} {
  func.func @_mm_kernel(%arg0: i32, %arg1: i32, %arg2: i32, %arg3: memref<8x256xbf16, #tpu.memory_space<vmem>>, %arg4: memref<256x256xbf16, #tpu.memory_space<vmem>>, %arg5: memref<1x256xf32, #tpu.memory_space<vmem>>, %arg6: memref<1x256xf32, #tpu.memory_space<vmem>>, %arg7: memref<8x256xbf16, #tpu.memory_space<vmem>>, %arg8: memref<8x256xf32, #tpu.memory_space<vmem>>) attributes {dimension_semantics = [#tpu.dimension_semantics<parallel>, #tpu.dimension_semantics<parallel>, #tpu.dimension_semantics<arbitrary>], iteration_bounds = array<i64: 2, 1, 1>, scalar_prefetch = 0 : i64, scratch_operands = 1 : i64, tpu.core_type = #tpu.core_type<tc>, window_params = [{transform_indices = @transform_0, window_bounds = array<i64: 8, 256>}, {transform_indices = @transform_1, window_bounds = array<i64: 256, 256>}, {transform_indices = @transform_2, window_bounds = array<i64: 1, 256>}, {transform_indices = @transform_3, window_bounds = array<i64: 1, 256>}, {transform_indices = @transform_4, window_bounds = array<i64: 8, 256>}]} {
    %c0_i32 = arith.constant 0 : i32
    %0 = arith.cmpi eq, %arg2, %c0_i32 : i32
    %1 = arith.extui %0 : i1 to i32
    %c0_i32_0 = arith.constant 0 : i32
    %2 = arith.cmpi ne, %1, %c0_i32_0 : i32
    scf.if %2 {
      %cst_10 = arith.constant 0.000000e+00 : f32
      %12 = vector.broadcast %cst_10 : f32 to vector<8x256xf32>
      %c0_11 = arith.constant 0 : index
      %c0_12 = arith.constant 0 : index
      %13 = vector.load %arg8[%c0_11, %c0_12] : memref<8x256xf32, #tpu.memory_space<vmem>>, vector<8x256xf32>
      tpu.vector_store %arg8[%c0_11, %c0_12], %12 {strides = array<i32>} : memref<8x256xf32, #tpu.memory_space<vmem>>, vector<8x256xf32>,
    } else {
    }
    %c0 = arith.constant 0 : index
    %c0_1 = arith.constant 0 : index
    %3 = vector.load %arg8[%c0, %c0_1] : memref<8x256xf32, #tpu.memory_space<vmem>>, vector<8x256xf32>
    %c0_2 = arith.constant 0 : index
    %c0_3 = arith.constant 0 : index
    %4 = vector.load %arg3[%c0_2, %c0_3] : memref<8x256xbf16, #tpu.memory_space<vmem>>, vector<8x256xbf16>
    %c0_4 = arith.constant 0 : index
    %c0_5 = arith.constant 0 : index
    %5 = vector.load %arg4[%c0_4, %c0_5] : memref<256x256xbf16, #tpu.memory_space<vmem>>, vector<256x256xbf16>
    %cst = arith.constant dense<0.000000e+00> : vector<8x256xf32>
    %6 = tpu.matmul %4, %5, %cst {dimension_numbers = #tpu.dot_dimension_numbers<[1], [0], [0], [1], [0, 0, 1, 1], [], []>} : vector<8x256xbf16>, vector<256x256xbf16>, vector<8x256xf32> -> vector<8x256xf32>
    %7 = arith.addf %3, %6 : vector<8x256xf32>
    %c0_6 = arith.constant 0 : index
    %c0_7 = arith.constant 0 : index
    %8 = vector.load %arg8[%c0_6, %c0_7] : memref<8x256xf32, #tpu.memory_space<vmem>>, vector<8x256xf32>
    tpu.vector_store %arg8[%c0_6, %c0_7], %7 {strides = array<i32>} : memref<8x256xf32, #tpu.memory_space<vmem>>, vector<8x256xf32>,
    %c0_i32_8 = arith.constant 0 : i32
    %9 = arith.cmpi eq, %arg2, %c0_i32_8 : i32
    %10 = arith.extui %9 : i1 to i32
    %c0_i32_9 = arith.constant 0 : i32
    %11 = arith.cmpi ne, %10, %c0_i32_9 : i32
    scf.if %11 {
      %c0_10 = arith.constant 0 : index
      %c0_11 = arith.constant 0 : index
      %12 = vector.load %arg8[%c0_10, %c0_11] : memref<8x256xf32, #tpu.memory_space<vmem>>, vector<8x256xf32>
      %c0_12 = arith.constant 0 : index
      %c0_13 = arith.constant 0 : index
      %13 = vector.load %arg5[%c0_12, %c0_13] : memref<1x256xf32, #tpu.memory_space<vmem>>, vector<1x256xf32>
      %14 = vector.broadcast %13 : vector<1x256xf32> to vector<8x256xf32>
      %15 = arith.mulf %12, %14 : vector<8x256xf32>
      %c0_14 = arith.constant 0 : index
      %c0_15 = arith.constant 0 : index
      %16 = vector.load %arg6[%c0_14, %c0_15] : memref<1x256xf32, #tpu.memory_space<vmem>>, vector<1x256xf32>
      %17 = vector.broadcast %16 : vector<1x256xf32> to vector<8x256xf32>
      %18 = arith.addf %15, %17 : vector<8x256xf32>
      %19 = arith.truncf %18 : vector<8x256xf32> to vector<8x256xbf16>
      %c0_16 = arith.constant 0 : index
      %c0_17 = arith.constant 0 : index
      %20 = vector.load %arg7[%c0_16, %c0_17] : memref<8x256xbf16, #tpu.memory_space<vmem>>, vector<8x256xbf16>
      tpu.vector_store %arg7[%c0_16, %c0_17], %19 {strides = array<i32>} : memref<8x256xbf16, #tpu.memory_space<vmem>>, vector<8x256xbf16>,
    } else {
    }
    return
  }
  func.func @transform_0(%arg0: i32, %arg1: i32, %arg2: i32) -> (i32, i32) {
    %c0_i32 = arith.constant 0 : i32
    return %arg1, %arg2 : i32, i32
  }
  func.func @transform_1(%arg0: i32, %arg1: i32, %arg2: i32) -> (i32, i32) {
    %c0_i32 = arith.constant 0 : i32
    return %arg2, %arg0 : i32, i32
  }
  func.func @transform_2(%arg0: i32, %arg1: i32, %arg2: i32) -> (i32, i32) {
    %c0_i32 = arith.constant 0 : i32
    %c0_i32_0 = arith.constant 0 : i32
    return %c0_i32, %arg0 : i32, i32
  }
  func.func @transform_3(%arg0: i32, %arg1: i32, %arg2: i32) -> (i32, i32) {
    %c0_i32 = arith.constant 0 : i32
    %c0_i32_0 = arith.constant 0 : i32
    return %c0_i32, %arg0 : i32, i32
  }
  func.func @transform_4(%arg0: i32, %arg1: i32, %arg2: i32) -> (i32, i32) {
    %c0_i32 = arith.constant 0 : i32
    return %arg1, %arg0 : i32, i32
  }
}

module attributes {stable_mosaic.version = 11 : i64} {
  func.func @_mm_kernel(%arg0: i32, %arg1: i32, %arg2: i32, %arg3: memref<8x768xbf16, #tpu.memory_space<vmem>>, %arg4: memref<768x256xbf16, #tpu.memory_space<vmem>>, %arg5: memref<1x256xf32, #tpu.memory_space<vmem>>, %arg6: memref<1x256xf32, #tpu.memory_space<vmem>>, %arg7: memref<8x256xbf16, #tpu.memory_space<vmem>>, %arg8: memref<8x256xbf16, #tpu.memory_space<vmem>>, %arg9: memref<8x256xf32, #tpu.memory_space<vmem>>) attributes {dimension_semantics = [#tpu.dimension_semantics<parallel>, #tpu.dimension_semantics<parallel>, #tpu.dimension_semantics<arbitrary>], iteration_bounds = array<i64: 2, 1, 6>, scalar_prefetch = 0 : i64, scratch_operands = 1 : i64, tpu.core_type = #tpu.core_type<tc>, window_params = [{transform_indices = @transform_0, window_bounds = array<i64: 8, 768>}, {transform_indices = @transform_1, window_bounds = array<i64: 768, 256>}, {transform_indices = @transform_2, window_bounds = array<i64: 1, 256>}, {transform_indices = @transform_3, window_bounds = array<i64: 1, 256>}, {transform_indices = @transform_4, window_bounds = array<i64: 8, 256>}, {transform_indices = @transform_5, window_bounds = array<i64: 8, 256>}]} {
    %c0_i32 = arith.constant 0 : i32
    %0 = arith.cmpi eq, %arg2, %c0_i32 : i32
    %1 = arith.extui %0 : i1 to i32
    %c0_i32_0 = arith.constant 0 : i32
    %2 = arith.cmpi ne, %1, %c0_i32_0 : i32
    scf.if %2 {
      %cst_9 = arith.constant 0.000000e+00 : f32
      %12 = vector.broadcast %cst_9 : f32 to vector<8x256xf32>
      %c0_10 = arith.constant 0 : index
      %c0_11 = arith.constant 0 : index
      %13 = vector.load %arg9[%c0_10, %c0_11] : memref<8x256xf32, #tpu.memory_space<vmem>>, vector<8x256xf32>
      tpu.vector_store %arg9[%c0_10, %c0_11], %12 {strides = array<i32>} : memref<8x256xf32, #tpu.memory_space<vmem>>, vector<8x256xf32>,
    } else {
    }
    %c0 = arith.constant 0 : index
    %c0_1 = arith.constant 0 : index
    %3 = vector.load %arg9[%c0, %c0_1] : memref<8x256xf32, #tpu.memory_space<vmem>>, vector<8x256xf32>
    %c0_2 = arith.constant 0 : index
    %c0_3 = arith.constant 0 : index
    %4 = vector.load %arg3[%c0_2, %c0_3] : memref<8x768xbf16, #tpu.memory_space<vmem>>, vector<8x768xbf16>
    %c0_4 = arith.constant 0 : index
    %c0_5 = arith.constant 0 : index
    %5 = vector.load %arg4[%c0_4, %c0_5] : memref<768x256xbf16, #tpu.memory_space<vmem>>, vector<768x256xbf16>
    %cst = arith.constant dense<0.000000e+00> : vector<8x256xf32>
    %6 = tpu.matmul %4, %5, %cst {dimension_numbers = #tpu.dot_dimension_numbers<[1], [0], [0], [1], [0, 0, 1, 1], [], []>} : vector<8x768xbf16>, vector<768x256xbf16>, vector<8x256xf32> -> vector<8x256xf32>
    %7 = arith.addf %3, %6 : vector<8x256xf32>
    %c0_6 = arith.constant 0 : index
    %c0_7 = arith.constant 0 : index
    %8 = vector.load %arg9[%c0_6, %c0_7] : memref<8x256xf32, #tpu.memory_space<vmem>>, vector<8x256xf32>
    tpu.vector_store %arg9[%c0_6, %c0_7], %7 {strides = array<i32>} : memref<8x256xf32, #tpu.memory_space<vmem>>, vector<8x256xf32>,
    %c5_i32 = arith.constant 5 : i32
    %9 = arith.cmpi eq, %arg2, %c5_i32 : i32
    %10 = arith.extui %9 : i1 to i32
    %c0_i32_8 = arith.constant 0 : i32
    %11 = arith.cmpi ne, %10, %c0_i32_8 : i32
    scf.if %11 {
      %c0_9 = arith.constant 0 : index
      %c0_10 = arith.constant 0 : index
      %12 = vector.load %arg9[%c0_9, %c0_10] : memref<8x256xf32, #tpu.memory_space<vmem>>, vector<8x256xf32>
      %c0_11 = arith.constant 0 : index
      %c0_12 = arith.constant 0 : index
      %13 = vector.load %arg5[%c0_11, %c0_12] : memref<1x256xf32, #tpu.memory_space<vmem>>, vector<1x256xf32>
      %14 = vector.broadcast %13 : vector<1x256xf32> to vector<8x256xf32>
      %15 = arith.mulf %12, %14 : vector<8x256xf32>
      %c0_13 = arith.constant 0 : index
      %c0_14 = arith.constant 0 : index
      %16 = vector.load %arg6[%c0_13, %c0_14] : memref<1x256xf32, #tpu.memory_space<vmem>>, vector<1x256xf32>
      %17 = vector.broadcast %16 : vector<1x256xf32> to vector<8x256xf32>
      %18 = arith.addf %15, %17 : vector<8x256xf32>
      %c0_15 = arith.constant 0 : index
      %c0_16 = arith.constant 0 : index
      %19 = vector.load %arg7[%c0_15, %c0_16] : memref<8x256xbf16, #tpu.memory_space<vmem>>, vector<8x256xbf16>
      %20 = arith.extf %19 : vector<8x256xbf16> to vector<8x256xf32>
      %21 = arith.addf %18, %20 : vector<8x256xf32>
      %cst_17 = arith.constant 0.000000e+00 : f32
      %22 = vector.broadcast %cst_17 : f32 to vector<8x256xf32>
      %23 = arith.maximumf %21, %22 : vector<8x256xf32>
      %24 = arith.truncf %23 : vector<8x256xf32> to vector<8x256xbf16>
      %c0_18 = arith.constant 0 : index
      %c0_19 = arith.constant 0 : index
      %25 = vector.load %arg8[%c0_18, %c0_19] : memref<8x256xbf16, #tpu.memory_space<vmem>>, vector<8x256xbf16>
      tpu.vector_store %arg8[%c0_18, %c0_19], %24 {strides = array<i32>} : memref<8x256xbf16, #tpu.memory_space<vmem>>, vector<8x256xbf16>,
    } else {
    }
    return
  }
  func.func @transform_0(%arg0: i32, %arg1: i32, %arg2: i32) -> (i32, i32) {
    %c0_i32 = arith.constant 0 : i32
    return %arg1, %arg2 : i32, i32
  }
  func.func @transform_1(%arg0: i32, %arg1: i32, %arg2: i32) -> (i32, i32) {
    %c0_i32 = arith.constant 0 : i32
    return %arg2, %arg0 : i32, i32
  }
  func.func @transform_2(%arg0: i32, %arg1: i32, %arg2: i32) -> (i32, i32) {
    %c0_i32 = arith.constant 0 : i32
    %c0_i32_0 = arith.constant 0 : i32
    return %c0_i32, %arg0 : i32, i32
  }
  func.func @transform_3(%arg0: i32, %arg1: i32, %arg2: i32) -> (i32, i32) {
    %c0_i32 = arith.constant 0 : i32
    %c0_i32_0 = arith.constant 0 : i32
    return %c0_i32, %arg0 : i32, i32
  }
  func.func @transform_4(%arg0: i32, %arg1: i32, %arg2: i32) -> (i32, i32) {
    %c0_i32 = arith.constant 0 : i32
    return %arg1, %arg0 : i32, i32
  }
  func.func @transform_5(%arg0: i32, %arg1: i32, %arg2: i32) -> (i32, i32) {
    %c0_i32 = arith.constant 0 : i32
    return %arg1, %arg0 : i32, i32
  }
}

module attributes {stable_mosaic.version = 11 : i64} {
  func.func @_mm_kernel(%arg0: i32, %arg1: i32, %arg2: i32, %arg3: memref<8x768xbf16, #tpu.memory_space<vmem>>, %arg4: memref<768x256xbf16, #tpu.memory_space<vmem>>, %arg5: memref<1x256xf32, #tpu.memory_space<vmem>>, %arg6: memref<1x256xf32, #tpu.memory_space<vmem>>, %arg7: memref<8x256xbf16, #tpu.memory_space<vmem>>, %arg8: memref<8x256xf32, #tpu.memory_space<vmem>>) attributes {dimension_semantics = [#tpu.dimension_semantics<parallel>, #tpu.dimension_semantics<parallel>, #tpu.dimension_semantics<arbitrary>], iteration_bounds = array<i64: 2, 1, 6>, scalar_prefetch = 0 : i64, scratch_operands = 1 : i64, tpu.core_type = #tpu.core_type<tc>, window_params = [{transform_indices = @transform_0, window_bounds = array<i64: 8, 768>}, {transform_indices = @transform_1, window_bounds = array<i64: 768, 256>}, {transform_indices = @transform_2, window_bounds = array<i64: 1, 256>}, {transform_indices = @transform_3, window_bounds = array<i64: 1, 256>}, {transform_indices = @transform_4, window_bounds = array<i64: 8, 256>}]} {
    %c0_i32 = arith.constant 0 : i32
    %0 = arith.cmpi eq, %arg2, %c0_i32 : i32
    %1 = arith.extui %0 : i1 to i32
    %c0_i32_0 = arith.constant 0 : i32
    %2 = arith.cmpi ne, %1, %c0_i32_0 : i32
    scf.if %2 {
      %cst_9 = arith.constant 0.000000e+00 : f32
      %12 = vector.broadcast %cst_9 : f32 to vector<8x256xf32>
      %c0_10 = arith.constant 0 : index
      %c0_11 = arith.constant 0 : index
      %13 = vector.load %arg8[%c0_10, %c0_11] : memref<8x256xf32, #tpu.memory_space<vmem>>, vector<8x256xf32>
      tpu.vector_store %arg8[%c0_10, %c0_11], %12 {strides = array<i32>} : memref<8x256xf32, #tpu.memory_space<vmem>>, vector<8x256xf32>,
    } else {
    }
    %c0 = arith.constant 0 : index
    %c0_1 = arith.constant 0 : index
    %3 = vector.load %arg8[%c0, %c0_1] : memref<8x256xf32, #tpu.memory_space<vmem>>, vector<8x256xf32>
    %c0_2 = arith.constant 0 : index
    %c0_3 = arith.constant 0 : index
    %4 = vector.load %arg3[%c0_2, %c0_3] : memref<8x768xbf16, #tpu.memory_space<vmem>>, vector<8x768xbf16>
    %c0_4 = arith.constant 0 : index
    %c0_5 = arith.constant 0 : index
    %5 = vector.load %arg4[%c0_4, %c0_5] : memref<768x256xbf16, #tpu.memory_space<vmem>>, vector<768x256xbf16>
    %cst = arith.constant dense<0.000000e+00> : vector<8x256xf32>
    %6 = tpu.matmul %4, %5, %cst {dimension_numbers = #tpu.dot_dimension_numbers<[1], [0], [0], [1], [0, 0, 1, 1], [], []>} : vector<8x768xbf16>, vector<768x256xbf16>, vector<8x256xf32> -> vector<8x256xf32>
    %7 = arith.addf %3, %6 : vector<8x256xf32>
    %c0_6 = arith.constant 0 : index
    %c0_7 = arith.constant 0 : index
    %8 = vector.load %arg8[%c0_6, %c0_7] : memref<8x256xf32, #tpu.memory_space<vmem>>, vector<8x256xf32>
    tpu.vector_store %arg8[%c0_6, %c0_7], %7 {strides = array<i32>} : memref<8x256xf32, #tpu.memory_space<vmem>>, vector<8x256xf32>,
    %c5_i32 = arith.constant 5 : i32
    %9 = arith.cmpi eq, %arg2, %c5_i32 : i32
    %10 = arith.extui %9 : i1 to i32
    %c0_i32_8 = arith.constant 0 : i32
    %11 = arith.cmpi ne, %10, %c0_i32_8 : i32
    scf.if %11 {
      %c0_9 = arith.constant 0 : index
      %c0_10 = arith.constant 0 : index
      %12 = vector.load %arg8[%c0_9, %c0_10] : memref<8x256xf32, #tpu.memory_space<vmem>>, vector<8x256xf32>
      %c0_11 = arith.constant 0 : index
      %c0_12 = arith.constant 0 : index
      %13 = vector.load %arg5[%c0_11, %c0_12] : memref<1x256xf32, #tpu.memory_space<vmem>>, vector<1x256xf32>
      %14 = vector.broadcast %13 : vector<1x256xf32> to vector<8x256xf32>
      %15 = arith.mulf %12, %14 : vector<8x256xf32>
      %c0_13 = arith.constant 0 : index
      %c0_14 = arith.constant 0 : index
      %16 = vector.load %arg6[%c0_13, %c0_14] : memref<1x256xf32, #tpu.memory_space<vmem>>, vector<1x256xf32>
      %17 = vector.broadcast %16 : vector<1x256xf32> to vector<8x256xf32>
      %18 = arith.addf %15, %17 : vector<8x256xf32>
      %cst_15 = arith.constant 0.000000e+00 : f32
      %19 = vector.broadcast %cst_15 : f32 to vector<8x256xf32>
      %20 = arith.maximumf %18, %19 : vector<8x256xf32>
      %21 = arith.truncf %20 : vector<8x256xf32> to vector<8x256xbf16>
      %c0_16 = arith.constant 0 : index
      %c0_17 = arith.constant 0 : index
      %22 = vector.load %arg7[%c0_16, %c0_17] : memref<8x256xbf16, #tpu.memory_space<vmem>>, vector<8x256xbf16>
      tpu.vector_store %arg7[%c0_16, %c0_17], %21 {strides = array<i32>} : memref<8x256xbf16, #tpu.memory_space<vmem>>, vector<8x256xbf16>,
    } else {
    }
    return
  }
  func.func @transform_0(%arg0: i32, %arg1: i32, %arg2: i32) -> (i32, i32) {
    %c0_i32 = arith.constant 0 : i32
    return %arg1, %arg2 : i32, i32
  }
  func.func @transform_1(%arg0: i32, %arg1: i32, %arg2: i32) -> (i32, i32) {
    %c0_i32 = arith.constant 0 : i32
    return %arg2, %arg0 : i32, i32
  }
  func.func @transform_2(%arg0: i32, %arg1: i32, %arg2: i32) -> (i32, i32) {
    %c0_i32 = arith.constant 0 : i32
    %c0_i32_0 = arith.constant 0 : i32
    return %c0_i32, %arg0 : i32, i32
  }
  func.func @transform_3(%arg0: i32, %arg1: i32, %arg2: i32) -> (i32, i32) {
    %c0_i32 = arith.constant 0 : i32
    %c0_i32_0 = arith.constant 0 : i32
    return %c0_i32, %arg0 : i32, i32
  }
  func.func @transform_4(%arg0: i32, %arg1: i32, %arg2: i32) -> (i32, i32) {
    %c0_i32 = arith.constant 0 : i32
    return %arg1, %arg0 : i32, i32
  }
}

module attributes {stable_mosaic.version = 11 : i64} {
  func.func @_mean_reduce_kernel(%arg0: memref<2x1x512xbf16, #tpu.memory_space<vmem>>, %arg1: memref<2x512xf32, #tpu.memory_space<vmem>>) attributes {dimension_semantics = [], scalar_prefetch = 0 : i64, scratch_operands = 0 : i64, tpu.core_type = #tpu.core_type<tc>} {
    %c0 = arith.constant 0 : index
    %c0_0 = arith.constant 0 : index
    %c0_1 = arith.constant 0 : index
    %0 = vector.load %arg0[%c0, %c0_0, %c0_1] : memref<2x1x512xbf16, #tpu.memory_space<vmem>>, vector<2x1x512xbf16>
    %1 = arith.extf %0 : vector<2x1x512xbf16> to vector<2x1x512xf32>
    %cst = arith.constant dense<0.000000e+00> : vector<2x512xf32>
    %2 = vector.multi_reduction <add>, %1, %cst [1] : vector<2x1x512xf32> to vector<2x512xf32>
    %cst_2 = arith.constant 1.000000e+00 : f32
    %3 = vector.broadcast %cst_2 : f32 to vector<2x512xf32>
    %4 = arith.divf %2, %3 : vector<2x512xf32>
    %c0_3 = arith.constant 0 : index
    %c0_4 = arith.constant 0 : index
    %5 = vector.load %arg1[%c0_3, %c0_4] : memref<2x512xf32, #tpu.memory_space<vmem>>, vector<2x512xf32>
    tpu.vector_store %arg1[%c0_3, %c0_4], %4 {strides = array<i32>} : memref<2x512xf32, #tpu.memory_space<vmem>>, vector<2x512xf32>,
    return
  }
}

module attributes {stable_mosaic.version = 11 : i64} {
  func.func @_head_kernel(%arg0: memref<2x512xf32, #tpu.memory_space<vmem>>, %arg1: memref<512x8xf32, #tpu.memory_space<vmem>>, %arg2: memref<1x8xf32, #tpu.memory_space<vmem>>, %arg3: memref<2x1xf32, #tpu.memory_space<vmem>>, %arg4: memref<2x7xf32, #tpu.memory_space<vmem>>) attributes {dimension_semantics = [], scalar_prefetch = 0 : i64, scratch_operands = 0 : i64, tpu.core_type = #tpu.core_type<tc>} {
    %c0 = arith.constant 0 : index
    %c0_0 = arith.constant 0 : index
    %0 = vector.load %arg0[%c0, %c0_0] : memref<2x512xf32, #tpu.memory_space<vmem>>, vector<2x512xf32>
    %c0_1 = arith.constant 0 : index
    %c0_2 = arith.constant 0 : index
    %1 = vector.load %arg1[%c0_1, %c0_2] : memref<512x8xf32, #tpu.memory_space<vmem>>, vector<512x8xf32>
    %cst = arith.constant dense<0.000000e+00> : vector<2x8xf32>
    %2 = tpu.matmul %0, %1, %cst {dimension_numbers = #tpu.dot_dimension_numbers<[1], [0], [0], [1], [0, 0, 1, 1], [], []>} : vector<2x512xf32>, vector<512x8xf32>, vector<2x8xf32> -> vector<2x8xf32>
    %c0_3 = arith.constant 0 : index
    %c0_4 = arith.constant 0 : index
    %3 = vector.load %arg2[%c0_3, %c0_4] : memref<1x8xf32, #tpu.memory_space<vmem>>, vector<1x8xf32>
    %4 = vector.broadcast %3 : vector<1x8xf32> to vector<2x8xf32>
    %5 = arith.addf %2, %4 : vector<2x8xf32>
    %6 = vector.extract_strided_slice %5 {offsets = [0, 0], sizes = [2, 7], strides = [1, 1]} : vector<2x8xf32> to vector<2x7xf32>
    %7 = vector.extract_strided_slice %5 {offsets = [0, 7], sizes = [2, 1], strides = [1, 1]} : vector<2x8xf32> to vector<2x1xf32>
    %cst_5 = arith.constant 0.000000e+00 : f32
    %8 = vector.broadcast %cst_5 : f32 to vector<2x1xf32>
    %9 = arith.cmpf oge, %7, %8 : vector<2x1xf32>
    %cst_6 = arith.constant 0.000000e+00 : f32
    %10 = vector.broadcast %cst_6 : f32 to vector<2x1xf32>
    %11 = arith.subf %10, %7 : vector<2x1xf32>
    %12 = math.exp %11 : vector<2x1xf32>
    %cst_7 = arith.constant 1.000000e+00 : f32
    %13 = vector.broadcast %cst_7 : f32 to vector<2x1xf32>
    %14 = arith.addf %13, %12 : vector<2x1xf32>
    %cst_8 = arith.constant 1.000000e+00 : f32
    %15 = vector.broadcast %cst_8 : f32 to vector<2x1xf32>
    %16 = arith.divf %15, %14 : vector<2x1xf32>
    %17 = math.exp %7 : vector<2x1xf32>
    %18 = math.exp %7 : vector<2x1xf32>
    %cst_9 = arith.constant 1.000000e+00 : f32
    %19 = vector.broadcast %cst_9 : f32 to vector<2x1xf32>
    %20 = arith.addf %19, %18 : vector<2x1xf32>
    %21 = arith.divf %17, %20 : vector<2x1xf32>
    %22 = arith.select %9, %16, %21 : vector<2x1xi1>, vector<2x1xf32>
    %c0_10 = arith.constant 0 : index
    %c0_11 = arith.constant 0 : index
    %23 = vector.load %arg3[%c0_10, %c0_11] : memref<2x1xf32, #tpu.memory_space<vmem>>, vector<2x1xf32>
    tpu.vector_store %arg3[%c0_10, %c0_11], %22 {strides = array<i32>} : memref<2x1xf32, #tpu.memory_space<vmem>>, vector<2x1xf32>,
    %24 = vector.broadcast %22 : vector<2x1xf32> to vector<2x7xf32>
    %25 = arith.mulf %24, %6 : vector<2x7xf32>
    %c0_12 = arith.constant 0 : index
    %c0_13 = arith.constant 0 : index
    %26 = vector.load %arg4[%c0_12, %c0_13] : memref<2x7xf32, #tpu.memory_space<vmem>>, vector<2x7xf32>
    tpu.vector_store %arg4[%c0_12, %c0_13], %25 {strides = array<i32>} : memref<2x7xf32, #tpu.memory_space<vmem>>, vector<2x7xf32>,
    return
  }
}

</mosaic_0001>

<bundles_post_ra>
// kernel: res18_feature_forward.23
= control target key start
LH: loop header
LB: loop body
LE: loop exit
PB: predicated region body
PF: predicated region fallthrough
CT: control target
= control target key end

     0   :  { %s1753_s15 = smov 0   ;;  %s1755_s16 = smov 0   ;;  %s2076_s0 = inlined_call_operand.vmem [shape: bf16[512,256], index: 0, kind: input, shape index: {}]   ;;  %s2077_s1 = inlined_call_operand.vmem [shape: bf16[256,64], index: 1, kind: input, shape index: {}]   ;;  %s2078_s2 = inlined_call_operand.vmem [shape: f32[1,64], index: 2, kind: input, shape index: {}]   ;;  %s2079_s3 = inlined_call_operand.vmem [shape: f32[1,64], index: 3, kind: input, shape index: {}]   ;;  %s2080_s4 = inlined_call_operand.vmem [shape: bf16[512,64], index: 4, kind: output, shape index: {}]  }
   0x1   :  { %s1757_s17 = smov 0  }
   0x2 LB: > { %s29_s18 = sadd.s32 1, %s1721_s16  ;;  %p1363_p0 = scmp.ge.s32.totalorder %s1725_s17, 1  ;;  %s1725_s17 = sphi %s1757_s17, %s14_s17   ;;  %s1721_s16 = sphi %s1755_s16, %s2082_s16   ;;  %s1717_s15 = sphi %s1753_s15, %s2081_s15  }
   0x3   : > { %p31_p1 = scmp.ge.s32.totalorder %s29_s18, 2  ;;  %p224_p2 = scmp.lt.s32.totalorder %s1725_s17, 3 }
   0x5   : > { %s2084_s18 = smov (%p31_p1, %s29_s18), 0  ;;  %p225_p3 = pnand %p1363_p0, %p224_p2 }
   0x6   : > { %v1639_v0 = vld [vmem:[%s2077_s1 + $0x40] sm:$0xff] (!%p225_p3)   ;;  %s1364_s21 = sshll.u32 (!%p225_p3), %s1717_s15, 5  ;;  %v1641_v2 = vld [vmem:[%s2077_s1 + $0x48] sm:$0xff] (!%p225_p3)   ;;  %v1643_v4 = vld [vmem:[%s2077_s1 + $0x50] sm:$0xff] (!%p225_p3)   ;;  %vm313_vm0 = vcmask (!%p225_p3), 523264   ;;  %v1727_v48 = vmov (!%p225_p3), 0.0  }
   0x7   : > { %228 = sbr.rel (%p225_p3) target bundleno = 333 (0x14d), region = 36  ;;  %v1640_v1 = vld [vmem:[%s2077_s1] sm:$0xff] (!%p225_p3)   ;;  %1486 = vmatprep.subr.bf16.mxu0 (!%p225_p3), %v1639_v0  ;;  %1598 = vmatprep.subr.bf16.mxu1 (!%p225_p3), %v1639_v0  ;;  %v1642_v3 = vld [vmem:[%s2077_s1 + $0x8] sm:$0xff] (!%p225_p3)   ;;  %p274_p4 = scmp.lt.s32.totalorder (!%p225_p3), %s1364_s21, 63  ;;  %v1644_v5 = vld [vmem:[%s2077_s1 + $0x10] sm:$0xff] (!%p225_p3)   ;;  %314 = vst.msk [vmem:[#allocation2] sm:$0xff] (!%p225_p3), %vm313_vm0, %v1727_v48 }
   0x8   : > { %1487 = vmatpush3.bf16.msra.mxu0 (!%p225_p3), %v1640_v1  ;;  %1606 = vmatpush3.bf16.msra.mxu1 (!%p225_p3), %v1640_v1  ;;  %v1645_v6 = vld [vmem:[%s2077_s1 + $0x58] sm:$0xff] (!%p225_p3)   ;;  %v1647_v8 = vld [vmem:[%s2077_s1 + $0x60] sm:$0xff] (!%p225_p3)   ;;  %v1649_v10 = vld [vmem:[%s2077_s1 + $0x68] sm:$0xff] (!%p225_p3)   ;;  %315 = vst.msk [vmem:[#allocation2 + $0x8] sm:$0xff] (!%p225_p3), %vm313_vm0, %v1727_v48  ;;  %vm1197_vm1 = vcmask (!%p225_p3), 519168  }
   0x9   : > { %1488 = vmatprep.subr.bf16.mxu0 (!%p225_p3), %v1641_v2  ;;  %1599 = vmatprep.subr.bf16.mxu1 (!%p225_p3), %v1641_v2  ;;  %v1646_v7 = vld [vmem:[%s2077_s1 + $0x18] sm:$0xff] (!%p225_p3)   ;;  %v1648_v9 = vld [vmem:[%s2077_s1 + $0x20] sm:$0xff] (!%p225_p3)   ;;  %v1650_v13 = vld [vmem:[%s2077_s1 + $0x28] sm:$0xff] (!%p225_p3)   ;;  %316 = vst.msk [vmem:[#allocation2 + $0x10] sm:$0xff] (!%p225_p3), %vm313_vm0, %v1727_v48 }
   0xa   : > { %v1651_v14 = vld [vmem:[%s2077_s1 + $0x70] sm:$0xff] (!%p225_p3)   ;;  %v1653_v16 = vld [vmem:[%s2077_s1 + $0x78] sm:$0xff] (!%p225_p3)   ;;  %317 = vst.msk [vmem:[#allocation2 + $0x18] sm:$0xff] (!%p225_p3), %vm313_vm0, %v1727_v48  ;;  %318 = vst.msk [vmem:[#allocation2 + $0x20] sm:$0xff] (!%p225_p3), %vm313_vm0, %v1727_v48 }
   0xb   : > { %v1652_v15 = vld [vmem:[%s2077_s1 + $0x30] sm:$0xff] (!%p225_p3)   ;;  %v1654_v17 = vld [vmem:[%s2077_s1 + $0x38] sm:$0xff] (!%p225_p3)   ;;  %319 = vst.msk [vmem:[#allocation2 + $0x28] sm:$0xff] (!%p225_p3), %vm313_vm0, %v1727_v48  ;;  %320 = vst.msk [vmem:[#allocation2 + $0x30] sm:$0xff] (!%p225_p3), %vm313_vm0, %v1727_v48 }
   0xc   : > { %1489 = vmatpush3.bf16.msra.mxu0 (!%p225_p3), %v1642_v3  ;;  %1607 = vmatpush3.bf16.msra.mxu1 (!%p225_p3), %v1642_v3  ;;  %321 = vst.msk [vmem:[#allocation2 + $0x38] sm:$0xff] (!%p225_p3), %vm313_vm0, %v1727_v48  ;;  %322 = vst.msk [vmem:[#allocation2 + $0x40] sm:$0xff] (!%p225_p3), %vm313_vm0, %v1727_v48 }
   0xd   : > { %1490 = vmatprep.subr.bf16.mxu0 (!%p225_p3), %v1643_v4  ;;  %1600 = vmatprep.subr.bf16.mxu1 (!%p225_p3), %v1643_v4  ;;  %323 = vst.msk [vmem:[#allocation2 + $0x48] sm:$0xff] (!%p225_p3), %vm313_vm0, %v1727_v48  ;;  %324 = vst.msk [vmem:[#allocation2 + $0x50] sm:$0xff] (!%p225_p3), %vm313_vm0, %v1727_v48 }
   0xe   : > { %s2086_s21 = smov (!%p274_p4, %s1364_s21), 63  ;;  %325 = vst.msk [vmem:[#allocation2 + $0x58] sm:$0xff] %vm313_vm0, %v1727_v48  ;;  %326 = vst.msk [vmem:[#allocation2 + $0x60] sm:$0xff] %vm313_vm0, %v1727_v48  ;;  %v346_v51 = vld [vmem:[#allocation2] sm:$0xff] }
   0xf   : > { %s1453_s10 = sshll.u32 %s2086_s21, 3  ;;  %327 = vst.msk [vmem:[#allocation2 + $0x68] sm:$0xff] %vm313_vm0, %v1727_v48  ;;  %328 = vst.msk [vmem:[#allocation2 + $0x70] sm:$0xff] %vm313_vm0, %v1727_v48  ;;  %v347_v59 = vld [vmem:[#allocation2 + $0x8] sm:$0xff]  ;;  %s1368_s12 = sshll.u32 %s2086_s21, 2 }
  0x10   : > { %1491 = vmatpush3.bf16.msra.mxu0 %v1644_v5  ;;  %1608 = vmatpush3.bf16.msra.mxu1 %v1644_v5  ;;  %s1804_s15 = scalar_lea.vmem %s2076_s0, %s1453_s10  ;;  %329 = vst.msk [vmem:[#allocation2 + $0x78] sm:$0xff] %vm313_vm0, %v1727_v48  ;;  %330 = vst.msk [vmem:[#allocation2 + $0x80] sm:$0xff] %vm313_vm0, %v1727_v48  ;;  %s1921_s14 = scalar_lea.vmem %s2080_s4, %s1368_s12 }
  0x11   : > { %1492 = vmatprep.subr.bf16.mxu0 %v1645_v6  ;;  %1601 = vmatprep.subr.bf16.mxu1 %v1645_v6  ;;  %v1657_v11 = vld [vmem:[%s1804_s15 + $0x4] ss:$8 sps:$4 sm:$0xff]   ;;  %v1655_v18 = vld [vmem:[%s1804_s15] ss:$8 sps:$4 sm:$0xff]   ;;  %v1661_v20 = vld [vmem:[%s1804_s15 + $0x14] ss:$8 sps:$4 sm:$0xff]  }
  0x12   : > { %v1660_v12 = vld [vmem:[%s1804_s15 + $0x84] ss:$8 sps:$4 sm:$0xff]   ;;  %730 = vmatprep.mubr.bf16.mxu0 %v1657_v11  ;;  %v1658_v19 = vld [vmem:[%s1804_s15 + $0x80] ss:$8 sps:$4 sm:$0xff]   ;;  %v1663_v21 = vld [vmem:[%s1804_s15 + $0x94] ss:$8 sps:$4 sm:$0xff]  }
  0x13   : > { %794 = vmatprep.mubr.bf16.mxu1 %v1660_v12  ;;  %v1665_v22 = vld [vmem:[%s1804_s15 + $0x10] ss:$8 sps:$4 sm:$0xff]   ;;  %v1667_v24 = vld [vmem:[%s1804_s15 + $0x24] ss:$8 sps:$4 sm:$0xff]   ;;  %v1671_v26 = vld [vmem:[%s1804_s15 + $0x20] ss:$8 sps:$4 sm:$0xff]  }
  0x14   : > { %1493 = vmatpush3.bf16.msra.mxu0 %v1646_v7  ;;  %1609 = vmatpush3.bf16.msra.mxu1 %v1646_v7  ;;  %v1666_v23 = vld [vmem:[%s1804_s15 + $0x90] ss:$8 sps:$4 sm:$0xff]   ;;  %v1669_v25 = vld [vmem:[%s1804_s15 + $0xa4] ss:$8 sps:$4 sm:$0xff]   ;;  %v1672_v27 = vld [vmem:[%s1804_s15 + $0xa0] ss:$8 sps:$4 sm:$0xff]  }
  0x15   : > { %1494 = vmatprep.subr.bf16.mxu0 %v1647_v8  ;;  %1602 = vmatprep.subr.bf16.mxu1 %v1647_v8  ;;  %v1673_v28 = vld [vmem:[%s1804_s15 + $0x34] ss:$8 sps:$4 sm:$0xff]   ;;  %v1677_v30 = vld [vmem:[%s1804_s15 + $0x30] ss:$8 sps:$4 sm:$0xff]   ;;  %v1679_v32 = vld [vmem:[%s1804_s15 + $0x44] ss:$8 sps:$4 sm:$0xff]  }
  0x16   : > { %v1675_v29 = vld [vmem:[%s1804_s15 + $0xb4] ss:$8 sps:$4 sm:$0xff]   ;;  %v1678_v31 = vld [vmem:[%s1804_s15 + $0xb0] ss:$8 sps:$4 sm:$0xff]   ;;  %v1681_v33 = vld [vmem:[%s1804_s15 + $0xc4] ss:$8 sps:$4 sm:$0xff]  }
  0x17   : > { %v1683_v34 = vld [vmem:[%s1804_s15 + $0x40] ss:$8 sps:$4 sm:$0xff]   ;;  %v1685_v36 = vld [vmem:[%s1804_s15 + $0x54] ss:$8 sps:$4 sm:$0xff]   ;;  %v1689_v38 = vld [vmem:[%s1804_s15 + $0x50] ss:$8 sps:$4 sm:$0xff]  }
  0x18   : > { %1495 = vmatpush3.bf16.msra.mxu0 %v1648_v9  ;;  %1610 = vmatpush3.bf16.msra.mxu1 %v1648_v9  ;;  %v1684_v35 = vld [vmem:[%s1804_s15 + $0xc0] ss:$8 sps:$4 sm:$0xff]   ;;  %v1687_v37 = vld [vmem:[%s1804_s15 + $0xd4] ss:$8 sps:$4 sm:$0xff]   ;;  %v1690_v39 = vld [vmem:[%s1804_s15 + $0xd0] ss:$8 sps:$4 sm:$0xff]  }
  0x19   : > { %1496 = vmatprep.subr.bf16.mxu0 %v1649_v10  ;;  %1603 = vmatprep.subr.bf16.mxu1 %v1649_v10  ;;  %v1691_v40 = vld [vmem:[%s1804_s15 + $0x64] ss:$8 sps:$4 sm:$0xff]   ;;  %v1695_v42 = vld [vmem:[%s1804_s15 + $0x60] ss:$8 sps:$4 sm:$0xff]   ;;  %v1697_v44 = vld [vmem:[%s1804_s15 + $0x74] ss:$8 sps:$4 sm:$0xff]  }
  0x1a   : > { %v1693_v41 = vld [vmem:[%s1804_s15 + $0xe4] ss:$8 sps:$4 sm:$0xff]   ;;  %v1696_v43 = vld [vmem:[%s1804_s15 + $0xe0] ss:$8 sps:$4 sm:$0xff]   ;;  %v1699_v45 = vld [vmem:[%s1804_s15 + $0xf4] ss:$8 sps:$4 sm:$0xff]  }
  0x1b   : > { %v1701_v46 = vld [vmem:[%s1804_s15 + $0x70] ss:$8 sps:$4 sm:$0xff]   ;;  %331 = vst.msk [vmem:[#allocation2 + $0x88] sm:$0xff] %vm313_vm0, %v1727_v48  ;;  %332 = vst.msk [vmem:[#allocation2 + $0x90] sm:$0xff] %vm313_vm0, %v1727_v48  ;;  %v362_v53 = vld [vmem:[#allocation2 + $0x80] sm:$0xff] }
  0x1c   : > { %1497 = vmatpush3.bf16.msra.mxu0 %v1650_v13  ;;  %1611 = vmatpush3.bf16.msra.mxu1 %v1650_v13  ;;  %v1702_v47 = vld [vmem:[%s1804_s15 + $0xf0] ss:$8 sps:$4 sm:$0xff]   ;;  %333 = vst.msk [vmem:[#allocation2 + $0x98] sm:$0xff] %vm313_vm0, %v1727_v48  ;;  %334 = vst.msk [vmem:[#allocation2 + $0xa0] sm:$0xff] %vm313_vm0, %v1727_v48 }
  0x1d   : > { %1498 = vmatprep.subr.bf16.mxu0 %v1651_v14  ;;  %1604 = vmatprep.subr.bf16.mxu1 %v1651_v14  ;;  %335 = vst.msk [vmem:[#allocation2 + $0xa8] sm:$0xff] %vm313_vm0, %v1727_v48  ;;  %336 = vst.msk [vmem:[#allocation2 + $0xb0] sm:$0xff] %vm313_vm0, %v1727_v48  ;;  %v348_v7 = vld [vmem:[#allocation2 + $0x10] sm:$0xff] }
  0x1e   : > { %337 = vst.msk [vmem:[#allocation2 + $0xb8] sm:$0xff] %vm313_vm0, %v1727_v48  ;;  %338 = vst.msk [vmem:[#allocation2 + $0xc0] sm:$0xff] %vm313_vm0, %v1727_v48 }
  0x1f   : > { %339 = vst.msk [vmem:[#allocation2 + $0xc8] sm:$0xff] %vm313_vm0, %v1727_v48  ;;  %340 = vst.msk [vmem:[#allocation2 + $0xd0] sm:$0xff] %vm313_vm0, %v1727_v48 }
  0x20   : > { %1499 = vmatpush3.bf16.msra.mxu0 %v1652_v15  ;;  %1612 = vmatpush3.bf16.msra.mxu1 %v1652_v15  ;;  %341 = vst.msk [vmem:[#allocation2 + $0xd8] sm:$0xff] %vm313_vm0, %v1727_v48  ;;  %342 = vst.msk [vmem:[#allocation2 + $0xe0] sm:$0xff] %vm313_vm0, %v1727_v48  ;;  %v1898_v15 = vld [vmem:[%s2078_s2] ss:$0 sm:$0xff] }
  0x21   : > { %1500 = vmatprep.subr.bf16.mxu0 %v1653_v16  ;;  %1605 = vmatprep.subr.bf16.mxu1 %v1653_v16  ;;  %343 = vst.msk [vmem:[#allocation2 + $0xe8] sm:$0xff] %vm313_vm0, %v1727_v48  ;;  %344 = vst.msk [vmem:[#allocation2 + $0xf0] sm:$0xff] %vm313_vm0, %v1727_v48  ;;  %v349_v16 = vld [vmem:[#allocation2 + $0x18] sm:$0xff] }
  0x22   : > { %345 = vst.msk [vmem:[#allocation2 + $0xf8] sm:$0xff] %vm313_vm0, %v1727_v48  ;;  %v363_v61 = vld [vmem:[#allocation2 + $0x88] sm:$0xff]  ;;  %v364_v9 = vld [vmem:[#allocation2 + $0x90] sm:$0xff] }
  0x24   : > { %1501 = vmatpush3.bf16.msra.mxu0 %v1654_v17  ;;  %1613 = vmatpush3.bf16.msra.mxu1 %v1654_v17 }
  0x27   : > { %731 = vmatmul.mubr.bf16.vlgmr.msra.gmra.mrb[0].mxu0 %v1655_v18  ;;  %795 = vmatmul.mubr.bf16.vlgmr.msra.gmra.mrb[0].mxu1 %v1658_v19  ;;  %v365_v18 = vld [vmem:[#allocation2 + $0x98] sm:$0xff] }
  0x28   : > { %738 = vmatprep.mubr.bf16.mxu0 %v1661_v20  ;;  %802 = vmatprep.mubr.bf16.mxu1 %v1663_v21 }
  0x2f   : > { %739 = vmatmul.mubr.bf16.gmra.mrb[4].mxu0 %v1665_v22  ;;  %803 = vmatmul.mubr.bf16.gmra.mrb[4].mxu1 %v1666_v23 }
  0x30   : > { %746 = vmatprep.mubr.bf16.mxu0 %v1667_v24  ;;  %810 = vmatprep.mubr.bf16.mxu1 %v1669_v25  ;;  %v1903_v25 = vld [vmem:[%s2079_s3] ss:$0 sm:$0xff] }
  0x37   : > { %747 = vmatmul.mubr.bf16.gmra.mrb[8].mxu0 %v1671_v26  ;;  %811 = vmatmul.mubr.bf16.gmra.mrb[8].mxu1 %v1672_v27 }
  0x38   : > { %754 = vmatprep.mubr.bf16.mxu0 %v1673_v28  ;;  %818 = vmatprep.mubr.bf16.mxu1 %v1675_v29 }
  0x3f   : > { %755 = vmatmul.mubr.bf16.gmra.mrb[12].mxu0 %v1677_v30  ;;  %819 = vmatmul.mubr.bf16.gmra.mrb[12].mxu1 %v1678_v31 }
  0x40   : > { %762 = vmatprep.mubr.bf16.mxu0 %v1679_v32  ;;  %826 = vmatprep.mubr.bf16.mxu1 %v1681_v33 }
  0x47   : > { %763 = vmatmul.mubr.bf16.gmra.mrb[16].mxu0 %v1683_v34  ;;  %827 = vmatmul.mubr.bf16.gmra.mrb[16].mxu1 %v1684_v35 }
  0x48   : > { %770 = vmatprep.mubr.bf16.mxu0 %v1685_v36  ;;  %834 = vmatprep.mubr.bf16.mxu1 %v1687_v37 }
  0x4f   : > { %771 = vmatmul.mubr.bf16.gmra.mrb[20].mxu0 %v1689_v38  ;;  %835 = vmatmul.mubr.bf16.gmra.mrb[20].mxu1 %v1690_v39 }
  0x50   : > { %778 = vmatprep.mubr.bf16.mxu0 %v1691_v40  ;;  %842 = vmatprep.mubr.bf16.mxu1 %v1693_v41 }
  0x57   : > { %779 = vmatmul.mubr.bf16.gmra.mrb[24].mxu0 %v1695_v42  ;;  %843 = vmatmul.mubr.bf16.gmra.mrb[24].mxu1 %v1696_v43 }
  0x58   : > { %786 = vmatprep.mubr.bf16.mxu0 %v1697_v44  ;;  %850 = vmatprep.mubr.bf16.mxu1 %v1699_v45  ;;  %v350_v45 = vld [vmem:[#allocation2 + $0x20] sm:$0xff] }
  0x5f   : > { %787 = vmatmul.mubr.bf16.gmra.mrb[28].mxu0 %v1701_v46  ;;  %851 = vmatmul.mubr.bf16.gmra.mrb[28].mxu1 %v1702_v47  ;;  %v366_v46 = vld [vmem:[#allocation2 + $0xa0] sm:$0xff] }
  0xfa   : > { %v1502_v49 = vpop.f32.mrb[0].mxu0  ;;  %v1550_v50 = vpop.f32.mrb[0].mxu1 }
  0xfb   : > { %v1503_v52 = vpop.f32.mrb[1].mxu0  ;;  %v1551_v54 = vpop.f32.mrb[1].mxu1 }
  0xfc   : > { %v1504_v55 = vadd.f32 %v1503_v52, %v1502_v49  ;;  %v1552_v56 = vadd.f32 %v1551_v54, %v1550_v50  ;;  %v1505_v57 = vpop.f32.mrb[2].mxu0  ;;  %v1553_v58 = vpop.f32.mrb[2].mxu1 }
  0xfd   : > { %v1506_v60 = vpop.f32.mrb[3].mxu0  ;;  %v1554_v62 = vpop.f32.mrb[3].mxu1 }
  0xfe   : > { %v859_v63 = vadd.f32 %v1504_v55, %v346_v51  ;;  %v875_v0 = vadd.f32 %v1552_v56, %v362_v53  ;;  %v1507_v1 = vadd.f32 %v1506_v60, %v1505_v57  ;;  %v1555_v2 = vadd.f32 %v1554_v62, %v1553_v58  ;;  %v351_v57 = vld [vmem:[#allocation2 + $0x28] sm:$0xff] }
  0xff   : > { %v367_v58 = vld [vmem:[#allocation2 + $0xa8] sm:$0xff] }
 0x100   : > { %892 = vst.msk [vmem:[#allocation2] sm:$0xff] %vm313_vm0, %v859_v63  ;;  %908 = vst.msk [vmem:[#allocation2 + $0x80] sm:$0xff] %vm313_vm0, %v875_v0  ;;  %v860_v3 = vadd.f32 %v1507_v1, %v347_v59  ;;  %v876_v4 = vadd.f32 %v1555_v2, %v363_v61 }
 0x102   : > { %893 = vst.msk [vmem:[#allocation2 + $0x8] sm:$0xff] %vm313_vm0, %v860_v3  ;;  %909 = vst.msk [vmem:[#allocation2 + $0x88] sm:$0xff] %vm313_vm0, %v876_v4  ;;  %v1508_v5 = vpop.f32.mrb[4].mxu0  ;;  %v1556_v6 = vpop.f32.mrb[4].mxu1 }
 0x103   : > { %v1509_v8 = vpop.f32.mrb[5].mxu0  ;;  %v1557_v10 = vpop.f32.mrb[5].mxu1 }
 0x104   : > { %v1510_v11 = vadd.f32 %v1509_v8, %v1508_v5  ;;  %v1558_v12 = vadd.f32 %v1557_v10, %v1556_v6  ;;  %v1511_v13 = vpop.f32.mrb[6].mxu0  ;;  %v1559_v14 = vpop.f32.mrb[6].mxu1 }
 0x105   : > { %v1512_v17 = vpop.f32.mrb[7].mxu0  ;;  %v1560_v19 = vpop.f32.mrb[7].mxu1 }
 0x106   : > { %v861_v20 = vadd.f32 %v1510_v11, %v348_v7  ;;  %v877_v21 = vadd.f32 %v1558_v12, %v364_v9  ;;  %v1513_v22 = vadd.f32 %v1512_v17, %v1511_v13  ;;  %v1561_v23 = vadd.f32 %v1560_v19, %v1559_v14 }
 0x107   : > { %v927_v24 = vld [vmem:[#allocation2] sm:$0xff] }
 0x108   : > { %v943_v26 = vld [vmem:[#allocation2 + $0x80] sm:$0xff]  ;;  %v966_v27 = vmul.f32 %v1898_v15, %v927_v24  ;;  %894 = vst.msk [vmem:[#allocation2 + $0x10] sm:$0xff] %vm313_vm0, %v861_v20  ;;  %910 = vst.msk [vmem:[#allocation2 + $0x90] sm:$0xff] %vm313_vm0, %v877_v21  ;;  %v862_v29 = vadd.f32 %v1513_v22, %v349_v16  ;;  %v878_v30 = vadd.f32 %v1561_v23, %v365_v18  ;;  %v352_v22 = vld [vmem:[#allocation2 + $0x30] sm:$0xff] }
 0x109   : > { %v982_v28 = vmul.f32 %v1898_v15, %v943_v26  ;;  %v928_v31 = vld [vmem:[#allocation2 + $0x8] sm:$0xff]  ;;  %v368_v23 = vld [vmem:[#allocation2 + $0xb0] sm:$0xff] }
 0x10a   : > { %v944_v32 = vld [vmem:[#allocation2 + $0x88] sm:$0xff]  ;;  %v1005_v33 = vadd.f32 %v1903_v25, %v966_v27  ;;  %v967_v35 = vmul.f32 %v1898_v15, %v928_v31  ;;  %895 = vst.msk [vmem:[#allocation2 + $0x18] sm:$0xff] %vm313_vm0, %v862_v29  ;;  %911 = vst.msk [vmem:[#allocation2 + $0x98] sm:$0xff] %vm313_vm0, %v878_v30  ;;  %v1514_v37 = vpop.f32.mrb[8].mxu0  ;;  %v1562_v38 = vpop.f32.mrb[8].mxu1 }
 0x10b   : > { %v1021_v34 = vadd.f32 %v1903_v25, %v982_v28  ;;  %v983_v36 = vmul.f32 %v1898_v15, %v944_v32  ;;  %v1515_v39 = vpop.f32.mrb[9].mxu0  ;;  %v1563_v40 = vpop.f32.mrb[9].mxu1 }
 0x10c   : > { %v1037_v41 = vmax.f32 %v1005_v33, 0.0  ;;  %v1006_v43 = vadd.f32 %v1903_v25, %v967_v35  ;;  %v1517_v47 = vpop.f32.mrb[10].mxu0  ;;  %v1565_v48 = vpop.f32.mrb[10].mxu1  ;;  %v1516_v49 = vadd.f32 %v1515_v39, %v1514_v37  ;;  %v1564_v50 = vadd.f32 %v1563_v40, %v1562_v38  ;;  %v353_v35 = vld [vmem:[#allocation2 + $0x38] sm:$0xff] }
 0x10d   : > { %v1053_v42 = vmax.f32 %v1021_v34, 0.0  ;;  %v1022_v44 = vadd.f32 %v1903_v25, %v983_v36  ;;  %v1518_v51 = vpop.f32.mrb[11].mxu0  ;;  %v1566_v52 = vpop.f32.mrb[11].mxu1  ;;  %v369_v36 = vld [vmem:[#allocation2 + $0xb8] sm:$0xff] }
 0x10e   : > { %v1454_v53 = vpack.c.bf16 %v1037_v41, %v1037_v41  ;;  %v1038_v55 = vmax.f32 %v1006_v43, 0.0  ;;  %v863_v61 = vadd.f32 %v1516_v49, %v350_v45  ;;  %v879_v62 = vadd.f32 %v1564_v50, %v366_v46 }
 0x10f   : > { %v1470_v54 = vpack.c.bf16 %v1053_v42, %v1053_v42  ;;  %v1054_v56 = vmax.f32 %v1022_v44, 0.0  ;;  %v929_v59 = vld [vmem:[#allocation2 + $0x10] sm:$0xff]  ;;  %v1519_v63 = vadd.f32 %v1518_v51, %v1517_v47  ;;  %v1567_v0 = vadd.f32 %v1566_v52, %v1565_v48 }
 0x110   : > { %v945_v60 = vld [vmem:[#allocation2 + $0x90] sm:$0xff]  ;;  %1198 = vst.msk [vmem:[%s1921_s14] sm:$0xf] %vm1197_vm1, %v1454_v53  ;;  %v1455_v1 = vpack.c.bf16 %v1038_v55, %v1038_v55  ;;  %v968_v3 = vmul.f32 %v1898_v15, %v929_v59  ;;  %v370_v59 = vld [vmem:[#allocation2 + $0xc0] sm:$0xff] }
 0x111   : > { %1214 = vst.msk [vmem:[%s1921_s14 + $0x40] sm:$0xf] %vm1197_vm1, %v1470_v54  ;;  %v1471_v2 = vpack.c.bf16 %v1054_v56, %v1054_v56  ;;  %v984_v4 = vmul.f32 %v1898_v15, %v945_v60  ;;  %v930_v5 = vld [vmem:[#allocation2 + $0x18] sm:$0xff]  ;;  %v864_v7 = vadd.f32 %v1519_v63, %v351_v57  ;;  %v880_v8 = vadd.f32 %v1567_v0, %v367_v58  ;;  %v354_v57 = vld [vmem:[#allocation2 + $0x40] sm:$0xff] }
 0x112   : > { %v946_v6 = vld [vmem:[#allocation2 + $0x98] sm:$0xff]  ;;  %896 = vst.msk [vmem:[#allocation2 + $0x20] sm:$0xff] %vm313_vm0, %v863_v61  ;;  %912 = vst.msk [vmem:[#allocation2 + $0xa0] sm:$0xff] %vm313_vm0, %v879_v62  ;;  %v1007_v9 = vadd.f32 %v1903_v25, %v968_v3  ;;  %v969_v11 = vmul.f32 %v1898_v15, %v930_v5  ;;  %v1520_v13 = vpop.f32.mrb[12].mxu0  ;;  %v1568_v14 = vpop.f32.mrb[12].mxu1  ;;  %v355_v5 = vld [vmem:[#allocation2 + $0x48] sm:$0xff] }
 0x113   : > { %1199 = vst.msk [vmem:[%s1921_s14 + $0x4] sm:$0xf] %vm1197_vm1, %v1455_v1  ;;  %1215 = vst.msk [vmem:[%s1921_s14 + $0x44] sm:$0xf] %vm1197_vm1, %v1471_v2  ;;  %v1023_v10 = vadd.f32 %v1903_v25, %v984_v4  ;;  %v985_v12 = vmul.f32 %v1898_v15, %v946_v6  ;;  %v1521_v16 = vpop.f32.mrb[13].mxu0  ;;  %v1569_v17 = vpop.f32.mrb[13].mxu1 }
 0x114   : > { %897 = vst.msk [vmem:[#allocation2 + $0x28] sm:$0xff] %vm313_vm0, %v864_v7  ;;  %913 = vst.msk [vmem:[#allocation2 + $0xa8] sm:$0xff] %vm313_vm0, %v880_v8  ;;  %v1039_v18 = vmax.f32 %v1007_v9, 0.0  ;;  %v1008_v20 = vadd.f32 %v1903_v25, %v969_v11  ;;  %v1523_v24 = vpop.f32.mrb[14].mxu0  ;;  %v1571_v26 = vpop.f32.mrb[14].mxu1  ;;  %v1522_v27 = vadd.f32 %v1521_v16, %v1520_v13  ;;  %v1570_v28 = vadd.f32 %v1569_v17, %v1568_v14  ;;  %v371_v7 = vld [vmem:[#allocation2 + $0xc8] sm:$0xff] }
 0x115   : > { %v1055_v19 = vmax.f32 %v1023_v10, 0.0  ;;  %v1024_v21 = vadd.f32 %v1903_v25, %v985_v12  ;;  %v1524_v29 = vpop.f32.mrb[15].mxu0  ;;  %v1572_v30 = vpop.f32.mrb[15].mxu1 }
 0x116   : > { %v1456_v31 = vpack.c.bf16 %v1039_v18, %v1039_v18  ;;  %v1040_v33 = vmax.f32 %v1008_v20, 0.0  ;;  %v865_v37 = vadd.f32 %v1522_v27, %v352_v22  ;;  %v881_v38 = vadd.f32 %v1570_v28, %v368_v23 }
 0x117   : > { %v1472_v32 = vpack.c.bf16 %v1055_v19, %v1055_v19  ;;  %v1056_v34 = vmax.f32 %v1024_v21, 0.0  ;;  %v1525_v39 = vadd.f32 %v1524_v29, %v1523_v24  ;;  %v1573_v40 = vadd.f32 %v1572_v30, %v1571_v26 }
 0x118   : > { %1200 = vst.msk [vmem:[%s1921_s14 + $0x8] sm:$0xf] %vm1197_vm1, %v1456_v31  ;;  %v1457_v41 = vpack.c.bf16 %v1040_v33, %v1040_v33 }
 0x119   : > { %1216 = vst.msk [vmem:[%s1921_s14 + $0x48] sm:$0xf] %vm1197_vm1, %v1472_v32  ;;  %v1473_v42 = vpack.c.bf16 %v1056_v34, %v1056_v34  ;;  %v931_v43 = vld [vmem:[#allocation2 + $0x20] sm:$0xff]  ;;  %v866_v47 = vadd.f32 %v1525_v39, %v353_v35  ;;  %v882_v48 = vadd.f32 %v1573_v40, %v369_v36  ;;  %v356_v35 = vld [vmem:[#allocation2 + $0x50] sm:$0xff] }
 0x11a   : > { %v947_v44 = vld [vmem:[#allocation2 + $0xa0] sm:$0xff]  ;;  %v970_v45 = vmul.f32 %v1898_v15, %v931_v43  ;;  %898 = vst.msk [vmem:[#allocation2 + $0x30] sm:$0xff] %vm313_vm0, %v865_v37  ;;  %914 = vst.msk [vmem:[#allocation2 + $0xb0] sm:$0xff] %vm313_vm0, %v881_v38  ;;  %v1526_v51 = vpop.f32.mrb[16].mxu0  ;;  %v1574_v52 = vpop.f32.mrb[16].mxu1  ;;  %v372_v37 = vld [vmem:[#allocation2 + $0xd0] sm:$0xff] }
 0x11b   : > { %v986_v46 = vmul.f32 %v1898_v15, %v947_v44  ;;  %1201 = vst.msk [vmem:[%s1921_s14 + $0xc] sm:$0xf] %vm1197_vm1, %v1457_v41  ;;  %1217 = vst.msk [vmem:[%s1921_s14 + $0x4c] sm:$0xf] %vm1197_vm1, %v1473_v42  ;;  %v932_v49 = vld [vmem:[#allocation2 + $0x28] sm:$0xff]  ;;  %v1527_v58 = vpop.f32.mrb[17].mxu0 }
 0x11c   : > { %v948_v50 = vld [vmem:[#allocation2 + $0xa8] sm:$0xff]  ;;  %v1009_v53 = vadd.f32 %v1903_v25, %v970_v45  ;;  %v971_v55 = vmul.f32 %v1898_v15, %v932_v49  ;;  %899 = vst.msk [vmem:[#allocation2 + $0x38] sm:$0xff] %vm313_vm0, %v866_v47  ;;  %915 = vst.msk [vmem:[#allocation2 + $0xb8] sm:$0xff] %vm313_vm0, %v882_v48  ;;  %v1575_v60 = vpop.f32.mrb[17].mxu1  ;;  %v1528_v61 = vadd.f32 %v1527_v58, %v1526_v51  ;;  %v1529_v63 = vpop.f32.mrb[18].mxu0  ;;  %v357_v47 = vld [vmem:[#allocation2 + $0x58] sm:$0xff] }
 0x11d   : > { %v1025_v54 = vadd.f32 %v1903_v25, %v986_v46  ;;  %v987_v56 = vmul.f32 %v1898_v15, %v948_v50  ;;  %v1576_v62 = vadd.f32 %v1575_v60, %v1574_v52  ;;  %v1577_v0 = vpop.f32.mrb[18].mxu1  ;;  %v1530_v6 = vpop.f32.mrb[19].mxu0  ;;  %v373_v49 = vld [vmem:[#allocation2 + $0xd8] sm:$0xff] }
 0x11e   : > { %v1041_v1 = vmax.f32 %v1009_v53, 0.0  ;;  %v1010_v3 = vadd.f32 %v1903_v25, %v971_v55  ;;  %v1578_v8 = vpop.f32.mrb[19].mxu1  ;;  %v867_v9 = vadd.f32 %v1528_v61, %v354_v57  ;;  %v1531_v11 = vadd.f32 %v1530_v6, %v1529_v63 }
 0x11f   : > { %v1057_v2 = vmax.f32 %v1025_v54, 0.0  ;;  %v1026_v4 = vadd.f32 %v1903_v25, %v987_v56  ;;  %v883_v10 = vadd.f32 %v1576_v62, %v370_v59  ;;  %v1579_v12 = vadd.f32 %v1578_v8, %v1577_v0 }
 0x120   : > { %v1458_v13 = vpack.c.bf16 %v1041_v1, %v1041_v1  ;;  %v1042_v16 = vmax.f32 %v1010_v3, 0.0  ;;  %900 = vst.msk [vmem:[#allocation2 + $0x40] sm:$0xff] %vm313_vm0, %v867_v9  ;;  %v868_v20 = vadd.f32 %v1531_v11, %v355_v5 }
 0x121   : > { %v1474_v14 = vpack.c.bf16 %v1057_v2, %v1057_v2  ;;  %v1058_v17 = vmax.f32 %v1026_v4, 0.0  ;;  %v933_v18 = vld [vmem:[#allocation2 + $0x30] sm:$0xff]  ;;  %916 = vst.msk [vmem:[#allocation2 + $0xc0] sm:$0xff] %vm313_vm0, %v883_v10  ;;  %v884_v21 = vadd.f32 %v1579_v12, %v371_v7 }
 0x122   : > { %v949_v19 = vld [vmem:[#allocation2 + $0xb0] sm:$0xff]  ;;  %1202 = vst.msk [vmem:[%s1921_s14 + $0x10] sm:$0xf] %vm1197_vm1, %v1458_v13  ;;  %v1459_v22 = vpack.c.bf16 %v1042_v16, %v1042_v16  ;;  %v972_v24 = vmul.f32 %v1898_v15, %v933_v18  ;;  %v1532_v29 = vpop.f32.mrb[20].mxu0  ;;  %v1580_v30 = vpop.f32.mrb[20].mxu1  ;;  %v358_v18 = vld [vmem:[#allocation2 + $0x60] sm:$0xff] }
 0x123   : > { %1218 = vst.msk [vmem:[%s1921_s14 + $0x50] sm:$0xf] %vm1197_vm1, %v1474_v14  ;;  %v1475_v23 = vpack.c.bf16 %v1058_v17, %v1058_v17  ;;  %v988_v26 = vmul.f32 %v1898_v15, %v949_v19  ;;  %v934_v27 = vld [vmem:[#allocation2 + $0x38] sm:$0xff]  ;;  %v1533_v36 = vpop.f32.mrb[21].mxu0  ;;  %v1581_v38 = vpop.f32.mrb[21].mxu1  ;;  %v374_v19 = vld [vmem:[#allocation2 + $0xe0] sm:$0xff] }
 0x124   : > { %v950_v28 = vld [vmem:[#allocation2 + $0xb8] sm:$0xff]  ;;  %901 = vst.msk [vmem:[#allocation2 + $0x48] sm:$0xff] %vm313_vm0, %v868_v20  ;;  %917 = vst.msk [vmem:[#allocation2 + $0xc8] sm:$0xff] %vm313_vm0, %v884_v21  ;;  %v1011_v31 = vadd.f32 %v1903_v25, %v972_v24  ;;  %v973_v33 = vmul.f32 %v1898_v15, %v934_v27  ;;  %v1534_v39 = vadd.f32 %v1533_v36, %v1532_v29  ;;  %v1535_v41 = vpop.f32.mrb[22].mxu0  ;;  %v1583_v42 = vpop.f32.mrb[22].mxu1 }
 0x125   : > { %1203 = vst.msk [vmem:[%s1921_s14 + $0x14] sm:$0xf] %vm1197_vm1, %v1459_v22  ;;  %1219 = vst.msk [vmem:[%s1921_s14 + $0x54] sm:$0xf] %vm1197_vm1, %v1475_v23  ;;  %v1027_v32 = vadd.f32 %v1903_v25, %v988_v26  ;;  %v989_v34 = vmul.f32 %v1898_v15, %v950_v28  ;;  %v1582_v40 = vadd.f32 %v1581_v38, %v1580_v30  ;;  %v1536_v48 = vpop.f32.mrb[23].mxu0  ;;  %v1584_v50 = vpop.f32.mrb[23].mxu1 }
 0x126   : > { %v1043_v43 = vmax.f32 %v1011_v31, 0.0  ;;  %v1012_v45 = vadd.f32 %v1903_v25, %v973_v33  ;;  %v869_v51 = vadd.f32 %v1534_v39, %v356_v35  ;;  %v1537_v53 = vadd.f32 %v1536_v48, %v1535_v41  ;;  %v359_v31 = vld [vmem:[#allocation2 + $0x68] sm:$0xff] }
 0x127   : > { %v1059_v44 = vmax.f32 %v1027_v32, 0.0  ;;  %v1028_v46 = vadd.f32 %v1903_v25, %v989_v34  ;;  %v885_v52 = vadd.f32 %v1582_v40, %v372_v37  ;;  %v1585_v54 = vadd.f32 %v1584_v50, %v1583_v42  ;;  %v935_v59 = vld [vmem:[#allocation2 + $0x40] sm:$0xff]  ;;  %v375_v32 = vld [vmem:[#allocation2 + $0xe8] sm:$0xff] }
 0x128   : > { %v1460_v55 = vpack.c.bf16 %v1043_v43, %v1043_v43  ;;  %v1044_v57 = vmax.f32 %v1012_v45, 0.0  ;;  %v951_v60 = vld [vmem:[#allocation2 + $0xc0] sm:$0xff]  ;;  %v974_v61 = vmul.f32 %v1898_v15, %v935_v59  ;;  %902 = vst.msk [vmem:[#allocation2 + $0x50] sm:$0xff] %vm313_vm0, %v869_v51  ;;  %v870_v63 = vadd.f32 %v1537_v53, %v357_v47  ;;  %v360_v59 = vld [vmem:[#allocation2 + $0x70] sm:$0xff] }
 0x129   : > { %v1476_v56 = vpack.c.bf16 %v1059_v44, %v1059_v44  ;;  %v1060_v58 = vmax.f32 %v1028_v46, 0.0  ;;  %v990_v62 = vmul.f32 %v1898_v15, %v951_v60  ;;  %918 = vst.msk [vmem:[#allocation2 + $0xd0] sm:$0xff] %vm313_vm0, %v885_v52  ;;  %v886_v0 = vadd.f32 %v1585_v54, %v373_v49  ;;  %v376_v60 = vld [vmem:[#allocation2 + $0xf0] sm:$0xff] }
 0x12a   : > { %1204 = vst.msk [vmem:[%s1921_s14 + $0x18] sm:$0xf] %vm1197_vm1, %v1460_v55  ;;  %v1461_v1 = vpack.c.bf16 %v1044_v57, %v1044_v57  ;;  %v1013_v5 = vadd.f32 %v1903_v25, %v974_v61  ;;  %v1538_v9 = vpop.f32.mrb[24].mxu0  ;;  %v1586_v10 = vpop.f32.mrb[24].mxu1 }
 0x12b   : > { %1220 = vst.msk [vmem:[%s1921_s14 + $0x58] sm:$0xf] %vm1197_vm1, %v1476_v56  ;;  %v1477_v2 = vpack.c.bf16 %v1060_v58, %v1060_v58  ;;  %v936_v3 = vld [vmem:[#allocation2 + $0x48] sm:$0xff]  ;;  %v1029_v6 = vadd.f32 %v1903_v25, %v990_v62  ;;  %v1539_v11 = vpop.f32.mrb[25].mxu0  ;;  %v1587_v12 = vpop.f32.mrb[25].mxu1 }
 0x12c   : > { %v952_v4 = vld [vmem:[#allocation2 + $0xc8] sm:$0xff]  ;;  %v975_v7 = vmul.f32 %v1898_v15, %v936_v3  ;;  %903 = vst.msk [vmem:[#allocation2 + $0x58] sm:$0xff] %vm313_vm0, %v870_v63  ;;  %919 = vst.msk [vmem:[#allocation2 + $0xd8] sm:$0xff] %vm313_vm0, %v886_v0  ;;  %v1045_v13 = vmax.f32 %v1013_v5, 0.0  ;;  %v1541_v20 = vpop.f32.mrb[26].mxu0  ;;  %v1589_v21 = vpop.f32.mrb[26].mxu1  ;;  %v1540_v22 = vadd.f32 %v1539_v11, %v1538_v9  ;;  %v1588_v23 = vadd.f32 %v1587_v12, %v1586_v10 }
 0x12d   : > { %v991_v8 = vmul.f32 %v1898_v15, %v952_v4  ;;  %1205 = vst.msk [vmem:[%s1921_s14 + $0x1c] sm:$0xf] %vm1197_vm1, %v1461_v1  ;;  %1221 = vst.msk [vmem:[%s1921_s14 + $0x5c] sm:$0xf] %vm1197_vm1, %v1477_v2  ;;  %v1061_v14 = vmax.f32 %v1029_v6, 0.0  ;;  %v1542_v24 = vpop.f32.mrb[27].mxu0 }
 0x12e   : > { %v1014_v16 = vadd.f32 %v1903_v25, %v975_v7  ;;  %v1590_v26 = vpop.f32.mrb[27].mxu1  ;;  %v1462_v27 = vpack.c.bf16 %v1045_v13, %v1045_v13  ;;  %v871_v35 = vadd.f32 %v1540_v22, %v358_v18  ;;  %v887_v36 = vadd.f32 %v1588_v23, %v374_v19  ;;  %v361_v7 = vld [vmem:[#allocation2 + $0x78] sm:$0xff] }
 0x12f   : > { %v1030_v17 = vadd.f32 %v1903_v25, %v991_v8  ;;  %v1478_v28 = vpack.c.bf16 %v1061_v14, %v1061_v14  ;;  %v937_v33 = vld [vmem:[#allocation2 + $0x50] sm:$0xff]  ;;  %v1543_v37 = vadd.f32 %v1542_v24, %v1541_v20  ;;  %v1591_v38 = vadd.f32 %v1590_v26, %v1589_v21  ;;  %v377_v8 = vld [vmem:[#allocation2 + $0xf8] sm:$0xff] }
 0x130   : > { %v1046_v29 = vmax.f32 %v1014_v16, 0.0  ;;  %v953_v34 = vld [vmem:[#allocation2 + $0xd0] sm:$0xff]  ;;  %1206 = vst.msk [vmem:[%s1921_s14 + $0x20] sm:$0xf] %vm1197_vm1, %v1462_v27  ;;  %v976_v41 = vmul.f32 %v1898_v15, %v937_v33 }
 0x131   : > { %v1062_v30 = vmax.f32 %v1030_v17, 0.0  ;;  %1222 = vst.msk [vmem:[%s1921_s14 + $0x60] sm:$0xf] %vm1197_vm1, %v1478_v28  ;;  %v992_v42 = vmul.f32 %v1898_v15, %v953_v34  ;;  %v872_v45 = vadd.f32 %v1543_v37, %v359_v31  ;;  %v888_v46 = vadd.f32 %v1591_v38, %v375_v32 }
 0x132   : > { %v1463_v39 = vpack.c.bf16 %v1046_v29, %v1046_v29  ;;  %904 = vst.msk [vmem:[#allocation2 + $0x60] sm:$0xff] %vm313_vm0, %v871_v35  ;;  %920 = vst.msk [vmem:[#allocation2 + $0xe0] sm:$0xff] %vm313_vm0, %v887_v36  ;;  %v1015_v47 = vadd.f32 %v1903_v25, %v976_v41  ;;  %v1544_v51 = vpop.f32.mrb[28].mxu0  ;;  %v1592_v52 = vpop.f32.mrb[28].mxu1 }
 0x133   : > { %v1479_v40 = vpack.c.bf16 %v1062_v30, %v1062_v30  ;;  %v938_v43 = vld [vmem:[#allocation2 + $0x58] sm:$0xff]  ;;  %v1031_v48 = vadd.f32 %v1903_v25, %v992_v42  ;;  %905 = vst.msk [vmem:[#allocation2 + $0x68] sm:$0xff] %vm313_vm0, %v872_v45  ;;  %921 = vst.msk [vmem:[#allocation2 + $0xe8] sm:$0xff] %vm313_vm0, %v888_v46  ;;  %v1545_v53 = vpop.f32.mrb[29].mxu0  ;;  %v1593_v54 = vpop.f32.mrb[29].mxu1 }
 0x134   : > { %v954_v44 = vld [vmem:[#allocation2 + $0xd8] sm:$0xff]  ;;  %1207 = vst.msk [vmem:[%s1921_s14 + $0x24] sm:$0xf] %vm1197_vm1, %v1463_v39  ;;  %v977_v49 = vmul.f32 %v1898_v15, %v938_v43  ;;  %v1047_v55 = vmax.f32 %v1015_v47, 0.0  ;;  %v1547_v61 = vpop.f32.mrb[30].mxu0  ;;  %v1595_v62 = vpop.f32.mrb[30].mxu1  ;;  %v1546_v63 = vadd.f32 %v1545_v53, %v1544_v51  ;;  %v1594_v0 = vadd.f32 %v1593_v54, %v1592_v52 }
 0x135   : > { %1223 = vst.msk [vmem:[%s1921_s14 + $0x64] sm:$0xf] %vm1197_vm1, %v1479_v40  ;;  %v993_v50 = vmul.f32 %v1898_v15, %v954_v44  ;;  %v1063_v56 = vmax.f32 %v1031_v48, 0.0  ;;  %v1548_v1 = vpop.f32.mrb[31].mxu0  ;;  %v1596_v2 = vpop.f32.mrb[31].mxu1 }
 0x136   : > { %v1016_v57 = vadd.f32 %v1903_v25, %v977_v49  ;;  %v1464_v3 = vpack.c.bf16 %v1047_v55, %v1047_v55  ;;  %v873_v9 = vadd.f32 %v1546_v63, %v360_v59  ;;  %v889_v10 = vadd.f32 %v1594_v0, %v376_v60 }
 0x137   : > { %v1032_v58 = vadd.f32 %v1903_v25, %v993_v50  ;;  %v1480_v4 = vpack.c.bf16 %v1063_v56, %v1063_v56  ;;  %v1549_v11 = vadd.f32 %v1548_v1, %v1547_v61  ;;  %v1597_v12 = vadd.f32 %v1596_v2, %v1595_v62 }
 0x138   : > { %v1048_v5 = vmax.f32 %v1016_v57, 0.0  ;;  %1208 = vst.msk [vmem:[%s1921_s14 + $0x28] sm:$0xf] %vm1197_vm1, %v1464_v3 }
 0x139   : > { %v1064_v6 = vmax.f32 %v1032_v58, 0.0  ;;  %1224 = vst.msk [vmem:[%s1921_s14 + $0x68] sm:$0xf] %vm1197_vm1, %v1480_v4  ;;  %v939_v16 = vld [vmem:[#allocation2 + $0x60] sm:$0xff]  ;;  %v874_v20 = vadd.f32 %v1549_v11, %v361_v7  ;;  %v890_v21 = vadd.f32 %v1597_v12, %v377_v8 }
 0x13a   : > { %v1465_v13 = vpack.c.bf16 %v1048_v5, %v1048_v5  ;;  %v955_v17 = vld [vmem:[#allocation2 + $0xe0] sm:$0xff]  ;;  %v978_v18 = vmul.f32 %v1898_v15, %v939_v16  ;;  %906 = vst.msk [vmem:[#allocation2 + $0x70] sm:$0xff] %vm313_vm0, %v873_v9  ;;  %922 = vst.msk [vmem:[#allocation2 + $0xf0] sm:$0xff] %vm313_vm0, %v889_v10  ;;  %v940_v22 = vld [vmem:[#allocation2 + $0x68] sm:$0xff] }
 0x13b   : > { %v1481_v14 = vpack.c.bf16 %v1064_v6, %v1064_v6  ;;  %v994_v19 = vmul.f32 %v1898_v15, %v955_v17  ;;  %v956_v23 = vld [vmem:[#allocation2 + $0xe8] sm:$0xff]  ;;  %v979_v27 = vmul.f32 %v1898_v15, %v940_v22  ;;  %907 = vst.msk [vmem:[#allocation2 + $0x78] sm:$0xff] %vm313_vm0, %v874_v20  ;;  %923 = vst.msk [vmem:[#allocation2 + $0xf8] sm:$0xff] %vm313_vm0, %v890_v21 }
 0x13c   : > { %1209 = vst.msk [vmem:[%s1921_s14 + $0x2c] sm:$0xf] %vm1197_vm1, %v1465_v13  ;;  %v1017_v24 = vadd.f32 %v1903_v25, %v978_v18  ;;  %v995_v28 = vmul.f32 %v1898_v15, %v956_v23 }
 0x13d   : > { %1225 = vst.msk [vmem:[%s1921_s14 + $0x6c] sm:$0xf] %vm1197_vm1, %v1481_v14  ;;  %v1033_v26 = vadd.f32 %v1903_v25, %v994_v19  ;;  %v1018_v31 = vadd.f32 %v1903_v25, %v979_v27 }
 0x13e   : > { %v1049_v29 = vmax.f32 %v1017_v24, 0.0  ;;  %v1034_v32 = vadd.f32 %v1903_v25, %v995_v28 }
 0x13f   : > { %v1065_v30 = vmax.f32 %v1033_v26, 0.0  ;;  %v1050_v35 = vmax.f32 %v1018_v31, 0.0 }
 0x140   : > { %v1466_v33 = vpack.c.bf16 %v1049_v29, %v1049_v29  ;;  %v1066_v36 = vmax.f32 %v1034_v32, 0.0 }
 0x141   : > { %v1482_v34 = vpack.c.bf16 %v1065_v30, %v1065_v30  ;;  %v941_v37 = vld [vmem:[#allocation2 + $0x70] sm:$0xff]  ;;  %v1467_v39 = vpack.c.bf16 %v1050_v35, %v1050_v35 }
 0x142   : > { %v957_v38 = vld [vmem:[#allocation2 + $0xf0] sm:$0xff]  ;;  %1210 = vst.msk [vmem:[%s1921_s14 + $0x30] sm:$0xf] %vm1197_vm1, %v1466_v33  ;;  %v1483_v40 = vpack.c.bf16 %v1066_v36, %v1066_v36  ;;  %v980_v41 = vmul.f32 %v1898_v15, %v941_v37  ;;  %v942_v43 = vld [vmem:[#allocation2 + $0x78] sm:$0xff] }
 0x143   : > { %1226 = vst.msk [vmem:[%s1921_s14 + $0x70] sm:$0xf] %vm1197_vm1, %v1482_v34  ;;  %v996_v42 = vmul.f32 %v1898_v15, %v957_v38  ;;  %v958_v44 = vld [vmem:[#allocation2 + $0xf8] sm:$0xff]  ;;  %1211 = vst.msk [vmem:[%s1921_s14 + $0x34] sm:$0xf] %vm1197_vm1, %v1467_v39  ;;  %v981_v47 = vmul.f32 %v1898_v15, %v942_v43 }
 0x144   : > { %1227 = vst.msk [vmem:[%s1921_s14 + $0x74] sm:$0xf] %vm1197_vm1, %v1483_v40  ;;  %v1019_v45 = vadd.f32 %v1903_v25, %v980_v41  ;;  %v997_v48 = vmul.f32 %v1898_v15, %v958_v44 }
 0x145   : > { %v1035_v46 = vadd.f32 %v1903_v25, %v996_v42  ;;  %v1020_v51 = vadd.f32 %v1903_v25, %v981_v47 }
 0x146   : > { %v1051_v49 = vmax.f32 %v1019_v45, 0.0  ;;  %v1036_v52 = vadd.f32 %v1903_v25, %v997_v48 }
 0x147   : > { %v1067_v50 = vmax.f32 %v1035_v46, 0.0  ;;  %v1052_v55 = vmax.f32 %v1020_v51, 0.0 }
 0x148   : > { %v1468_v53 = vpack.c.bf16 %v1051_v49, %v1051_v49  ;;  %v1068_v56 = vmax.f32 %v1036_v52, 0.0 }
 0x149   : > { %v1484_v54 = vpack.c.bf16 %v1067_v50, %v1067_v50  ;;  %v1469_v57 = vpack.c.bf16 %v1052_v55, %v1052_v55 }
 0x14a   : > { %1212 = vst.msk [vmem:[%s1921_s14 + $0x38] sm:$0xf] %vm1197_vm1, %v1468_v53  ;;  %v1485_v58 = vpack.c.bf16 %v1068_v56, %v1068_v56 }
 0x14b   : > { %1228 = vst.msk [vmem:[%s1921_s14 + $0x78] sm:$0xf] %vm1197_vm1, %v1484_v54  ;;  %1213 = vst.msk [vmem:[%s1921_s14 + $0x3c] sm:$0xf] %vm1197_vm1, %v1469_v57 }
 0x14c   : > { %1229 = vst.msk [vmem:[%s1921_s14 + $0x7c] sm:$0xf] %vm1197_vm1, %v1485_v58 }
 0x14d PF: > { %s14_s17 = sadd.s32 1, %s1725_s17   ;;  %s2081_s15 = smov %s1721_s16 }
 0x14e   : > { %p11_p5 = scmp.ge.s32.totalorder %s14_s17, 4   ;;  %s2082_s16 = smov %s2084_s18 }
 0x150   :  { %13 = sbr.rel (!%p11_p5) target bundleno = 2 (0x2), region = 83 }

// kernel: res18_feature_forward.24
= control target key start
LH: loop header
LB: loop body
LE: loop exit
PB: predicated region body
PF: predicated region fallthrough
CT: control target
= control target key end

     0   :  { %vm153_vm0 = vcmask 519168   ;;  %s1385_s0 = inlined_call_operand.vmem [shape: bf16[9,128,64], index: 0, kind: input, shape index: {}]   ;;  %s1386_s1 = inlined_call_operand.vmem [shape: bf16[128,64], index: 1, kind: output, shape index: {}]  }
   0x1   :  { %v9_v0 = vld [vmem:[%s1385_s0] sm:$0xf]  ;;  %v10_v12 = vld [vmem:[%s1385_s0 + $0x4] sm:$0xf]  ;;  %v11_v33 = vld [vmem:[%s1385_s0 + $0x8] sm:$0xf] }
   0x2   :  { %v25_v1 = vld [vmem:[%s1385_s0 + $0x40] sm:$0xf]  ;;  %v156_v4 = vsel %vm153_vm0, %v9_v0, 4286644096  ;;  %v26_v13 = vld [vmem:[%s1385_s0 + $0x44] sm:$0xf] }
   0x3   :  { %v41_v2 = vld [vmem:[%s1385_s0 + $0x80] sm:$0xf]  ;;  %v159_v5 = vsel %vm153_vm0, %v25_v1, 4286644096  ;;  %v42_v14 = vld [vmem:[%s1385_s0 + $0x84] sm:$0xf] }
   0x4   :  { %v57_v3 = vld [vmem:[%s1385_s0 + $0xc0] sm:$0xf]  ;;  %v163_v6 = vsel %vm153_vm0, %v41_v2, 4286644096  ;;  %v161_v8 = vmax.bf16 %v159_v5, %v156_v4  ;;  %v58_v19 = vld [vmem:[%s1385_s0 + $0xc4] sm:$0xf] }
   0x5   :  { %v73_v7 = vld [vmem:[%s1385_s0 + $0x100] sm:$0xf]  ;;  %v167_v10 = vsel %vm153_vm0, %v57_v3, 4286644096  ;;  %v191_v20 = vsel %vm153_vm0, %v10_v12, 4286644096 }
   0x6   :  { %v89_v9 = vld [vmem:[%s1385_s0 + $0x140] sm:$0xf]  ;;  %v165_v11 = vmax.bf16 %v163_v6, %v161_v8  ;;  %v171_v15 = vsel %vm153_vm0, %v73_v7, 4286644096  ;;  %v194_v21 = vsel %vm153_vm0, %v26_v13, 4286644096 }
   0x7   :  { %v105_v16 = vld [vmem:[%s1385_s0 + $0x180] sm:$0xf]  ;;  %v175_v18 = vsel %vm153_vm0, %v89_v9, 4286644096  ;;  %v198_v22 = vsel %vm153_vm0, %v42_v14, 4286644096  ;;  %v196_v27 = vmax.bf16 %v194_v21, %v191_v20 }
   0x8   :  { %v169_v17 = vmax.bf16 %v167_v10, %v165_v11  ;;  %v121_v23 = vld [vmem:[%s1385_s0 + $0x1c0] sm:$0xf]  ;;  %v74_v26 = vld [vmem:[%s1385_s0 + $0x104] sm:$0xf]  ;;  %v179_v28 = vsel %vm153_vm0, %v105_v16, 4286644096 }
   0x9   :  { %v137_v24 = vld [vmem:[%s1385_s0 + $0x200] sm:$0xf]  ;;  %v90_v29 = vld [vmem:[%s1385_s0 + $0x144] sm:$0xf]  ;;  %v202_v30 = vsel %vm153_vm0, %v58_v19, 4286644096  ;;  %v200_v32 = vmax.bf16 %v198_v22, %v196_v27 }
   0xa   :  { %v173_v25 = vmax.bf16 %v171_v15, %v169_v17  ;;  %v27_v34 = vld [vmem:[%s1385_s0 + $0x48] sm:$0xf]  ;;  %v183_v36 = vsel %vm153_vm0, %v121_v23, 4286644096  ;;  %v187_v37 = vsel %vm153_vm0, %v137_v24, 4286644096 }
   0xb   :  { %v43_v35 = vld [vmem:[%s1385_s0 + $0x88] sm:$0xf]  ;;  %v206_v38 = vsel %vm153_vm0, %v74_v26, 4286644096  ;;  %v106_v40 = vld [vmem:[%s1385_s0 + $0x184] sm:$0xf]  ;;  %v204_v41 = vmax.bf16 %v202_v30, %v200_v32 }
   0xc   :  { %v177_v31 = vmax.bf16 %v175_v18, %v173_v25  ;;  %v210_v42 = vsel %vm153_vm0, %v90_v29, 4286644096  ;;  %v59_v43 = vld [vmem:[%s1385_s0 + $0xc8] sm:$0xf]  ;;  %v226_v44 = vsel %vm153_vm0, %v11_v33, 4286644096 }
   0xd   :  { %v229_v45 = vsel %vm153_vm0, %v27_v34, 4286644096  ;;  %v233_v46 = vsel %vm153_vm0, %v43_v35, 4286644096  ;;  %v122_v48 = vld [vmem:[%s1385_s0 + $0x1c4] sm:$0xf]  ;;  %v208_v50 = vmax.bf16 %v206_v38, %v204_v41 }
   0xe   :  { %v181_v39 = vmax.bf16 %v179_v28, %v177_v31  ;;  %v138_v49 = vld [vmem:[%s1385_s0 + $0x204] sm:$0xf]  ;;  %v75_v51 = vld [vmem:[%s1385_s0 + $0x108] sm:$0xf]  ;;  %v231_v52 = vmax.bf16 %v229_v45, %v226_v44  ;;  %v214_v53 = vsel %vm153_vm0, %v106_v40, 4286644096 }
   0xf   :  { %v91_v54 = vld [vmem:[%s1385_s0 + $0x148] sm:$0xf]  ;;  %v237_v55 = vsel %vm153_vm0, %v59_v43, 4286644096  ;;  %v212_v57 = vmax.bf16 %v210_v42, %v208_v50  ;;  %v12_v59 = vld [vmem:[%s1385_s0 + $0xc] sm:$0xf] }
  0x10   :  { %v185_v47 = vmax.bf16 %v183_v36, %v181_v39  ;;  %v235_v58 = vmax.bf16 %v233_v46, %v231_v52  ;;  %v28_v60 = vld [vmem:[%s1385_s0 + $0x4c] sm:$0xf]  ;;  %v218_v62 = vsel %vm153_vm0, %v122_v48, 4286644096  ;;  %v222_v63 = vsel %vm153_vm0, %v138_v49, 4286644096 }
  0x11   :  { %v44_v61 = vld [vmem:[%s1385_s0 + $0x8c] sm:$0xf]  ;;  %v241_v0 = vsel %vm153_vm0, %v75_v51, 4286644096  ;;  %v216_v1 = vmax.bf16 %v214_v53, %v212_v57  ;;  %v107_v2 = vld [vmem:[%s1385_s0 + $0x188] sm:$0xf] }
  0x12   :  { %v189_v56 = vmax.bf16 %v187_v37, %v185_v47  ;;  %v239_v3 = vmax.bf16 %v237_v55, %v235_v58  ;;  %v245_v4 = vsel %vm153_vm0, %v91_v54, 4286644096  ;;  %v60_v5 = vld [vmem:[%s1385_s0 + $0xcc] sm:$0xf]  ;;  %v261_v6 = vsel %vm153_vm0, %v12_v59, 4286644096 }
  0x13   :  { %v264_v7 = vsel %vm153_vm0, %v28_v60, 4286644096  ;;  %v268_v8 = vsel %vm153_vm0, %v44_v61, 4286644096  ;;  %v220_v9 = vmax.bf16 %v218_v62, %v216_v1  ;;  %v123_v10 = vld [vmem:[%s1385_s0 + $0x1c8] sm:$0xf] }
  0x14   :  { %715 = vst.msk [vmem:[%s1386_s1] sm:$0xf] %vm153_vm0, %v189_v56  ;;  %v139_v11 = vld [vmem:[%s1385_s0 + $0x208] sm:$0xf]  ;;  %v243_v12 = vmax.bf16 %v241_v0, %v239_v3  ;;  %v76_v13 = vld [vmem:[%s1385_s0 + $0x10c] sm:$0xf]  ;;  %v266_v14 = vmax.bf16 %v264_v7, %v261_v6 }
  0x15   :  { %v249_v15 = vsel %vm153_vm0, %v107_v2, 4286644096  ;;  %v92_v16 = vld [vmem:[%s1385_s0 + $0x14c] sm:$0xf]  ;;  %v272_v17 = vsel %vm153_vm0, %v60_v5, 4286644096  ;;  %v224_v18 = vmax.bf16 %v222_v63, %v220_v9 }
  0x16   :  { %v247_v19 = vmax.bf16 %v245_v4, %v243_v12  ;;  %v270_v20 = vmax.bf16 %v268_v8, %v266_v14  ;;  %v13_v21 = vld [vmem:[%s1385_s0 + $0x10] sm:$0xf]  ;;  %v253_v24 = vsel %vm153_vm0, %v123_v10, 4286644096  ;;  %v257_v25 = vsel %vm153_vm0, %v139_v11, 4286644096 }
  0x17   :  { %v29_v22 = vld [vmem:[%s1385_s0 + $0x50] sm:$0xf]  ;;  %v276_v26 = vsel %vm153_vm0, %v76_v13, 4286644096  ;;  %716 = vst.msk [vmem:[%s1386_s1 + $0x4] sm:$0xf] %vm153_vm0, %v224_v18 }
  0x18   :  { %v45_v23 = vld [vmem:[%s1385_s0 + $0x90] sm:$0xf]  ;;  %v251_v27 = vmax.bf16 %v249_v15, %v247_v19  ;;  %v108_v28 = vld [vmem:[%s1385_s0 + $0x18c] sm:$0xf]  ;;  %v274_v29 = vmax.bf16 %v272_v17, %v270_v20  ;;  %v280_v30 = vsel %vm153_vm0, %v92_v16, 4286644096 }
  0x19   :  { %v61_v31 = vld [vmem:[%s1385_s0 + $0xd0] sm:$0xf]  ;;  %v296_v32 = vsel %vm153_vm0, %v13_v21, 4286644096  ;;  %v299_v33 = vsel %vm153_vm0, %v29_v22, 4286644096 }
  0x1a   :  { %v303_v34 = vsel %vm153_vm0, %v45_v23, 4286644096  ;;  %v255_v35 = vmax.bf16 %v253_v24, %v251_v27  ;;  %v124_v36 = vld [vmem:[%s1385_s0 + $0x1cc] sm:$0xf]  ;;  %v278_v38 = vmax.bf16 %v276_v26, %v274_v29  ;;  %v77_v39 = vld [vmem:[%s1385_s0 + $0x110] sm:$0xf]  ;;  %v301_v40 = vmax.bf16 %v299_v33, %v296_v32 }
  0x1b   :  { %v140_v37 = vld [vmem:[%s1385_s0 + $0x20c] sm:$0xf]  ;;  %v284_v41 = vsel %vm153_vm0, %v108_v28, 4286644096  ;;  %v93_v42 = vld [vmem:[%s1385_s0 + $0x150] sm:$0xf] }
  0x1c   :  { %v307_v43 = vsel %vm153_vm0, %v61_v31, 4286644096  ;;  %v259_v44 = vmax.bf16 %v257_v25, %v255_v35  ;;  %v282_v45 = vmax.bf16 %v280_v30, %v278_v38  ;;  %v305_v46 = vmax.bf16 %v303_v34, %v301_v40  ;;  %v14_v47 = vld [vmem:[%s1385_s0 + $0x14] sm:$0xf]  ;;  %v109_v54 = vld [vmem:[%s1385_s0 + $0x190] sm:$0xf] }
  0x1d   :  { %v30_v48 = vld [vmem:[%s1385_s0 + $0x54] sm:$0xf]  ;;  %v288_v50 = vsel %vm153_vm0, %v124_v36, 4286644096  ;;  %v292_v51 = vsel %vm153_vm0, %v140_v37, 4286644096 }
  0x1e   :  { %v46_v49 = vld [vmem:[%s1385_s0 + $0x94] sm:$0xf]  ;;  %v311_v52 = vsel %vm153_vm0, %v77_v39, 4286644096  ;;  %717 = vst.msk [vmem:[%s1386_s1 + $0x8] sm:$0xf] %vm153_vm0, %v259_v44  ;;  %v286_v53 = vmax.bf16 %v284_v41, %v282_v45  ;;  %v309_v55 = vmax.bf16 %v307_v43, %v305_v46 }
  0x1f   :  { %v315_v56 = vsel %vm153_vm0, %v93_v42, 4286644096  ;;  %v62_v57 = vld [vmem:[%s1385_s0 + $0xd4] sm:$0xf]  ;;  %v331_v58 = vsel %vm153_vm0, %v14_v47, 4286644096 }
  0x20   :  { %v334_v59 = vsel %vm153_vm0, %v30_v48, 4286644096  ;;  %v338_v60 = vsel %vm153_vm0, %v46_v49, 4286644096  ;;  %v290_v61 = vmax.bf16 %v288_v50, %v286_v53  ;;  %v125_v62 = vld [vmem:[%s1385_s0 + $0x1d0] sm:$0xf]  ;;  %v313_v0 = vmax.bf16 %v311_v52, %v309_v55 }
  0x21   :  { %v141_v63 = vld [vmem:[%s1385_s0 + $0x210] sm:$0xf]  ;;  %v78_v1 = vld [vmem:[%s1385_s0 + $0x114] sm:$0xf]  ;;  %v336_v2 = vmax.bf16 %v334_v59, %v331_v58  ;;  %v319_v3 = vsel %vm153_vm0, %v109_v54, 4286644096 }
  0x22   :  { %v94_v4 = vld [vmem:[%s1385_s0 + $0x154] sm:$0xf]  ;;  %v342_v5 = vsel %vm153_vm0, %v62_v57, 4286644096  ;;  %v294_v6 = vmax.bf16 %v292_v51, %v290_v61  ;;  %v317_v7 = vmax.bf16 %v315_v56, %v313_v0  ;;  %v15_v9 = vld [vmem:[%s1385_s0 + $0x18] sm:$0xf] }
  0x23   :  { %v340_v8 = vmax.bf16 %v338_v60, %v336_v2  ;;  %v31_v10 = vld [vmem:[%s1385_s0 + $0x58] sm:$0xf]  ;;  %v323_v12 = vsel %vm153_vm0, %v125_v62, 4286644096  ;;  %v327_v13 = vsel %vm153_vm0, %v141_v63, 4286644096 }
  0x24   :  { %v47_v11 = vld [vmem:[%s1385_s0 + $0x98] sm:$0xf]  ;;  %v346_v14 = vsel %vm153_vm0, %v78_v1, 4286644096  ;;  %718 = vst.msk [vmem:[%s1386_s1 + $0xc] sm:$0xf] %vm153_vm0, %v294_v6  ;;  %v321_v15 = vmax.bf16 %v319_v3, %v317_v7 }
  0x25   :  { %v110_v16 = vld [vmem:[%s1385_s0 + $0x194] sm:$0xf]  ;;  %v344_v17 = vmax.bf16 %v342_v5, %v340_v8  ;;  %v350_v18 = vsel %vm153_vm0, %v94_v4, 4286644096  ;;  %v63_v19 = vld [vmem:[%s1385_s0 + $0xd8] sm:$0xf] }
  0x26   :  { %v366_v20 = vsel %vm153_vm0, %v15_v9, 4286644096  ;;  %v369_v21 = vsel %vm153_vm0, %v31_v10, 4286644096  ;;  %v373_v22 = vsel %vm153_vm0, %v47_v11, 4286644096  ;;  %v325_v23 = vmax.bf16 %v323_v12, %v321_v15 }
  0x27   :  { %v126_v24 = vld [vmem:[%s1385_s0 + $0x1d4] sm:$0xf]  ;;  %v348_v26 = vmax.bf16 %v346_v14, %v344_v17  ;;  %v79_v27 = vld [vmem:[%s1385_s0 + $0x118] sm:$0xf]  ;;  %v371_v28 = vmax.bf16 %v369_v21, %v366_v20  ;;  %v354_v29 = vsel %vm153_vm0, %v110_v16, 4286644096 }
  0x28   :  { %v142_v25 = vld [vmem:[%s1385_s0 + $0x214] sm:$0xf]  ;;  %v95_v30 = vld [vmem:[%s1385_s0 + $0x158] sm:$0xf]  ;;  %v377_v31 = vsel %vm153_vm0, %v63_v19, 4286644096  ;;  %v329_v32 = vmax.bf16 %v327_v13, %v325_v23 }
  0x29   :  { %v352_v33 = vmax.bf16 %v350_v18, %v348_v26  ;;  %v375_v34 = vmax.bf16 %v373_v22, %v371_v28  ;;  %v16_v35 = vld [vmem:[%s1385_s0 + $0x1c] sm:$0xf]  ;;  %v358_v38 = vsel %vm153_vm0, %v126_v24, 4286644096  ;;  %v362_v39 = vsel %vm153_vm0, %v142_v25, 4286644096 }
  0x2a   :  { %v32_v36 = vld [vmem:[%s1385_s0 + $0x5c] sm:$0xf]  ;;  %v381_v40 = vsel %vm153_vm0, %v79_v27, 4286644096  ;;  %719 = vst.msk [vmem:[%s1386_s1 + $0x10] sm:$0xf] %vm153_vm0, %v329_v32 }
  0x2b   :  { %v48_v37 = vld [vmem:[%s1385_s0 + $0x9c] sm:$0xf]  ;;  %v356_v41 = vmax.bf16 %v354_v29, %v352_v33  ;;  %v111_v42 = vld [vmem:[%s1385_s0 + $0x198] sm:$0xf]  ;;  %v379_v43 = vmax.bf16 %v377_v31, %v375_v34  ;;  %v385_v44 = vsel %vm153_vm0, %v95_v30, 4286644096 }
  0x2c   :  { %v64_v45 = vld [vmem:[%s1385_s0 + $0xdc] sm:$0xf]  ;;  %v401_v46 = vsel %vm153_vm0, %v16_v35, 4286644096  ;;  %v404_v47 = vsel %vm153_vm0, %v32_v36, 4286644096 }
  0x2d   :  { %v408_v48 = vsel %vm153_vm0, %v48_v37, 4286644096  ;;  %v360_v49 = vmax.bf16 %v358_v38, %v356_v41  ;;  %v127_v50 = vld [vmem:[%s1385_s0 + $0x1d8] sm:$0xf]  ;;  %v383_v52 = vmax.bf16 %v381_v40, %v379_v43  ;;  %v80_v53 = vld [vmem:[%s1385_s0 + $0x11c] sm:$0xf]  ;;  %v406_v54 = vmax.bf16 %v404_v47, %v401_v46 }
  0x2e   :  { %v143_v51 = vld [vmem:[%s1385_s0 + $0x218] sm:$0xf]  ;;  %v389_v55 = vsel %vm153_vm0, %v111_v42, 4286644096  ;;  %v96_v56 = vld [vmem:[%s1385_s0 + $0x15c] sm:$0xf] }
  0x2f   :  { %v412_v57 = vsel %vm153_vm0, %v64_v45, 4286644096  ;;  %v364_v58 = vmax.bf16 %v362_v39, %v360_v49  ;;  %v387_v59 = vmax.bf16 %v385_v44, %v383_v52  ;;  %v410_v60 = vmax.bf16 %v408_v48, %v406_v54  ;;  %v17_v61 = vld [vmem:[%s1385_s0 + $0x20] sm:$0xf]  ;;  %v112_v4 = vld [vmem:[%s1385_s0 + $0x19c] sm:$0xf] }
  0x30   :  { %v33_v62 = vld [vmem:[%s1385_s0 + $0x60] sm:$0xf]  ;;  %v393_v0 = vsel %vm153_vm0, %v127_v50, 4286644096  ;;  %v397_v1 = vsel %vm153_vm0, %v143_v51, 4286644096 }
  0x31   :  { %v49_v63 = vld [vmem:[%s1385_s0 + $0xa0] sm:$0xf]  ;;  %v416_v2 = vsel %vm153_vm0, %v80_v53, 4286644096  ;;  %720 = vst.msk [vmem:[%s1386_s1 + $0x14] sm:$0xf] %vm153_vm0, %v364_v58  ;;  %v391_v3 = vmax.bf16 %v389_v55, %v387_v59  ;;  %v414_v5 = vmax.bf16 %v412_v57, %v410_v60 }
  0x32   :  { %v420_v6 = vsel %vm153_vm0, %v96_v56, 4286644096  ;;  %v65_v7 = vld [vmem:[%s1385_s0 + $0xe0] sm:$0xf]  ;;  %v436_v8 = vsel %vm153_vm0, %v17_v61, 4286644096 }
  0x33   :  { %v439_v9 = vsel %vm153_vm0, %v33_v62, 4286644096  ;;  %v443_v10 = vsel %vm153_vm0, %v49_v63, 4286644096  ;;  %v395_v11 = vmax.bf16 %v393_v0, %v391_v3  ;;  %v128_v12 = vld [vmem:[%s1385_s0 + $0x1dc] sm:$0xf]  ;;  %v418_v14 = vmax.bf16 %v416_v2, %v414_v5 }
  0x34   :  { %v144_v13 = vld [vmem:[%s1385_s0 + $0x21c] sm:$0xf]  ;;  %v81_v15 = vld [vmem:[%s1385_s0 + $0x120] sm:$0xf]  ;;  %v441_v16 = vmax.bf16 %v439_v9, %v436_v8  ;;  %v424_v17 = vsel %vm153_vm0, %v112_v4, 4286644096 }
  0x35   :  { %v97_v18 = vld [vmem:[%s1385_s0 + $0x160] sm:$0xf]  ;;  %v447_v19 = vsel %vm153_vm0, %v65_v7, 4286644096  ;;  %v399_v20 = vmax.bf16 %v397_v1, %v395_v11  ;;  %v422_v21 = vmax.bf16 %v420_v6, %v418_v14  ;;  %v18_v23 = vld [vmem:[%s1385_s0 + $0x24] sm:$0xf] }
  0x36   :  { %v445_v22 = vmax.bf16 %v443_v10, %v441_v16  ;;  %v34_v24 = vld [vmem:[%s1385_s0 + $0x64] sm:$0xf]  ;;  %v428_v26 = vsel %vm153_vm0, %v128_v12, 4286644096  ;;  %v432_v27 = vsel %vm153_vm0, %v144_v13, 4286644096 }
  0x37   :  { %v50_v25 = vld [vmem:[%s1385_s0 + $0xa4] sm:$0xf]  ;;  %v451_v28 = vsel %vm153_vm0, %v81_v15, 4286644096  ;;  %721 = vst.msk [vmem:[%s1386_s1 + $0x18] sm:$0xf] %vm153_vm0, %v399_v20  ;;  %v426_v29 = vmax.bf16 %v424_v17, %v422_v21 }
  0x38   :  { %v113_v30 = vld [vmem:[%s1385_s0 + $0x1a0] sm:$0xf]  ;;  %v449_v31 = vmax.bf16 %v447_v19, %v445_v22  ;;  %v455_v32 = vsel %vm153_vm0, %v97_v18, 4286644096  ;;  %v66_v33 = vld [vmem:[%s1385_s0 + $0xe4] sm:$0xf] }
  0x39   :  { %v471_v34 = vsel %vm153_vm0, %v18_v23, 4286644096  ;;  %v474_v35 = vsel %vm153_vm0, %v34_v24, 4286644096  ;;  %v478_v36 = vsel %vm153_vm0, %v50_v25, 4286644096  ;;  %v430_v37 = vmax.bf16 %v428_v26, %v426_v29 }
  0x3a   :  { %v129_v38 = vld [vmem:[%s1385_s0 + $0x1e0] sm:$0xf]  ;;  %v453_v40 = vmax.bf16 %v451_v28, %v449_v31  ;;  %v82_v41 = vld [vmem:[%s1385_s0 + $0x124] sm:$0xf]  ;;  %v476_v42 = vmax.bf16 %v474_v35, %v471_v34  ;;  %v459_v43 = vsel %vm153_vm0, %v113_v30, 4286644096 }
  0x3b   :  { %v145_v39 = vld [vmem:[%s1385_s0 + $0x220] sm:$0xf]  ;;  %v98_v44 = vld [vmem:[%s1385_s0 + $0x164] sm:$0xf]  ;;  %v482_v45 = vsel %vm153_vm0, %v66_v33, 4286644096  ;;  %v434_v46 = vmax.bf16 %v432_v27, %v430_v37 }
  0x3c   :  { %v457_v47 = vmax.bf16 %v455_v32, %v453_v40  ;;  %v480_v48 = vmax.bf16 %v478_v36, %v476_v42  ;;  %v19_v49 = vld [vmem:[%s1385_s0 + $0x28] sm:$0xf]  ;;  %v463_v52 = vsel %vm153_vm0, %v129_v38, 4286644096  ;;  %v467_v53 = vsel %vm153_vm0, %v145_v39, 4286644096 }
  0x3d   :  { %v35_v50 = vld [vmem:[%s1385_s0 + $0x68] sm:$0xf]  ;;  %v486_v54 = vsel %vm153_vm0, %v82_v41, 4286644096  ;;  %722 = vst.msk [vmem:[%s1386_s1 + $0x1c] sm:$0xf] %vm153_vm0, %v434_v46 }
  0x3e   :  { %v51_v51 = vld [vmem:[%s1385_s0 + $0xa8] sm:$0xf]  ;;  %v461_v55 = vmax.bf16 %v459_v43, %v457_v47  ;;  %v114_v56 = vld [vmem:[%s1385_s0 + $0x1a4] sm:$0xf]  ;;  %v484_v57 = vmax.bf16 %v482_v45, %v480_v48  ;;  %v490_v58 = vsel %vm153_vm0, %v98_v44, 4286644096 }
  0x3f   :  { %v67_v59 = vld [vmem:[%s1385_s0 + $0xe8] sm:$0xf]  ;;  %v506_v60 = vsel %vm153_vm0, %v19_v49, 4286644096  ;;  %v509_v61 = vsel %vm153_vm0, %v35_v50, 4286644096 }
  0x40   :  { %v513_v62 = vsel %vm153_vm0, %v51_v51, 4286644096  ;;  %v465_v63 = vmax.bf16 %v463_v52, %v461_v55  ;;  %v130_v0 = vld [vmem:[%s1385_s0 + $0x1e4] sm:$0xf]  ;;  %v488_v2 = vmax.bf16 %v486_v54, %v484_v57  ;;  %v83_v3 = vld [vmem:[%s1385_s0 + $0x128] sm:$0xf]  ;;  %v511_v4 = vmax.bf16 %v509_v61, %v506_v60 }
  0x41   :  { %v146_v1 = vld [vmem:[%s1385_s0 + $0x224] sm:$0xf]  ;;  %v494_v5 = vsel %vm153_vm0, %v114_v56, 4286644096  ;;  %v99_v6 = vld [vmem:[%s1385_s0 + $0x168] sm:$0xf] }
  0x42   :  { %v517_v7 = vsel %vm153_vm0, %v67_v59, 4286644096  ;;  %v469_v8 = vmax.bf16 %v467_v53, %v465_v63  ;;  %v492_v9 = vmax.bf16 %v490_v58, %v488_v2  ;;  %v515_v10 = vmax.bf16 %v513_v62, %v511_v4  ;;  %v20_v11 = vld [vmem:[%s1385_s0 + $0x2c] sm:$0xf]  ;;  %v115_v18 = vld [vmem:[%s1385_s0 + $0x1a8] sm:$0xf] }
  0x43   :  { %v36_v12 = vld [vmem:[%s1385_s0 + $0x6c] sm:$0xf]  ;;  %v498_v14 = vsel %vm153_vm0, %v130_v0, 4286644096  ;;  %v502_v15 = vsel %vm153_vm0, %v146_v1, 4286644096 }
  0x44   :  { %v52_v13 = vld [vmem:[%s1385_s0 + $0xac] sm:$0xf]  ;;  %v521_v16 = vsel %vm153_vm0, %v83_v3, 4286644096  ;;  %723 = vst.msk [vmem:[%s1386_s1 + $0x20] sm:$0xf] %vm153_vm0, %v469_v8  ;;  %v496_v17 = vmax.bf16 %v494_v5, %v492_v9  ;;  %v519_v19 = vmax.bf16 %v517_v7, %v515_v10 }
  0x45   :  { %v525_v20 = vsel %vm153_vm0, %v99_v6, 4286644096  ;;  %v68_v21 = vld [vmem:[%s1385_s0 + $0xec] sm:$0xf]  ;;  %v541_v22 = vsel %vm153_vm0, %v20_v11, 4286644096 }
  0x46   :  { %v544_v23 = vsel %vm153_vm0, %v36_v12, 4286644096  ;;  %v548_v24 = vsel %vm153_vm0, %v52_v13, 4286644096  ;;  %v500_v25 = vmax.bf16 %v498_v14, %v496_v17  ;;  %v131_v26 = vld [vmem:[%s1385_s0 + $0x1e8] sm:$0xf]  ;;  %v523_v28 = vmax.bf16 %v521_v16, %v519_v19 }
  0x47   :  { %v147_v27 = vld [vmem:[%s1385_s0 + $0x228] sm:$0xf]  ;;  %v84_v29 = vld [vmem:[%s1385_s0 + $0x12c] sm:$0xf]  ;;  %v546_v30 = vmax.bf16 %v544_v23, %v541_v22  ;;  %v529_v31 = vsel %vm153_vm0, %v115_v18, 4286644096 }
  0x48   :  { %v100_v32 = vld [vmem:[%s1385_s0 + $0x16c] sm:$0xf]  ;;  %v552_v33 = vsel %vm153_vm0, %v68_v21, 4286644096  ;;  %v504_v34 = vmax.bf16 %v502_v15, %v500_v25  ;;  %v527_v35 = vmax.bf16 %v525_v20, %v523_v28  ;;  %v21_v37 = vld [vmem:[%s1385_s0 + $0x30] sm:$0xf] }
  0x49   :  { %v550_v36 = vmax.bf16 %v548_v24, %v546_v30  ;;  %v37_v38 = vld [vmem:[%s1385_s0 + $0x70] sm:$0xf]  ;;  %v533_v40 = vsel %vm153_vm0, %v131_v26, 4286644096  ;;  %v537_v41 = vsel %vm153_vm0, %v147_v27, 4286644096 }
  0x4a   :  { %v53_v39 = vld [vmem:[%s1385_s0 + $0xb0] sm:$0xf]  ;;  %v556_v42 = vsel %vm153_vm0, %v84_v29, 4286644096  ;;  %724 = vst.msk [vmem:[%s1386_s1 + $0x24] sm:$0xf] %vm153_vm0, %v504_v34  ;;  %v531_v43 = vmax.bf16 %v529_v31, %v527_v35 }
  0x4b   :  { %v116_v44 = vld [vmem:[%s1385_s0 + $0x1ac] sm:$0xf]  ;;  %v554_v45 = vmax.bf16 %v552_v33, %v550_v36  ;;  %v560_v46 = vsel %vm153_vm0, %v100_v32, 4286644096  ;;  %v69_v47 = vld [vmem:[%s1385_s0 + $0xf0] sm:$0xf] }
  0x4c   :  { %v576_v48 = vsel %vm153_vm0, %v21_v37, 4286644096  ;;  %v579_v49 = vsel %vm153_vm0, %v37_v38, 4286644096  ;;  %v583_v50 = vsel %vm153_vm0, %v53_v39, 4286644096  ;;  %v535_v51 = vmax.bf16 %v533_v40, %v531_v43 }
  0x4d   :  { %v132_v52 = vld [vmem:[%s1385_s0 + $0x1ec] sm:$0xf]  ;;  %v558_v54 = vmax.bf16 %v556_v42, %v554_v45  ;;  %v85_v55 = vld [vmem:[%s1385_s0 + $0x130] sm:$0xf]  ;;  %v581_v56 = vmax.bf16 %v579_v49, %v576_v48  ;;  %v564_v57 = vsel %vm153_vm0, %v116_v44, 4286644096 }
  0x4e   :  { %v148_v53 = vld [vmem:[%s1385_s0 + $0x22c] sm:$0xf]  ;;  %v101_v58 = vld [vmem:[%s1385_s0 + $0x170] sm:$0xf]  ;;  %v587_v59 = vsel %vm153_vm0, %v69_v47, 4286644096  ;;  %v539_v60 = vmax.bf16 %v537_v41, %v535_v51 }
  0x4f   :  { %v562_v61 = vmax.bf16 %v560_v46, %v558_v54  ;;  %v585_v62 = vmax.bf16 %v583_v50, %v581_v56  ;;  %v22_v63 = vld [vmem:[%s1385_s0 + $0x34] sm:$0xf]  ;;  %v568_v2 = vsel %vm153_vm0, %v132_v52, 4286644096  ;;  %v572_v3 = vsel %vm153_vm0, %v148_v53, 4286644096 }
  0x50   :  { %v38_v0 = vld [vmem:[%s1385_s0 + $0x74] sm:$0xf]  ;;  %v591_v4 = vsel %vm153_vm0, %v85_v55, 4286644096  ;;  %725 = vst.msk [vmem:[%s1386_s1 + $0x28] sm:$0xf] %vm153_vm0, %v539_v60 }
  0x51   :  { %v54_v1 = vld [vmem:[%s1385_s0 + $0xb4] sm:$0xf]  ;;  %v566_v5 = vmax.bf16 %v564_v57, %v562_v61  ;;  %v117_v6 = vld [vmem:[%s1385_s0 + $0x1b0] sm:$0xf]  ;;  %v589_v7 = vmax.bf16 %v587_v59, %v585_v62  ;;  %v595_v8 = vsel %vm153_vm0, %v101_v58, 4286644096 }
  0x52   :  { %v70_v9 = vld [vmem:[%s1385_s0 + $0xf4] sm:$0xf]  ;;  %v611_v10 = vsel %vm153_vm0, %v22_v63, 4286644096  ;;  %v614_v11 = vsel %vm153_vm0, %v38_v0, 4286644096 }
  0x53   :  { %v618_v12 = vsel %vm153_vm0, %v54_v1, 4286644096  ;;  %v570_v13 = vmax.bf16 %v568_v2, %v566_v5  ;;  %v133_v14 = vld [vmem:[%s1385_s0 + $0x1f0] sm:$0xf]  ;;  %v593_v16 = vmax.bf16 %v591_v4, %v589_v7  ;;  %v86_v17 = vld [vmem:[%s1385_s0 + $0x134] sm:$0xf]  ;;  %v616_v18 = vmax.bf16 %v614_v11, %v611_v10 }
  0x54   :  { %v149_v15 = vld [vmem:[%s1385_s0 + $0x230] sm:$0xf]  ;;  %v599_v19 = vsel %vm153_vm0, %v117_v6, 4286644096  ;;  %v102_v20 = vld [vmem:[%s1385_s0 + $0x174] sm:$0xf] }
  0x55   :  { %v622_v21 = vsel %vm153_vm0, %v70_v9, 4286644096  ;;  %v574_v22 = vmax.bf16 %v572_v3, %v570_v13  ;;  %v597_v23 = vmax.bf16 %v595_v8, %v593_v16  ;;  %v620_v24 = vmax.bf16 %v618_v12, %v616_v18  ;;  %v23_v25 = vld [vmem:[%s1385_s0 + $0x38] sm:$0xf]  ;;  %v118_v32 = vld [vmem:[%s1385_s0 + $0x1b4] sm:$0xf] }
  0x56   :  { %v39_v26 = vld [vmem:[%s1385_s0 + $0x78] sm:$0xf]  ;;  %v603_v28 = vsel %vm153_vm0, %v133_v14, 4286644096  ;;  %v607_v29 = vsel %vm153_vm0, %v149_v15, 4286644096 }
  0x57   :  { %v55_v27 = vld [vmem:[%s1385_s0 + $0xb8] sm:$0xf]  ;;  %v626_v30 = vsel %vm153_vm0, %v86_v17, 4286644096  ;;  %726 = vst.msk [vmem:[%s1386_s1 + $0x2c] sm:$0xf] %vm153_vm0, %v574_v22  ;;  %v601_v31 = vmax.bf16 %v599_v19, %v597_v23  ;;  %v624_v33 = vmax.bf16 %v622_v21, %v620_v24 }
  0x58   :  { %v630_v34 = vsel %vm153_vm0, %v102_v20, 4286644096  ;;  %v71_v35 = vld [vmem:[%s1385_s0 + $0xf8] sm:$0xf]  ;;  %v646_v36 = vsel %vm153_vm0, %v23_v25, 4286644096 }
  0x59   :  { %v649_v37 = vsel %vm153_vm0, %v39_v26, 4286644096  ;;  %v653_v38 = vsel %vm153_vm0, %v55_v27, 4286644096  ;;  %v605_v39 = vmax.bf16 %v603_v28, %v601_v31  ;;  %v134_v40 = vld [vmem:[%s1385_s0 + $0x1f4] sm:$0xf]  ;;  %v628_v42 = vmax.bf16 %v626_v30, %v624_v33 }
  0x5a   :  { %v150_v41 = vld [vmem:[%s1385_s0 + $0x234] sm:$0xf]  ;;  %v87_v43 = vld [vmem:[%s1385_s0 + $0x138] sm:$0xf]  ;;  %v651_v44 = vmax.bf16 %v649_v37, %v646_v36  ;;  %v634_v45 = vsel %vm153_vm0, %v118_v32, 4286644096 }
  0x5b   :  { %v103_v46 = vld [vmem:[%s1385_s0 + $0x178] sm:$0xf]  ;;  %v657_v47 = vsel %vm153_vm0, %v71_v35, 4286644096  ;;  %v609_v48 = vmax.bf16 %v607_v29, %v605_v39  ;;  %v632_v49 = vmax.bf16 %v630_v34, %v628_v42  ;;  %v24_v51 = vld [vmem:[%s1385_s0 + $0x3c] sm:$0xf] }
  0x5c   :  { %v655_v50 = vmax.bf16 %v653_v38, %v651_v44  ;;  %v40_v52 = vld [vmem:[%s1385_s0 + $0x7c] sm:$0xf]  ;;  %v638_v54 = vsel %vm153_vm0, %v134_v40, 4286644096  ;;  %v642_v55 = vsel %vm153_vm0, %v150_v41, 4286644096 }
  0x5d   :  { %v56_v53 = vld [vmem:[%s1385_s0 + $0xbc] sm:$0xf]  ;;  %v661_v56 = vsel %vm153_vm0, %v87_v43, 4286644096  ;;  %727 = vst.msk [vmem:[%s1386_s1 + $0x30] sm:$0xf] %vm153_vm0, %v609_v48  ;;  %v636_v57 = vmax.bf16 %v634_v45, %v632_v49 }
  0x5e   :  { %v119_v58 = vld [vmem:[%s1385_s0 + $0x1b8] sm:$0xf]  ;;  %v659_v59 = vmax.bf16 %v657_v47, %v655_v50  ;;  %v665_v60 = vsel %vm153_vm0, %v103_v46, 4286644096  ;;  %v72_v61 = vld [vmem:[%s1385_s0 + $0xfc] sm:$0xf] }
  0x5f   :  { %v681_v62 = vsel %vm153_vm0, %v24_v51, 4286644096  ;;  %v684_v63 = vsel %vm153_vm0, %v40_v52, 4286644096  ;;  %v688_v0 = vsel %vm153_vm0, %v56_v53, 4286644096  ;;  %v640_v1 = vmax.bf16 %v638_v54, %v636_v57 }
  0x60   :  { %v135_v2 = vld [vmem:[%s1385_s0 + $0x1f8] sm:$0xf]  ;;  %v663_v3 = vmax.bf16 %v661_v56, %v659_v59  ;;  %v88_v4 = vld [vmem:[%s1385_s0 + $0x13c] sm:$0xf]  ;;  %v686_v5 = vmax.bf16 %v684_v63, %v681_v62  ;;  %v669_v6 = vsel %vm153_vm0, %v119_v58, 4286644096 }
  0x61   :  { %v692_v7 = vsel %vm153_vm0, %v72_v61, 4286644096  ;;  %v644_v8 = vmax.bf16 %v642_v55, %v640_v1  ;;  %v151_v9 = vld [vmem:[%s1385_s0 + $0x238] sm:$0xf]  ;;  %v104_v11 = vld [vmem:[%s1385_s0 + $0x17c] sm:$0xf] }
  0x62   :  { %v667_v10 = vmax.bf16 %v665_v60, %v663_v3  ;;  %v690_v12 = vmax.bf16 %v688_v0, %v686_v5  ;;  %v673_v13 = vsel %vm153_vm0, %v135_v2, 4286644096  ;;  %v696_v14 = vsel %vm153_vm0, %v88_v4, 4286644096  ;;  %v120_v16 = vld [vmem:[%s1385_s0 + $0x1bc] sm:$0xf] }
  0x63   :  { %728 = vst.msk [vmem:[%s1386_s1 + $0x34] sm:$0xf] %vm153_vm0, %v644_v8  ;;  %v677_v18 = vsel %vm153_vm0, %v151_v9, 4286644096  ;;  %v700_v19 = vsel %vm153_vm0, %v104_v11, 4286644096 }
  0x64   :  { %v671_v15 = vmax.bf16 %v669_v6, %v667_v10  ;;  %v694_v17 = vmax.bf16 %v692_v7, %v690_v12  ;;  %v136_v21 = vld [vmem:[%s1385_s0 + $0x1fc] sm:$0xf]  ;;  %v704_v23 = vsel %vm153_vm0, %v120_v16, 4286644096 }
  0x65   :  { %v152_v25 = vld [vmem:[%s1385_s0 + $0x23c] sm:$0xf]  ;;  %v708_v27 = vsel %vm153_vm0, %v136_v21, 4286644096 }
  0x66   :  { %v675_v20 = vmax.bf16 %v673_v13, %v671_v15  ;;  %v698_v22 = vmax.bf16 %v696_v14, %v694_v17  ;;  %v712_v29 = vsel %vm153_vm0, %v152_v25, 4286644096 }
  0x68   :  { %v679_v24 = vmax.bf16 %v677_v18, %v675_v20  ;;  %v702_v26 = vmax.bf16 %v700_v19, %v698_v22 }
  0x6a   :  { %729 = vst.msk [vmem:[%s1386_s1 + $0x38] sm:$0xf] %vm153_vm0, %v679_v24  ;;  %v706_v28 = vmax.bf16 %v704_v23, %v702_v26 }
  0x6c   :  { %v710_v30 = vmax.bf16 %v708_v27, %v706_v28 }
  0x6e   :  { %v714_v31 = vmax.bf16 %v712_v29, %v710_v30 }
  0x70   :  { %730 = vst.msk [vmem:[%s1386_s1 + $0x3c] sm:$0xf] %vm153_vm0, %v714_v31 }

// kernel: res18_feature_forward.25
= control target key start
LH: loop header
LB: loop body
LE: loop exit
PB: predicated region body
PF: predicated region fallthrough
CT: control target
= control target key end

     0   :  { %vm22_vm0 = vcmask 523264   ;;  %vm1100_vm1 = vcmask 519168   ;;  %s1964_s1 = inlined_call_operand.vmem [shape: bf16[640,64], index: 1, kind: input, shape index: {}]   ;;  %s1965_s0 = inlined_call_operand.vmem [shape: bf16[128,640], index: 0, kind: input, shape index: {}]   ;;  %s1966_s2 = inlined_call_operand.vmem [shape: f32[1,64], index: 2, kind: input, shape index: {}]   ;;  %s1967_s3 = inlined_call_operand.vmem [shape: f32[1,64], index: 3, kind: input, shape index: {}]   ;;  %s1968_s4 = inlined_call_operand.vmem [shape: bf16[128,64], index: 4, kind: output, shape index: {}]  }
   0x1   :  { %v1428_v0 = vld [vmem:[%s1964_s1 + $0x40] sm:$0xff]   ;;  %v1432_v4 = vld [vmem:[%s1964_s1 + $0x48] sm:$0xff]   ;;  %v1436_v8 = vld [vmem:[%s1964_s1 + $0x50] sm:$0xff]  }
   0x2   :  { %v1429_v1 = vld [vmem:[%s1964_s1 + $0xc0] sm:$0xff]   ;;  %1235 = vmatprep.subr.bf16.mxu0 %v1428_v0  ;;  %v1433_v5 = vld [vmem:[%s1964_s1 + $0xc8] sm:$0xff]   ;;  %v1437_v9 = vld [vmem:[%s1964_s1 + $0xd0] sm:$0xff]  }
   0x3   :  { %v1430_v2 = vld [vmem:[%s1964_s1] sm:$0xff]   ;;  %1299 = vmatprep.subr.bf16.mxu1 %v1429_v1  ;;  %v1434_v6 = vld [vmem:[%s1964_s1 + $0x8] sm:$0xff]   ;;  %v1438_v10 = vld [vmem:[%s1964_s1 + $0x10] sm:$0xff]  }
   0x4   :  { %v1431_v3 = vld [vmem:[%s1964_s1 + $0x80] sm:$0xff]   ;;  %1236 = vmatpush3.bf16.msra.mxu0 %v1430_v2  ;;  %v1435_v7 = vld [vmem:[%s1964_s1 + $0x88] sm:$0xff]   ;;  %v1439_v11 = vld [vmem:[%s1964_s1 + $0x90] sm:$0xff]  }
   0x5   :  { %1300 = vmatpush3.bf16.msra.mxu1 %v1431_v3  ;;  %1237 = vmatprep.subr.bf16.mxu0 %v1432_v4  ;;  %v1440_v12 = vld [vmem:[%s1964_s1 + $0x58] sm:$0xff]   ;;  %v1444_v16 = vld [vmem:[%s1964_s1 + $0x60] sm:$0xff]   ;;  %v1448_v20 = vld [vmem:[%s1964_s1 + $0x68] sm:$0xff]  }
   0x6   :  { %1301 = vmatprep.subr.bf16.mxu1 %v1433_v5  ;;  %v1441_v13 = vld [vmem:[%s1964_s1 + $0xd8] sm:$0xff]   ;;  %v1445_v17 = vld [vmem:[%s1964_s1 + $0xe0] sm:$0xff]   ;;  %v1449_v21 = vld [vmem:[%s1964_s1 + $0xe8] sm:$0xff]  }
   0x7   :  { %v1442_v14 = vld [vmem:[%s1964_s1 + $0x18] sm:$0xff]   ;;  %v1446_v18 = vld [vmem:[%s1964_s1 + $0x20] sm:$0xff]   ;;  %v1450_v22 = vld [vmem:[%s1964_s1 + $0x28] sm:$0xff]  }
   0x8   :  { %1238 = vmatpush3.bf16.msra.mxu0 %v1434_v6  ;;  %v1443_v15 = vld [vmem:[%s1964_s1 + $0x98] sm:$0xff]   ;;  %v1447_v19 = vld [vmem:[%s1964_s1 + $0xa0] sm:$0xff]   ;;  %v1451_v23 = vld [vmem:[%s1964_s1 + $0xa8] sm:$0xff]  }
   0x9   :  { %1302 = vmatpush3.bf16.msra.mxu1 %v1435_v7  ;;  %1239 = vmatprep.subr.bf16.mxu0 %v1436_v8  ;;  %v1452_v24 = vld [vmem:[%s1964_s1 + $0x70] sm:$0xff]   ;;  %v1456_v28 = vld [vmem:[%s1964_s1 + $0x78] sm:$0xff]   ;;  %v1465_v35 = vld [vmem:[%s1965_s0 + $0xc] ss:$20 sps:$4 sm:$0xff]  }
   0xa   :  { %1303 = vmatprep.subr.bf16.mxu1 %v1437_v9  ;;  %v1453_v25 = vld [vmem:[%s1964_s1 + $0xf0] sm:$0xff]   ;;  %v1457_v29 = vld [vmem:[%s1964_s1 + $0xf8] sm:$0xff]   ;;  %v1466_v36 = vld [vmem:[%s1964_s1 + $0x100] sm:$0xff]   ;;  %760 = vmatprep.mubr.bf16.mxu1 %v1465_v35 }
   0xb   :  { %v1454_v26 = vld [vmem:[%s1964_s1 + $0x30] sm:$0xff]   ;;  %v1458_v30 = vld [vmem:[%s1964_s1 + $0x38] sm:$0xff]   ;;  %v1467_v37 = vld [vmem:[%s1965_s0 + $0x2c] ss:$20 sps:$4 sm:$0xff]  }
   0xc   :  { %1240 = vmatpush3.bf16.msra.mxu0 %v1438_v10  ;;  %v1455_v27 = vld [vmem:[%s1964_s1 + $0xb0] sm:$0xff]   ;;  %v1459_v31 = vld [vmem:[%s1964_s1 + $0xb8] sm:$0xff]   ;;  %v1473_v39 = vld [vmem:[%s1964_s1 + $0x108] sm:$0xff]  }
   0xd   :  { %1304 = vmatpush3.bf16.msra.mxu1 %v1439_v11  ;;  %1241 = vmatprep.subr.bf16.mxu0 %v1440_v12  ;;  %v1460_v32 = vld [vmem:[%s1965_s0] ss:$20 sps:$4 sm:$0xff]   ;;  %v1462_v33 = vld [vmem:[%s1965_s0 + $0x4] ss:$20 sps:$4 sm:$0xff]   ;;  %v1463_v34 = vld [vmem:[%s1965_s0 + $0x8] ss:$20 sps:$4 sm:$0xff]  }
   0xe   :  { %1305 = vmatprep.subr.bf16.mxu1 %v1441_v13  ;;  %663 = vmatprep.mubr.bf16.mxu0 %v1462_v33  ;;  %v1469_v38 = vld [vmem:[%s1965_s0 + $0x34] ss:$20 sps:$4 sm:$0xff]   ;;  %v1472_v41 = vld [vmem:[%s1965_s0 + $0x30] ss:$20 sps:$4 sm:$0xff]   ;;  %v1487_v45 = vld [vmem:[%s1964_s1 + $0x118] sm:$0xff]  }
   0xf   :  { %v1471_v40 = vld [vmem:[%s1965_s0 + $0x28] ss:$20 sps:$4 sm:$0xff]   ;;  %v1480_v44 = vld [vmem:[%s1964_s1 + $0x110] sm:$0xff]   ;;  %v1479_v47 = vld [vmem:[%s1965_s0 + $0x58] ss:$20 sps:$4 sm:$0xff]  }
  0x10   :  { %1242 = vmatpush3.bf16.msra.mxu0 %v1442_v14  ;;  %v1474_v42 = vld [vmem:[%s1965_s0 + $0x54] ss:$20 sps:$4 sm:$0xff]   ;;  %v1476_v43 = vld [vmem:[%s1965_s0 + $0x5c] ss:$20 sps:$4 sm:$0xff]   ;;  %v1483_v49 = vld [vmem:[%s1965_s0 + $0x84] ss:$20 sps:$4 sm:$0xff]  }
  0x11   :  { %1306 = vmatpush3.bf16.msra.mxu1 %v1443_v15  ;;  %1243 = vmatprep.subr.bf16.mxu0 %v1444_v16  ;;  %v1478_v46 = vld [vmem:[%s1965_s0 + $0x50] ss:$20 sps:$4 sm:$0xff]   ;;  %v1501_v51 = vld [vmem:[%s1964_s1 + $0x128] sm:$0xff]   ;;  %v1486_v53 = vld [vmem:[%s1965_s0 + $0x80] ss:$20 sps:$4 sm:$0xff]   ;;  %v1524_v16 = vmov 0.0  }
  0x12   :  { %1307 = vmatprep.subr.bf16.mxu1 %v1445_v17  ;;  %v1481_v48 = vld [vmem:[%s1965_s0 + $0x7c] ss:$20 sps:$4 sm:$0xff]   ;;  %v1494_v50 = vld [vmem:[%s1964_s1 + $0x120] sm:$0xff]   ;;  %v1485_v52 = vld [vmem:[%s1965_s0 + $0x78] ss:$20 sps:$4 sm:$0xff]   ;;  %25 = vst.msk [vmem:[#allocation2 + $0x10] sm:$0xff] %vm22_vm0, %v1524_v16 }
  0x13   :  { %v1488_v54 = vld [vmem:[%s1965_s0 + $0xa4] ss:$20 sps:$4 sm:$0xff]   ;;  %v1508_v55 = vld [vmem:[%s1964_s1 + $0x130] sm:$0xff]   ;;  %v1490_v56 = vld [vmem:[%s1965_s0 + $0xac] ss:$20 sps:$4 sm:$0xff]   ;;  %23 = vst.msk [vmem:[#allocation2] sm:$0xff] %vm22_vm0, %v1524_v16 }
  0x14   :  { %1244 = vmatpush3.bf16.msra.mxu0 %v1446_v18  ;;  %v1515_v57 = vld [vmem:[%s1964_s1 + $0x138] sm:$0xff]   ;;  %v1492_v58 = vld [vmem:[%s1965_s0 + $0xa0] ss:$20 sps:$4 sm:$0xff]   ;;  %v1500_v63 = vld [vmem:[%s1965_s0 + $0xd0] ss:$20 sps:$4 sm:$0xff]   ;;  %24 = vst.msk [vmem:[#allocation2 + $0x8] sm:$0xff] %vm22_vm0, %v1524_v16 }
  0x15   :  { %1308 = vmatpush3.bf16.msra.mxu1 %v1447_v19  ;;  %1245 = vmatprep.subr.bf16.mxu0 %v1448_v20  ;;  %v1493_v59 = vld [vmem:[%s1965_s0 + $0xa8] ss:$20 sps:$4 sm:$0xff]   ;;  %v1495_v60 = vld [vmem:[%s1965_s0 + $0xcc] ss:$20 sps:$4 sm:$0xff]   ;;  %v1506_v2 = vld [vmem:[%s1965_s0 + $0xf0] ss:$20 sps:$4 sm:$0xff]  }
  0x16   :  { %1309 = vmatprep.subr.bf16.mxu1 %v1449_v21  ;;  %v1497_v61 = vld [vmem:[%s1965_s0 + $0xd4] ss:$20 sps:$4 sm:$0xff]   ;;  %v1504_v1 = vld [vmem:[%s1965_s0 + $0xfc] ss:$20 sps:$4 sm:$0xff]   ;;  %v1507_v3 = vld [vmem:[%s1965_s0 + $0xf8] ss:$20 sps:$4 sm:$0xff]  }
  0x17   :  { %v1499_v62 = vld [vmem:[%s1965_s0 + $0xc8] ss:$20 sps:$4 sm:$0xff]   ;;  %v1511_v5 = vld [vmem:[%s1965_s0 + $0x124] ss:$20 sps:$4 sm:$0xff]   ;;  %v1514_v7 = vld [vmem:[%s1965_s0 + $0x120] ss:$20 sps:$4 sm:$0xff]  }
  0x18   :  { %1246 = vmatpush3.bf16.msra.mxu0 %v1450_v22  ;;  %v1502_v0 = vld [vmem:[%s1965_s0 + $0xf4] ss:$20 sps:$4 sm:$0xff]   ;;  %v1509_v4 = vld [vmem:[%s1965_s0 + $0x11c] ss:$20 sps:$4 sm:$0xff]   ;;  %v1513_v6 = vld [vmem:[%s1965_s0 + $0x118] ss:$20 sps:$4 sm:$0xff]  }
  0x19   :  { %1310 = vmatpush3.bf16.msra.mxu1 %v1451_v23  ;;  %1247 = vmatprep.subr.bf16.mxu0 %v1452_v24  ;;  %v1516_v8 = vld [vmem:[%s1965_s0 + $0x10] ss:$20 sps:$4 sm:$0xff]   ;;  %v1518_v10 = vld [vmem:[%s1965_s0 + $0x38] ss:$20 sps:$4 sm:$0xff]   ;;  %v1520_v12 = vld [vmem:[%s1965_s0 + $0x60] ss:$20 sps:$4 sm:$0xff]  }
  0x1a   :  { %1311 = vmatprep.subr.bf16.mxu1 %v1453_v25  ;;  %v1517_v9 = vld [vmem:[%s1965_s0 + $0xb0] ss:$20 sps:$4 sm:$0xff]   ;;  %v1519_v11 = vld [vmem:[%s1965_s0 + $0xd8] ss:$20 sps:$4 sm:$0xff]   ;;  %v1521_v13 = vld [vmem:[%s1965_s0 + $0x100] ss:$20 sps:$4 sm:$0xff]  }
  0x1b   :  { %v1522_v14 = vld [vmem:[%s1965_s0 + $0x88] ss:$20 sps:$4 sm:$0xff]   ;;  %26 = vst.msk [vmem:[#allocation2 + $0x18] sm:$0xff] %vm22_vm0, %v1524_v16  ;;  %27 = vst.msk [vmem:[#allocation2 + $0x20] sm:$0xff] %vm22_vm0, %v1524_v16 }
  0x1c   :  { %1248 = vmatpush3.bf16.msra.mxu0 %v1454_v26  ;;  %v1523_v15 = vld [vmem:[%s1965_s0 + $0x128] ss:$20 sps:$4 sm:$0xff]   ;;  %28 = vst.msk [vmem:[#allocation2 + $0x28] sm:$0xff] %vm22_vm0, %v1524_v16  ;;  %29 = vst.msk [vmem:[#allocation2 + $0x30] sm:$0xff] %vm22_vm0, %v1524_v16 }
  0x1d   :  { %1312 = vmatpush3.bf16.msra.mxu1 %v1455_v27  ;;  %1249 = vmatprep.subr.bf16.mxu0 %v1456_v28  ;;  %30 = vst.msk [vmem:[#allocation2 + $0x38] sm:$0xff] %vm22_vm0, %v1524_v16  ;;  %31 = vst.msk [vmem:[#allocation2 + $0x40] sm:$0xff] %vm22_vm0, %v1524_v16 }
  0x1e   :  { %1313 = vmatprep.subr.bf16.mxu1 %v1457_v29  ;;  %32 = vst.msk [vmem:[#allocation2 + $0x48] sm:$0xff] %vm22_vm0, %v1524_v16  ;;  %33 = vst.msk [vmem:[#allocation2 + $0x50] sm:$0xff] %vm22_vm0, %v1524_v16 }
  0x1f   :  { %34 = vst.msk [vmem:[#allocation2 + $0x58] sm:$0xff] %vm22_vm0, %v1524_v16  ;;  %35 = vst.msk [vmem:[#allocation2 + $0x60] sm:$0xff] %vm22_vm0, %v1524_v16 }
  0x20   :  { %1250 = vmatpush3.bf16.msra.mxu0 %v1458_v30  ;;  %36 = vst.msk [vmem:[#allocation2 + $0x68] sm:$0xff] %vm22_vm0, %v1524_v16  ;;  %37 = vst.msk [vmem:[#allocation2 + $0x70] sm:$0xff] %vm22_vm0, %v1524_v16 }
  0x21   :  { %1314 = vmatpush3.bf16.msra.mxu1 %v1459_v31  ;;  %1379 = vmatprep.subr.bf16.mxu0 %v1466_v36  ;;  %38 = vst.msk [vmem:[#allocation2 + $0x78] sm:$0xff] %vm22_vm0, %v1524_v16 }
  0x22   :  { %1411 = vmatprep.subr.bf16.mxu1 %v1466_v36 }
  0x23   :  { %664 = vmatmul.mubr.bf16.vlgmr.msra.gmra.mrb[0].mxu0 %v1460_v32 }
  0x24   :  { %761 = vmatmul.mubr.bf16.vlgmr.msra.gmra.mrb[0].mxu1 %v1463_v34  ;;  %1380 = vmatpush3.bf16.msra.mxu0 %v1466_v36 }
  0x25   :  { %1419 = vmatpush3.bf16.msra.mxu1 %v1466_v36  ;;  %671 = vmatprep.mubr.bf16.mxu0 %v1467_v37 }
  0x26   :  { %768 = vmatprep.mubr.bf16.mxu1 %v1469_v38  ;;  %1381 = vmatprep.subr.bf16.mxu0 %v1473_v39 }
  0x27   :  { %1412 = vmatprep.subr.bf16.mxu1 %v1473_v39 }
  0x28   :  { %1382 = vmatpush3.bf16.msra.mxu0 %v1473_v39 }
  0x29   :  { %1420 = vmatpush3.bf16.msra.mxu1 %v1473_v39  ;;  %1383 = vmatprep.subr.bf16.mxu0 %v1480_v44 }
  0x2a   :  { %1413 = vmatprep.subr.bf16.mxu1 %v1480_v44 }
  0x2b   :  { %672 = vmatmul.mubr.bf16.gmra.mrb[4].mxu0 %v1471_v40 }
  0x2c   :  { %769 = vmatmul.mubr.bf16.gmra.mrb[4].mxu1 %v1472_v41  ;;  %679 = vmatprep.mubr.bf16.mxu0 %v1474_v42 }
  0x2d   :  { %776 = vmatprep.mubr.bf16.mxu1 %v1476_v43  ;;  %1384 = vmatpush3.bf16.msra.mxu0 %v1480_v44 }
  0x2e   :  { %1421 = vmatpush3.bf16.msra.mxu1 %v1480_v44  ;;  %1385 = vmatprep.subr.bf16.mxu0 %v1487_v45 }
  0x2f   :  { %1414 = vmatprep.subr.bf16.mxu1 %v1487_v45 }
  0x31   :  { %1386 = vmatpush3.bf16.msra.mxu0 %v1487_v45 }
  0x32   :  { %1422 = vmatpush3.bf16.msra.mxu1 %v1487_v45  ;;  %1387 = vmatprep.subr.bf16.mxu0 %v1494_v50 }
  0x33   :  { %680 = vmatmul.mubr.bf16.gmra.mrb[8].mxu0 %v1478_v46  ;;  %1415 = vmatprep.subr.bf16.mxu1 %v1494_v50 }
  0x34   :  { %777 = vmatmul.mubr.bf16.gmra.mrb[8].mxu1 %v1479_v47  ;;  %687 = vmatprep.mubr.bf16.mxu0 %v1481_v48 }
  0x35   :  { %784 = vmatprep.mubr.bf16.mxu1 %v1483_v49  ;;  %1388 = vmatpush3.bf16.msra.mxu0 %v1494_v50 }
  0x36   :  { %1423 = vmatpush3.bf16.msra.mxu1 %v1494_v50  ;;  %1389 = vmatprep.subr.bf16.mxu0 %v1501_v51 }
  0x37   :  { %1416 = vmatprep.subr.bf16.mxu1 %v1501_v51 }
  0x39   :  { %1390 = vmatpush3.bf16.msra.mxu0 %v1501_v51 }
  0x3a   :  { %1424 = vmatpush3.bf16.msra.mxu1 %v1501_v51  ;;  %1391 = vmatprep.subr.bf16.mxu0 %v1508_v55 }
  0x3b   :  { %688 = vmatmul.mubr.bf16.gmra.mrb[12].mxu0 %v1485_v52  ;;  %1417 = vmatprep.subr.bf16.mxu1 %v1508_v55 }
  0x3c   :  { %785 = vmatmul.mubr.bf16.gmra.mrb[12].mxu1 %v1486_v53  ;;  %695 = vmatprep.mubr.bf16.mxu0 %v1488_v54 }
  0x3d   :  { %792 = vmatprep.mubr.bf16.mxu1 %v1490_v56  ;;  %1392 = vmatpush3.bf16.msra.mxu0 %v1508_v55 }
  0x3e   :  { %1425 = vmatpush3.bf16.msra.mxu1 %v1508_v55  ;;  %1393 = vmatprep.subr.bf16.mxu0 %v1515_v57 }
  0x3f   :  { %1418 = vmatprep.subr.bf16.mxu1 %v1515_v57 }
  0x41   :  { %1394 = vmatpush3.bf16.msra.mxu0 %v1515_v57 }
  0x42   :  { %1426 = vmatpush3.bf16.msra.mxu1 %v1515_v57 }
  0x43   :  { %696 = vmatmul.mubr.bf16.gmra.mrb[16].mxu0 %v1492_v58 }
  0x44   :  { %793 = vmatmul.mubr.bf16.gmra.mrb[16].mxu1 %v1493_v59  ;;  %703 = vmatprep.mubr.bf16.mxu0 %v1495_v60 }
  0x45   :  { %800 = vmatprep.mubr.bf16.mxu1 %v1497_v61 }
  0x4b   :  { %704 = vmatmul.mubr.bf16.gmra.mrb[20].mxu0 %v1499_v62 }
  0x4c   :  { %801 = vmatmul.mubr.bf16.gmra.mrb[20].mxu1 %v1500_v63  ;;  %711 = vmatprep.mubr.bf16.mxu0 %v1502_v0 }
  0x4d   :  { %808 = vmatprep.mubr.bf16.mxu1 %v1504_v1 }
  0x53   :  { %712 = vmatmul.mubr.bf16.gmra.mrb[24].mxu0 %v1506_v2 }
  0x54   :  { %809 = vmatmul.mubr.bf16.gmra.mrb[24].mxu1 %v1507_v3  ;;  %719 = vmatprep.mubr.bf16.mxu0 %v1509_v4 }
  0x55   :  { %816 = vmatprep.mubr.bf16.mxu1 %v1511_v5 }
  0x5b   :  { %720 = vmatmul.mubr.bf16.gmra.mrb[28].mxu0 %v1513_v6 }
  0x5c   :  { %817 = vmatmul.mubr.bf16.gmra.mrb[28].mxu1 %v1514_v7  ;;  %1395 = vmatprep.mubr.bf16.mxu0 %v1516_v8 }
  0x5d   :  { %1403 = vmatprep.mubr.bf16.mxu1 %v1517_v9 }
  0x63   :  { %1396 = vmatmul.mubr.bf16.vlgmr.msra.gmra.mrb[32].mxu0 %v1518_v10 }
  0x64   :  { %1404 = vmatmul.mubr.bf16.vlgmr.msra.gmra.mrb[32].mxu1 %v1519_v11  ;;  %1399 = vmatprep.mubr.bf16.mxu0 %v1520_v12 }
  0x65   :  { %1407 = vmatprep.mubr.bf16.mxu1 %v1521_v13 }
  0x6b   :  { %1400 = vmatmul.mubr.bf16.gmra.mrb[36].mxu0 %v1522_v14 }
  0x6c   :  { %1408 = vmatmul.mubr.bf16.gmra.mrb[36].mxu1 %v1523_v15 }
  0xf6   :  { %v1251_v17 = vpop.f32.mrb[0].mxu0 }
  0xf7   :  { %v1315_v18 = vpop.f32.mrb[0].mxu1  ;;  %v1252_v19 = vpop.f32.mrb[1].mxu0 }
  0xf8   :  { %v1253_v20 = vadd.f32 %v1252_v19, %v1251_v17  ;;  %v1316_v21 = vpop.f32.mrb[1].mxu1  ;;  %v1254_v22 = vpop.f32.mrb[2].mxu0 }
  0xf9   :  { %v1317_v23 = vadd.f32 %v1316_v21, %v1315_v18  ;;  %v1318_v24 = vpop.f32.mrb[2].mxu1  ;;  %v1255_v25 = vpop.f32.mrb[3].mxu0 }
  0xfa   :  { %v1256_v26 = vadd.f32 %v1255_v25, %v1254_v22  ;;  %v1319_v27 = vpop.f32.mrb[3].mxu1 }
  0xfb   :  { %v1320_v28 = vadd.f32 %v1319_v27, %v1318_v24  ;;  %v1806_v29 = vadd.f32 %v1317_v23, %v1253_v20 }
  0xfd   :  { %v1808_v30 = vadd.f32 %v1320_v28, %v1256_v26 }
  0xfe   :  { %v1257_v31 = vpop.f32.mrb[4].mxu0 }
  0xff   :  { %v1321_v32 = vpop.f32.mrb[4].mxu1  ;;  %v1258_v33 = vpop.f32.mrb[5].mxu0 }
 0x100   :  { %v1259_v34 = vadd.f32 %v1258_v33, %v1257_v31  ;;  %v1322_v35 = vpop.f32.mrb[5].mxu1  ;;  %v1260_v36 = vpop.f32.mrb[6].mxu0 }
 0x101   :  { %v1323_v37 = vadd.f32 %v1322_v35, %v1321_v32  ;;  %v1324_v38 = vpop.f32.mrb[6].mxu1  ;;  %v1261_v39 = vpop.f32.mrb[7].mxu0 }
 0x102   :  { %v1262_v40 = vadd.f32 %v1261_v39, %v1260_v36  ;;  %v1325_v41 = vpop.f32.mrb[7].mxu1 }
 0x103   :  { %v1326_v42 = vadd.f32 %v1325_v41, %v1324_v38  ;;  %v1810_v43 = vadd.f32 %v1323_v37, %v1259_v34 }
 0x105   :  { %v1812_v44 = vadd.f32 %v1326_v42, %v1262_v40 }
 0x106   :  { %v1263_v45 = vpop.f32.mrb[8].mxu0 }
 0x107   :  { %v1327_v46 = vpop.f32.mrb[8].mxu1  ;;  %v1264_v47 = vpop.f32.mrb[9].mxu0 }
 0x108   :  { %v1265_v48 = vadd.f32 %v1264_v47, %v1263_v45  ;;  %v1328_v49 = vpop.f32.mrb[9].mxu1  ;;  %v1266_v50 = vpop.f32.mrb[10].mxu0 }
 0x109   :  { %v1329_v51 = vadd.f32 %v1328_v49, %v1327_v46  ;;  %v1330_v52 = vpop.f32.mrb[10].mxu1  ;;  %v1267_v53 = vpop.f32.mrb[11].mxu0 }
 0x10a   :  { %v1268_v54 = vadd.f32 %v1267_v53, %v1266_v50  ;;  %v1331_v55 = vpop.f32.mrb[11].mxu1 }
 0x10b   :  { %v1332_v56 = vadd.f32 %v1331_v55, %v1330_v52  ;;  %v1814_v57 = vadd.f32 %v1329_v51, %v1265_v48 }
 0x10d   :  { %v1816_v58 = vadd.f32 %v1332_v56, %v1268_v54 }
 0x10e   :  { %v1269_v59 = vpop.f32.mrb[12].mxu0 }
 0x10f   :  { %v1333_v60 = vpop.f32.mrb[12].mxu1  ;;  %v1270_v61 = vpop.f32.mrb[13].mxu0 }
 0x110   :  { %v1271_v62 = vadd.f32 %v1270_v61, %v1269_v59  ;;  %v1334_v63 = vpop.f32.mrb[13].mxu1  ;;  %v1272_v0 = vpop.f32.mrb[14].mxu0 }
 0x111   :  { %v1335_v1 = vadd.f32 %v1334_v63, %v1333_v60  ;;  %v1336_v2 = vpop.f32.mrb[14].mxu1  ;;  %v1273_v3 = vpop.f32.mrb[15].mxu0 }
 0x112   :  { %v1274_v4 = vadd.f32 %v1273_v3, %v1272_v0  ;;  %v1337_v5 = vpop.f32.mrb[15].mxu1 }
 0x113   :  { %v1338_v6 = vadd.f32 %v1337_v5, %v1336_v2  ;;  %v1818_v7 = vadd.f32 %v1335_v1, %v1271_v62 }
 0x115   :  { %v1820_v8 = vadd.f32 %v1338_v6, %v1274_v4 }
 0x116   :  { %v1275_v9 = vpop.f32.mrb[16].mxu0 }
 0x117   :  { %v1339_v10 = vpop.f32.mrb[16].mxu1  ;;  %v1276_v11 = vpop.f32.mrb[17].mxu0 }
 0x118   :  { %v1277_v12 = vadd.f32 %v1276_v11, %v1275_v9  ;;  %v1340_v13 = vpop.f32.mrb[17].mxu1  ;;  %v1278_v14 = vpop.f32.mrb[18].mxu0  ;;  %v41_v9 = vld [vmem:[#allocation2 + $0x10] sm:$0xff] }
 0x119   :  { %v1341_v15 = vadd.f32 %v1340_v13, %v1339_v10  ;;  %v1342_v16 = vpop.f32.mrb[18].mxu1  ;;  %v1279_v17 = vpop.f32.mrb[19].mxu0 }
 0x11a   :  { %v1280_v18 = vadd.f32 %v1279_v17, %v1278_v14  ;;  %v1343_v19 = vpop.f32.mrb[19].mxu1  ;;  %v39_v14 = vld [vmem:[#allocation2] sm:$0xff] }
 0x11b   :  { %v1344_v20 = vadd.f32 %v1343_v19, %v1342_v16  ;;  %v795_v21 = vadd.f32 %v1341_v15, %v1277_v12  ;;  %v49_v12 = vld [vmem:[#allocation2 + $0x50] sm:$0xff] }
 0x11d   :  { %v1822_v22 = vadd.f32 %v1344_v20, %v1280_v18  ;;  %v47_v18 = vld [vmem:[#allocation2 + $0x40] sm:$0xff]  ;;  %v42_v20 = vld [vmem:[#allocation2 + $0x18] sm:$0xff] }
 0x11e   :  { %v1281_v23 = vpop.f32.mrb[20].mxu0 }
 0x11f   :  { %v1345_v24 = vpop.f32.mrb[20].mxu1  ;;  %v1282_v25 = vpop.f32.mrb[21].mxu0 }
 0x120   :  { %v1283_v26 = vadd.f32 %v1282_v25, %v1281_v23  ;;  %v1346_v27 = vpop.f32.mrb[21].mxu1  ;;  %v1284_v28 = vpop.f32.mrb[22].mxu0 }
 0x121   :  { %v1347_v31 = vadd.f32 %v1346_v27, %v1345_v24  ;;  %v1348_v32 = vpop.f32.mrb[22].mxu1  ;;  %v1285_v33 = vpop.f32.mrb[23].mxu0  ;;  %v50_v27 = vld [vmem:[#allocation2 + $0x58] sm:$0xff] }
 0x122   :  { %v1286_v34 = vadd.f32 %v1285_v33, %v1284_v28  ;;  %v1349_v35 = vpop.f32.mrb[23].mxu1 }
 0x123   :  { %v1350_v36 = vadd.f32 %v1349_v35, %v1348_v32  ;;  %v803_v37 = vadd.f32 %v1347_v31, %v1283_v26  ;;  %v40_v31 = vld [vmem:[#allocation2 + $0x8] sm:$0xff] }
 0x125   :  { %v806_v38 = vadd.f32 %v1350_v36, %v1286_v34  ;;  %v48_v36 = vld [vmem:[#allocation2 + $0x48] sm:$0xff] }
 0x126   :  { %v1287_v39 = vpop.f32.mrb[24].mxu0 }
 0x127   :  { %v1351_v40 = vpop.f32.mrb[24].mxu1  ;;  %v1288_v41 = vpop.f32.mrb[25].mxu0 }
 0x128   :  { %v1289_v42 = vadd.f32 %v1288_v41, %v1287_v39  ;;  %v1352_v45 = vpop.f32.mrb[25].mxu1  ;;  %v1290_v46 = vpop.f32.mrb[26].mxu0 }
 0x129   :  { %v1353_v47 = vadd.f32 %v1352_v45, %v1351_v40  ;;  %v1354_v48 = vpop.f32.mrb[26].mxu1  ;;  %v1291_v49 = vpop.f32.mrb[27].mxu0 }
 0x12a   :  { %v1292_v50 = vadd.f32 %v1291_v49, %v1290_v46  ;;  %v1355_v51 = vpop.f32.mrb[27].mxu1  ;;  %v43_v46 = vld [vmem:[#allocation2 + $0x20] sm:$0xff] }
 0x12b   :  { %v1356_v52 = vadd.f32 %v1355_v51, %v1354_v48  ;;  %v1824_v53 = vadd.f32 %v1353_v47, %v1289_v42  ;;  %v53_v42 = vld [vmem:[#allocation2 + $0x70] sm:$0xff]  ;;  %v1847_v48 = vld [vmem:[%s1966_s2] ss:$0 sm:$0xff] }
 0x12c   :  { %v51_v51 = vld [vmem:[#allocation2 + $0x60] sm:$0xff] }
 0x12d   :  { %v1826_v54 = vadd.f32 %v1356_v52, %v1292_v50 }
 0x12e   :  { %v1293_v55 = vpop.f32.mrb[28].mxu0 }
 0x12f   :  { %v1357_v56 = vpop.f32.mrb[28].mxu1  ;;  %v1294_v59 = vpop.f32.mrb[29].mxu0 }
 0x130   :  { %v1295_v60 = vadd.f32 %v1294_v59, %v1293_v55  ;;  %v1358_v61 = vpop.f32.mrb[29].mxu1  ;;  %v1296_v62 = vpop.f32.mrb[30].mxu0  ;;  %v46_v55 = vld [vmem:[#allocation2 + $0x38] sm:$0xff] }
 0x131   :  { %v1359_v63 = vadd.f32 %v1358_v61, %v1357_v56  ;;  %v1360_v0 = vpop.f32.mrb[30].mxu1  ;;  %v1297_v1 = vpop.f32.mrb[31].mxu0  ;;  %v54_v61 = vld [vmem:[#allocation2 + $0x78] sm:$0xff] }
 0x132   :  { %v1298_v2 = vadd.f32 %v1297_v1, %v1296_v62  ;;  %v1361_v3 = vpop.f32.mrb[31].mxu1 }
 0x133   :  { %v1362_v4 = vadd.f32 %v1361_v3, %v1360_v0  ;;  %v819_v5 = vadd.f32 %v1359_v63, %v1295_v60  ;;  %v44_v63 = vld [vmem:[#allocation2 + $0x28] sm:$0xff] }
 0x135   :  { %v1828_v6 = vadd.f32 %v1362_v4, %v1298_v2  ;;  %v1855_v2 = vld [vmem:[%s1967_s3] ss:$0 sm:$0xff] }
 0x136   :  { %v1397_v10 = vpop.f32.mrb[32].mxu0 }
 0x137   :  { %v868_v11 = vadd.f32 %v1397_v10, %v1810_v43  ;;  %v1405_v13 = vpop.f32.mrb[32].mxu1  ;;  %v859_v15 = vpop.f32.mrb[33].mxu0 }
 0x138   :  { %v900_v16 = vadd.f32 %v1405_v13, %v803_v37  ;;  %v860_v17 = vadd.f32 %v859_v15, %v1806_v29  ;;  %v891_v19 = vpop.f32.mrb[33].mxu1  ;;  %v1398_v23 = vpop.f32.mrb[34].mxu0 }
 0x139   :  { %v924_v24 = vadd.f32 %v868_v11, %v41_v9  ;;  %v892_v25 = vadd.f32 %v891_v19, %v795_v21  ;;  %v871_v26 = vadd.f32 %v1398_v23, %v1812_v44  ;;  %v1406_v28 = vpop.f32.mrb[34].mxu1  ;;  %v862_v32 = vpop.f32.mrb[35].mxu0  ;;  %v52_v9 = vld [vmem:[#allocation2 + $0x68] sm:$0xff] }
 0x13a   :  { %v932_v43 = vadd.f32 %v900_v16, %v49_v12  ;;  %v922_v33 = vadd.f32 %v860_v17, %v39_v14  ;;  %v903_v34 = vadd.f32 %v1406_v28, %v806_v38  ;;  %v863_v35 = vadd.f32 %v862_v32, %v1808_v30  ;;  %v894_v37 = vpop.f32.mrb[35].mxu1  ;;  %v45_v30 = vld [vmem:[#allocation2 + $0x30] sm:$0xff] }
 0x13b   :  { %941 = vst.msk [vmem:[#allocation2 + $0x10] sm:$0xff] %vm22_vm0, %v924_v24  ;;  %v930_v29 = vadd.f32 %v892_v25, %v47_v18  ;;  %v925_v39 = vadd.f32 %v871_v26, %v42_v20  ;;  %v895_v40 = vadd.f32 %v894_v37, %v1822_v22 }
 0x13c   :  { %949 = vst.msk [vmem:[#allocation2 + $0x50] sm:$0xff] %vm22_vm0, %v932_v43  ;;  %939 = vst.msk [vmem:[#allocation2] sm:$0xff] %vm22_vm0, %v922_v33  ;;  %v933_v44 = vadd.f32 %v903_v34, %v50_v27  ;;  %v923_v21 = vadd.f32 %v863_v35, %v40_v31 }
 0x13d   :  { %947 = vst.msk [vmem:[#allocation2 + $0x40] sm:$0xff] %vm22_vm0, %v930_v29  ;;  %942 = vst.msk [vmem:[#allocation2 + $0x18] sm:$0xff] %vm22_vm0, %v925_v39  ;;  %v931_v38 = vadd.f32 %v895_v40, %v48_v36 }
 0x13e   :  { %950 = vst.msk [vmem:[#allocation2 + $0x58] sm:$0xff] %vm22_vm0, %v933_v44  ;;  %940 = vst.msk [vmem:[#allocation2 + $0x8] sm:$0xff] %vm22_vm0, %v923_v21  ;;  %v1401_v41 = vpop.f32.mrb[36].mxu0 }
 0x13f   :  { %948 = vst.msk [vmem:[#allocation2 + $0x48] sm:$0xff] %vm22_vm0, %v931_v38  ;;  %v884_v22 = vadd.f32 %v1401_v41, %v1818_v7  ;;  %v1409_v45 = vpop.f32.mrb[36].mxu1  ;;  %v875_v47 = vpop.f32.mrb[37].mxu0 }
 0x140   :  { %v916_v49 = vadd.f32 %v1409_v45, %v819_v5  ;;  %v876_v50 = vadd.f32 %v875_v47, %v1814_v57  ;;  %v907_v52 = vpop.f32.mrb[37].mxu1  ;;  %v1402_v56 = vpop.f32.mrb[38].mxu0 }
 0x141   :  { %v928_v59 = vadd.f32 %v884_v22, %v45_v30  ;;  %v908_v7 = vadd.f32 %v907_v52, %v1824_v53  ;;  %v887_v60 = vadd.f32 %v1402_v56, %v1820_v8  ;;  %v1410_v62 = vpop.f32.mrb[38].mxu1  ;;  %v878_v0 = vpop.f32.mrb[39].mxu0 }
 0x142   :  { %v960_v1 = vld [vmem:[#allocation2 + $0x10] sm:$0xff]  ;;  %v936_v57 = vadd.f32 %v916_v49, %v53_v42  ;;  %v926_v3 = vadd.f32 %v876_v50, %v43_v46  ;;  %v919_v4 = vadd.f32 %v1410_v62, %v1828_v6  ;;  %v879_v5 = vadd.f32 %v878_v0, %v1816_v58  ;;  %v910_v53 = vpop.f32.mrb[39].mxu1 }
 0x143   :  { %v983_v8 = vmul.f32 %v1847_v48, %v960_v1  ;;  %v968_v10 = vld [vmem:[#allocation2 + $0x50] sm:$0xff]  ;;  %v958_v11 = vld [vmem:[#allocation2] sm:$0xff]  ;;  %945 = vst.msk [vmem:[#allocation2 + $0x30] sm:$0xff] %vm22_vm0, %v928_v59  ;;  %v934_v12 = vadd.f32 %v908_v7, %v51_v51  ;;  %v929_v13 = vadd.f32 %v887_v60, %v46_v55  ;;  %v911_v14 = vadd.f32 %v910_v53, %v1826_v54 }
 0x144   :  { %v991_v15 = vmul.f32 %v1847_v48, %v968_v10  ;;  %v981_v16 = vmul.f32 %v1847_v48, %v958_v11  ;;  %v966_v17 = vld [vmem:[#allocation2 + $0x40] sm:$0xff]  ;;  %v961_v6 = vld [vmem:[#allocation2 + $0x18] sm:$0xff]  ;;  %953 = vst.msk [vmem:[#allocation2 + $0x70] sm:$0xff] %vm22_vm0, %v936_v57  ;;  %943 = vst.msk [vmem:[#allocation2 + $0x20] sm:$0xff] %vm22_vm0, %v926_v3  ;;  %v937_v58 = vadd.f32 %v919_v4, %v54_v61 }
 0x145   :  { %v927_v18 = vadd.f32 %v879_v5, %v44_v63  ;;  %v1006_v19 = vadd.f32 %v1855_v2, %v983_v8  ;;  %v989_v20 = vmul.f32 %v1847_v48, %v966_v17  ;;  %v984_v23 = vmul.f32 %v1847_v48, %v961_v6  ;;  %v969_v24 = vld [vmem:[#allocation2 + $0x58] sm:$0xff]  ;;  %v959_v54 = vld [vmem:[#allocation2 + $0x8] sm:$0xff]  ;;  %951 = vst.msk [vmem:[#allocation2 + $0x60] sm:$0xff] %vm22_vm0, %v934_v12 }
 0x146   :  { %946 = vst.msk [vmem:[#allocation2 + $0x38] sm:$0xff] %vm22_vm0, %v929_v13  ;;  %v935_v25 = vadd.f32 %v911_v14, %v52_v9  ;;  %v1014_v26 = vadd.f32 %v1855_v2, %v991_v15  ;;  %v1004_v27 = vadd.f32 %v1855_v2, %v981_v16  ;;  %v992_v28 = vmul.f32 %v1847_v48, %v969_v24  ;;  %v967_v32 = vld [vmem:[#allocation2 + $0x48] sm:$0xff] }
 0x147   :  { %v982_v31 = vmul.f32 %v1847_v48, %v959_v54  ;;  %954 = vst.msk [vmem:[#allocation2 + $0x78] sm:$0xff] %vm22_vm0, %v937_v58  ;;  %944 = vst.msk [vmem:[#allocation2 + $0x28] sm:$0xff] %vm22_vm0, %v927_v18  ;;  %v1022_v43 = vmax.f32 %v1006_v19, 0.0  ;;  %v1012_v33 = vadd.f32 %v1855_v2, %v989_v20  ;;  %v1007_v34 = vadd.f32 %v1855_v2, %v984_v23 }
 0x148   :  { %v990_v35 = vmul.f32 %v1847_v48, %v967_v32  ;;  %952 = vst.msk [vmem:[#allocation2 + $0x68] sm:$0xff] %vm22_vm0, %v935_v25  ;;  %v1030_v36 = vmax.f32 %v1014_v26, 0.0  ;;  %v1020_v37 = vmax.f32 %v1004_v27, 0.0  ;;  %v1015_v29 = vadd.f32 %v1855_v2, %v992_v28 }
 0x149   :  { %v1005_v39 = vadd.f32 %v1855_v2, %v982_v31  ;;  %v1221_v40 = vpack.c.bf16 %v1022_v43, %v1022_v43  ;;  %v1028_v44 = vmax.f32 %v1012_v33, 0.0  ;;  %v1023_v21 = vmax.f32 %v1007_v34, 0.0 }
 0x14a   :  { %v1013_v38 = vadd.f32 %v1855_v2, %v990_v35  ;;  %v1229_v30 = vpack.c.bf16 %v1030_v36, %v1030_v36  ;;  %v1219_v41 = vpack.c.bf16 %v1020_v37, %v1020_v37  ;;  %v1031_v22 = vmax.f32 %v1015_v29, 0.0  ;;  %v964_v45 = vld [vmem:[#allocation2 + $0x30] sm:$0xff] }
 0x14b   :  { %v1021_v42 = vmax.f32 %v1005_v39, 0.0  ;;  %1103 = vst.msk [vmem:[%s1968_s4 + $0x8] sm:$0xf] %vm1100_vm1, %v1221_v40  ;;  %v1227_v46 = vpack.c.bf16 %v1028_v44, %v1028_v44  ;;  %v1222_v47 = vpack.c.bf16 %v1023_v21, %v1023_v21  ;;  %v987_v50 = vmul.f32 %v1847_v48, %v964_v45  ;;  %v972_v51 = vld [vmem:[#allocation2 + $0x70] sm:$0xff]  ;;  %v962_v52 = vld [vmem:[#allocation2 + $0x20] sm:$0xff] }
 0x14c   :  { %v1029_v49 = vmax.f32 %v1013_v38, 0.0  ;;  %1111 = vst.msk [vmem:[%s1968_s4 + $0x28] sm:$0xf] %vm1100_vm1, %v1229_v30  ;;  %1101 = vst.msk [vmem:[%s1968_s4] sm:$0xf] %vm1100_vm1, %v1219_v41  ;;  %v1230_v55 = vpack.c.bf16 %v1031_v22, %v1031_v22  ;;  %v995_v59 = vmul.f32 %v1847_v48, %v972_v51  ;;  %v985_v7 = vmul.f32 %v1847_v48, %v962_v52  ;;  %v970_v60 = vld [vmem:[#allocation2 + $0x60] sm:$0xff] }
 0x14d   :  { %v1220_v56 = vpack.c.bf16 %v1021_v42, %v1021_v42  ;;  %v965_v61 = vld [vmem:[#allocation2 + $0x38] sm:$0xff]  ;;  %1109 = vst.msk [vmem:[%s1968_s4 + $0x20] sm:$0xf] %vm1100_vm1, %v1227_v46  ;;  %1104 = vst.msk [vmem:[%s1968_s4 + $0xc] sm:$0xf] %vm1100_vm1, %v1222_v47  ;;  %v1010_v63 = vadd.f32 %v1855_v2, %v987_v50  ;;  %v993_v0 = vmul.f32 %v1847_v48, %v970_v60 }
 0x14e   :  { %v1228_v62 = vpack.c.bf16 %v1029_v49, %v1029_v49  ;;  %v988_v1 = vmul.f32 %v1847_v48, %v965_v61  ;;  %v973_v57 = vld [vmem:[#allocation2 + $0x78] sm:$0xff]  ;;  %v963_v3 = vld [vmem:[#allocation2 + $0x28] sm:$0xff]  ;;  %1112 = vst.msk [vmem:[%s1968_s4 + $0x2c] sm:$0xf] %vm1100_vm1, %v1230_v55  ;;  %v1018_v4 = vadd.f32 %v1855_v2, %v995_v59  ;;  %v1008_v5 = vadd.f32 %v1855_v2, %v985_v7 }
 0x14f   :  { %1102 = vst.msk [vmem:[%s1968_s4 + $0x4] sm:$0xf] %vm1100_vm1, %v1220_v56  ;;  %v996_v9 = vmul.f32 %v1847_v48, %v973_v57  ;;  %v986_v53 = vmul.f32 %v1847_v48, %v963_v3  ;;  %v971_v8 = vld [vmem:[#allocation2 + $0x68] sm:$0xff]  ;;  %v1026_v10 = vmax.f32 %v1010_v63, 0.0  ;;  %v1016_v11 = vadd.f32 %v1855_v2, %v993_v0 }
 0x150   :  { %1110 = vst.msk [vmem:[%s1968_s4 + $0x24] sm:$0xf] %vm1100_vm1, %v1228_v62  ;;  %v1011_v12 = vadd.f32 %v1855_v2, %v988_v1  ;;  %v994_v13 = vmul.f32 %v1847_v48, %v971_v8  ;;  %v1034_v14 = vmax.f32 %v1018_v4, 0.0  ;;  %v1024_v15 = vmax.f32 %v1008_v5, 0.0 }
 0x151   :  { %v1019_v16 = vadd.f32 %v1855_v2, %v996_v9  ;;  %v1009_v17 = vadd.f32 %v1855_v2, %v986_v53  ;;  %v1225_v6 = vpack.c.bf16 %v1026_v10, %v1026_v10  ;;  %v1032_v58 = vmax.f32 %v1016_v11, 0.0 }
 0x152   :  { %v1027_v18 = vmax.f32 %v1011_v12, 0.0  ;;  %v1017_v19 = vadd.f32 %v1855_v2, %v994_v13  ;;  %v1233_v20 = vpack.c.bf16 %v1034_v14, %v1034_v14  ;;  %v1223_v23 = vpack.c.bf16 %v1024_v15, %v1024_v15 }
 0x153   :  { %v1035_v24 = vmax.f32 %v1019_v16, 0.0  ;;  %v1025_v54 = vmax.f32 %v1009_v17, 0.0  ;;  %1107 = vst.msk [vmem:[%s1968_s4 + $0x18] sm:$0xf] %vm1100_vm1, %v1225_v6  ;;  %v1231_v48 = vpack.c.bf16 %v1032_v58, %v1032_v58 }
 0x154   :  { %v1226_v25 = vpack.c.bf16 %v1027_v18, %v1027_v18  ;;  %v1033_v26 = vmax.f32 %v1017_v19, 0.0  ;;  %1115 = vst.msk [vmem:[%s1968_s4 + $0x38] sm:$0xf] %vm1100_vm1, %v1233_v20  ;;  %1105 = vst.msk [vmem:[%s1968_s4 + $0x10] sm:$0xf] %vm1100_vm1, %v1223_v23 }
 0x155   :  { %v1234_v2 = vpack.c.bf16 %v1035_v24, %v1035_v24  ;;  %v1224_v27 = vpack.c.bf16 %v1025_v54, %v1025_v54  ;;  %1113 = vst.msk [vmem:[%s1968_s4 + $0x30] sm:$0xf] %vm1100_vm1, %v1231_v48 }
 0x156   :  { %1108 = vst.msk [vmem:[%s1968_s4 + $0x1c] sm:$0xf] %vm1100_vm1, %v1226_v25  ;;  %v1232_v28 = vpack.c.bf16 %v1033_v26, %v1033_v26 }
 0x157   :  { %1116 = vst.msk [vmem:[%s1968_s4 + $0x3c] sm:$0xf] %vm1100_vm1, %v1234_v2  ;;  %1106 = vst.msk [vmem:[%s1968_s4 + $0x14] sm:$0xf] %vm1100_vm1, %v1224_v27 }
 0x158   :  { %1114 = vst.msk [vmem:[%s1968_s4 + $0x34] sm:$0xf] %vm1100_vm1, %v1232_v28 }

// kernel: res18_feature_forward.26
= control target key start
LH: loop header
LB: loop body
LE: loop exit
PB: predicated region body
PF: predicated region fallthrough
CT: control target
= control target key end

     0   :  { %vm25_vm0 = vcmask 523264   ;;  %vm1151_vm1 = vcmask 519168   ;;  %s2153_s1 = inlined_call_operand.vmem [shape: bf16[640,64], index: 1, kind: input, shape index: {}]   ;;  %s2154_s0 = inlined_call_operand.vmem [shape: bf16[128,640], index: 0, kind: input, shape index: {}]   ;;  %s2155_s4 = inlined_call_operand.vmem [shape: bf16[128,64], index: 4, kind: input, shape index: {}]   ;;  %s2156_s2 = inlined_call_operand.vmem [shape: f32[1,64], index: 2, kind: input, shape index: {}]   ;;  %s2157_s3 = inlined_call_operand.vmem [shape: f32[1,64], index: 3, kind: input, shape index: {}]   ;;  %s2158_s5 = inlined_call_operand.vmem [shape: bf16[128,64], index: 5, kind: output, shape index: {}]  }
   0x1   :  { %v1518_v0 = vld [vmem:[%s2153_s1 + $0x40] sm:$0xff]   ;;  %v1522_v4 = vld [vmem:[%s2153_s1 + $0x48] sm:$0xff]   ;;  %v1526_v8 = vld [vmem:[%s2153_s1 + $0x50] sm:$0xff]  }
   0x2   :  { %v1519_v1 = vld [vmem:[%s2153_s1 + $0xc0] sm:$0xff]   ;;  %1325 = vmatprep.subr.bf16.mxu0 %v1518_v0  ;;  %v1523_v5 = vld [vmem:[%s2153_s1 + $0xc8] sm:$0xff]   ;;  %v1527_v9 = vld [vmem:[%s2153_s1 + $0xd0] sm:$0xff]  }
   0x3   :  { %v1520_v2 = vld [vmem:[%s2153_s1] sm:$0xff]   ;;  %1389 = vmatprep.subr.bf16.mxu1 %v1519_v1  ;;  %v1524_v6 = vld [vmem:[%s2153_s1 + $0x8] sm:$0xff]   ;;  %v1528_v10 = vld [vmem:[%s2153_s1 + $0x10] sm:$0xff]  }
   0x4   :  { %v1521_v3 = vld [vmem:[%s2153_s1 + $0x80] sm:$0xff]   ;;  %1326 = vmatpush3.bf16.msra.mxu0 %v1520_v2  ;;  %v1525_v7 = vld [vmem:[%s2153_s1 + $0x88] sm:$0xff]   ;;  %v1529_v11 = vld [vmem:[%s2153_s1 + $0x90] sm:$0xff]  }
   0x5   :  { %1390 = vmatpush3.bf16.msra.mxu1 %v1521_v3  ;;  %1327 = vmatprep.subr.bf16.mxu0 %v1522_v4  ;;  %v1530_v12 = vld [vmem:[%s2153_s1 + $0x58] sm:$0xff]   ;;  %v1534_v16 = vld [vmem:[%s2153_s1 + $0x60] sm:$0xff]   ;;  %v1538_v20 = vld [vmem:[%s2153_s1 + $0x68] sm:$0xff]  }
   0x6   :  { %1391 = vmatprep.subr.bf16.mxu1 %v1523_v5  ;;  %v1531_v13 = vld [vmem:[%s2153_s1 + $0xd8] sm:$0xff]   ;;  %v1535_v17 = vld [vmem:[%s2153_s1 + $0xe0] sm:$0xff]   ;;  %v1539_v21 = vld [vmem:[%s2153_s1 + $0xe8] sm:$0xff]  }
   0x7   :  { %v1532_v14 = vld [vmem:[%s2153_s1 + $0x18] sm:$0xff]   ;;  %v1536_v18 = vld [vmem:[%s2153_s1 + $0x20] sm:$0xff]   ;;  %v1540_v22 = vld [vmem:[%s2153_s1 + $0x28] sm:$0xff]  }
   0x8   :  { %1328 = vmatpush3.bf16.msra.mxu0 %v1524_v6  ;;  %v1533_v15 = vld [vmem:[%s2153_s1 + $0x98] sm:$0xff]   ;;  %v1537_v19 = vld [vmem:[%s2153_s1 + $0xa0] sm:$0xff]   ;;  %v1541_v23 = vld [vmem:[%s2153_s1 + $0xa8] sm:$0xff]  }
   0x9   :  { %1392 = vmatpush3.bf16.msra.mxu1 %v1525_v7  ;;  %1329 = vmatprep.subr.bf16.mxu0 %v1526_v8  ;;  %v1542_v24 = vld [vmem:[%s2153_s1 + $0x70] sm:$0xff]   ;;  %v1546_v28 = vld [vmem:[%s2153_s1 + $0x78] sm:$0xff]   ;;  %v1555_v35 = vld [vmem:[%s2154_s0 + $0xc] ss:$20 sps:$4 sm:$0xff]  }
   0xa   :  { %1393 = vmatprep.subr.bf16.mxu1 %v1527_v9  ;;  %v1543_v25 = vld [vmem:[%s2153_s1 + $0xf0] sm:$0xff]   ;;  %v1547_v29 = vld [vmem:[%s2153_s1 + $0xf8] sm:$0xff]   ;;  %v1556_v36 = vld [vmem:[%s2153_s1 + $0x100] sm:$0xff]   ;;  %763 = vmatprep.mubr.bf16.mxu1 %v1555_v35 }
   0xb   :  { %v1544_v26 = vld [vmem:[%s2153_s1 + $0x30] sm:$0xff]   ;;  %v1548_v30 = vld [vmem:[%s2153_s1 + $0x38] sm:$0xff]   ;;  %v1557_v37 = vld [vmem:[%s2154_s0 + $0x2c] ss:$20 sps:$4 sm:$0xff]  }
   0xc   :  { %1330 = vmatpush3.bf16.msra.mxu0 %v1528_v10  ;;  %v1545_v27 = vld [vmem:[%s2153_s1 + $0xb0] sm:$0xff]   ;;  %v1549_v31 = vld [vmem:[%s2153_s1 + $0xb8] sm:$0xff]   ;;  %v1563_v39 = vld [vmem:[%s2153_s1 + $0x108] sm:$0xff]  }
   0xd   :  { %1394 = vmatpush3.bf16.msra.mxu1 %v1529_v11  ;;  %1331 = vmatprep.subr.bf16.mxu0 %v1530_v12  ;;  %v1550_v32 = vld [vmem:[%s2154_s0] ss:$20 sps:$4 sm:$0xff]   ;;  %v1552_v33 = vld [vmem:[%s2154_s0 + $0x4] ss:$20 sps:$4 sm:$0xff]   ;;  %v1553_v34 = vld [vmem:[%s2154_s0 + $0x8] ss:$20 sps:$4 sm:$0xff]  }
   0xe   :  { %1395 = vmatprep.subr.bf16.mxu1 %v1531_v13  ;;  %666 = vmatprep.mubr.bf16.mxu0 %v1552_v33  ;;  %v1559_v38 = vld [vmem:[%s2154_s0 + $0x34] ss:$20 sps:$4 sm:$0xff]   ;;  %v1562_v41 = vld [vmem:[%s2154_s0 + $0x30] ss:$20 sps:$4 sm:$0xff]   ;;  %v1577_v45 = vld [vmem:[%s2153_s1 + $0x118] sm:$0xff]  }
   0xf   :  { %v1561_v40 = vld [vmem:[%s2154_s0 + $0x28] ss:$20 sps:$4 sm:$0xff]   ;;  %v1570_v44 = vld [vmem:[%s2153_s1 + $0x110] sm:$0xff]   ;;  %v1569_v47 = vld [vmem:[%s2154_s0 + $0x58] ss:$20 sps:$4 sm:$0xff]  }
  0x10   :  { %1332 = vmatpush3.bf16.msra.mxu0 %v1532_v14  ;;  %v1564_v42 = vld [vmem:[%s2154_s0 + $0x54] ss:$20 sps:$4 sm:$0xff]   ;;  %v1566_v43 = vld [vmem:[%s2154_s0 + $0x5c] ss:$20 sps:$4 sm:$0xff]   ;;  %v1573_v49 = vld [vmem:[%s2154_s0 + $0x84] ss:$20 sps:$4 sm:$0xff]  }
  0x11   :  { %1396 = vmatpush3.bf16.msra.mxu1 %v1533_v15  ;;  %1333 = vmatprep.subr.bf16.mxu0 %v1534_v16  ;;  %v1568_v46 = vld [vmem:[%s2154_s0 + $0x50] ss:$20 sps:$4 sm:$0xff]   ;;  %v1591_v51 = vld [vmem:[%s2153_s1 + $0x128] sm:$0xff]   ;;  %v1576_v53 = vld [vmem:[%s2154_s0 + $0x80] ss:$20 sps:$4 sm:$0xff]   ;;  %v1614_v16 = vmov 0.0  }
  0x12   :  { %1397 = vmatprep.subr.bf16.mxu1 %v1535_v17  ;;  %v1571_v48 = vld [vmem:[%s2154_s0 + $0x7c] ss:$20 sps:$4 sm:$0xff]   ;;  %v1584_v50 = vld [vmem:[%s2153_s1 + $0x120] sm:$0xff]   ;;  %v1575_v52 = vld [vmem:[%s2154_s0 + $0x78] ss:$20 sps:$4 sm:$0xff]   ;;  %28 = vst.msk [vmem:[#allocation2 + $0x10] sm:$0xff] %vm25_vm0, %v1614_v16 }
  0x13   :  { %v1578_v54 = vld [vmem:[%s2154_s0 + $0xa4] ss:$20 sps:$4 sm:$0xff]   ;;  %v1598_v55 = vld [vmem:[%s2153_s1 + $0x130] sm:$0xff]   ;;  %v1580_v56 = vld [vmem:[%s2154_s0 + $0xac] ss:$20 sps:$4 sm:$0xff]   ;;  %26 = vst.msk [vmem:[#allocation2] sm:$0xff] %vm25_vm0, %v1614_v16 }
  0x14   :  { %1334 = vmatpush3.bf16.msra.mxu0 %v1536_v18  ;;  %v1605_v57 = vld [vmem:[%s2153_s1 + $0x138] sm:$0xff]   ;;  %v1582_v58 = vld [vmem:[%s2154_s0 + $0xa0] ss:$20 sps:$4 sm:$0xff]   ;;  %v1590_v63 = vld [vmem:[%s2154_s0 + $0xd0] ss:$20 sps:$4 sm:$0xff]   ;;  %27 = vst.msk [vmem:[#allocation2 + $0x8] sm:$0xff] %vm25_vm0, %v1614_v16 }
  0x15   :  { %1398 = vmatpush3.bf16.msra.mxu1 %v1537_v19  ;;  %1335 = vmatprep.subr.bf16.mxu0 %v1538_v20  ;;  %v1583_v59 = vld [vmem:[%s2154_s0 + $0xa8] ss:$20 sps:$4 sm:$0xff]   ;;  %v1585_v60 = vld [vmem:[%s2154_s0 + $0xcc] ss:$20 sps:$4 sm:$0xff]   ;;  %v1596_v2 = vld [vmem:[%s2154_s0 + $0xf0] ss:$20 sps:$4 sm:$0xff]  }
  0x16   :  { %1399 = vmatprep.subr.bf16.mxu1 %v1539_v21  ;;  %v1587_v61 = vld [vmem:[%s2154_s0 + $0xd4] ss:$20 sps:$4 sm:$0xff]   ;;  %v1594_v1 = vld [vmem:[%s2154_s0 + $0xfc] ss:$20 sps:$4 sm:$0xff]   ;;  %v1597_v3 = vld [vmem:[%s2154_s0 + $0xf8] ss:$20 sps:$4 sm:$0xff]  }
  0x17   :  { %v1589_v62 = vld [vmem:[%s2154_s0 + $0xc8] ss:$20 sps:$4 sm:$0xff]   ;;  %v1601_v5 = vld [vmem:[%s2154_s0 + $0x124] ss:$20 sps:$4 sm:$0xff]   ;;  %v1604_v7 = vld [vmem:[%s2154_s0 + $0x120] ss:$20 sps:$4 sm:$0xff]  }
  0x18   :  { %1336 = vmatpush3.bf16.msra.mxu0 %v1540_v22  ;;  %v1592_v0 = vld [vmem:[%s2154_s0 + $0xf4] ss:$20 sps:$4 sm:$0xff]   ;;  %v1599_v4 = vld [vmem:[%s2154_s0 + $0x11c] ss:$20 sps:$4 sm:$0xff]   ;;  %v1603_v6 = vld [vmem:[%s2154_s0 + $0x118] ss:$20 sps:$4 sm:$0xff]  }
  0x19   :  { %1400 = vmatpush3.bf16.msra.mxu1 %v1541_v23  ;;  %1337 = vmatprep.subr.bf16.mxu0 %v1542_v24  ;;  %v1606_v8 = vld [vmem:[%s2154_s0 + $0x10] ss:$20 sps:$4 sm:$0xff]   ;;  %v1608_v10 = vld [vmem:[%s2154_s0 + $0x38] ss:$20 sps:$4 sm:$0xff]   ;;  %v1610_v12 = vld [vmem:[%s2154_s0 + $0x60] ss:$20 sps:$4 sm:$0xff]  }
  0x1a   :  { %1401 = vmatprep.subr.bf16.mxu1 %v1543_v25  ;;  %v1607_v9 = vld [vmem:[%s2154_s0 + $0xb0] ss:$20 sps:$4 sm:$0xff]   ;;  %v1609_v11 = vld [vmem:[%s2154_s0 + $0xd8] ss:$20 sps:$4 sm:$0xff]   ;;  %v1611_v13 = vld [vmem:[%s2154_s0 + $0x100] ss:$20 sps:$4 sm:$0xff]  }
  0x1b   :  { %v1612_v14 = vld [vmem:[%s2154_s0 + $0x88] ss:$20 sps:$4 sm:$0xff]   ;;  %29 = vst.msk [vmem:[#allocation2 + $0x18] sm:$0xff] %vm25_vm0, %v1614_v16  ;;  %30 = vst.msk [vmem:[#allocation2 + $0x20] sm:$0xff] %vm25_vm0, %v1614_v16 }
  0x1c   :  { %1338 = vmatpush3.bf16.msra.mxu0 %v1544_v26  ;;  %v1613_v15 = vld [vmem:[%s2154_s0 + $0x128] ss:$20 sps:$4 sm:$0xff]   ;;  %31 = vst.msk [vmem:[#allocation2 + $0x28] sm:$0xff] %vm25_vm0, %v1614_v16  ;;  %32 = vst.msk [vmem:[#allocation2 + $0x30] sm:$0xff] %vm25_vm0, %v1614_v16 }
  0x1d   :  { %1402 = vmatpush3.bf16.msra.mxu1 %v1545_v27  ;;  %1339 = vmatprep.subr.bf16.mxu0 %v1546_v28  ;;  %33 = vst.msk [vmem:[#allocation2 + $0x38] sm:$0xff] %vm25_vm0, %v1614_v16  ;;  %34 = vst.msk [vmem:[#allocation2 + $0x40] sm:$0xff] %vm25_vm0, %v1614_v16 }
  0x1e   :  { %1403 = vmatprep.subr.bf16.mxu1 %v1547_v29  ;;  %35 = vst.msk [vmem:[#allocation2 + $0x48] sm:$0xff] %vm25_vm0, %v1614_v16  ;;  %36 = vst.msk [vmem:[#allocation2 + $0x50] sm:$0xff] %vm25_vm0, %v1614_v16 }
  0x1f   :  { %37 = vst.msk [vmem:[#allocation2 + $0x58] sm:$0xff] %vm25_vm0, %v1614_v16  ;;  %38 = vst.msk [vmem:[#allocation2 + $0x60] sm:$0xff] %vm25_vm0, %v1614_v16 }
  0x20   :  { %1340 = vmatpush3.bf16.msra.mxu0 %v1548_v30  ;;  %39 = vst.msk [vmem:[#allocation2 + $0x68] sm:$0xff] %vm25_vm0, %v1614_v16  ;;  %40 = vst.msk [vmem:[#allocation2 + $0x70] sm:$0xff] %vm25_vm0, %v1614_v16 }
  0x21   :  { %1404 = vmatpush3.bf16.msra.mxu1 %v1549_v31  ;;  %1469 = vmatprep.subr.bf16.mxu0 %v1556_v36  ;;  %41 = vst.msk [vmem:[#allocation2 + $0x78] sm:$0xff] %vm25_vm0, %v1614_v16 }
  0x22   :  { %1501 = vmatprep.subr.bf16.mxu1 %v1556_v36 }
  0x23   :  { %667 = vmatmul.mubr.bf16.vlgmr.msra.gmra.mrb[0].mxu0 %v1550_v32 }
  0x24   :  { %764 = vmatmul.mubr.bf16.vlgmr.msra.gmra.mrb[0].mxu1 %v1553_v34  ;;  %1470 = vmatpush3.bf16.msra.mxu0 %v1556_v36 }
  0x25   :  { %1509 = vmatpush3.bf16.msra.mxu1 %v1556_v36  ;;  %674 = vmatprep.mubr.bf16.mxu0 %v1557_v37 }
  0x26   :  { %771 = vmatprep.mubr.bf16.mxu1 %v1559_v38  ;;  %1471 = vmatprep.subr.bf16.mxu0 %v1563_v39 }
  0x27   :  { %1502 = vmatprep.subr.bf16.mxu1 %v1563_v39 }
  0x28   :  { %1472 = vmatpush3.bf16.msra.mxu0 %v1563_v39 }
  0x29   :  { %1510 = vmatpush3.bf16.msra.mxu1 %v1563_v39  ;;  %1473 = vmatprep.subr.bf16.mxu0 %v1570_v44 }
  0x2a   :  { %1503 = vmatprep.subr.bf16.mxu1 %v1570_v44 }
  0x2b   :  { %675 = vmatmul.mubr.bf16.gmra.mrb[4].mxu0 %v1561_v40 }
  0x2c   :  { %772 = vmatmul.mubr.bf16.gmra.mrb[4].mxu1 %v1562_v41  ;;  %682 = vmatprep.mubr.bf16.mxu0 %v1564_v42 }
  0x2d   :  { %779 = vmatprep.mubr.bf16.mxu1 %v1566_v43  ;;  %1474 = vmatpush3.bf16.msra.mxu0 %v1570_v44 }
  0x2e   :  { %1511 = vmatpush3.bf16.msra.mxu1 %v1570_v44  ;;  %1475 = vmatprep.subr.bf16.mxu0 %v1577_v45 }
  0x2f   :  { %1504 = vmatprep.subr.bf16.mxu1 %v1577_v45 }
  0x31   :  { %1476 = vmatpush3.bf16.msra.mxu0 %v1577_v45 }
  0x32   :  { %1512 = vmatpush3.bf16.msra.mxu1 %v1577_v45  ;;  %1477 = vmatprep.subr.bf16.mxu0 %v1584_v50 }
  0x33   :  { %683 = vmatmul.mubr.bf16.gmra.mrb[8].mxu0 %v1568_v46  ;;  %1505 = vmatprep.subr.bf16.mxu1 %v1584_v50 }
  0x34   :  { %780 = vmatmul.mubr.bf16.gmra.mrb[8].mxu1 %v1569_v47  ;;  %690 = vmatprep.mubr.bf16.mxu0 %v1571_v48 }
  0x35   :  { %787 = vmatprep.mubr.bf16.mxu1 %v1573_v49  ;;  %1478 = vmatpush3.bf16.msra.mxu0 %v1584_v50 }
  0x36   :  { %1513 = vmatpush3.bf16.msra.mxu1 %v1584_v50  ;;  %1479 = vmatprep.subr.bf16.mxu0 %v1591_v51 }
  0x37   :  { %1506 = vmatprep.subr.bf16.mxu1 %v1591_v51 }
  0x39   :  { %1480 = vmatpush3.bf16.msra.mxu0 %v1591_v51 }
  0x3a   :  { %1514 = vmatpush3.bf16.msra.mxu1 %v1591_v51  ;;  %1481 = vmatprep.subr.bf16.mxu0 %v1598_v55 }
  0x3b   :  { %691 = vmatmul.mubr.bf16.gmra.mrb[12].mxu0 %v1575_v52  ;;  %1507 = vmatprep.subr.bf16.mxu1 %v1598_v55 }
  0x3c   :  { %788 = vmatmul.mubr.bf16.gmra.mrb[12].mxu1 %v1576_v53  ;;  %698 = vmatprep.mubr.bf16.mxu0 %v1578_v54 }
  0x3d   :  { %795 = vmatprep.mubr.bf16.mxu1 %v1580_v56  ;;  %1482 = vmatpush3.bf16.msra.mxu0 %v1598_v55 }
  0x3e   :  { %1515 = vmatpush3.bf16.msra.mxu1 %v1598_v55  ;;  %1483 = vmatprep.subr.bf16.mxu0 %v1605_v57 }
  0x3f   :  { %1508 = vmatprep.subr.bf16.mxu1 %v1605_v57 }
  0x41   :  { %1484 = vmatpush3.bf16.msra.mxu0 %v1605_v57 }
  0x42   :  { %1516 = vmatpush3.bf16.msra.mxu1 %v1605_v57 }
  0x43   :  { %699 = vmatmul.mubr.bf16.gmra.mrb[16].mxu0 %v1582_v58 }
  0x44   :  { %796 = vmatmul.mubr.bf16.gmra.mrb[16].mxu1 %v1583_v59  ;;  %706 = vmatprep.mubr.bf16.mxu0 %v1585_v60 }
  0x45   :  { %803 = vmatprep.mubr.bf16.mxu1 %v1587_v61 }
  0x4b   :  { %707 = vmatmul.mubr.bf16.gmra.mrb[20].mxu0 %v1589_v62 }
  0x4c   :  { %804 = vmatmul.mubr.bf16.gmra.mrb[20].mxu1 %v1590_v63  ;;  %714 = vmatprep.mubr.bf16.mxu0 %v1592_v0 }
  0x4d   :  { %811 = vmatprep.mubr.bf16.mxu1 %v1594_v1 }
  0x53   :  { %715 = vmatmul.mubr.bf16.gmra.mrb[24].mxu0 %v1596_v2 }
  0x54   :  { %812 = vmatmul.mubr.bf16.gmra.mrb[24].mxu1 %v1597_v3  ;;  %722 = vmatprep.mubr.bf16.mxu0 %v1599_v4 }
  0x55   :  { %819 = vmatprep.mubr.bf16.mxu1 %v1601_v5 }
  0x5b   :  { %723 = vmatmul.mubr.bf16.gmra.mrb[28].mxu0 %v1603_v6 }
  0x5c   :  { %820 = vmatmul.mubr.bf16.gmra.mrb[28].mxu1 %v1604_v7  ;;  %1485 = vmatprep.mubr.bf16.mxu0 %v1606_v8 }
  0x5d   :  { %1493 = vmatprep.mubr.bf16.mxu1 %v1607_v9 }
  0x63   :  { %1486 = vmatmul.mubr.bf16.vlgmr.msra.gmra.mrb[32].mxu0 %v1608_v10 }
  0x64   :  { %1494 = vmatmul.mubr.bf16.vlgmr.msra.gmra.mrb[32].mxu1 %v1609_v11  ;;  %1489 = vmatprep.mubr.bf16.mxu0 %v1610_v12 }
  0x65   :  { %1497 = vmatprep.mubr.bf16.mxu1 %v1611_v13 }
  0x6b   :  { %1490 = vmatmul.mubr.bf16.gmra.mrb[36].mxu0 %v1612_v14 }
  0x6c   :  { %1498 = vmatmul.mubr.bf16.gmra.mrb[36].mxu1 %v1613_v15 }
  0xf6   :  { %v1341_v17 = vpop.f32.mrb[0].mxu0 }
  0xf7   :  { %v1405_v18 = vpop.f32.mrb[0].mxu1  ;;  %v1342_v19 = vpop.f32.mrb[1].mxu0 }
  0xf8   :  { %v1343_v20 = vadd.f32 %v1342_v19, %v1341_v17  ;;  %v1406_v21 = vpop.f32.mrb[1].mxu1  ;;  %v1344_v22 = vpop.f32.mrb[2].mxu0 }
  0xf9   :  { %v1407_v23 = vadd.f32 %v1406_v21, %v1405_v18  ;;  %v1408_v24 = vpop.f32.mrb[2].mxu1  ;;  %v1345_v25 = vpop.f32.mrb[3].mxu0 }
  0xfa   :  { %v1346_v26 = vadd.f32 %v1345_v25, %v1344_v22  ;;  %v1409_v27 = vpop.f32.mrb[3].mxu1 }
  0xfb   :  { %v1410_v28 = vadd.f32 %v1409_v27, %v1408_v24  ;;  %v1901_v29 = vadd.f32 %v1407_v23, %v1343_v20 }
  0xfd   :  { %v1903_v30 = vadd.f32 %v1410_v28, %v1346_v26 }
  0xfe   :  { %v1347_v31 = vpop.f32.mrb[4].mxu0 }
  0xff   :  { %v1411_v32 = vpop.f32.mrb[4].mxu1  ;;  %v1348_v33 = vpop.f32.mrb[5].mxu0 }
 0x100   :  { %v1349_v34 = vadd.f32 %v1348_v33, %v1347_v31  ;;  %v1412_v35 = vpop.f32.mrb[5].mxu1  ;;  %v1350_v36 = vpop.f32.mrb[6].mxu0 }
 0x101   :  { %v1413_v37 = vadd.f32 %v1412_v35, %v1411_v32  ;;  %v1414_v38 = vpop.f32.mrb[6].mxu1  ;;  %v1351_v39 = vpop.f32.mrb[7].mxu0 }
 0x102   :  { %v1352_v40 = vadd.f32 %v1351_v39, %v1350_v36  ;;  %v1415_v41 = vpop.f32.mrb[7].mxu1 }
 0x103   :  { %v1416_v42 = vadd.f32 %v1415_v41, %v1414_v38  ;;  %v1905_v43 = vadd.f32 %v1413_v37, %v1349_v34 }
 0x105   :  { %v1907_v44 = vadd.f32 %v1416_v42, %v1352_v40 }
 0x106   :  { %v1353_v45 = vpop.f32.mrb[8].mxu0 }
 0x107   :  { %v1417_v46 = vpop.f32.mrb[8].mxu1  ;;  %v1354_v47 = vpop.f32.mrb[9].mxu0 }
 0x108   :  { %v1355_v48 = vadd.f32 %v1354_v47, %v1353_v45  ;;  %v1418_v49 = vpop.f32.mrb[9].mxu1  ;;  %v1356_v50 = vpop.f32.mrb[10].mxu0 }
 0x109   :  { %v1419_v51 = vadd.f32 %v1418_v49, %v1417_v46  ;;  %v1420_v52 = vpop.f32.mrb[10].mxu1  ;;  %v1357_v53 = vpop.f32.mrb[11].mxu0 }
 0x10a   :  { %v1358_v54 = vadd.f32 %v1357_v53, %v1356_v50  ;;  %v1421_v55 = vpop.f32.mrb[11].mxu1 }
 0x10b   :  { %v1422_v56 = vadd.f32 %v1421_v55, %v1420_v52  ;;  %v1909_v57 = vadd.f32 %v1419_v51, %v1355_v48 }
 0x10d   :  { %v1911_v58 = vadd.f32 %v1422_v56, %v1358_v54 }
 0x10e   :  { %v1359_v59 = vpop.f32.mrb[12].mxu0 }
 0x10f   :  { %v1423_v60 = vpop.f32.mrb[12].mxu1  ;;  %v1360_v61 = vpop.f32.mrb[13].mxu0 }
 0x110   :  { %v1361_v62 = vadd.f32 %v1360_v61, %v1359_v59  ;;  %v1424_v63 = vpop.f32.mrb[13].mxu1  ;;  %v1362_v0 = vpop.f32.mrb[14].mxu0 }
 0x111   :  { %v1425_v1 = vadd.f32 %v1424_v63, %v1423_v60  ;;  %v1426_v2 = vpop.f32.mrb[14].mxu1  ;;  %v1363_v3 = vpop.f32.mrb[15].mxu0 }
 0x112   :  { %v1364_v4 = vadd.f32 %v1363_v3, %v1362_v0  ;;  %v1427_v5 = vpop.f32.mrb[15].mxu1 }
 0x113   :  { %v1428_v6 = vadd.f32 %v1427_v5, %v1426_v2  ;;  %v1913_v7 = vadd.f32 %v1425_v1, %v1361_v62 }
 0x115   :  { %v1915_v8 = vadd.f32 %v1428_v6, %v1364_v4 }
 0x116   :  { %v1365_v9 = vpop.f32.mrb[16].mxu0 }
 0x117   :  { %v1429_v10 = vpop.f32.mrb[16].mxu1  ;;  %v1366_v11 = vpop.f32.mrb[17].mxu0 }
 0x118   :  { %v1367_v12 = vadd.f32 %v1366_v11, %v1365_v9  ;;  %v1430_v13 = vpop.f32.mrb[17].mxu1  ;;  %v1368_v14 = vpop.f32.mrb[18].mxu0  ;;  %v44_v9 = vld [vmem:[#allocation2 + $0x10] sm:$0xff] }
 0x119   :  { %v1431_v15 = vadd.f32 %v1430_v13, %v1429_v10  ;;  %v1432_v16 = vpop.f32.mrb[18].mxu1  ;;  %v1369_v17 = vpop.f32.mrb[19].mxu0 }
 0x11a   :  { %v1370_v18 = vadd.f32 %v1369_v17, %v1368_v14  ;;  %v1433_v19 = vpop.f32.mrb[19].mxu1  ;;  %v42_v14 = vld [vmem:[#allocation2] sm:$0xff]  ;;  %v1933_v17 = vld [vmem:[%s2155_s4 + $0x8] sm:$0xff]  }
 0x11b   :  { %v1434_v20 = vadd.f32 %v1433_v19, %v1432_v16  ;;  %v1917_v21 = vadd.f32 %v1431_v15, %v1367_v12  ;;  %v52_v12 = vld [vmem:[#allocation2 + $0x50] sm:$0xff]  ;;  %v50_v16 = vld [vmem:[#allocation2 + $0x40] sm:$0xff] }
 0x11d   :  { %v1919_v22 = vadd.f32 %v1434_v20, %v1370_v18 }
 0x11e   :  { %v1371_v23 = vpop.f32.mrb[20].mxu0 }
 0x11f   :  { %v1435_v24 = vpop.f32.mrb[20].mxu1  ;;  %v1372_v25 = vpop.f32.mrb[21].mxu0 }
 0x120   :  { %v1373_v26 = vadd.f32 %v1372_v25, %v1371_v23  ;;  %v1436_v27 = vpop.f32.mrb[21].mxu1  ;;  %v1374_v28 = vpop.f32.mrb[22].mxu0  ;;  %v45_v23 = vld [vmem:[#allocation2 + $0x18] sm:$0xff] }
 0x121   :  { %v1437_v31 = vadd.f32 %v1436_v27, %v1435_v24  ;;  %v1438_v32 = vpop.f32.mrb[22].mxu1  ;;  %v1375_v33 = vpop.f32.mrb[23].mxu0  ;;  %v53_v25 = vld [vmem:[#allocation2 + $0x58] sm:$0xff]  ;;  %v1944_v27 = vld [vmem:[%s2155_s4] sm:$0xff]  }
 0x122   :  { %v1376_v34 = vadd.f32 %v1375_v33, %v1374_v28  ;;  %v1439_v35 = vpop.f32.mrb[23].mxu1 }
 0x123   :  { %v1440_v36 = vadd.f32 %v1439_v35, %v1438_v32  ;;  %v806_v37 = vadd.f32 %v1437_v31, %v1373_v26  ;;  %v43_v32 = vld [vmem:[#allocation2 + $0x8] sm:$0xff] }
 0x125   :  { %v809_v38 = vadd.f32 %v1440_v36, %v1376_v34  ;;  %v1951_v36 = vld [vmem:[%s2155_s4 + $0x20] sm:$0xff]  }
 0x126   :  { %v1377_v39 = vpop.f32.mrb[24].mxu0 }
 0x127   :  { %v1441_v40 = vpop.f32.mrb[24].mxu1  ;;  %v1378_v41 = vpop.f32.mrb[25].mxu0 }
 0x128   :  { %v1379_v42 = vadd.f32 %v1378_v41, %v1377_v39  ;;  %v1442_v45 = vpop.f32.mrb[25].mxu1  ;;  %v1380_v46 = vpop.f32.mrb[26].mxu0 }
 0x129   :  { %v1443_v47 = vadd.f32 %v1442_v45, %v1441_v40  ;;  %v1444_v48 = vpop.f32.mrb[26].mxu1  ;;  %v1381_v49 = vpop.f32.mrb[27].mxu0  ;;  %v51_v40 = vld [vmem:[#allocation2 + $0x48] sm:$0xff] }
 0x12a   :  { %v1382_v50 = vadd.f32 %v1381_v49, %v1380_v46  ;;  %v1445_v51 = vpop.f32.mrb[27].mxu1  ;;  %v1960_v46 = vld [vmem:[%s2155_s4 + $0x18] sm:$0xff]   ;;  %v1974_v49 = vld [vmem:[%s2155_s4 + $0x10] sm:$0xff]  }
 0x12b   :  { %v1446_v52 = vadd.f32 %v1445_v51, %v1444_v48  ;;  %v1921_v53 = vadd.f32 %v1443_v47, %v1379_v42  ;;  %v1288_v47 = vunpack.c.l.bf16 %v1944_v27  ;;  %v1304_v51 = vunpack.c.l.bf16 %v1951_v36 }
 0x12d   :  { %v1923_v54 = vadd.f32 %v1446_v52, %v1382_v50  ;;  %v1979_v50 = vld [vmem:[%s2155_s4 + $0x30] sm:$0xff]   ;;  %v1293_v52 = vunpack.c.h.bf16 %v1933_v17 }
 0x12e   :  { %v1383_v55 = vpop.f32.mrb[28].mxu0 }
 0x12f   :  { %v1447_v56 = vpop.f32.mrb[28].mxu1  ;;  %v1384_v59 = vpop.f32.mrb[29].mxu0 }
 0x130   :  { %v1385_v60 = vadd.f32 %v1384_v59, %v1383_v55  ;;  %v1448_v61 = vpop.f32.mrb[29].mxu1  ;;  %v1386_v62 = vpop.f32.mrb[30].mxu0  ;;  %v1289_v59 = vunpack.c.h.bf16 %v1944_v27 }
 0x131   :  { %v1449_v63 = vadd.f32 %v1448_v61, %v1447_v56  ;;  %v1450_v0 = vpop.f32.mrb[30].mxu1  ;;  %v1387_v1 = vpop.f32.mrb[31].mxu0  ;;  %v48_v61 = vld [vmem:[#allocation2 + $0x30] sm:$0xff] }
 0x132   :  { %v1388_v2 = vadd.f32 %v1387_v1, %v1386_v62  ;;  %v1451_v3 = vpop.f32.mrb[31].mxu1 }
 0x133   :  { %v1452_v4 = vadd.f32 %v1451_v3, %v1450_v0  ;;  %v1925_v5 = vadd.f32 %v1449_v63, %v1385_v60  ;;  %v1305_v60 = vunpack.c.h.bf16 %v1951_v36  ;;  %v1300_v63 = vunpack.c.l.bf16 %v1960_v46 }
 0x135   :  { %v1927_v6 = vadd.f32 %v1452_v4, %v1388_v2  ;;  %v56_v2 = vld [vmem:[#allocation2 + $0x70] sm:$0xff]  ;;  %v46_v4 = vld [vmem:[#allocation2 + $0x20] sm:$0xff] }
 0x136   :  { %v1487_v10 = vpop.f32.mrb[32].mxu0 }
 0x137   :  { %v871_v11 = vadd.f32 %v1487_v10, %v1905_v43  ;;  %v1495_v13 = vpop.f32.mrb[32].mxu1  ;;  %v862_v15 = vpop.f32.mrb[33].mxu0  ;;  %v1939_v43 = vld [vmem:[%s2155_s4 + $0x28] sm:$0xff]   ;;  %v1296_v10 = vunpack.c.l.bf16 %v1974_v49 }
 0x138   :  { %v903_v18 = vadd.f32 %v1495_v13, %v806_v37  ;;  %v863_v19 = vadd.f32 %v862_v15, %v1901_v29  ;;  %v894_v20 = vpop.f32.mrb[33].mxu1  ;;  %v1488_v24 = vpop.f32.mrb[34].mxu0  ;;  %v1309_v55 = vunpack.c.h.bf16 %v1939_v43  ;;  %v2000_v13 = vld [vmem:[%s2156_s2] ss:$0 sm:$0xff] }
 0x139   :  { %v927_v26 = vadd.f32 %v871_v11, %v44_v9  ;;  %v895_v28 = vadd.f32 %v894_v20, %v1917_v21  ;;  %v874_v31 = vadd.f32 %v1488_v24, %v1907_v44  ;;  %v1496_v29 = vpop.f32.mrb[34].mxu1  ;;  %v865_v33 = vpop.f32.mrb[35].mxu0  ;;  %v1292_v21 = vunpack.c.l.bf16 %v1933_v17 }
 0x13a   :  { %v935_v34 = vadd.f32 %v903_v18, %v52_v12  ;;  %v925_v35 = vadd.f32 %v863_v19, %v42_v14  ;;  %v906_v37 = vadd.f32 %v1496_v29, %v809_v38  ;;  %v866_v39 = vadd.f32 %v865_v33, %v1903_v30  ;;  %v897_v41 = vpop.f32.mrb[35].mxu1  ;;  %v1965_v38 = vld [vmem:[%s2155_s4 + $0x38] sm:$0xff]   ;;  %v47_v29 = vld [vmem:[#allocation2 + $0x28] sm:$0xff]  ;;  %v2012_v33 = vld [vmem:[%s2157_s3] ss:$0 sm:$0xff] }
 0x13b   :  { %944 = vst.msk [vmem:[#allocation2 + $0x10] sm:$0xff] %vm25_vm0, %v927_v26  ;;  %v933_v44 = vadd.f32 %v895_v28, %v50_v16  ;;  %v928_v42 = vadd.f32 %v874_v31, %v45_v23  ;;  %v898_v45 = vadd.f32 %v897_v41, %v1919_v22  ;;  %v1308_v30 = vunpack.c.l.bf16 %v1939_v43  ;;  %v49_v18 = vld [vmem:[#allocation2 + $0x38] sm:$0xff] }
 0x13c   :  { %952 = vst.msk [vmem:[#allocation2 + $0x50] sm:$0xff] %vm25_vm0, %v935_v34  ;;  %942 = vst.msk [vmem:[#allocation2] sm:$0xff] %vm25_vm0, %v925_v35  ;;  %v936_v48 = vadd.f32 %v906_v37, %v53_v25  ;;  %v926_v22 = vadd.f32 %v866_v39, %v43_v32  ;;  %v1316_v0 = vunpack.c.l.bf16 %v1965_v38  ;;  %v1312_v11 = vunpack.c.l.bf16 %v1979_v50  ;;  %v57_v28 = vld [vmem:[#allocation2 + $0x78] sm:$0xff] }
 0x13d   :  { %950 = vst.msk [vmem:[#allocation2 + $0x40] sm:$0xff] %vm25_vm0, %v933_v44  ;;  %945 = vst.msk [vmem:[#allocation2 + $0x18] sm:$0xff] %vm25_vm0, %v928_v42  ;;  %v934_v56 = vadd.f32 %v898_v45, %v51_v40  ;;  %v1301_v12 = vunpack.c.h.bf16 %v1960_v46  ;;  %v1317_v20 = vunpack.c.h.bf16 %v1965_v38  ;;  %v1297_v23 = vunpack.c.h.bf16 %v1974_v49 }
 0x13e   :  { %953 = vst.msk [vmem:[#allocation2 + $0x58] sm:$0xff] %vm25_vm0, %v936_v48  ;;  %943 = vst.msk [vmem:[#allocation2 + $0x8] sm:$0xff] %vm25_vm0, %v926_v22  ;;  %v1491_v62 = vpop.f32.mrb[36].mxu0 }
 0x13f   :  { %951 = vst.msk [vmem:[#allocation2 + $0x48] sm:$0xff] %vm25_vm0, %v934_v56  ;;  %v887_v1 = vadd.f32 %v1491_v62, %v1913_v7  ;;  %v1499_v3 = vpop.f32.mrb[36].mxu1  ;;  %v878_v9 = vpop.f32.mrb[37].mxu0  ;;  %v54_v7 = vld [vmem:[#allocation2 + $0x60] sm:$0xff] }
 0x140   :  { %v919_v14 = vadd.f32 %v1499_v3, %v1925_v5  ;;  %v879_v15 = vadd.f32 %v878_v9, %v1909_v57  ;;  %v910_v16 = vpop.f32.mrb[37].mxu1  ;;  %v1492_v19 = vpop.f32.mrb[38].mxu0  ;;  %v1313_v5 = vunpack.c.h.bf16 %v1979_v50 }
 0x141   :  { %v931_v24 = vadd.f32 %v887_v1, %v48_v61  ;;  %v911_v25 = vadd.f32 %v910_v16, %v1921_v53  ;;  %v890_v26 = vadd.f32 %v1492_v19, %v1915_v8  ;;  %v1500_v31 = vpop.f32.mrb[38].mxu1  ;;  %v881_v32 = vpop.f32.mrb[39].mxu0  ;;  %v55_v8 = vld [vmem:[#allocation2 + $0x68] sm:$0xff] }
 0x142   :  { %v963_v57 = vld [vmem:[#allocation2 + $0x10] sm:$0xff]  ;;  %v939_v34 = vadd.f32 %v919_v14, %v56_v2  ;;  %v929_v35 = vadd.f32 %v879_v15, %v46_v4  ;;  %v922_v37 = vadd.f32 %v1500_v31, %v1927_v6  ;;  %v882_v53 = vadd.f32 %v881_v32, %v1911_v58  ;;  %v913_v39 = vpop.f32.mrb[39].mxu1 }
 0x143   :  { %v986_v40 = vmul.f32 %v2000_v13, %v963_v57  ;;  %v971_v41 = vld [vmem:[#allocation2 + $0x50] sm:$0xff]  ;;  %v961_v44 = vld [vmem:[#allocation2] sm:$0xff]  ;;  %948 = vst.msk [vmem:[#allocation2 + $0x30] sm:$0xff] %vm25_vm0, %v931_v24  ;;  %v937_v42 = vadd.f32 %v911_v25, %v54_v7  ;;  %v932_v45 = vadd.f32 %v890_v26, %v49_v18  ;;  %v914_v48 = vadd.f32 %v913_v39, %v1923_v54 }
 0x144   :  { %v994_v22 = vmul.f32 %v2000_v13, %v971_v41  ;;  %v984_v56 = vmul.f32 %v2000_v13, %v961_v44  ;;  %v969_v61 = vld [vmem:[#allocation2 + $0x40] sm:$0xff]  ;;  %v964_v6 = vld [vmem:[#allocation2 + $0x18] sm:$0xff]  ;;  %956 = vst.msk [vmem:[#allocation2 + $0x70] sm:$0xff] %vm25_vm0, %v939_v34  ;;  %946 = vst.msk [vmem:[#allocation2 + $0x20] sm:$0xff] %vm25_vm0, %v929_v35  ;;  %v940_v58 = vadd.f32 %v922_v37, %v57_v28 }
 0x145   :  { %v930_v62 = vadd.f32 %v882_v53, %v47_v29  ;;  %v1009_v1 = vadd.f32 %v2012_v33, %v986_v40  ;;  %v992_v2 = vmul.f32 %v2000_v13, %v969_v61  ;;  %v987_v3 = vmul.f32 %v2000_v13, %v964_v6  ;;  %v972_v4 = vld [vmem:[#allocation2 + $0x58] sm:$0xff]  ;;  %v962_v54 = vld [vmem:[#allocation2 + $0x8] sm:$0xff]  ;;  %954 = vst.msk [vmem:[#allocation2 + $0x60] sm:$0xff] %vm25_vm0, %v937_v42 }
 0x146   :  { %949 = vst.msk [vmem:[#allocation2 + $0x38] sm:$0xff] %vm25_vm0, %v932_v45  ;;  %v938_v9 = vadd.f32 %v914_v48, %v55_v8  ;;  %v1017_v14 = vadd.f32 %v2012_v33, %v994_v22  ;;  %v1007_v15 = vadd.f32 %v2012_v33, %v984_v56  ;;  %v995_v7 = vmul.f32 %v2000_v13, %v972_v4  ;;  %v970_v18 = vld [vmem:[#allocation2 + $0x48] sm:$0xff] }
 0x147   :  { %v985_v16 = vmul.f32 %v2000_v13, %v962_v54  ;;  %957 = vst.msk [vmem:[#allocation2 + $0x78] sm:$0xff] %vm25_vm0, %v940_v58  ;;  %947 = vst.msk [vmem:[#allocation2 + $0x28] sm:$0xff] %vm25_vm0, %v930_v62  ;;  %v1057_v19 = vadd.f32 %v1292_v21, %v1009_v1  ;;  %v1015_v24 = vadd.f32 %v2012_v33, %v992_v2 }
 0x148   :  { %v1010_v25 = vadd.f32 %v2012_v33, %v987_v3  ;;  %v993_v26 = vmul.f32 %v2000_v13, %v970_v18  ;;  %955 = vst.msk [vmem:[#allocation2 + $0x68] sm:$0xff] %vm25_vm0, %v938_v9  ;;  %v1065_v28 = vadd.f32 %v1308_v30, %v1017_v14  ;;  %v1055_v31 = vadd.f32 %v1288_v47, %v1007_v15 }
 0x149   :  { %v1018_v29 = vadd.f32 %v2012_v33, %v995_v7  ;;  %v1008_v32 = vadd.f32 %v2012_v33, %v985_v16  ;;  %v1073_v57 = vmax.f32 %v1057_v19, 0.0  ;;  %v1063_v21 = vadd.f32 %v1304_v51, %v1015_v24 }
 0x14a   :  { %v1058_v34 = vadd.f32 %v1293_v52, %v1010_v25  ;;  %v1016_v35 = vadd.f32 %v2012_v33, %v993_v26  ;;  %v1081_v37 = vmax.f32 %v1065_v28, 0.0  ;;  %v1071_v53 = vmax.f32 %v1055_v31, 0.0  ;;  %v967_v8 = vld [vmem:[#allocation2 + $0x30] sm:$0xff] }
 0x14b   :  { %v1066_v30 = vadd.f32 %v1309_v55, %v1018_v29  ;;  %v1056_v47 = vadd.f32 %v1289_v59, %v1008_v32  ;;  %v1272_v39 = vpack.c.bf16 %v1073_v57, %v1073_v57  ;;  %v1079_v40 = vmax.f32 %v1063_v21, 0.0  ;;  %v975_v44 = vld [vmem:[#allocation2 + $0x70] sm:$0xff]  ;;  %v965_v17 = vld [vmem:[#allocation2 + $0x20] sm:$0xff] }
 0x14c   :  { %v1074_v41 = vmax.f32 %v1058_v34, 0.0  ;;  %v1064_v51 = vadd.f32 %v1305_v60, %v1016_v35  ;;  %v1280_v52 = vpack.c.bf16 %v1081_v37, %v1081_v37  ;;  %v1270_v42 = vpack.c.bf16 %v1071_v53, %v1071_v53  ;;  %v973_v22 = vld [vmem:[#allocation2 + $0x60] sm:$0xff] }
 0x14d   :  { %v1082_v45 = vmax.f32 %v1066_v30, 0.0  ;;  %v1072_v48 = vmax.f32 %v1056_v47, 0.0  ;;  %v968_v56 = vld [vmem:[#allocation2 + $0x38] sm:$0xff]  ;;  %1154 = vst.msk [vmem:[%s2158_s5 + $0x8] sm:$0xf] %vm1151_vm1, %v1272_v39  ;;  %v1278_v43 = vpack.c.bf16 %v1079_v40, %v1079_v40  ;;  %v990_v59 = vmul.f32 %v2000_v13, %v967_v8 }
 0x14e   :  { %v1273_v27 = vpack.c.bf16 %v1074_v41, %v1074_v41  ;;  %v1080_v55 = vmax.f32 %v1064_v51, 0.0  ;;  %v976_v36 = vld [vmem:[#allocation2 + $0x78] sm:$0xff]  ;;  %v966_v60 = vld [vmem:[#allocation2 + $0x28] sm:$0xff]  ;;  %1162 = vst.msk [vmem:[%s2158_s5 + $0x28] sm:$0xf] %vm1151_vm1, %v1280_v52  ;;  %v998_v58 = vmul.f32 %v2000_v13, %v975_v44  ;;  %v988_v62 = vmul.f32 %v2000_v13, %v965_v17 }
 0x14f   :  { %1152 = vst.msk [vmem:[%s2158_s5] sm:$0xf] %vm1151_vm1, %v1270_v42  ;;  %v1281_v61 = vpack.c.bf16 %v1082_v45, %v1082_v45  ;;  %v1271_v6 = vpack.c.bf16 %v1072_v48, %v1072_v48  ;;  %v974_v1 = vld [vmem:[#allocation2 + $0x68] sm:$0xff]  ;;  %1160 = vst.msk [vmem:[%s2158_s5 + $0x20] sm:$0xf] %vm1151_vm1, %v1278_v43  ;;  %v1013_v3 = vadd.f32 %v2012_v33, %v990_v59 }
 0x150   :  { %1155 = vst.msk [vmem:[%s2158_s5 + $0xc] sm:$0xf] %vm1151_vm1, %v1273_v27  ;;  %v1279_v2 = vpack.c.bf16 %v1080_v55, %v1080_v55  ;;  %v996_v4 = vmul.f32 %v2000_v13, %v973_v22  ;;  %v991_v54 = vmul.f32 %v2000_v13, %v968_v56  ;;  %v1021_v9 = vadd.f32 %v2012_v33, %v998_v58 }
 0x151   :  { %1163 = vst.msk [vmem:[%s2158_s5 + $0x2c] sm:$0xf] %vm1151_vm1, %v1281_v61  ;;  %1153 = vst.msk [vmem:[%s2158_s5 + $0x4] sm:$0xf] %vm1151_vm1, %v1271_v6  ;;  %v1011_v14 = vadd.f32 %v2012_v33, %v988_v62  ;;  %v999_v15 = vmul.f32 %v2000_v13, %v976_v36  ;;  %v989_v7 = vmul.f32 %v2000_v13, %v966_v60 }
 0x152   :  { %1161 = vst.msk [vmem:[%s2158_s5 + $0x24] sm:$0xf] %vm1151_vm1, %v1279_v2  ;;  %v1061_v16 = vadd.f32 %v1300_v63, %v1013_v3  ;;  %v1019_v18 = vadd.f32 %v2012_v33, %v996_v4  ;;  %v1014_v19 = vadd.f32 %v2012_v33, %v991_v54  ;;  %v997_v24 = vmul.f32 %v2000_v13, %v974_v1 }
 0x153   :  { %v1069_v25 = vadd.f32 %v1316_v0, %v1021_v9  ;;  %v1059_v26 = vadd.f32 %v1296_v10, %v1011_v14  ;;  %v1022_v28 = vadd.f32 %v2012_v33, %v999_v15  ;;  %v1012_v31 = vadd.f32 %v2012_v33, %v989_v7 }
 0x154   :  { %v1077_v29 = vmax.f32 %v1061_v16, 0.0  ;;  %v1067_v63 = vadd.f32 %v1312_v11, %v1019_v18  ;;  %v1062_v32 = vadd.f32 %v1301_v12, %v1014_v19  ;;  %v1020_v57 = vadd.f32 %v2012_v33, %v997_v24 }
 0x155   :  { %v1085_v13 = vmax.f32 %v1069_v25, 0.0  ;;  %v1075_v21 = vmax.f32 %v1059_v26, 0.0  ;;  %v1070_v0 = vadd.f32 %v1317_v20, %v1022_v28  ;;  %v1060_v10 = vadd.f32 %v1297_v23, %v1012_v31 }
 0x156   :  { %v1276_v34 = vpack.c.bf16 %v1077_v29, %v1077_v29  ;;  %v1083_v35 = vmax.f32 %v1067_v63, 0.0  ;;  %v1078_v37 = vmax.f32 %v1062_v32, 0.0  ;;  %v1068_v53 = vadd.f32 %v1313_v5, %v1020_v57 }
 0x157   :  { %v1284_v11 = vpack.c.bf16 %v1085_v13, %v1085_v13  ;;  %v1274_v30 = vpack.c.bf16 %v1075_v21, %v1075_v21  ;;  %v1086_v46 = vmax.f32 %v1070_v0, 0.0  ;;  %v1076_v12 = vmax.f32 %v1060_v10, 0.0 }
 0x158   :  { %1158 = vst.msk [vmem:[%s2158_s5 + $0x18] sm:$0xf] %vm1151_vm1, %v1276_v34  ;;  %v1282_v38 = vpack.c.bf16 %v1083_v35, %v1083_v35  ;;  %v1277_v20 = vpack.c.bf16 %v1078_v37, %v1078_v37  ;;  %v1084_v33 = vmax.f32 %v1068_v53, 0.0 }
 0x159   :  { %1166 = vst.msk [vmem:[%s2158_s5 + $0x38] sm:$0xf] %vm1151_vm1, %v1284_v11  ;;  %1156 = vst.msk [vmem:[%s2158_s5 + $0x10] sm:$0xf] %vm1151_vm1, %v1274_v30  ;;  %v1285_v49 = vpack.c.bf16 %v1086_v46, %v1086_v46  ;;  %v1275_v50 = vpack.c.bf16 %v1076_v12, %v1076_v12 }
 0x15a   :  { %1164 = vst.msk [vmem:[%s2158_s5 + $0x30] sm:$0xf] %vm1151_vm1, %v1282_v38  ;;  %1159 = vst.msk [vmem:[%s2158_s5 + $0x1c] sm:$0xf] %vm1151_vm1, %v1277_v20  ;;  %v1283_v23 = vpack.c.bf16 %v1084_v33, %v1084_v33 }
 0x15b   :  { %1167 = vst.msk [vmem:[%s2158_s5 + $0x3c] sm:$0xf] %vm1151_vm1, %v1285_v49  ;;  %1157 = vst.msk [vmem:[%s2158_s5 + $0x14] sm:$0xf] %vm1151_vm1, %v1275_v50 }
 0x15c   :  { %1165 = vst.msk [vmem:[%s2158_s5 + $0x34] sm:$0xf] %vm1151_vm1, %v1283_v23 }

// kernel: res18_feature_forward.30
= control target key start
LH: loop header
LB: loop body
LE: loop exit
PB: predicated region body
PF: predicated region fallthrough
CT: control target
= control target key end

     0   :  { %s1024_s1 = inlined_call_operand.vmem [shape: bf16[640,128], index: 1, kind: input, shape index: {}]   ;;  %s1025_s0 = inlined_call_operand.vmem [shape: bf16[32,640], index: 0, kind: input, shape index: {}]   ;;  %s1026_s2 = inlined_call_operand.vmem [shape: f32[1,128], index: 2, kind: input, shape index: {}]   ;;  %s1027_s3 = inlined_call_operand.vmem [shape: f32[1,128], index: 3, kind: input, shape index: {}]   ;;  %s1028_s4 = inlined_call_operand.vmem [shape: bf16[32,128], index: 4, kind: output, shape index: {}]  }
   0x1   :  { %v783_v0 = vld [vmem:[%s1024_s1 + $0x40] sm:$0xff]   ;;  %v787_v4 = vld [vmem:[%s1024_s1 + $0x48] sm:$0xff]   ;;  %v791_v8 = vld [vmem:[%s1024_s1 + $0x50] sm:$0xff]  }
   0x2   :  { %v784_v1 = vld [vmem:[%s1024_s1 + $0xc0] sm:$0xff]   ;;  %697 = vmatprep.subr.bf16.mxu0 %v783_v0  ;;  %v788_v5 = vld [vmem:[%s1024_s1 + $0xc8] sm:$0xff]   ;;  %v792_v9 = vld [vmem:[%s1024_s1 + $0xd0] sm:$0xff]  }
   0x3   :  { %v785_v2 = vld [vmem:[%s1024_s1] sm:$0xff]   ;;  %725 = vmatprep.subr.bf16.mxu1 %v784_v1  ;;  %v789_v6 = vld [vmem:[%s1024_s1 + $0x8] sm:$0xff]   ;;  %v793_v10 = vld [vmem:[%s1024_s1 + $0x10] sm:$0xff]  }
   0x4   :  { %v786_v3 = vld [vmem:[%s1024_s1 + $0x80] sm:$0xff]   ;;  %698 = vmatpush3.bf16.msra.mxu0 %v785_v2  ;;  %v790_v7 = vld [vmem:[%s1024_s1 + $0x88] sm:$0xff]   ;;  %v794_v11 = vld [vmem:[%s1024_s1 + $0x90] sm:$0xff]  }
   0x5   :  { %726 = vmatpush3.bf16.msra.mxu1 %v786_v3  ;;  %699 = vmatprep.subr.bf16.mxu0 %v787_v4  ;;  %v795_v12 = vld [vmem:[%s1024_s1 + $0x58] sm:$0xff]   ;;  %v799_v16 = vld [vmem:[%s1024_s1 + $0x60] sm:$0xff]   ;;  %v803_v20 = vld [vmem:[%s1024_s1 + $0x68] sm:$0xff]  }
   0x6   :  { %727 = vmatprep.subr.bf16.mxu1 %v788_v5  ;;  %v796_v13 = vld [vmem:[%s1024_s1 + $0xd8] sm:$0xff]   ;;  %v800_v17 = vld [vmem:[%s1024_s1 + $0xe0] sm:$0xff]   ;;  %v804_v21 = vld [vmem:[%s1024_s1 + $0xe8] sm:$0xff]  }
   0x7   :  { %v797_v14 = vld [vmem:[%s1024_s1 + $0x18] sm:$0xff]   ;;  %v801_v18 = vld [vmem:[%s1024_s1 + $0x20] sm:$0xff]   ;;  %v805_v22 = vld [vmem:[%s1024_s1 + $0x28] sm:$0xff]  }
   0x8   :  { %700 = vmatpush3.bf16.msra.mxu0 %v789_v6  ;;  %v798_v15 = vld [vmem:[%s1024_s1 + $0x98] sm:$0xff]   ;;  %v802_v19 = vld [vmem:[%s1024_s1 + $0xa0] sm:$0xff]   ;;  %v806_v23 = vld [vmem:[%s1024_s1 + $0xa8] sm:$0xff]  }
   0x9   :  { %728 = vmatpush3.bf16.msra.mxu1 %v790_v7  ;;  %701 = vmatprep.subr.bf16.mxu0 %v791_v8  ;;  %v807_v24 = vld [vmem:[%s1024_s1 + $0x70] sm:$0xff]   ;;  %v811_v28 = vld [vmem:[%s1024_s1 + $0x78] sm:$0xff]   ;;  %v820_v35 = vld [vmem:[%s1025_s0 + $0xc] ss:$20 sps:$4 sm:$0xff]  }
   0xa   :  { %729 = vmatprep.subr.bf16.mxu1 %v792_v9  ;;  %v808_v25 = vld [vmem:[%s1024_s1 + $0xf0] sm:$0xff]   ;;  %v812_v29 = vld [vmem:[%s1024_s1 + $0xf8] sm:$0xff]   ;;  %v821_v36 = vld [vmem:[%s1024_s1 + $0x100] sm:$0xff]   ;;  %495 = vmatprep.mubr.bf16.mxu1 %v820_v35 }
   0xb   :  { %v809_v26 = vld [vmem:[%s1024_s1 + $0x30] sm:$0xff]   ;;  %v813_v30 = vld [vmem:[%s1024_s1 + $0x38] sm:$0xff]   ;;  %v822_v37 = vld [vmem:[%s1024_s1 + $0x108] sm:$0xff]  }
   0xc   :  { %702 = vmatpush3.bf16.msra.mxu0 %v793_v10  ;;  %v810_v27 = vld [vmem:[%s1024_s1 + $0xb0] sm:$0xff]   ;;  %v814_v31 = vld [vmem:[%s1024_s1 + $0xb8] sm:$0xff]   ;;  %v826_v39 = vld [vmem:[%s1025_s0 + $0x2c] ss:$20 sps:$4 sm:$0xff]  }
   0xd   :  { %730 = vmatpush3.bf16.msra.mxu1 %v794_v11  ;;  %703 = vmatprep.subr.bf16.mxu0 %v795_v12  ;;  %v815_v32 = vld [vmem:[%s1025_s0] ss:$20 sps:$4 sm:$0xff]   ;;  %v817_v33 = vld [vmem:[%s1025_s0 + $0x4] ss:$20 sps:$4 sm:$0xff]   ;;  %v818_v34 = vld [vmem:[%s1025_s0 + $0x8] ss:$20 sps:$4 sm:$0xff]  }
   0xe   :  { %731 = vmatprep.subr.bf16.mxu1 %v796_v13  ;;  %446 = vmatprep.mubr.bf16.mxu0 %v817_v33  ;;  %v823_v38 = vld [vmem:[%s1024_s1 + $0x110] sm:$0xff]   ;;  %v824_v41 = vld [vmem:[%s1024_s1 + $0x118] sm:$0xff]   ;;  %v825_v45 = vld [vmem:[%s1024_s1 + $0x120] sm:$0xff]  }
   0xf   :  { %v828_v40 = vld [vmem:[%s1025_s0 + $0x34] ss:$20 sps:$4 sm:$0xff]   ;;  %v832_v43 = vld [vmem:[%s1025_s0 + $0x30] ss:$20 sps:$4 sm:$0xff]   ;;  %v834_v48 = vld [vmem:[%s1024_s1 + $0x138] sm:$0xff]  }
  0x10   :  { %704 = vmatpush3.bf16.msra.mxu0 %v797_v14  ;;  %v831_v42 = vld [vmem:[%s1025_s0 + $0x28] ss:$20 sps:$4 sm:$0xff]   ;;  %v835_v44 = vld [vmem:[%s1025_s0 + $0x10] ss:$20 sps:$4 sm:$0xff]   ;;  %v836_v49 = vld [vmem:[%s1025_s0 + $0x38] ss:$20 sps:$4 sm:$0xff]  }
  0x11   :  { %732 = vmatpush3.bf16.msra.mxu1 %v798_v15  ;;  %705 = vmatprep.subr.bf16.mxu0 %v799_v16  ;;  %v830_v46 = vld [vmem:[%s1024_s1 + $0x128] sm:$0xff]   ;;  %v833_v47 = vld [vmem:[%s1024_s1 + $0x130] sm:$0xff]   ;;  %v676_v15 = vld [vmem:[%s1026_s2] ss:$0 sm:$0xff] }
  0x12   :  { %733 = vmatprep.subr.bf16.mxu1 %v800_v17 }
  0x14   :  { %706 = vmatpush3.bf16.msra.mxu0 %v801_v18  ;;  %v677_v18 = vld [vmem:[%s1027_s3] ss:$0 sm:$0xff] }
  0x15   :  { %734 = vmatpush3.bf16.msra.mxu1 %v802_v19  ;;  %707 = vmatprep.subr.bf16.mxu0 %v803_v20 }
  0x16   :  { %735 = vmatprep.subr.bf16.mxu1 %v804_v21 }
  0x18   :  { %708 = vmatpush3.bf16.msra.mxu0 %v805_v22 }
  0x19   :  { %736 = vmatpush3.bf16.msra.mxu1 %v806_v23  ;;  %709 = vmatprep.subr.bf16.mxu0 %v807_v24 }
  0x1a   :  { %737 = vmatprep.subr.bf16.mxu1 %v808_v25 }
  0x1c   :  { %710 = vmatpush3.bf16.msra.mxu0 %v809_v26 }
  0x1d   :  { %738 = vmatpush3.bf16.msra.mxu1 %v810_v27  ;;  %711 = vmatprep.subr.bf16.mxu0 %v811_v28 }
  0x1e   :  { %739 = vmatprep.subr.bf16.mxu1 %v812_v29 }
  0x20   :  { %712 = vmatpush3.bf16.msra.mxu0 %v813_v30 }
  0x21   :  { %740 = vmatpush3.bf16.msra.mxu1 %v814_v31  ;;  %763 = vmatprep.subr.bf16.mxu0 %v821_v36 }
  0x23   :  { %447 = vmatmul.mubr.bf16.vlgmr.msra.gmra.mrb[0].mxu0 %v815_v32 }
  0x24   :  { %496 = vmatmul.mubr.bf16.vlgmr.msra.gmra.mrb[0].mxu1 %v818_v34  ;;  %764 = vmatpush3.bf16.msra.mxu0 %v821_v36 }
  0x25   :  { %765 = vmatprep.subr.bf16.mxu0 %v822_v37  ;;  %454 = vmatprep.mubr.bf16.mxu0 %v826_v39 }
  0x26   :  { %503 = vmatprep.mubr.bf16.mxu1 %v828_v40 }
  0x28   :  { %766 = vmatpush3.bf16.msra.mxu0 %v822_v37 }
  0x29   :  { %767 = vmatprep.subr.bf16.mxu0 %v823_v38 }
  0x2b   :  { %455 = vmatmul.mubr.bf16.gmra.mrb[4].mxu0 %v831_v42 }
  0x2c   :  { %504 = vmatmul.mubr.bf16.gmra.mrb[4].mxu1 %v832_v43  ;;  %768 = vmatpush3.bf16.msra.mxu0 %v823_v38 }
  0x2d   :  { %769 = vmatprep.subr.bf16.mxu0 %v824_v41  ;;  %779 = vmatprep.mubr.bf16.mxu0 %v835_v44 }
  0x30   :  { %770 = vmatpush3.bf16.msra.mxu0 %v824_v41 }
  0x31   :  { %771 = vmatprep.subr.bf16.mxu0 %v825_v45 }
  0x34   :  { %772 = vmatpush3.bf16.msra.mxu0 %v825_v45 }
  0x35   :  { %773 = vmatprep.subr.bf16.mxu0 %v830_v46 }
  0x38   :  { %774 = vmatpush3.bf16.msra.mxu0 %v830_v46 }
  0x39   :  { %775 = vmatprep.subr.bf16.mxu0 %v833_v47 }
  0x3c   :  { %776 = vmatpush3.bf16.msra.mxu0 %v833_v47 }
  0x3d   :  { %777 = vmatprep.subr.bf16.mxu0 %v834_v48 }
  0x40   :  { %778 = vmatpush3.bf16.msra.mxu0 %v834_v48 }
  0x43   :  { %780 = vmatmul.mubr.bf16.vlgmr.msra.gmra.mrb[8].mxu0 %v836_v49 }
  0xf6   :  { %v713_v50 = vpop.f32.mrb[0].mxu0 }
  0xf7   :  { %v741_v51 = vpop.f32.mrb[0].mxu1  ;;  %v714_v52 = vpop.f32.mrb[1].mxu0 }
  0xf8   :  { %v715_v53 = vadd.f32 %v714_v52, %v713_v50  ;;  %v742_v54 = vpop.f32.mrb[1].mxu1  ;;  %v716_v55 = vpop.f32.mrb[2].mxu0 }
  0xf9   :  { %v743_v56 = vadd.f32 %v742_v54, %v741_v51  ;;  %v744_v57 = vpop.f32.mrb[2].mxu1  ;;  %v717_v58 = vpop.f32.mrb[3].mxu0 }
  0xfa   :  { %v718_v59 = vadd.f32 %v717_v58, %v716_v55  ;;  %v745_v60 = vpop.f32.mrb[3].mxu1 }
  0xfb   :  { %v746_v61 = vadd.f32 %v745_v60, %v744_v57  ;;  %v498_v62 = vadd.f32 %v743_v56, %v715_v53 }
  0xfd   :  { %v501_v63 = vadd.f32 %v746_v61, %v718_v59 }
  0xfe   :  { %v719_v0 = vpop.f32.mrb[4].mxu0 }
  0xff   :  { %v747_v1 = vpop.f32.mrb[4].mxu1  ;;  %v720_v2 = vpop.f32.mrb[5].mxu0 }
 0x100   :  { %v721_v3 = vadd.f32 %v720_v2, %v719_v0  ;;  %v748_v4 = vpop.f32.mrb[5].mxu1  ;;  %v722_v5 = vpop.f32.mrb[6].mxu0 }
 0x101   :  { %v749_v6 = vadd.f32 %v748_v4, %v747_v1  ;;  %v750_v7 = vpop.f32.mrb[6].mxu1  ;;  %v723_v8 = vpop.f32.mrb[7].mxu0 }
 0x102   :  { %v724_v9 = vadd.f32 %v723_v8, %v722_v5  ;;  %v751_v10 = vpop.f32.mrb[7].mxu1 }
 0x103   :  { %v752_v11 = vadd.f32 %v751_v10, %v750_v7  ;;  %v506_v12 = vadd.f32 %v749_v6, %v721_v3 }
 0x105   :  { %v509_v13 = vadd.f32 %v752_v11, %v724_v9 }
 0x116   :  { %v781_v14 = vpop.f32.mrb[8].mxu0 }
 0x117   :  { %v555_v16 = vadd.f32 %v781_v14, %v506_v12  ;;  %v546_v17 = vpop.f32.mrb[9].mxu0 }
 0x118   :  { %v547_v19 = vadd.f32 %v546_v17, %v498_v62  ;;  %v782_v20 = vpop.f32.mrb[10].mxu0 }
 0x119   :  { %v585_v21 = vmul.f32 %v676_v15, %v555_v16  ;;  %v558_v22 = vadd.f32 %v782_v20, %v509_v13  ;;  %v549_v23 = vpop.f32.mrb[11].mxu0 }
 0x11a   :  { %v583_v24 = vmul.f32 %v676_v15, %v547_v19  ;;  %v550_v25 = vadd.f32 %v549_v23, %v501_v63 }
 0x11b   :  { %v596_v26 = vadd.f32 %v677_v18, %v585_v21  ;;  %v586_v27 = vmul.f32 %v676_v15, %v558_v22 }
 0x11c   :  { %v594_v28 = vadd.f32 %v677_v18, %v583_v24  ;;  %v584_v29 = vmul.f32 %v676_v15, %v550_v25 }
 0x11d   :  { %v597_v30 = vadd.f32 %v677_v18, %v586_v27  ;;  %v600_v32 = vmax.f32 %v596_v26, 0.0 }
 0x11e   :  { %v595_v31 = vadd.f32 %v677_v18, %v584_v29  ;;  %v598_v34 = vmax.f32 %v594_v28, 0.0 }
 0x11f   :  { %v601_v33 = vmax.f32 %v597_v30, 0.0 }
 0x120   :  { %v599_v35 = vmax.f32 %v595_v31, 0.0 }
 0x121   :  { %v694_v36 = vpack.c.bf16 %v601_v33, %v600_v32 }
 0x122   :  { %v689_v37 = vpack.c.bf16 %v599_v35, %v598_v34 }
 0x123   :  { %696 = vst [vmem:[%s1028_s4 + $0x8] sm:$0xff] %v694_v36  }
 0x124   :  { %690 = vst [vmem:[%s1028_s4] sm:$0xff] %v689_v37  }

// kernel: res18_feature_forward.29
= control target key start
LH: loop header
LB: loop body
LE: loop exit
PB: predicated region body
PF: predicated region fallthrough
CT: control target
= control target key end

     0   :  { %s358_s1 = inlined_call_operand.vmem [shape: bf16[128,128], index: 1, kind: input, shape index: {}]   ;;  %s359_s0 = inlined_call_operand.vmem [shape: bf16[32,128], index: 0, kind: input, shape index: {}]   ;;  %s360_s2 = inlined_call_operand.vmem [shape: f32[1,128], index: 2, kind: input, shape index: {}]   ;;  %s361_s3 = inlined_call_operand.vmem [shape: f32[1,128], index: 3, kind: input, shape index: {}]   ;;  %s362_s4 = inlined_call_operand.vmem [shape: bf16[32,128], index: 4, kind: output, shape index: {}]  }
   0x1   :  { %v281_v0 = vld [vmem:[%s358_s1] sm:$0xff]   ;;  %v282_v1 = vld [vmem:[%s358_s1 + $0x8] sm:$0xff]   ;;  %v283_v2 = vld [vmem:[%s358_s1 + $0x10] sm:$0xff]  }
   0x2   :  { %261 = vmatprep.subr.bf16.mxu0 %v281_v0  ;;  %v284_v3 = vld [vmem:[%s358_s1 + $0x18] sm:$0xff]   ;;  %v289_v4 = vld [vmem:[%s359_s0] sm:$0xff]   ;;  %v286_v6 = vld [vmem:[%s358_s1 + $0x28] sm:$0xff]  }
   0x3   :  { %262 = vmatpush3.bf16.msra.mxu0 %v281_v0  ;;  %277 = vmatprep.mubr.bf16.mxu0 %v289_v4  ;;  %v285_v5 = vld [vmem:[%s358_s1 + $0x20] sm:$0xff]   ;;  %v287_v7 = vld [vmem:[%s358_s1 + $0x30] sm:$0xff]   ;;  %v288_v8 = vld [vmem:[%s358_s1 + $0x38] sm:$0xff]  }
   0x4   :  { %263 = vmatprep.subr.bf16.mxu0 %v282_v1  ;;  %v290_v9 = vld [vmem:[%s359_s0 + $0x8] sm:$0xff]   ;;  %v230_v10 = vld [vmem:[%s360_s2] ss:$0 sm:$0xff] }
   0x5   :  { %v231_v14 = vld [vmem:[%s361_s3] ss:$0 sm:$0xff] }
   0x7   :  { %264 = vmatpush3.bf16.msra.mxu0 %v282_v1 }
   0x8   :  { %265 = vmatprep.subr.bf16.mxu0 %v283_v2 }
   0xb   :  { %266 = vmatpush3.bf16.msra.mxu0 %v283_v2 }
   0xc   :  { %267 = vmatprep.subr.bf16.mxu0 %v284_v3 }
   0xf   :  { %268 = vmatpush3.bf16.msra.mxu0 %v284_v3 }
  0x10   :  { %269 = vmatprep.subr.bf16.mxu0 %v285_v5 }
  0x13   :  { %270 = vmatpush3.bf16.msra.mxu0 %v285_v5 }
  0x14   :  { %271 = vmatprep.subr.bf16.mxu0 %v286_v6 }
  0x17   :  { %272 = vmatpush3.bf16.msra.mxu0 %v286_v6 }
  0x18   :  { %273 = vmatprep.subr.bf16.mxu0 %v287_v7 }
  0x1b   :  { %274 = vmatpush3.bf16.msra.mxu0 %v287_v7 }
  0x1c   :  { %275 = vmatprep.subr.bf16.mxu0 %v288_v8 }
  0x1f   :  { %276 = vmatpush3.bf16.msra.mxu0 %v288_v8 }
  0x22   :  { %278 = vmatmul.mubr.bf16.vlgmr.msra.gmra.mrb[0].mxu0 %v290_v9 }
  0xf5   :  { %v279_v11 = vpop.f32.mrb[0].mxu0 }
  0xf6   :  { %v183_v12 = vmul.f32 %v279_v11, %v230_v10  ;;  %v144_v13 = vpop.f32.mrb[1].mxu0 }
  0xf7   :  { %v181_v15 = vmul.f32 %v230_v10, %v144_v13  ;;  %v280_v16 = vpop.f32.mrb[2].mxu0 }
  0xf8   :  { %v184_v17 = vmul.f32 %v280_v16, %v230_v10  ;;  %v147_v18 = vpop.f32.mrb[3].mxu0  ;;  %v194_v20 = vadd.f32 %v231_v14, %v183_v12 }
  0xf9   :  { %v182_v19 = vmul.f32 %v230_v10, %v147_v18  ;;  %v192_v22 = vadd.f32 %v231_v14, %v181_v15 }
  0xfa   :  { %v195_v21 = vadd.f32 %v231_v14, %v184_v17 }
  0xfb   :  { %v193_v23 = vadd.f32 %v231_v14, %v182_v19 }
  0xfc   :  { %v248_v24 = vpack.c.bf16 %v195_v21, %v194_v20 }
  0xfd   :  { %v243_v25 = vpack.c.bf16 %v193_v23, %v192_v22 }
  0xfe   :  { %250 = vst [vmem:[%s362_s4 + $0x8] sm:$0xff] %v248_v24  }
  0xff   :  { %244 = vst [vmem:[%s362_s4] sm:$0xff] %v243_v25  }

// kernel: res18_feature_forward.32
= control target key start
LH: loop header
LB: loop body
LE: loop exit
PB: predicated region body
PF: predicated region fallthrough
CT: control target
= control target key end

     0   :  { %s1421_s15 = smov 0   ;;  %s1423_s16 = smov 0   ;;  %s1554_s0 = inlined_call_operand.vmem [shape: bf16[32,1280], index: 0, kind: input, shape index: {}]   ;;  %s1555_s1 = inlined_call_operand.vmem [shape: bf16[1280,128], index: 1, kind: input, shape index: {}]   ;;  %s1556_s2 = inlined_call_operand.vmem [shape: f32[1,128], index: 2, kind: input, shape index: {}]   ;;  %s1557_s3 = inlined_call_operand.vmem [shape: f32[1,128], index: 3, kind: input, shape index: {}]   ;;  %s1558_s4 = inlined_call_operand.vmem [shape: bf16[32,128], index: 4, kind: output, shape index: {}]  }
   0x1   :  { %s1425_s17 = smov 0   ;;  %s1427_s18 = smov 0  }
   0x2   :  { %s1429_s19 = smov 0  }
   0x3 LB: > { %s26_s20 = sadd.s32 1, %s1389_s18  ;;  %p49_p1 = scmp.ne.s32.totalorder %s1381_s16, %s1377_s15  ;;  %s1393_s19 = sphi %s1429_s19, %s14_s19   ;;  %s1389_s18 = sphi %s1427_s18, %s1562_s18   ;;  %s1385_s17 = sphi %s1425_s17, %s1561_s17   ;;  %s1381_s16 = sphi %s1423_s16, %s1560_s16   ;;  %s1377_s15 = sphi %s1421_s15, %s1559_s15  }
   0x4   : > { %p27_p0 = scmp.ge.s32.totalorder %s26_s20, 2  ;;  %p50_p2 = scmp.eq.s32.totalorder %s1393_s19, 0 }
   0x5   : > { %s42_s22 = sadd.s32 1, %s1381_s16  ;;  %p1082_p5 = scmp.ge.s32.totalorder %s1393_s19, 2 }
   0x6   : > { %s1564_s20 = smov (%p27_p0, %s26_s20), 0  ;;  %p51_p3 = por %p50_p2, %p49_p1 }
   0x7   : > { %s38_s21 = ssub.s32 %s1389_s18, %s1564_s20  ;;  %195 = sbr.rel (%p1082_p5) target bundleno = 25 (0x19), region = 24 }
   0x8   : > { %p40_p4 = scmp.eq.s32.totalorder %s38_s21, 0 }
   0xa   : > { %s1456_s23 = scalar_select %p40_p4, %s1381_s16, %s42_s22  }
   0xe   : > { %198 = sbr.rel (!%p51_p3) target bundleno = 25 (0x19), region = 28  ;;  %s200_s24 = sand.u32 (%p51_p3), 1, %s1381_s16  }
   0xf   : > { %s1156_s25 = smul.u32 (%p51_p3), 20, %s1389_s18 }
  0x10   : > { %s1258_s26 = smul.u32 (%p51_p3), 80, %s200_s24 }
  0x11   : > { %s208_s29 = scalar_lea.vmem (%p51_p3), %s1554_s0, %s1156_s25 }
  0x12   : > { %v223_v0 = vld [vmem:[%s208_s29] sm:$0xff] (%p51_p3)  ;;  %v225_v1 = vld [vmem:[%s208_s29 + $0x8] sm:$0xff] (%p51_p3)  ;;  %s202_s30 = scalar_lea.vmem (%p51_p3), [#allocation3], %s1258_s26  ;;  %v229_v3 = vld [vmem:[%s208_s29 + $0x30] sm:$0xff] (%p51_p3) }
  0x13   : > { %v227_v2 = vld [vmem:[%s208_s29 + $0x28] sm:$0xff] (%p51_p3)  ;;  %224 = vst [vmem:[%s202_s30] sm:$0xff] (%p51_p3), %v223_v0  ;;  %226 = vst [vmem:[%s202_s30 + $0x8] sm:$0xff] (%p51_p3), %v225_v1  ;;  %v231_v4 = vld [vmem:[%s208_s29 + $0x50] sm:$0xff] (%p51_p3) }
  0x14   : > { %228 = vst [vmem:[%s202_s30 + $0x14] sm:$0xff] (%p51_p3), %v227_v2  ;;  %v233_v5 = vld [vmem:[%s208_s29 + $0x58] sm:$0xff] (%p51_p3)  ;;  %230 = vst [vmem:[%s202_s30 + $0x1c] sm:$0xff] (%p51_p3), %v229_v3  ;;  %v237_v7 = vld [vmem:[%s208_s29 + $0x80] sm:$0xff] (%p51_p3) }
  0x15   : > { %232 = vst [vmem:[%s202_s30 + $0x28] sm:$0xff] %v231_v4  ;;  %234 = vst [vmem:[%s202_s30 + $0x30] sm:$0xff] %v233_v5  ;;  %v235_v6 = vld [vmem:[%s208_s29 + $0x78] sm:$0xff]  ;;  %v1084_v8 = vld [vmem:[%s208_s29 + $0x10] sm:$0xf] }
  0x16   : > { %236 = vst [vmem:[%s202_s30 + $0x3c] sm:$0xff] %v235_v6  ;;  %238 = vst [vmem:[%s202_s30 + $0x44] sm:$0xff] %v237_v7  ;;  %v1086_v9 = vld [vmem:[%s208_s29 + $0x38] sm:$0xf]  ;;  %v1088_v10 = vld [vmem:[%s208_s29 + $0x60] sm:$0xf] }
  0x17   : > { %1085 = vst [vmem:[%s202_s30 + $0x10] sm:$0xf] %v1084_v8  ;;  %v1090_v11 = vld [vmem:[%s208_s29 + $0x88] sm:$0xf]  ;;  %1087 = vst [vmem:[%s202_s30 + $0x24] sm:$0xf] %v1086_v9 }
  0x18   : > { %1089 = vst [vmem:[%s202_s30 + $0x38] sm:$0xf] %v1088_v10  ;;  %1091 = vst [vmem:[%s202_s30 + $0x4c] sm:$0xf] %v1090_v11 }
  0x19 PF: > { %p1092_p6 = scmp.ge.s32.totalorder %s1393_s19, 1  ;;  %p270_p7 = scmp.lt.s32.totalorder %s1393_s19, 3 }
  0x1b   : > { %p271_p8 = pnand %p1092_p6, %p270_p7 }
  0x1c   : > { %s277_s5 = sand.u32 (!%p271_p8), 1, %s1377_s15   ;;  %s321_s6 = smul.u32 (!%p271_p8), 80, %s1385_s17 }
  0x1d   : > { %274 = sbr.rel (%p271_p8) target bundleno = 345 (0x159), region = 58  ;;  %p1094_p10 = scmp.ne.s32.totalorder (!%p271_p8), %s1385_s17, 0 }
  0x1e   : > { %s1259_s7 = smul.u32 (!%p271_p8), 80, %s277_s5  ;;  %p322_p9 = scmp.lt.s32.totalorder (!%p271_p8), %s321_s6, 159 }
  0x20   : > { %s1473_s12 = scalar_lea.vmem (!%p271_p8), [#allocation3], %s1259_s7 }
  0x24   : > { %s1566_s6 = smov (!%p322_p9, %s321_s6), 159  ;;  %349 = sbr.rel (%p1094_p10) target bundleno = 43 (0x2b), region = 66 }
  0x25   : > { %s1093_s8 = sshll.u32 %s1566_s6, 2  ;;  %v1395_v12 = vmov (!%p1094_p10), 0.0  }
  0x26   : > { %s1471_s11 = scalar_lea.vmem %s1555_s1, %s1093_s8  ;;  %350 = vst [vmem:[#allocation2] sm:$0xff] (!%p1094_p10), %v1395_v12  ;;  %351 = vst [vmem:[#allocation2 + $0x8] sm:$0xff] (!%p1094_p10), %v1395_v12 }
  0x27   : > { %352 = vst [vmem:[#allocation2 + $0x10] sm:$0xff] (!%p1094_p10), %v1395_v12  ;;  %353 = vst [vmem:[#allocation2 + $0x18] sm:$0xff] (!%p1094_p10), %v1395_v12 }
  0x2b PF: > { %v1301_v13 = vld [vmem:[%s1471_s11 + $0x40] sm:$0xff]   ;;  %v1305_v17 = vld [vmem:[%s1471_s11 + $0x48] sm:$0xff]   ;;  %v1309_v21 = vld [vmem:[%s1471_s11 + $0x50] sm:$0xff]   ;;  %p1145_p11 = scmp.ne.s32.totalorder %s1385_s17, 1 }
  0x2c   : > { %v1302_v14 = vld [vmem:[%s1471_s11 + $0xc0] sm:$0xff]   ;;  %1172 = vmatprep.subr.bf16.mxu0 %v1301_v13  ;;  %v1306_v18 = vld [vmem:[%s1471_s11 + $0xc8] sm:$0xff]   ;;  %v1310_v22 = vld [vmem:[%s1471_s11 + $0xd0] sm:$0xff]  }
  0x2d   : > { %v1303_v15 = vld [vmem:[%s1471_s11] sm:$0xff]   ;;  %1200 = vmatprep.subr.bf16.mxu1 %v1302_v14  ;;  %v1307_v19 = vld [vmem:[%s1471_s11 + $0x8] sm:$0xff]   ;;  %v1311_v23 = vld [vmem:[%s1471_s11 + $0x10] sm:$0xff]  }
  0x2e   : > { %v1304_v16 = vld [vmem:[%s1471_s11 + $0x80] sm:$0xff]   ;;  %1173 = vmatpush3.bf16.msra.mxu0 %v1303_v15  ;;  %v1308_v20 = vld [vmem:[%s1471_s11 + $0x88] sm:$0xff]   ;;  %v1312_v24 = vld [vmem:[%s1471_s11 + $0x90] sm:$0xff]  }
  0x2f   : > { %1201 = vmatpush3.bf16.msra.mxu1 %v1304_v16  ;;  %1174 = vmatprep.subr.bf16.mxu0 %v1305_v17  ;;  %v1313_v25 = vld [vmem:[%s1471_s11 + $0x58] sm:$0xff]   ;;  %v1317_v29 = vld [vmem:[%s1471_s11 + $0x60] sm:$0xff]   ;;  %v1321_v33 = vld [vmem:[%s1471_s11 + $0x68] sm:$0xff]  }
  0x30   : > { %1202 = vmatprep.subr.bf16.mxu1 %v1306_v18  ;;  %v1314_v26 = vld [vmem:[%s1471_s11 + $0xd8] sm:$0xff]   ;;  %v1318_v30 = vld [vmem:[%s1471_s11 + $0xe0] sm:$0xff]   ;;  %v1322_v34 = vld [vmem:[%s1471_s11 + $0xe8] sm:$0xff]  }
  0x31   : > { %v1315_v27 = vld [vmem:[%s1471_s11 + $0x18] sm:$0xff]   ;;  %v1319_v31 = vld [vmem:[%s1471_s11 + $0x20] sm:$0xff]   ;;  %v1323_v35 = vld [vmem:[%s1471_s11 + $0x28] sm:$0xff]  }
  0x32   : > { %1175 = vmatpush3.bf16.msra.mxu0 %v1307_v19  ;;  %v1316_v28 = vld [vmem:[%s1471_s11 + $0x98] sm:$0xff]   ;;  %v1320_v32 = vld [vmem:[%s1471_s11 + $0xa0] sm:$0xff]   ;;  %v1324_v36 = vld [vmem:[%s1471_s11 + $0xa8] sm:$0xff]  }
  0x33   : > { %1203 = vmatpush3.bf16.msra.mxu1 %v1308_v20  ;;  %1176 = vmatprep.subr.bf16.mxu0 %v1309_v21  ;;  %v1325_v37 = vld [vmem:[%s1471_s11 + $0x70] sm:$0xff]   ;;  %v1329_v41 = vld [vmem:[%s1471_s11 + $0x78] sm:$0xff]   ;;  %v1339_v49 = vld [vmem:[%s1471_s11 + $0x100] sm:$0xff]  }
  0x34   : > { %1204 = vmatprep.subr.bf16.mxu1 %v1310_v22  ;;  %v1326_v38 = vld [vmem:[%s1471_s11 + $0xf0] sm:$0xff]   ;;  %v1330_v42 = vld [vmem:[%s1471_s11 + $0xf8] sm:$0xff]   ;;  %v1340_v50 = vld [vmem:[%s1471_s11 + $0x108] sm:$0xff]  }
  0x35   : > { %v1327_v39 = vld [vmem:[%s1471_s11 + $0x30] sm:$0xff]   ;;  %v1331_v43 = vld [vmem:[%s1471_s11 + $0x38] sm:$0xff]   ;;  %v1343_v58 = vld [vmem:[%s1471_s11 + $0x120] sm:$0xff]  }
  0x36   : > { %1177 = vmatpush3.bf16.msra.mxu0 %v1311_v23  ;;  %v1328_v40 = vld [vmem:[%s1471_s11 + $0xb0] sm:$0xff]   ;;  %v1332_v44 = vld [vmem:[%s1471_s11 + $0xb8] sm:$0xff]   ;;  %v1348_v59 = vld [vmem:[%s1471_s11 + $0x128] sm:$0xff]  }
  0x37   : > { %1205 = vmatpush3.bf16.msra.mxu1 %v1312_v24  ;;  %1178 = vmatprep.subr.bf16.mxu0 %v1313_v25  ;;  %v1333_v45 = vld [vmem:[%s1473_s12] ss:$20 sps:$4 sm:$0xff]   ;;  %v1335_v46 = vld [vmem:[%s1473_s12 + $0x4] ss:$20 sps:$4 sm:$0xff]   ;;  %v1336_v47 = vld [vmem:[%s1473_s12 + $0x8] ss:$20 sps:$4 sm:$0xff]  }
  0x38   : > { %1206 = vmatprep.subr.bf16.mxu1 %v1314_v26  ;;  %v1338_v48 = vld [vmem:[%s1473_s12 + $0xc] ss:$20 sps:$4 sm:$0xff]   ;;  %774 = vmatprep.mubr.bf16.mxu0 %v1335_v46  ;;  %v1346_v53 = vld [vmem:[%s1473_s12 + $0x34] ss:$20 sps:$4 sm:$0xff]   ;;  %v1350_v56 = vld [vmem:[%s1473_s12 + $0x30] ss:$20 sps:$4 sm:$0xff]  }
  0x39   : > { %823 = vmatprep.mubr.bf16.mxu1 %v1338_v48  ;;  %v1341_v51 = vld [vmem:[%s1471_s11 + $0x110] sm:$0xff]   ;;  %v1342_v54 = vld [vmem:[%s1471_s11 + $0x118] sm:$0xff]   ;;  %v1147_v48 = vld [vmem:[%s1557_s3] ss:$0 sm:$0xff] (!%p1145_p11) }
  0x3a   : > { %1179 = vmatpush3.bf16.msra.mxu0 %v1315_v27  ;;  %v1344_v52 = vld [vmem:[%s1473_s12 + $0x2c] ss:$20 sps:$4 sm:$0xff]   ;;  %v1349_v55 = vld [vmem:[%s1473_s12 + $0x28] ss:$20 sps:$4 sm:$0xff]   ;;  %v1353_v57 = vld [vmem:[%s1473_s12 + $0x10] ss:$20 sps:$4 sm:$0xff]  }
  0x3b   : > { %1207 = vmatpush3.bf16.msra.mxu1 %v1316_v28  ;;  %1180 = vmatprep.subr.bf16.mxu0 %v1317_v29  ;;  %v1351_v60 = vld [vmem:[%s1471_s11 + $0x130] sm:$0xff]   ;;  %v1352_v61 = vld [vmem:[%s1471_s11 + $0x138] sm:$0xff]  }
  0x3c   : > { %1208 = vmatprep.subr.bf16.mxu1 %v1318_v30  ;;  %v1354_v62 = vld [vmem:[%s1473_s12 + $0x38] ss:$20 sps:$4 sm:$0xff]   ;;  %v356_v27 = vld [vmem:[#allocation2 + $0x10] sm:$0xff]  ;;  %v354_v30 = vld [vmem:[#allocation2] sm:$0xff] }
  0x3e   : > { %1181 = vmatpush3.bf16.msra.mxu0 %v1319_v31 }
  0x3f   : > { %1209 = vmatpush3.bf16.msra.mxu1 %v1320_v32  ;;  %1182 = vmatprep.subr.bf16.mxu0 %v1321_v33  ;;  %v357_v33 = vld [vmem:[#allocation2 + $0x18] sm:$0xff] }
  0x40   : > { %1210 = vmatprep.subr.bf16.mxu1 %v1322_v34 }
  0x42   : > { %1183 = vmatpush3.bf16.msra.mxu0 %v1323_v35 }
  0x43   : > { %1211 = vmatpush3.bf16.msra.mxu1 %v1324_v36  ;;  %1184 = vmatprep.subr.bf16.mxu0 %v1325_v37  ;;  %v355_v37 = vld [vmem:[#allocation2 + $0x8] sm:$0xff] }
  0x44   : > { %1212 = vmatprep.subr.bf16.mxu1 %v1326_v38 }
  0x46   : > { %1185 = vmatpush3.bf16.msra.mxu0 %v1327_v39 }
  0x47   : > { %1213 = vmatpush3.bf16.msra.mxu1 %v1328_v40  ;;  %1186 = vmatprep.subr.bf16.mxu0 %v1329_v41 }
  0x48   : > { %1214 = vmatprep.subr.bf16.mxu1 %v1330_v42 }
  0x4a   : > { %1187 = vmatpush3.bf16.msra.mxu0 %v1331_v43 }
  0x4b   : > { %1215 = vmatpush3.bf16.msra.mxu1 %v1332_v44  ;;  %1238 = vmatprep.subr.bf16.mxu0 %v1339_v49 }
  0x4d   : > { %775 = vmatmul.mubr.bf16.vlgmr.msra.gmra.mrb[0].mxu0 %v1333_v45  ;;  %v1146_v45 = vld [vmem:[%s1556_s2] ss:$0 sm:$0xff] (!%p1145_p11) }
  0x4e   : > { %824 = vmatmul.mubr.bf16.vlgmr.msra.gmra.mrb[0].mxu1 %v1336_v47  ;;  %1239 = vmatpush3.bf16.msra.mxu0 %v1339_v49 }
  0x4f   : > { %1240 = vmatprep.subr.bf16.mxu0 %v1340_v50  ;;  %782 = vmatprep.mubr.bf16.mxu0 %v1344_v52 }
  0x50   : > { %831 = vmatprep.mubr.bf16.mxu1 %v1346_v53 }
  0x52   : > { %1241 = vmatpush3.bf16.msra.mxu0 %v1340_v50 }
  0x53   : > { %1242 = vmatprep.subr.bf16.mxu0 %v1341_v51 }
  0x55   : > { %783 = vmatmul.mubr.bf16.gmra.mrb[4].mxu0 %v1349_v55 }
  0x56   : > { %832 = vmatmul.mubr.bf16.gmra.mrb[4].mxu1 %v1350_v56  ;;  %1243 = vmatpush3.bf16.msra.mxu0 %v1341_v51 }
  0x57   : > { %1244 = vmatprep.subr.bf16.mxu0 %v1342_v54  ;;  %1254 = vmatprep.mubr.bf16.mxu0 %v1353_v57 }
  0x5a   : > { %1245 = vmatpush3.bf16.msra.mxu0 %v1342_v54 }
  0x5b   : > { %1246 = vmatprep.subr.bf16.mxu0 %v1343_v58 }
  0x5e   : > { %1247 = vmatpush3.bf16.msra.mxu0 %v1343_v58 }
  0x5f   : > { %1248 = vmatprep.subr.bf16.mxu0 %v1348_v59 }
  0x62   : > { %1249 = vmatpush3.bf16.msra.mxu0 %v1348_v59 }
  0x63   : > { %1250 = vmatprep.subr.bf16.mxu0 %v1351_v60 }
  0x66   : > { %1251 = vmatpush3.bf16.msra.mxu0 %v1351_v60 }
  0x67   : > { %1252 = vmatprep.subr.bf16.mxu0 %v1352_v61 }
  0x6a   : > { %1253 = vmatpush3.bf16.msra.mxu0 %v1352_v61 }
  0x6d   : > { %1255 = vmatmul.mubr.bf16.vlgmr.msra.gmra.mrb[8].mxu0 %v1354_v62 }
 0x120   : > { %v1188_v63 = vpop.f32.mrb[0].mxu0 }
 0x121   : > { %v1216_v0 = vpop.f32.mrb[0].mxu1  ;;  %v1189_v1 = vpop.f32.mrb[1].mxu0 }
 0x122   : > { %v1190_v2 = vadd.f32 %v1189_v1, %v1188_v63  ;;  %v1217_v3 = vpop.f32.mrb[1].mxu1  ;;  %v1191_v4 = vpop.f32.mrb[2].mxu0 }
 0x123   : > { %v1218_v5 = vadd.f32 %v1217_v3, %v1216_v0  ;;  %v1219_v6 = vpop.f32.mrb[2].mxu1  ;;  %v1192_v7 = vpop.f32.mrb[3].mxu0 }
 0x124   : > { %v1193_v8 = vadd.f32 %v1192_v7, %v1191_v4  ;;  %v1220_v9 = vpop.f32.mrb[3].mxu1 }
 0x125   : > { %v1221_v10 = vadd.f32 %v1220_v9, %v1219_v6  ;;  %v826_v11 = vadd.f32 %v1218_v5, %v1190_v2 }
 0x127   : > { %v829_v12 = vadd.f32 %v1221_v10, %v1193_v8 }
 0x128   : > { %v1194_v13 = vpop.f32.mrb[4].mxu0 }
 0x129   : > { %v1222_v14 = vpop.f32.mrb[4].mxu1  ;;  %v1195_v15 = vpop.f32.mrb[5].mxu0 }
 0x12a   : > { %v1196_v16 = vadd.f32 %v1195_v15, %v1194_v13  ;;  %v1223_v17 = vpop.f32.mrb[5].mxu1  ;;  %v1197_v18 = vpop.f32.mrb[6].mxu0 }
 0x12b   : > { %v1224_v19 = vadd.f32 %v1223_v17, %v1222_v14  ;;  %v1225_v20 = vpop.f32.mrb[6].mxu1  ;;  %v1198_v21 = vpop.f32.mrb[7].mxu0 }
 0x12c   : > { %v1199_v22 = vadd.f32 %v1198_v21, %v1197_v18  ;;  %v1226_v23 = vpop.f32.mrb[7].mxu1 }
 0x12d   : > { %v1227_v24 = vadd.f32 %v1226_v23, %v1225_v20  ;;  %v834_v25 = vadd.f32 %v1224_v19, %v1196_v16 }
 0x12f   : > { %v837_v26 = vadd.f32 %v1227_v24, %v1199_v22 }
 0x140   : > { %v1256_v28 = vpop.f32.mrb[8].mxu0 }
 0x141   : > { %v883_v29 = vadd.f32 %v1256_v28, %v834_v25  ;;  %v874_v31 = vpop.f32.mrb[9].mxu0 }
 0x142   : > { %v875_v32 = vadd.f32 %v874_v31, %v826_v11  ;;  %v1257_v34 = vpop.f32.mrb[10].mxu0  ;;  %900 = sbr.rel (%p1145_p11) target bundleno = 345 (0x159), region = 70 }
 0x143   : > { %v891_v35 = vadd.f32 %v883_v29, %v356_v27  ;;  %v886_v36 = vadd.f32 %v1257_v34, %v837_v26  ;;  %v877_v38 = vpop.f32.mrb[11].mxu0 }
 0x144   : > { %v889_v39 = vadd.f32 %v875_v32, %v354_v30  ;;  %v878_v40 = vadd.f32 %v877_v38, %v829_v12 }
 0x145   : > { %895 = vst [vmem:[#allocation2 + $0x10] sm:$0xff] %v891_v35  ;;  %v892_v41 = vadd.f32 %v886_v36, %v357_v33 }
 0x146   : > { %893 = vst [vmem:[#allocation2] sm:$0xff] %v889_v39  ;;  %v890_v42 = vadd.f32 %v878_v40, %v355_v37 }
 0x147   : > { %896 = vst [vmem:[#allocation2 + $0x18] sm:$0xff] %v892_v41 }
 0x148   : > { %894 = vst [vmem:[#allocation2 + $0x8] sm:$0xff] %v890_v42 }
 0x14c   : > { %v903_v49 = vld [vmem:[#allocation2 + $0x10] sm:$0xff] }
 0x14d   : > { %v901_v43 = vld [vmem:[#allocation2] sm:$0xff]  ;;  %v914_v51 = vmul.f32 %v1146_v45, %v903_v49 }
 0x14e   : > { %v912_v46 = vmul.f32 %v1146_v45, %v901_v43  ;;  %v904_v50 = vld [vmem:[#allocation2 + $0x18] sm:$0xff] }
 0x14f   : > { %v902_v44 = vld [vmem:[#allocation2 + $0x8] sm:$0xff]  ;;  %v915_v52 = vmul.f32 %v1146_v45, %v904_v50  ;;  %v925_v55 = vadd.f32 %v1147_v48, %v914_v51 }
 0x150   : > { %v913_v47 = vmul.f32 %v1146_v45, %v902_v44  ;;  %v923_v53 = vadd.f32 %v1147_v48, %v912_v46 }
 0x151   : > { %v926_v56 = vadd.f32 %v1147_v48, %v915_v52  ;;  %v929_v59 = vmax.f32 %v925_v55, 0.0 }
 0x152   : > { %v924_v54 = vadd.f32 %v1147_v48, %v913_v47  ;;  %v927_v57 = vmax.f32 %v923_v53, 0.0 }
 0x153   : > { %v930_v60 = vmax.f32 %v926_v56, 0.0 }
 0x154   : > { %v928_v58 = vmax.f32 %v924_v54, 0.0 }
 0x155   : > { %v1169_v62 = vpack.c.bf16 %v930_v60, %v929_v59 }
 0x156   : > { %v1164_v61 = vpack.c.bf16 %v928_v58, %v927_v57 }
 0x157   : > { %1171 = vst [vmem:[%s1558_s4 + $0x8] sm:$0xff] %v1169_v62  }
 0x158   : > { %1165 = vst [vmem:[%s1558_s4] sm:$0xff] %v1164_v61  }
 0x159 PF: > { %s14_s19 = sadd.s32 1, %s1393_s19   ;;  %s1559_s15 = smov %s1381_s16 }
 0x15a   : > { %p11_p12 = scmp.ge.s32.totalorder %s14_s19, 4   ;;  %s1560_s16 = smov %s1456_s23 }
 0x15b   : > { %s1561_s17 = smov %s1389_s18  ;;  %s1562_s18 = smov %s1564_s20 }
 0x15c   :  { %13 = sbr.rel (!%p11_p12) target bundleno = 3 (0x3), region = 120 }

// kernel: res18_feature_forward.31
= control target key start
LH: loop header
LB: loop body
LE: loop exit
PB: predicated region body
PF: predicated region fallthrough
CT: control target
= control target key end

     0   :  { %s1526_s18 = smov 0   ;;  %s1528_s19 = smov 0   ;;  %s1665_s0 = inlined_call_operand.vmem [shape: bf16[32,1280], index: 0, kind: input, shape index: {}]   ;;  %s1666_s1 = inlined_call_operand.vmem [shape: bf16[1280,128], index: 1, kind: input, shape index: {}]   ;;  %s1667_s2 = inlined_call_operand.vmem [shape: f32[1,128], index: 2, kind: input, shape index: {}]   ;;  %s1668_s3 = inlined_call_operand.vmem [shape: f32[1,128], index: 3, kind: input, shape index: {}]   ;;  %s1669_s4 = inlined_call_operand.vmem [shape: bf16[32,128], index: 4, kind: input, shape index: {}]   ;;  %s1670_s5 = inlined_call_operand.vmem [shape: bf16[32,128], index: 5, kind: output, shape index: {}]  }
   0x1   :  { %s1530_s20 = smov 0   ;;  %s1532_s21 = smov 0  }
   0x2   :  { %s1534_s22 = smov 0  }
   0x3 LB: > { %s27_s23 = sadd.s32 1, %s1489_s21  ;;  %p50_p1 = scmp.ne.s32.totalorder %s1481_s19, %s1477_s18  ;;  %s1493_s22 = sphi %s1534_s22, %s15_s22   ;;  %s1489_s21 = sphi %s1532_s21, %s1674_s21   ;;  %s1485_s20 = sphi %s1530_s20, %s1673_s20   ;;  %s1481_s19 = sphi %s1528_s19, %s1672_s19   ;;  %s1477_s18 = sphi %s1526_s18, %s1671_s18  }
   0x4   : > { %p28_p0 = scmp.ge.s32.totalorder %s27_s23, 2  ;;  %p51_p2 = scmp.eq.s32.totalorder %s1493_s22, 0 }
   0x5   : > { %s43_s25 = sadd.s32 1, %s1481_s19  ;;  %p1173_p5 = scmp.ge.s32.totalorder %s1493_s22, 2 }
   0x6   : > { %s1676_s23 = smov (%p28_p0, %s27_s23), 0  ;;  %p52_p3 = por %p51_p2, %p50_p1 }
   0x7   : > { %s39_s24 = ssub.s32 %s1489_s21, %s1676_s23  ;;  %236 = sbr.rel (%p1173_p5) target bundleno = 25 (0x19), region = 28 }
   0x8   : > { %p41_p4 = scmp.eq.s32.totalorder %s39_s24, 0 }
   0xa   : > { %s1561_s26 = scalar_select %p41_p4, %s1481_s19, %s43_s25  }
   0xe   : > { %239 = sbr.rel (!%p52_p3) target bundleno = 25 (0x19), region = 32  ;;  %s241_s27 = sand.u32 (%p52_p3), 1, %s1481_s19  }
   0xf   : > { %s1247_s28 = smul.u32 (%p52_p3), 20, %s1489_s21 }
  0x10   : > { %s1358_s29 = smul.u32 (%p52_p3), 80, %s241_s27 }
  0x11   : > { %s249_s7 = scalar_lea.vmem (%p52_p3), %s1665_s0, %s1247_s28 }
  0x12   : > { %v264_v0 = vld [vmem:[%s249_s7] sm:$0xff] (%p52_p3)  ;;  %v266_v1 = vld [vmem:[%s249_s7 + $0x8] sm:$0xff] (%p52_p3)  ;;  %s243_s8 = scalar_lea.vmem (%p52_p3), [#allocation3], %s1358_s29  ;;  %v270_v3 = vld [vmem:[%s249_s7 + $0x30] sm:$0xff] (%p52_p3) }
  0x13   : > { %v268_v2 = vld [vmem:[%s249_s7 + $0x28] sm:$0xff] (%p52_p3)  ;;  %265 = vst [vmem:[%s243_s8] sm:$0xff] (%p52_p3), %v264_v0  ;;  %267 = vst [vmem:[%s243_s8 + $0x8] sm:$0xff] (%p52_p3), %v266_v1  ;;  %v272_v4 = vld [vmem:[%s249_s7 + $0x50] sm:$0xff] (%p52_p3) }
  0x14   : > { %269 = vst [vmem:[%s243_s8 + $0x14] sm:$0xff] (%p52_p3), %v268_v2  ;;  %v274_v5 = vld [vmem:[%s249_s7 + $0x58] sm:$0xff] (%p52_p3)  ;;  %271 = vst [vmem:[%s243_s8 + $0x1c] sm:$0xff] (%p52_p3), %v270_v3  ;;  %v278_v7 = vld [vmem:[%s249_s7 + $0x80] sm:$0xff] (%p52_p3) }
  0x15   : > { %273 = vst [vmem:[%s243_s8 + $0x28] sm:$0xff] %v272_v4  ;;  %275 = vst [vmem:[%s243_s8 + $0x30] sm:$0xff] %v274_v5  ;;  %v276_v6 = vld [vmem:[%s249_s7 + $0x78] sm:$0xff]  ;;  %v1175_v8 = vld [vmem:[%s249_s7 + $0x10] sm:$0xf] }
  0x16   : > { %277 = vst [vmem:[%s243_s8 + $0x3c] sm:$0xff] %v276_v6  ;;  %279 = vst [vmem:[%s243_s8 + $0x44] sm:$0xff] %v278_v7  ;;  %v1177_v9 = vld [vmem:[%s249_s7 + $0x38] sm:$0xf]  ;;  %v1179_v10 = vld [vmem:[%s249_s7 + $0x60] sm:$0xf] }
  0x17   : > { %1176 = vst [vmem:[%s243_s8 + $0x10] sm:$0xf] %v1175_v8  ;;  %v1181_v11 = vld [vmem:[%s249_s7 + $0x88] sm:$0xf]  ;;  %1178 = vst [vmem:[%s243_s8 + $0x24] sm:$0xf] %v1177_v9 }
  0x18   : > { %1180 = vst [vmem:[%s243_s8 + $0x38] sm:$0xf] %v1179_v10  ;;  %1182 = vst [vmem:[%s243_s8 + $0x4c] sm:$0xf] %v1181_v11 }
  0x19 PF: > { %p1183_p6 = scmp.ge.s32.totalorder %s1493_s22, 1  ;;  %p311_p7 = scmp.lt.s32.totalorder %s1493_s22, 3 }
  0x1b   : > { %p312_p8 = pnand %p1183_p6, %p311_p7 }
  0x1c   : > { %s318_s9 = sand.u32 (!%p312_p8), 1, %s1477_s18   ;;  %s372_s10 = smul.u32 (!%p312_p8), 80, %s1485_s20 }
  0x1d   : > { %315 = sbr.rel (%p312_p8) target bundleno = 347 (0x15b), region = 62  ;;  %p1185_p10 = scmp.ne.s32.totalorder (!%p312_p8), %s1485_s20, 0 }
  0x1e   : > { %s1359_s11 = smul.u32 (!%p312_p8), 80, %s318_s9  ;;  %p373_p9 = scmp.lt.s32.totalorder (!%p312_p8), %s372_s10, 159 }
  0x20   : > { %s1578_s16 = scalar_lea.vmem (!%p312_p8), [#allocation3], %s1359_s11 }
  0x24   : > { %s1678_s10 = smov (!%p373_p9, %s372_s10), 159  ;;  %409 = sbr.rel (%p1185_p10) target bundleno = 43 (0x2b), region = 70 }
  0x25   : > { %s1184_s12 = sshll.u32 %s1678_s10, 2  ;;  %v1495_v12 = vmov (!%p1185_p10), 0.0  }
  0x26   : > { %s1576_s15 = scalar_lea.vmem %s1666_s1, %s1184_s12  ;;  %410 = vst [vmem:[#allocation2] sm:$0xff] (!%p1185_p10), %v1495_v12  ;;  %411 = vst [vmem:[#allocation2 + $0x8] sm:$0xff] (!%p1185_p10), %v1495_v12 }
  0x27   : > { %412 = vst [vmem:[#allocation2 + $0x10] sm:$0xff] (!%p1185_p10), %v1495_v12  ;;  %413 = vst [vmem:[#allocation2 + $0x18] sm:$0xff] (!%p1185_p10), %v1495_v12 }
  0x2b PF: > { %v1401_v13 = vld [vmem:[%s1576_s15 + $0x40] sm:$0xff]   ;;  %v1405_v17 = vld [vmem:[%s1576_s15 + $0x48] sm:$0xff]   ;;  %v1409_v21 = vld [vmem:[%s1576_s15 + $0x50] sm:$0xff]   ;;  %p1236_p11 = scmp.ne.s32.totalorder %s1485_s20, 1 }
  0x2c   : > { %v1402_v14 = vld [vmem:[%s1576_s15 + $0xc0] sm:$0xff]   ;;  %1272 = vmatprep.subr.bf16.mxu0 %v1401_v13  ;;  %v1406_v18 = vld [vmem:[%s1576_s15 + $0xc8] sm:$0xff]   ;;  %v1410_v22 = vld [vmem:[%s1576_s15 + $0xd0] sm:$0xff]  }
  0x2d   : > { %v1403_v15 = vld [vmem:[%s1576_s15] sm:$0xff]   ;;  %1300 = vmatprep.subr.bf16.mxu1 %v1402_v14  ;;  %v1407_v19 = vld [vmem:[%s1576_s15 + $0x8] sm:$0xff]   ;;  %v1411_v23 = vld [vmem:[%s1576_s15 + $0x10] sm:$0xff]  }
  0x2e   : > { %v1404_v16 = vld [vmem:[%s1576_s15 + $0x80] sm:$0xff]   ;;  %1273 = vmatpush3.bf16.msra.mxu0 %v1403_v15  ;;  %v1408_v20 = vld [vmem:[%s1576_s15 + $0x88] sm:$0xff]   ;;  %v1412_v24 = vld [vmem:[%s1576_s15 + $0x90] sm:$0xff]  }
  0x2f   : > { %1301 = vmatpush3.bf16.msra.mxu1 %v1404_v16  ;;  %1274 = vmatprep.subr.bf16.mxu0 %v1405_v17  ;;  %v1413_v25 = vld [vmem:[%s1576_s15 + $0x58] sm:$0xff]   ;;  %v1417_v29 = vld [vmem:[%s1576_s15 + $0x60] sm:$0xff]   ;;  %v1421_v33 = vld [vmem:[%s1576_s15 + $0x68] sm:$0xff]  }
  0x30   : > { %1302 = vmatprep.subr.bf16.mxu1 %v1406_v18  ;;  %v1414_v26 = vld [vmem:[%s1576_s15 + $0xd8] sm:$0xff]   ;;  %v1418_v30 = vld [vmem:[%s1576_s15 + $0xe0] sm:$0xff]   ;;  %v1422_v34 = vld [vmem:[%s1576_s15 + $0xe8] sm:$0xff]  }
  0x31   : > { %v1415_v27 = vld [vmem:[%s1576_s15 + $0x18] sm:$0xff]   ;;  %v1419_v31 = vld [vmem:[%s1576_s15 + $0x20] sm:$0xff]   ;;  %v1423_v35 = vld [vmem:[%s1576_s15 + $0x28] sm:$0xff]  }
  0x32   : > { %1275 = vmatpush3.bf16.msra.mxu0 %v1407_v19  ;;  %v1416_v28 = vld [vmem:[%s1576_s15 + $0x98] sm:$0xff]   ;;  %v1420_v32 = vld [vmem:[%s1576_s15 + $0xa0] sm:$0xff]   ;;  %v1424_v36 = vld [vmem:[%s1576_s15 + $0xa8] sm:$0xff]  }
  0x33   : > { %1303 = vmatpush3.bf16.msra.mxu1 %v1408_v20  ;;  %1276 = vmatprep.subr.bf16.mxu0 %v1409_v21  ;;  %v1425_v37 = vld [vmem:[%s1576_s15 + $0x70] sm:$0xff]   ;;  %v1429_v41 = vld [vmem:[%s1576_s15 + $0x78] sm:$0xff]   ;;  %v1439_v49 = vld [vmem:[%s1576_s15 + $0x100] sm:$0xff]  }
  0x34   : > { %1304 = vmatprep.subr.bf16.mxu1 %v1410_v22  ;;  %v1426_v38 = vld [vmem:[%s1576_s15 + $0xf0] sm:$0xff]   ;;  %v1430_v42 = vld [vmem:[%s1576_s15 + $0xf8] sm:$0xff]   ;;  %v1440_v50 = vld [vmem:[%s1576_s15 + $0x108] sm:$0xff]  }
  0x35   : > { %v1427_v39 = vld [vmem:[%s1576_s15 + $0x30] sm:$0xff]   ;;  %v1431_v43 = vld [vmem:[%s1576_s15 + $0x38] sm:$0xff]   ;;  %v1443_v58 = vld [vmem:[%s1576_s15 + $0x120] sm:$0xff]  }
  0x36   : > { %1277 = vmatpush3.bf16.msra.mxu0 %v1411_v23  ;;  %v1428_v40 = vld [vmem:[%s1576_s15 + $0xb0] sm:$0xff]   ;;  %v1432_v44 = vld [vmem:[%s1576_s15 + $0xb8] sm:$0xff]   ;;  %v1448_v59 = vld [vmem:[%s1576_s15 + $0x128] sm:$0xff]  }
  0x37   : > { %1305 = vmatpush3.bf16.msra.mxu1 %v1412_v24  ;;  %1278 = vmatprep.subr.bf16.mxu0 %v1413_v25  ;;  %v1433_v45 = vld [vmem:[%s1578_s16] ss:$20 sps:$4 sm:$0xff]   ;;  %v1435_v46 = vld [vmem:[%s1578_s16 + $0x4] ss:$20 sps:$4 sm:$0xff]   ;;  %v1436_v47 = vld [vmem:[%s1578_s16 + $0x8] ss:$20 sps:$4 sm:$0xff]  }
  0x38   : > { %1306 = vmatprep.subr.bf16.mxu1 %v1414_v26  ;;  %v1438_v48 = vld [vmem:[%s1578_s16 + $0xc] ss:$20 sps:$4 sm:$0xff]   ;;  %834 = vmatprep.mubr.bf16.mxu0 %v1435_v46  ;;  %v1446_v53 = vld [vmem:[%s1578_s16 + $0x34] ss:$20 sps:$4 sm:$0xff]   ;;  %v1450_v56 = vld [vmem:[%s1578_s16 + $0x30] ss:$20 sps:$4 sm:$0xff]  }
  0x39   : > { %883 = vmatprep.mubr.bf16.mxu1 %v1438_v48  ;;  %v1441_v51 = vld [vmem:[%s1576_s15 + $0x110] sm:$0xff]   ;;  %v1442_v54 = vld [vmem:[%s1576_s15 + $0x118] sm:$0xff]   ;;  %v1238_v48 = vld [vmem:[%s1668_s3] ss:$0 sm:$0xff] (!%p1236_p11) }
  0x3a   : > { %1279 = vmatpush3.bf16.msra.mxu0 %v1415_v27  ;;  %v1444_v52 = vld [vmem:[%s1578_s16 + $0x2c] ss:$20 sps:$4 sm:$0xff]   ;;  %v1449_v55 = vld [vmem:[%s1578_s16 + $0x28] ss:$20 sps:$4 sm:$0xff]   ;;  %v1453_v57 = vld [vmem:[%s1578_s16 + $0x10] ss:$20 sps:$4 sm:$0xff]  }
  0x3b   : > { %1307 = vmatpush3.bf16.msra.mxu1 %v1416_v28  ;;  %1280 = vmatprep.subr.bf16.mxu0 %v1417_v29  ;;  %v1451_v60 = vld [vmem:[%s1576_s15 + $0x130] sm:$0xff]   ;;  %v1452_v61 = vld [vmem:[%s1576_s15 + $0x138] sm:$0xff]  }
  0x3c   : > { %1308 = vmatprep.subr.bf16.mxu1 %v1418_v30  ;;  %v1454_v62 = vld [vmem:[%s1578_s16 + $0x38] ss:$20 sps:$4 sm:$0xff]   ;;  %v416_v27 = vld [vmem:[#allocation2 + $0x10] sm:$0xff]  ;;  %v414_v30 = vld [vmem:[#allocation2] sm:$0xff] }
  0x3e   : > { %1281 = vmatpush3.bf16.msra.mxu0 %v1419_v31 }
  0x3f   : > { %1309 = vmatpush3.bf16.msra.mxu1 %v1420_v32  ;;  %1282 = vmatprep.subr.bf16.mxu0 %v1421_v33  ;;  %v417_v33 = vld [vmem:[#allocation2 + $0x18] sm:$0xff] }
  0x40   : > { %1310 = vmatprep.subr.bf16.mxu1 %v1422_v34 }
  0x42   : > { %1283 = vmatpush3.bf16.msra.mxu0 %v1423_v35 }
  0x43   : > { %1311 = vmatpush3.bf16.msra.mxu1 %v1424_v36  ;;  %1284 = vmatprep.subr.bf16.mxu0 %v1425_v37  ;;  %v415_v37 = vld [vmem:[#allocation2 + $0x8] sm:$0xff] }
  0x44   : > { %1312 = vmatprep.subr.bf16.mxu1 %v1426_v38 }
  0x46   : > { %1285 = vmatpush3.bf16.msra.mxu0 %v1427_v39 }
  0x47   : > { %1313 = vmatpush3.bf16.msra.mxu1 %v1428_v40  ;;  %1286 = vmatprep.subr.bf16.mxu0 %v1429_v41 }
  0x48   : > { %1314 = vmatprep.subr.bf16.mxu1 %v1430_v42 }
  0x4a   : > { %1287 = vmatpush3.bf16.msra.mxu0 %v1431_v43 }
  0x4b   : > { %1315 = vmatpush3.bf16.msra.mxu1 %v1432_v44  ;;  %1338 = vmatprep.subr.bf16.mxu0 %v1439_v49 }
  0x4d   : > { %835 = vmatmul.mubr.bf16.vlgmr.msra.gmra.mrb[0].mxu0 %v1433_v45  ;;  %v1237_v45 = vld [vmem:[%s1667_s2] ss:$0 sm:$0xff] (!%p1236_p11) }
  0x4e   : > { %884 = vmatmul.mubr.bf16.vlgmr.msra.gmra.mrb[0].mxu1 %v1436_v47  ;;  %1339 = vmatpush3.bf16.msra.mxu0 %v1439_v49  ;;  %v1253_v49 = vld [vmem:[%s1669_s4] sm:$0xff] (!%p1236_p11)  }
  0x4f   : > { %1340 = vmatprep.subr.bf16.mxu0 %v1440_v50  ;;  %842 = vmatprep.mubr.bf16.mxu0 %v1444_v52  ;;  %v1255_v52 = vunpack.c.h.bf16 (!%p1236_p11), %v1253_v49 }
  0x50   : > { %891 = vmatprep.mubr.bf16.mxu1 %v1446_v53 }
  0x52   : > { %1341 = vmatpush3.bf16.msra.mxu0 %v1440_v50 }
  0x53   : > { %1342 = vmatprep.subr.bf16.mxu0 %v1441_v51 }
  0x55   : > { %843 = vmatmul.mubr.bf16.gmra.mrb[4].mxu0 %v1449_v55  ;;  %v1270_v55 = vld [vmem:[%s1669_s4 + $0x8] sm:$0xff] (!%p1236_p11)  }
  0x56   : > { %892 = vmatmul.mubr.bf16.gmra.mrb[4].mxu1 %v1450_v56  ;;  %1343 = vmatpush3.bf16.msra.mxu0 %v1441_v51  ;;  %v1254_v51 = vunpack.c.l.bf16 (!%p1236_p11), %v1253_v49 }
  0x57   : > { %1344 = vmatprep.subr.bf16.mxu0 %v1442_v54  ;;  %1354 = vmatprep.mubr.bf16.mxu0 %v1453_v57 }
  0x5a   : > { %1345 = vmatpush3.bf16.msra.mxu0 %v1442_v54 }
  0x5b   : > { %1346 = vmatprep.subr.bf16.mxu0 %v1443_v58 }
  0x5e   : > { %1347 = vmatpush3.bf16.msra.mxu0 %v1443_v58 }
  0x5f   : > { %1348 = vmatprep.subr.bf16.mxu0 %v1448_v59 }
  0x62   : > { %1349 = vmatpush3.bf16.msra.mxu0 %v1448_v59  ;;  %v1258_v59 = vunpack.c.l.bf16 (!%p1236_p11), %v1270_v55 }
  0x63   : > { %1350 = vmatprep.subr.bf16.mxu0 %v1451_v60 }
  0x66   : > { %1351 = vmatpush3.bf16.msra.mxu0 %v1451_v60 }
  0x67   : > { %1352 = vmatprep.subr.bf16.mxu0 %v1452_v61 }
  0x6a   : > { %1353 = vmatpush3.bf16.msra.mxu0 %v1452_v61  ;;  %v1259_v61 = vunpack.c.h.bf16 (!%p1236_p11), %v1270_v55 }
  0x6d   : > { %1355 = vmatmul.mubr.bf16.vlgmr.msra.gmra.mrb[8].mxu0 %v1454_v62 }
 0x120   : > { %v1288_v63 = vpop.f32.mrb[0].mxu0 }
 0x121   : > { %v1316_v0 = vpop.f32.mrb[0].mxu1  ;;  %v1289_v1 = vpop.f32.mrb[1].mxu0 }
 0x122   : > { %v1290_v2 = vadd.f32 %v1289_v1, %v1288_v63  ;;  %v1317_v3 = vpop.f32.mrb[1].mxu1  ;;  %v1291_v4 = vpop.f32.mrb[2].mxu0 }
 0x123   : > { %v1318_v5 = vadd.f32 %v1317_v3, %v1316_v0  ;;  %v1319_v6 = vpop.f32.mrb[2].mxu1  ;;  %v1292_v7 = vpop.f32.mrb[3].mxu0 }
 0x124   : > { %v1293_v8 = vadd.f32 %v1292_v7, %v1291_v4  ;;  %v1320_v9 = vpop.f32.mrb[3].mxu1 }
 0x125   : > { %v1321_v10 = vadd.f32 %v1320_v9, %v1319_v6  ;;  %v886_v11 = vadd.f32 %v1318_v5, %v1290_v2 }
 0x127   : > { %v889_v12 = vadd.f32 %v1321_v10, %v1293_v8 }
 0x128   : > { %v1294_v13 = vpop.f32.mrb[4].mxu0 }
 0x129   : > { %v1322_v14 = vpop.f32.mrb[4].mxu1  ;;  %v1295_v15 = vpop.f32.mrb[5].mxu0 }
 0x12a   : > { %v1296_v16 = vadd.f32 %v1295_v15, %v1294_v13  ;;  %v1323_v17 = vpop.f32.mrb[5].mxu1  ;;  %v1297_v18 = vpop.f32.mrb[6].mxu0 }
 0x12b   : > { %v1324_v19 = vadd.f32 %v1323_v17, %v1322_v14  ;;  %v1325_v20 = vpop.f32.mrb[6].mxu1  ;;  %v1298_v21 = vpop.f32.mrb[7].mxu0 }
 0x12c   : > { %v1299_v22 = vadd.f32 %v1298_v21, %v1297_v18  ;;  %v1326_v23 = vpop.f32.mrb[7].mxu1 }
 0x12d   : > { %v1327_v24 = vadd.f32 %v1326_v23, %v1325_v20  ;;  %v894_v25 = vadd.f32 %v1324_v19, %v1296_v16 }
 0x12f   : > { %v897_v26 = vadd.f32 %v1327_v24, %v1299_v22 }
 0x140   : > { %v1356_v28 = vpop.f32.mrb[8].mxu0 }
 0x141   : > { %v943_v29 = vadd.f32 %v1356_v28, %v894_v25  ;;  %v934_v31 = vpop.f32.mrb[9].mxu0 }
 0x142   : > { %v935_v32 = vadd.f32 %v934_v31, %v886_v11  ;;  %v1357_v34 = vpop.f32.mrb[10].mxu0  ;;  %960 = sbr.rel (%p1236_p11) target bundleno = 347 (0x15b), region = 74 }
 0x143   : > { %v951_v35 = vadd.f32 %v943_v29, %v416_v27  ;;  %v946_v36 = vadd.f32 %v1357_v34, %v897_v26  ;;  %v937_v38 = vpop.f32.mrb[11].mxu0 }
 0x144   : > { %v949_v39 = vadd.f32 %v935_v32, %v414_v30  ;;  %v938_v40 = vadd.f32 %v937_v38, %v889_v12 }
 0x145   : > { %955 = vst [vmem:[#allocation2 + $0x10] sm:$0xff] %v951_v35  ;;  %v952_v41 = vadd.f32 %v946_v36, %v417_v33 }
 0x146   : > { %953 = vst [vmem:[#allocation2] sm:$0xff] %v949_v39  ;;  %v950_v42 = vadd.f32 %v938_v40, %v415_v37 }
 0x147   : > { %956 = vst [vmem:[#allocation2 + $0x18] sm:$0xff] %v952_v41 }
 0x148   : > { %954 = vst [vmem:[#allocation2 + $0x8] sm:$0xff] %v950_v42 }
 0x14c   : > { %v963_v50 = vld [vmem:[#allocation2 + $0x10] sm:$0xff] }
 0x14d   : > { %v961_v43 = vld [vmem:[#allocation2] sm:$0xff]  ;;  %v974_v54 = vmul.f32 %v1237_v45, %v963_v50 }
 0x14e   : > { %v972_v46 = vmul.f32 %v1237_v45, %v961_v43  ;;  %v964_v53 = vld [vmem:[#allocation2 + $0x18] sm:$0xff] }
 0x14f   : > { %v962_v44 = vld [vmem:[#allocation2 + $0x8] sm:$0xff]  ;;  %v975_v58 = vmul.f32 %v1237_v45, %v964_v53  ;;  %v985_v60 = vadd.f32 %v1238_v48, %v974_v54 }
 0x150   : > { %v973_v47 = vmul.f32 %v1237_v45, %v962_v44  ;;  %v983_v56 = vadd.f32 %v1238_v48, %v972_v46 }
 0x151   : > { %v986_v0 = vadd.f32 %v1238_v48, %v975_v58  ;;  %v997_v1 = vadd.f32 %v1258_v59, %v985_v60 }
 0x152   : > { %v984_v57 = vadd.f32 %v1238_v48, %v973_v47  ;;  %v995_v62 = vadd.f32 %v1254_v51, %v983_v56 }
 0x153   : > { %v998_v4 = vadd.f32 %v1259_v61, %v986_v0  ;;  %v1001_v5 = vmax.f32 %v997_v1, 0.0 }
 0x154   : > { %v996_v63 = vadd.f32 %v1255_v52, %v984_v57  ;;  %v999_v2 = vmax.f32 %v995_v62, 0.0 }
 0x155   : > { %v1002_v7 = vmax.f32 %v998_v4, 0.0 }
 0x156   : > { %v1000_v3 = vmax.f32 %v996_v63, 0.0 }
 0x157   : > { %v1268_v8 = vpack.c.bf16 %v1002_v7, %v1001_v5 }
 0x158   : > { %v1263_v6 = vpack.c.bf16 %v1000_v3, %v999_v2 }
 0x159   : > { %1271 = vst [vmem:[%s1670_s5 + $0x8] sm:$0xff] %v1268_v8  }
 0x15a   : > { %1264 = vst [vmem:[%s1670_s5] sm:$0xff] %v1263_v6  }
 0x15b PF: > { %s15_s22 = sadd.s32 1, %s1493_s22   ;;  %s1671_s18 = smov %s1481_s19 }
 0x15c   : > { %p12_p12 = scmp.ge.s32.totalorder %s15_s22, 4   ;;  %s1672_s19 = smov %s1561_s26 }
 0x15d   : > { %s1673_s20 = smov %s1489_s21  ;;  %s1674_s21 = smov %s1676_s23 }
 0x15e   :  { %14 = sbr.rel (!%p12_p12) target bundleno = 3 (0x3), region = 127 }

// kernel: res18_feature_forward.35
= control target key start
LH: loop header
LB: loop body
LE: loop exit
PB: predicated region body
PF: predicated region fallthrough
CT: control target
= control target key end

     0   :  { %s1439_s15 = smov 0   ;;  %s1441_s16 = smov 0   ;;  %s1574_s0 = inlined_call_operand.vmem [shape: bf16[8,1280], index: 0, kind: input, shape index: {}]   ;;  %s1575_s1 = inlined_call_operand.vmem [shape: bf16[1280,256], index: 1, kind: input, shape index: {}]   ;;  %s1576_s2 = inlined_call_operand.vmem [shape: f32[1,256], index: 2, kind: input, shape index: {}]   ;;  %s1577_s3 = inlined_call_operand.vmem [shape: f32[1,256], index: 3, kind: input, shape index: {}]   ;;  %s1578_s4 = inlined_call_operand.vmem [shape: bf16[8,256], index: 4, kind: output, shape index: {}]  }
   0x1   :  { %s1443_s17 = smov 0  }
   0x2 LB: > { %s26_s18 = sadd.s32 1, %s1406_s16  ;;  %p1139_p0 = scmp.ge.s32.totalorder %s1410_s17, 1  ;;  %s1410_s17 = sphi %s1443_s17, %s14_s17   ;;  %s1406_s16 = sphi %s1441_s16, %s1580_s16   ;;  %s1402_s15 = sphi %s1439_s15, %s1579_s15  }
   0x3   : > { %p27_p1 = scmp.ge.s32.totalorder %s26_s18, 2  ;;  %p229_p2 = scmp.lt.s32.totalorder %s1410_s17, 3 }
   0x5   : > { %s1582_s18 = smov (%p27_p1, %s26_s18), 0  ;;  %p230_p3 = pnand %p1139_p0, %p229_p2 }
   0x6   : > { %s281_s19 = smul.u32 (!%p230_p3), 5, %s1402_s15  ;;  %p1143_p6 = scmp.ne.s32.totalorder (!%p230_p3), %s1402_s15, 0 }
   0x7   : > { %233 = sbr.rel (%p230_p3) target bundleno = 355 (0x163), region = 36 }
   0x8   : > { %s291_s20 = smul.u32 (!%p230_p3), 80, %s1402_s15  ;;  %p284_p4 = scmp.lt.s32.totalorder (!%p230_p3), %s281_s19, 9 }
   0xa   : > { %p293_p5 = scmp.lt.s32.totalorder (!%p230_p3), %s291_s20, 159 }
   0xe   : > { %s1584_s19 = smov (!%p284_p4, %s281_s19), 9  ;;  %s1586_s20 = smov (!%p293_p5, %s291_s20), 159 }
   0xf   : > { %s1140_s21 = sshll.u32 %s1584_s19, 2  ;;  %s1235_s25 = sshll.u32 %s1586_s20, 3  ;;  %v1412_v0 = vmov (!%p1143_p6), 0.0  }
  0x10   : > { %s1464_s24 = scalar_lea.vmem %s1574_s0, %s1140_s21  ;;  %s1469_s28 = scalar_lea.vmem %s1575_s1, %s1235_s25  ;;  %328 = vst [vmem:[#allocation2] sm:$0xff] (!%p1143_p6), %v1412_v0  ;;  %329 = vst [vmem:[#allocation2 + $0x8] sm:$0xff] (!%p1143_p6), %v1412_v0 }
  0x11   : > { %327 = sbr.rel (%p1143_p6) target bundleno = 24 (0x18), region = 40 }
  0x18 PF: > { %v1263_v1 = vld [vmem:[%s1469_s28 + $0x4] ss:$8 sps:$4 sm:$0xff]   ;;  %v1267_v3 = vld [vmem:[%s1469_s28] ss:$8 sps:$4 sm:$0xff]   ;;  %v1269_v5 = vld [vmem:[%s1469_s28 + $0x14] ss:$8 sps:$4 sm:$0xff]  }
  0x19   : > { %v1265_v2 = vld [vmem:[%s1469_s28 + $0x104] ss:$8 sps:$4 sm:$0xff]   ;;  %833 = vmatprep.subr.bf16.mxu0 %v1263_v1  ;;  %v1268_v4 = vld [vmem:[%s1469_s28 + $0x100] ss:$8 sps:$4 sm:$0xff]   ;;  %v1271_v6 = vld [vmem:[%s1469_s28 + $0x114] ss:$8 sps:$4 sm:$0xff]  }
  0x1a   : > { %874 = vmatprep.subr.bf16.mxu1 %v1265_v2  ;;  %834 = vmatpush1.bf16.msra.mxu0 %v1267_v3  ;;  %v1273_v7 = vld [vmem:[%s1469_s28 + $0x10] ss:$8 sps:$4 sm:$0xff]   ;;  %v1275_v9 = vld [vmem:[%s1469_s28 + $0x24] ss:$8 sps:$4 sm:$0xff]   ;;  %v1279_v11 = vld [vmem:[%s1469_s28 + $0x20] ss:$8 sps:$4 sm:$0xff]  }
  0x1b   : > { %875 = vmatpush1.bf16.msra.mxu1 %v1268_v4  ;;  %835 = vmatprep.subr.bf16.mxu0 %v1269_v5  ;;  %v1274_v8 = vld [vmem:[%s1469_s28 + $0x110] ss:$8 sps:$4 sm:$0xff]   ;;  %v1277_v10 = vld [vmem:[%s1469_s28 + $0x124] ss:$8 sps:$4 sm:$0xff]   ;;  %v1280_v12 = vld [vmem:[%s1469_s28 + $0x120] ss:$8 sps:$4 sm:$0xff]  }
  0x1c   : > { %876 = vmatprep.subr.bf16.mxu1 %v1271_v6  ;;  %v1281_v13 = vld [vmem:[%s1469_s28 + $0x34] ss:$8 sps:$4 sm:$0xff]   ;;  %v1285_v15 = vld [vmem:[%s1469_s28 + $0x30] ss:$8 sps:$4 sm:$0xff]   ;;  %v1287_v17 = vld [vmem:[%s1469_s28 + $0x44] ss:$8 sps:$4 sm:$0xff]  }
  0x1d   : > { %v1283_v14 = vld [vmem:[%s1469_s28 + $0x134] ss:$8 sps:$4 sm:$0xff]   ;;  %v1286_v16 = vld [vmem:[%s1469_s28 + $0x130] ss:$8 sps:$4 sm:$0xff]   ;;  %v1289_v18 = vld [vmem:[%s1469_s28 + $0x144] ss:$8 sps:$4 sm:$0xff]  }
  0x1e   : > { %836 = vmatpush1.bf16.msra.mxu0 %v1273_v7  ;;  %v1291_v19 = vld [vmem:[%s1469_s28 + $0x40] ss:$8 sps:$4 sm:$0xff]   ;;  %v1293_v21 = vld [vmem:[%s1469_s28 + $0x54] ss:$8 sps:$4 sm:$0xff]   ;;  %v1297_v23 = vld [vmem:[%s1469_s28 + $0x50] ss:$8 sps:$4 sm:$0xff]  }
  0x1f   : > { %877 = vmatpush1.bf16.msra.mxu1 %v1274_v8  ;;  %837 = vmatprep.subr.bf16.mxu0 %v1275_v9  ;;  %v1292_v20 = vld [vmem:[%s1469_s28 + $0x140] ss:$8 sps:$4 sm:$0xff]   ;;  %v1295_v22 = vld [vmem:[%s1469_s28 + $0x154] ss:$8 sps:$4 sm:$0xff]   ;;  %v1298_v24 = vld [vmem:[%s1469_s28 + $0x150] ss:$8 sps:$4 sm:$0xff]  }
  0x20   : > { %878 = vmatprep.subr.bf16.mxu1 %v1277_v10  ;;  %v1299_v25 = vld [vmem:[%s1469_s28 + $0x64] ss:$8 sps:$4 sm:$0xff]   ;;  %v1303_v27 = vld [vmem:[%s1469_s28 + $0x60] ss:$8 sps:$4 sm:$0xff]   ;;  %v1305_v29 = vld [vmem:[%s1469_s28 + $0x74] ss:$8 sps:$4 sm:$0xff]  }
  0x21   : > { %v1301_v26 = vld [vmem:[%s1469_s28 + $0x164] ss:$8 sps:$4 sm:$0xff]   ;;  %v1304_v28 = vld [vmem:[%s1469_s28 + $0x160] ss:$8 sps:$4 sm:$0xff]   ;;  %v1307_v30 = vld [vmem:[%s1469_s28 + $0x174] ss:$8 sps:$4 sm:$0xff]  }
  0x22   : > { %838 = vmatpush1.bf16.msra.mxu0 %v1279_v11  ;;  %v1309_v31 = vld [vmem:[%s1469_s28 + $0x70] ss:$8 sps:$4 sm:$0xff]   ;;  %v1311_v33 = vld [vmem:[%s1469_s28 + $0x84] ss:$8 sps:$4 sm:$0xff]   ;;  %v1315_v35 = vld [vmem:[%s1469_s28 + $0x80] ss:$8 sps:$4 sm:$0xff]  }
  0x23   : > { %879 = vmatpush1.bf16.msra.mxu1 %v1280_v12  ;;  %839 = vmatprep.subr.bf16.mxu0 %v1281_v13  ;;  %v1310_v32 = vld [vmem:[%s1469_s28 + $0x170] ss:$8 sps:$4 sm:$0xff]   ;;  %v1313_v34 = vld [vmem:[%s1469_s28 + $0x184] ss:$8 sps:$4 sm:$0xff]   ;;  %v1316_v36 = vld [vmem:[%s1469_s28 + $0x180] ss:$8 sps:$4 sm:$0xff]  }
  0x24   : > { %880 = vmatprep.subr.bf16.mxu1 %v1283_v14  ;;  %v1317_v37 = vld [vmem:[%s1469_s28 + $0x94] ss:$8 sps:$4 sm:$0xff]   ;;  %v1321_v39 = vld [vmem:[%s1469_s28 + $0x90] ss:$8 sps:$4 sm:$0xff]   ;;  %v1323_v41 = vld [vmem:[%s1469_s28 + $0xa4] ss:$8 sps:$4 sm:$0xff]  }
  0x25   : > { %v1319_v38 = vld [vmem:[%s1469_s28 + $0x194] ss:$8 sps:$4 sm:$0xff]   ;;  %v1322_v40 = vld [vmem:[%s1469_s28 + $0x190] ss:$8 sps:$4 sm:$0xff]   ;;  %v1325_v42 = vld [vmem:[%s1469_s28 + $0x1a4] ss:$8 sps:$4 sm:$0xff]  }
  0x26   : > { %840 = vmatpush1.bf16.msra.mxu0 %v1285_v15  ;;  %v1327_v43 = vld [vmem:[%s1469_s28 + $0xa0] ss:$8 sps:$4 sm:$0xff]   ;;  %v1329_v45 = vld [vmem:[%s1469_s28 + $0xb4] ss:$8 sps:$4 sm:$0xff]   ;;  %v1333_v50 = vld [vmem:[%s1469_s28 + $0xb0] ss:$8 sps:$4 sm:$0xff]  }
  0x27   : > { %881 = vmatpush1.bf16.msra.mxu1 %v1286_v16  ;;  %841 = vmatprep.subr.bf16.mxu0 %v1287_v17  ;;  %v1328_v44 = vld [vmem:[%s1469_s28 + $0x1a0] ss:$8 sps:$4 sm:$0xff]   ;;  %v1331_v46 = vld [vmem:[%s1469_s28 + $0x1b4] ss:$8 sps:$4 sm:$0xff]   ;;  %v1334_v51 = vld [vmem:[%s1469_s28 + $0x1b0] ss:$8 sps:$4 sm:$0xff]  }
  0x28   : > { %882 = vmatprep.subr.bf16.mxu1 %v1289_v18  ;;  %v332_v47 = vld [vmem:[%s1464_s24] sm:$0xff]  ;;  %v333_v49 = vld [vmem:[%s1464_s24 + $0x8] sm:$0xff]  ;;  %v1341_v57 = vld [vmem:[%s1469_s28 + $0xd4] ss:$8 sps:$4 sm:$0xff]   ;;  %v1413_v11 = vmov 0   ;;  %p1229_p7 = scmp.ne.s32.totalorder %s1402_s15, 1 }
  0x29   : > { %v1145_v48 = vcombine.high %v332_v47, %v332_v47  ;;  %v1147_v52 = vcombine.high %v333_v49, %v333_v49  ;;  %v1335_v53 = vld [vmem:[%s1469_s28 + $0xc4] ss:$8 sps:$4 sm:$0xff]   ;;  %v1339_v55 = vld [vmem:[%s1469_s28 + $0xc0] ss:$8 sps:$4 sm:$0xff]   ;;  %v1343_v58 = vld [vmem:[%s1469_s28 + $0x1d4] ss:$8 sps:$4 sm:$0xff]   ;;  %v1144_v6 = vcombine.low %v332_v47, %v332_v47  ;;  %v1146_v7 = vcombine.low %v333_v49, %v333_v49 }
  0x2a   : > { %842 = vmatpush1.bf16.msra.mxu0 %v1291_v19  ;;  %v1337_v54 = vld [vmem:[%s1469_s28 + $0x1c4] ss:$8 sps:$4 sm:$0xff]   ;;  %v1340_v56 = vld [vmem:[%s1469_s28 + $0x1c0] ss:$8 sps:$4 sm:$0xff]   ;;  %v1345_v59 = vld [vmem:[%s1469_s28 + $0xd0] ss:$8 sps:$4 sm:$0xff]  }
  0x2b   : > { %883 = vmatpush1.bf16.msra.mxu1 %v1292_v20  ;;  %843 = vmatprep.subr.bf16.mxu0 %v1293_v21  ;;  %v1346_v60 = vld [vmem:[%s1469_s28 + $0x1d0] ss:$8 sps:$4 sm:$0xff]   ;;  %v1347_v61 = vld [vmem:[%s1469_s28 + $0xe4] ss:$8 sps:$4 sm:$0xff]   ;;  %v1351_v63 = vld [vmem:[%s1469_s28 + $0xe0] ss:$8 sps:$4 sm:$0xff]  }
  0x2c   : > { %884 = vmatprep.subr.bf16.mxu1 %v1295_v22  ;;  %865 = vmatprep.mubr.bf16.mxu0 %v1145_v48  ;;  %v1349_v62 = vld [vmem:[%s1469_s28 + $0x1e4] ss:$8 sps:$4 sm:$0xff]   ;;  %v1352_v0 = vld [vmem:[%s1469_s28 + $0x1e0] ss:$8 sps:$4 sm:$0xff]   ;;  %v1353_v1 = vld [vmem:[%s1469_s28 + $0xf4] ss:$8 sps:$4 sm:$0xff]  }
  0x2d   : > { %906 = vmatprep.mubr.bf16.mxu1 %v1147_v52  ;;  %v1355_v2 = vld [vmem:[%s1469_s28 + $0x1f4] ss:$8 sps:$4 sm:$0xff]   ;;  %v1357_v3 = vld [vmem:[%s1469_s28 + $0xf0] ss:$8 sps:$4 sm:$0xff]   ;;  %v1365_v5 = vld [vmem:[%s1469_s28 + $0x204] ss:$8 sps:$4 sm:$0xff]  }
  0x2e   : > { %844 = vmatpush1.bf16.msra.mxu0 %v1297_v23  ;;  %v1358_v4 = vld [vmem:[%s1469_s28 + $0x1f0] ss:$8 sps:$4 sm:$0xff]   ;;  %v1363_v8 = vld [vmem:[%s1469_s28 + $0x200] ss:$8 sps:$4 sm:$0xff]   ;;  %v1368_v9 = vld [vmem:[%s1469_s28 + $0x214] ss:$8 sps:$4 sm:$0xff]  }
  0x2f   : > { %885 = vmatpush1.bf16.msra.mxu1 %v1298_v24  ;;  %845 = vmatprep.subr.bf16.mxu0 %v1299_v25  ;;  %v1366_v10 = vld [vmem:[%s1469_s28 + $0x210] ss:$8 sps:$4 sm:$0xff]   ;;  %v1371_v12 = vld [vmem:[%s1469_s28 + $0x224] ss:$8 sps:$4 sm:$0xff]   ;;  %v1369_v13 = vld [vmem:[%s1469_s28 + $0x220] ss:$8 sps:$4 sm:$0xff]  }
  0x30   : > { %886 = vmatprep.subr.bf16.mxu1 %v1301_v26  ;;  %v1374_v14 = vld [vmem:[%s1469_s28 + $0x234] ss:$8 sps:$4 sm:$0xff]   ;;  %v1372_v15 = vld [vmem:[%s1469_s28 + $0x230] ss:$8 sps:$4 sm:$0xff]   ;;  %v1377_v16 = vld [vmem:[%s1469_s28 + $0x244] ss:$8 sps:$4 sm:$0xff]  }
  0x31   : > { %v1375_v17 = vld [vmem:[%s1469_s28 + $0x240] ss:$8 sps:$4 sm:$0xff]   ;;  %v1380_v18 = vld [vmem:[%s1469_s28 + $0x254] ss:$8 sps:$4 sm:$0xff]   ;;  %v1378_v19 = vld [vmem:[%s1469_s28 + $0x250] ss:$8 sps:$4 sm:$0xff]  }
  0x32   : > { %846 = vmatpush1.bf16.msra.mxu0 %v1303_v27  ;;  %v1383_v20 = vld [vmem:[%s1469_s28 + $0x264] ss:$8 sps:$4 sm:$0xff]   ;;  %v1381_v21 = vld [vmem:[%s1469_s28 + $0x260] ss:$8 sps:$4 sm:$0xff]   ;;  %v1386_v22 = vld [vmem:[%s1469_s28 + $0x274] ss:$8 sps:$4 sm:$0xff]  }
  0x33   : > { %887 = vmatpush1.bf16.msra.mxu1 %v1304_v28  ;;  %847 = vmatprep.subr.bf16.mxu0 %v1305_v29  ;;  %v1384_v23 = vld [vmem:[%s1469_s28 + $0x270] ss:$8 sps:$4 sm:$0xff]   ;;  %v966_v47 = vld [vmem:[%s1576_s2] sm:$0x3] (!%p1229_p7) }
  0x34   : > { %888 = vmatprep.subr.bf16.mxu1 %v1307_v30  ;;  %v1387_v24 = vld [vmem:[%s1464_s24 + $0x10] ss:$0 sps:$4 sm:$0xff]   ;;  %v980_v48 = vld [vmem:[%s1577_s3] sm:$0x3] (!%p1229_p7) }
  0x36   : > { %848 = vmatpush1.bf16.msra.mxu0 %v1309_v31 }
  0x37   : > { %889 = vmatpush1.bf16.msra.mxu1 %v1310_v32  ;;  %849 = vmatprep.subr.bf16.mxu0 %v1311_v33 }
  0x38   : > { %890 = vmatprep.subr.bf16.mxu1 %v1313_v34 }
  0x3a   : > { %850 = vmatpush1.bf16.msra.mxu0 %v1315_v35  ;;  %v330_v35 = vld [vmem:[#allocation2] sm:$0xff] }
  0x3b   : > { %891 = vmatpush1.bf16.msra.mxu1 %v1316_v36  ;;  %851 = vmatprep.subr.bf16.mxu0 %v1317_v37 }
  0x3c   : > { %892 = vmatprep.subr.bf16.mxu1 %v1319_v38  ;;  %v331_v38 = vld [vmem:[#allocation2 + $0x8] sm:$0xff] }
  0x3e   : > { %852 = vmatpush1.bf16.msra.mxu0 %v1321_v39 }
  0x3f   : > { %893 = vmatpush1.bf16.msra.mxu1 %v1322_v40  ;;  %853 = vmatprep.subr.bf16.mxu0 %v1323_v41 }
  0x40   : > { %894 = vmatprep.subr.bf16.mxu1 %v1325_v42 }
  0x42   : > { %854 = vmatpush1.bf16.msra.mxu0 %v1327_v43 }
  0x43   : > { %895 = vmatpush1.bf16.msra.mxu1 %v1328_v44  ;;  %855 = vmatprep.subr.bf16.mxu0 %v1329_v45  ;;  %v968_v45 = vlaneseq (!%p1229_p7) }
  0x44   : > { %896 = vmatprep.subr.bf16.mxu1 %v1331_v46 }
  0x45   : > { %v969_v46 = vshrl.u32 (!%p1229_p7), %v968_v45, 7 }
  0x46   : > { %856 = vmatpush1.bf16.msra.mxu0 %v1333_v50 }
  0x47   : > { %897 = vmatpush1.bf16.msra.mxu1 %v1334_v51  ;;  %857 = vmatprep.subr.bf16.mxu0 %v1335_v53  ;;  %v970_v49 = vsub.s32 (!%p1229_p7), 0, %v969_v46  ;;  %v974_v50 = vsub.s32 (!%p1229_p7), 1, %v969_v46 }
  0x48   : > { %898 = vmatprep.subr.bf16.mxu1 %v1337_v54 }
  0x49   : > { %v971_v53 = vrot.slane (!%p1229_p7), %v966_v47, %v970_v49  ;;  %v975_v54 = vrot.slane (!%p1229_p7), %v966_v47, %v974_v50 }
  0x4a   : > { %858 = vmatpush1.bf16.msra.mxu0 %v1339_v55  ;;  %v985_v55 = vrot.slane (!%p1229_p7), %v980_v48, %v970_v49 }
  0x4b   : > { %899 = vmatpush1.bf16.msra.mxu1 %v1340_v56  ;;  %859 = vmatprep.subr.bf16.mxu0 %v1341_v57  ;;  %v989_v56 = vrot.slane (!%p1229_p7), %v980_v48, %v974_v50 }
  0x4c   : > { %900 = vmatprep.subr.bf16.mxu1 %v1343_v58 }
  0x4e   : > { %860 = vmatpush1.bf16.msra.mxu0 %v1345_v59 }
  0x4f   : > { %901 = vmatpush1.bf16.msra.mxu1 %v1346_v60  ;;  %861 = vmatprep.subr.bf16.mxu0 %v1347_v61 }
  0x50   : > { %902 = vmatprep.subr.bf16.mxu1 %v1349_v62 }
  0x52   : > { %862 = vmatpush1.bf16.msra.mxu0 %v1351_v63 }
  0x53   : > { %903 = vmatpush1.bf16.msra.mxu1 %v1352_v0  ;;  %863 = vmatprep.subr.bf16.mxu0 %v1353_v1 }
  0x54   : > { %904 = vmatprep.subr.bf16.mxu1 %v1355_v2 }
  0x56   : > { %864 = vmatpush1.bf16.msra.mxu0 %v1357_v3 }
  0x57   : > { %905 = vmatpush1.bf16.msra.mxu1 %v1358_v4  ;;  %915 = vmatprep.subr.bf16.mxu0 %v1365_v5 }
  0x59   : > { %866 = vmatmul.mubr.bf16.vlgmr.msra.gmra.mrb[0].mxu0 %v1144_v6 }
  0x5a   : > { %907 = vmatmul.mubr.bf16.vlgmr.msra.gmra.mrb[0].mxu1 %v1146_v7  ;;  %916 = vmatpush1.bf16.msra.mxu0 %v1363_v8 }
  0x5b   : > { %947 = vmatprep.mubr.bf16.mxu0 %v1413_v11  ;;  %917 = vmatprep.subr.bf16.mxu0 %v1368_v9 }
  0x5e   : > { %918 = vmatpush1.bf16.msra.mxu0 %v1366_v10 }
  0x5f   : > { %919 = vmatprep.subr.bf16.mxu0 %v1371_v12 }
  0x62   : > { %920 = vmatpush1.bf16.msra.mxu0 %v1369_v13 }
  0x63   : > { %921 = vmatprep.subr.bf16.mxu0 %v1374_v14 }
  0x66   : > { %922 = vmatpush1.bf16.msra.mxu0 %v1372_v15 }
  0x67   : > { %923 = vmatprep.subr.bf16.mxu0 %v1377_v16 }
  0x6a   : > { %924 = vmatpush1.bf16.msra.mxu0 %v1375_v17 }
  0x6b   : > { %925 = vmatprep.subr.bf16.mxu0 %v1380_v18 }
  0x6e   : > { %926 = vmatpush1.bf16.msra.mxu0 %v1378_v19 }
  0x6f   : > { %927 = vmatprep.subr.bf16.mxu0 %v1383_v20 }
  0x72   : > { %928 = vmatpush1.bf16.msra.mxu0 %v1381_v21 }
  0x73   : > { %929 = vmatprep.subr.bf16.mxu0 %v1386_v22 }
  0x76   : > { %930 = vmatpush1.bf16.msra.mxu0 %v1384_v23 }
  0x79   : > { %948 = vmatmul.mubr.bf16.vlgmr.msra.gmra.mrb[4].mxu0 %v1387_v24 }
 0x12c   : > { %v867_v25 = vpop.f32.mrb[0].mxu0 }
 0x12d   : > { %v908_v26 = vpop.f32.mrb[0].mxu1  ;;  %v869_v28 = vpop.f32.mrb[1].mxu0 }
 0x12e   : > { %v909_v27 = vadd.f32 %v908_v26, %v867_v25  ;;  %v910_v29 = vpop.f32.mrb[1].mxu1  ;;  %v871_v31 = vpop.f32.mrb[2].mxu0 }
 0x12f   : > { %v911_v30 = vadd.f32 %v910_v29, %v869_v28  ;;  %v912_v32 = vpop.f32.mrb[2].mxu1  ;;  %v872_v33 = vpop.f32.mrb[3].mxu0 }
 0x130   : > { %v913_v34 = vpop.f32.mrb[3].mxu1 }
 0x14c   : > { %v949_v36 = vpop.f32.mrb[4].mxu0  ;;  %963 = sbr.rel (%p1229_p7) target bundleno = 355 (0x163), region = 44 }
 0x14d   : > { %v950_v37 = vadd.f32 %v949_v36, %v909_v27  ;;  %v951_v39 = vpop.f32.mrb[5].mxu0 }
 0x14e   : > { %v952_v40 = vadd.f32 %v951_v39, %v911_v30  ;;  %v953_v41 = vpop.f32.mrb[6].mxu0 }
 0x14f   : > { %v956_v42 = vadd.f32 %v950_v37, %v330_v35  ;;  %v954_v43 = vpop.f32.mrb[7].mxu0 }
 0x150   : > { %v957_v44 = vadd.f32 %v952_v40, %v331_v38 }
 0x151   : > { %958 = vst [vmem:[#allocation2] sm:$0xff] %v956_v42 }
 0x152   : > { %959 = vst [vmem:[#allocation2 + $0x8] sm:$0xff] %v957_v44 }
 0x158   : > { %v964_v51 = vld [vmem:[#allocation2] sm:$0xff] }
 0x159   : > { %v965_v52 = vld [vmem:[#allocation2 + $0x8] sm:$0xff]  ;;  %v978_v57 = vmul.f32 %v971_v53, %v964_v51 }
 0x15a   : > { %v979_v58 = vmul.f32 %v975_v54, %v965_v52 }
 0x15b   : > { %v992_v59 = vadd.f32 %v985_v55, %v978_v57 }
 0x15c   : > { %v993_v60 = vadd.f32 %v989_v56, %v979_v58 }
 0x15d   : > { %v994_v61 = vmax.f32 %v992_v59, 0.0 }
 0x15e   : > { %v995_v62 = vmax.f32 %v993_v60, 0.0 }
 0x160   : > { %v1236_v63 = vpack.c.bf16 %v995_v62, %v994_v61 }
 0x162   : > { %1004 = vst [vmem:[%s1578_s4] sm:$0xff] %v1236_v63 }
 0x163 PF: > { %s14_s17 = sadd.s32 1, %s1410_s17   ;;  %s1579_s15 = smov %s1406_s16 }
 0x164   : > { %p11_p8 = scmp.ge.s32.totalorder %s14_s17, 4   ;;  %s1580_s16 = smov %s1582_s18 }
 0x166   :  { %13 = sbr.rel (!%p11_p8) target bundleno = 2 (0x2), region = 83 }

// kernel: res18_feature_forward.34
= control target key start
LH: loop header
LB: loop body
LE: loop exit
PB: predicated region body
PF: predicated region fallthrough
CT: control target
= control target key end

     0   :  { %v257_v1 = vmov 0   ;;  %v175_v18 = vlaneseq  ;;  %s343_s1 = inlined_call_operand.vmem [shape: bf16[128,256], index: 1, kind: input, shape index: {}]   ;;  %s344_s0 = inlined_call_operand.vmem [shape: bf16[8,128], index: 0, kind: input, shape index: {}]   ;;  %s345_s2 = inlined_call_operand.vmem [shape: f32[1,256], index: 2, kind: input, shape index: {}]   ;;  %s346_s3 = inlined_call_operand.vmem [shape: f32[1,256], index: 3, kind: input, shape index: {}]   ;;  %s347_s4 = inlined_call_operand.vmem [shape: bf16[8,256], index: 4, kind: output, shape index: {}]  }
   0x1   :  { %v233_v0 = vld [vmem:[%s343_s1 + $0x4] ss:$8 sps:$4 sm:$0xff]   ;;  %155 = vmatprep.mubr.bf16.mxu0 %v257_v1  ;;  %v235_v2 = vld [vmem:[%s343_s1] ss:$8 sps:$4 sm:$0xff]   ;;  %v236_v3 = vld [vmem:[%s343_s1 + $0x14] ss:$8 sps:$4 sm:$0xff]  }
   0x2   :  { %123 = vmatprep.subr.bf16.mxu0 %v233_v0  ;;  %v238_v4 = vld [vmem:[%s343_s1 + $0x10] ss:$8 sps:$4 sm:$0xff]   ;;  %v239_v5 = vld [vmem:[%s343_s1 + $0x24] ss:$8 sps:$4 sm:$0xff]   ;;  %v241_v6 = vld [vmem:[%s343_s1 + $0x20] ss:$8 sps:$4 sm:$0xff]  }
   0x3   :  { %124 = vmatpush1.bf16.msra.mxu0 %v235_v2  ;;  %v242_v7 = vld [vmem:[%s343_s1 + $0x34] ss:$8 sps:$4 sm:$0xff]   ;;  %v244_v8 = vld [vmem:[%s343_s1 + $0x30] ss:$8 sps:$4 sm:$0xff]   ;;  %v245_v9 = vld [vmem:[%s343_s1 + $0x44] ss:$8 sps:$4 sm:$0xff]  }
   0x4   :  { %125 = vmatprep.subr.bf16.mxu0 %v236_v3  ;;  %v247_v10 = vld [vmem:[%s343_s1 + $0x40] ss:$8 sps:$4 sm:$0xff]   ;;  %v248_v11 = vld [vmem:[%s343_s1 + $0x54] ss:$8 sps:$4 sm:$0xff]   ;;  %v250_v12 = vld [vmem:[%s343_s1 + $0x50] ss:$8 sps:$4 sm:$0xff]  }
   0x5   :  { %v251_v13 = vld [vmem:[%s343_s1 + $0x64] ss:$8 sps:$4 sm:$0xff]   ;;  %v253_v14 = vld [vmem:[%s343_s1 + $0x60] ss:$8 sps:$4 sm:$0xff]   ;;  %v254_v15 = vld [vmem:[%s343_s1 + $0x74] ss:$8 sps:$4 sm:$0xff]  }
   0x6   :  { %v256_v16 = vld [vmem:[%s343_s1 + $0x70] ss:$8 sps:$4 sm:$0xff]   ;;  %v26_v17 = vld [vmem:[%s344_s0] sm:$0xf]  ;;  %v176_v19 = vshrl.u32 %v175_v18, 7 }
   0x7   :  { %126 = vmatpush1.bf16.msra.mxu0 %v238_v4  ;;  %v173_v21 = vld [vmem:[%s345_s2] sm:$0x3] }
   0x8   :  { %127 = vmatprep.subr.bf16.mxu0 %v239_v5  ;;  %v177_v20 = vsub.s32 0, %v176_v19  ;;  %v181_v22 = vsub.s32 1, %v176_v19  ;;  %v187_v23 = vld [vmem:[%s346_s3] sm:$0x3] }
   0xa   :  { %v178_v24 = vrot.slane %v173_v21, %v177_v20  ;;  %v182_v25 = vrot.slane %v173_v21, %v181_v22  ;;  %v192_v26 = vrot.slane %v187_v23, %v177_v20  ;;  %v196_v28 = vrot.slane %v187_v23, %v181_v22 }
   0xb   :  { %128 = vmatpush1.bf16.msra.mxu0 %v241_v6 }
   0xc   :  { %129 = vmatprep.subr.bf16.mxu0 %v242_v7 }
   0xf   :  { %130 = vmatpush1.bf16.msra.mxu0 %v244_v8 }
  0x10   :  { %131 = vmatprep.subr.bf16.mxu0 %v245_v9 }
  0x13   :  { %132 = vmatpush1.bf16.msra.mxu0 %v247_v10 }
  0x14   :  { %133 = vmatprep.subr.bf16.mxu0 %v248_v11 }
  0x17   :  { %134 = vmatpush1.bf16.msra.mxu0 %v250_v12 }
  0x18   :  { %135 = vmatprep.subr.bf16.mxu0 %v251_v13 }
  0x1b   :  { %136 = vmatpush1.bf16.msra.mxu0 %v253_v14 }
  0x1c   :  { %137 = vmatprep.subr.bf16.mxu0 %v254_v15 }
  0x1f   :  { %138 = vmatpush1.bf16.msra.mxu0 %v256_v16 }
  0x22   :  { %156 = vmatmul.mubr.bf16.vlgmr.msra.gmra.mrb[0].mxu0 %v26_v17 }
  0xf5   :  { %v157_v27 = vpop.f32.mrb[0].mxu0 }
  0xf6   :  { %v185_v29 = vmul.f32 %v178_v24, %v157_v27  ;;  %v159_v30 = vpop.f32.mrb[1].mxu0 }
  0xf7   :  { %v186_v31 = vmul.f32 %v182_v25, %v159_v30  ;;  %v161_v32 = vpop.f32.mrb[2].mxu0 }
  0xf8   :  { %v199_v33 = vadd.f32 %v192_v26, %v185_v29  ;;  %v162_v34 = vpop.f32.mrb[3].mxu0 }
  0xf9   :  { %v200_v35 = vadd.f32 %v196_v28, %v186_v31 }
  0xfb   :  { %v231_v36 = vpack.c.bf16 %v200_v35, %v199_v33 }
  0xfd   :  { %209 = vst [vmem:[%s347_s4] sm:$0xff] %v231_v36 }

// kernel: res18_feature_forward.36
= control target key start
LH: loop header
LB: loop body
LE: loop exit
PB: predicated region body
PF: predicated region fallthrough
CT: control target
= control target key end

     0   :  { %s1672_s18 = smov 0   ;;  %s1674_s19 = smov 0   ;;  %s1832_s0 = inlined_call_operand.vmem [shape: bf16[8,2304], index: 0, kind: input, shape index: {}]   ;;  %s1833_s1 = inlined_call_operand.vmem [shape: bf16[2304,256], index: 1, kind: input, shape index: {}]   ;;  %s1834_s2 = inlined_call_operand.vmem [shape: f32[1,256], index: 2, kind: input, shape index: {}]   ;;  %s1835_s3 = inlined_call_operand.vmem [shape: f32[1,256], index: 3, kind: input, shape index: {}]   ;;  %s1836_s4 = inlined_call_operand.vmem [shape: bf16[8,256], index: 4, kind: input, shape index: {}]   ;;  %s1837_s5 = inlined_call_operand.vmem [shape: bf16[8,256], index: 5, kind: output, shape index: {}]  }
   0x1   :  { %s1676_s20 = smov 0  }
   0x2 LB: > { %s27_s21 = sadd.s32 1, %s1635_s19  ;;  %p1327_p0 = scmp.ge.s32.totalorder %s1639_s20, 1  ;;  %s1639_s20 = sphi %s1676_s20, %s15_s20   ;;  %s1635_s19 = sphi %s1674_s19, %s1839_s19   ;;  %s1631_s18 = sphi %s1672_s18, %s1838_s18  }
   0x3   : > { %p28_p1 = scmp.ge.s32.totalorder %s27_s21, 3  ;;  %p271_p2 = scmp.lt.s32.totalorder %s1639_s20, 4 }
   0x5   : > { %s1841_s21 = smov (%p28_p1, %s27_s21), 0  ;;  %p272_p3 = pnand %p1327_p0, %p271_p2 }
   0x6   : > { %s334_s22 = smul.u32 (!%p272_p3), 6, %s1631_s18  ;;  %p1331_p6 = scmp.ne.s32.totalorder (!%p272_p3), %s1631_s18, 0 }
   0x7   : > { %275 = sbr.rel (%p272_p3) target bundleno = 389 (0x185), region = 40 }
   0x8   : > { %s344_s23 = smul.u32 (!%p272_p3), 96, %s1631_s18  ;;  %p337_p4 = scmp.lt.s32.totalorder (!%p272_p3), %s334_s22, 17 }
   0xa   : > { %p346_p5 = scmp.lt.s32.totalorder (!%p272_p3), %s344_s23, 287 }
   0xe   : > { %s1843_s22 = smov (!%p337_p4, %s334_s22), 17  ;;  %s1845_s23 = smov (!%p346_p5, %s344_s23), 287 }
   0xf   : > { %s1328_s24 = sshll.u32 %s1843_s22, 2  ;;  %s1440_s28 = sshll.u32 %s1845_s23, 3  ;;  %v1641_v0 = vmov (!%p1331_p6), 0.0  }
  0x10   : > { %s1697_s27 = scalar_lea.vmem %s1832_s0, %s1328_s24  ;;  %s1702_s6 = scalar_lea.vmem %s1833_s1, %s1440_s28  ;;  %390 = vst [vmem:[#allocation2] sm:$0xff] (!%p1331_p6), %v1641_v0  ;;  %391 = vst [vmem:[#allocation2 + $0x8] sm:$0xff] (!%p1331_p6), %v1641_v0 }
  0x11   : > { %389 = sbr.rel (%p1331_p6) target bundleno = 24 (0x18), region = 44 }
  0x18 PF: > { %v1467_v1 = vld [vmem:[%s1702_s6 + $0x4] ss:$8 sps:$4 sm:$0xff]   ;;  %v1471_v3 = vld [vmem:[%s1702_s6] ss:$8 sps:$4 sm:$0xff]   ;;  %v1473_v5 = vld [vmem:[%s1702_s6 + $0x14] ss:$8 sps:$4 sm:$0xff]  }
  0x19   : > { %v1469_v2 = vld [vmem:[%s1702_s6 + $0x104] ss:$8 sps:$4 sm:$0xff]   ;;  %994 = vmatprep.subr.bf16.mxu0 %v1467_v1  ;;  %v1472_v4 = vld [vmem:[%s1702_s6 + $0x100] ss:$8 sps:$4 sm:$0xff]   ;;  %v1475_v6 = vld [vmem:[%s1702_s6 + $0x114] ss:$8 sps:$4 sm:$0xff]  }
  0x1a   : > { %1035 = vmatprep.subr.bf16.mxu1 %v1469_v2  ;;  %995 = vmatpush1.bf16.msra.mxu0 %v1471_v3  ;;  %v1477_v7 = vld [vmem:[%s1702_s6 + $0x10] ss:$8 sps:$4 sm:$0xff]   ;;  %v1479_v9 = vld [vmem:[%s1702_s6 + $0x24] ss:$8 sps:$4 sm:$0xff]   ;;  %v1483_v11 = vld [vmem:[%s1702_s6 + $0x20] ss:$8 sps:$4 sm:$0xff]  }
  0x1b   : > { %1036 = vmatpush1.bf16.msra.mxu1 %v1472_v4  ;;  %996 = vmatprep.subr.bf16.mxu0 %v1473_v5  ;;  %v1478_v8 = vld [vmem:[%s1702_s6 + $0x110] ss:$8 sps:$4 sm:$0xff]   ;;  %v1481_v10 = vld [vmem:[%s1702_s6 + $0x124] ss:$8 sps:$4 sm:$0xff]   ;;  %v1484_v12 = vld [vmem:[%s1702_s6 + $0x120] ss:$8 sps:$4 sm:$0xff]  }
  0x1c   : > { %1037 = vmatprep.subr.bf16.mxu1 %v1475_v6  ;;  %v1485_v13 = vld [vmem:[%s1702_s6 + $0x34] ss:$8 sps:$4 sm:$0xff]   ;;  %v1489_v15 = vld [vmem:[%s1702_s6 + $0x30] ss:$8 sps:$4 sm:$0xff]   ;;  %v1491_v17 = vld [vmem:[%s1702_s6 + $0x44] ss:$8 sps:$4 sm:$0xff]  }
  0x1d   : > { %v1487_v14 = vld [vmem:[%s1702_s6 + $0x134] ss:$8 sps:$4 sm:$0xff]   ;;  %v1490_v16 = vld [vmem:[%s1702_s6 + $0x130] ss:$8 sps:$4 sm:$0xff]   ;;  %v1493_v18 = vld [vmem:[%s1702_s6 + $0x144] ss:$8 sps:$4 sm:$0xff]  }
  0x1e   : > { %997 = vmatpush1.bf16.msra.mxu0 %v1477_v7  ;;  %v1495_v19 = vld [vmem:[%s1702_s6 + $0x40] ss:$8 sps:$4 sm:$0xff]   ;;  %v1497_v21 = vld [vmem:[%s1702_s6 + $0x54] ss:$8 sps:$4 sm:$0xff]   ;;  %v1501_v23 = vld [vmem:[%s1702_s6 + $0x50] ss:$8 sps:$4 sm:$0xff]  }
  0x1f   : > { %1038 = vmatpush1.bf16.msra.mxu1 %v1478_v8  ;;  %998 = vmatprep.subr.bf16.mxu0 %v1479_v9  ;;  %v1496_v20 = vld [vmem:[%s1702_s6 + $0x140] ss:$8 sps:$4 sm:$0xff]   ;;  %v1499_v22 = vld [vmem:[%s1702_s6 + $0x154] ss:$8 sps:$4 sm:$0xff]   ;;  %v1502_v24 = vld [vmem:[%s1702_s6 + $0x150] ss:$8 sps:$4 sm:$0xff]  }
  0x20   : > { %1039 = vmatprep.subr.bf16.mxu1 %v1481_v10  ;;  %v1503_v25 = vld [vmem:[%s1702_s6 + $0x64] ss:$8 sps:$4 sm:$0xff]   ;;  %v1507_v27 = vld [vmem:[%s1702_s6 + $0x60] ss:$8 sps:$4 sm:$0xff]   ;;  %v1509_v29 = vld [vmem:[%s1702_s6 + $0x74] ss:$8 sps:$4 sm:$0xff]  }
  0x21   : > { %v1505_v26 = vld [vmem:[%s1702_s6 + $0x164] ss:$8 sps:$4 sm:$0xff]   ;;  %v1508_v28 = vld [vmem:[%s1702_s6 + $0x160] ss:$8 sps:$4 sm:$0xff]   ;;  %v1511_v30 = vld [vmem:[%s1702_s6 + $0x174] ss:$8 sps:$4 sm:$0xff]  }
  0x22   : > { %999 = vmatpush1.bf16.msra.mxu0 %v1483_v11  ;;  %v1513_v31 = vld [vmem:[%s1702_s6 + $0x70] ss:$8 sps:$4 sm:$0xff]   ;;  %v1515_v33 = vld [vmem:[%s1702_s6 + $0x84] ss:$8 sps:$4 sm:$0xff]   ;;  %v1519_v35 = vld [vmem:[%s1702_s6 + $0x80] ss:$8 sps:$4 sm:$0xff]  }
  0x23   : > { %1040 = vmatpush1.bf16.msra.mxu1 %v1484_v12  ;;  %1000 = vmatprep.subr.bf16.mxu0 %v1485_v13  ;;  %v1514_v32 = vld [vmem:[%s1702_s6 + $0x170] ss:$8 sps:$4 sm:$0xff]   ;;  %v1517_v34 = vld [vmem:[%s1702_s6 + $0x184] ss:$8 sps:$4 sm:$0xff]   ;;  %v1520_v36 = vld [vmem:[%s1702_s6 + $0x180] ss:$8 sps:$4 sm:$0xff]  }
  0x24   : > { %1041 = vmatprep.subr.bf16.mxu1 %v1487_v14  ;;  %v1521_v37 = vld [vmem:[%s1702_s6 + $0x94] ss:$8 sps:$4 sm:$0xff]   ;;  %v1525_v39 = vld [vmem:[%s1702_s6 + $0x90] ss:$8 sps:$4 sm:$0xff]   ;;  %v1527_v41 = vld [vmem:[%s1702_s6 + $0xa4] ss:$8 sps:$4 sm:$0xff]  }
  0x25   : > { %v1523_v38 = vld [vmem:[%s1702_s6 + $0x194] ss:$8 sps:$4 sm:$0xff]   ;;  %v1526_v40 = vld [vmem:[%s1702_s6 + $0x190] ss:$8 sps:$4 sm:$0xff]   ;;  %v1529_v42 = vld [vmem:[%s1702_s6 + $0x1a4] ss:$8 sps:$4 sm:$0xff]  }
  0x26   : > { %1001 = vmatpush1.bf16.msra.mxu0 %v1489_v15  ;;  %v1531_v43 = vld [vmem:[%s1702_s6 + $0xa0] ss:$8 sps:$4 sm:$0xff]   ;;  %v1533_v45 = vld [vmem:[%s1702_s6 + $0xb4] ss:$8 sps:$4 sm:$0xff]   ;;  %v1537_v50 = vld [vmem:[%s1702_s6 + $0xb0] ss:$8 sps:$4 sm:$0xff]  }
  0x27   : > { %1042 = vmatpush1.bf16.msra.mxu1 %v1490_v16  ;;  %1002 = vmatprep.subr.bf16.mxu0 %v1491_v17  ;;  %v1532_v44 = vld [vmem:[%s1702_s6 + $0x1a0] ss:$8 sps:$4 sm:$0xff]   ;;  %v1535_v46 = vld [vmem:[%s1702_s6 + $0x1b4] ss:$8 sps:$4 sm:$0xff]   ;;  %v1538_v51 = vld [vmem:[%s1702_s6 + $0x1b0] ss:$8 sps:$4 sm:$0xff]  }
  0x28   : > { %1043 = vmatprep.subr.bf16.mxu1 %v1493_v18  ;;  %v394_v47 = vld [vmem:[%s1697_s27] sm:$0xff]  ;;  %v395_v49 = vld [vmem:[%s1697_s27 + $0x8] sm:$0xff]  ;;  %v1545_v57 = vld [vmem:[%s1702_s6 + $0xd4] ss:$8 sps:$4 sm:$0xff]   ;;  %p1434_p7 = scmp.ne.s32.totalorder %s1631_s18, 2 }
  0x29   : > { %v1333_v48 = vcombine.high %v394_v47, %v394_v47  ;;  %v1335_v52 = vcombine.high %v395_v49, %v395_v49  ;;  %v1539_v53 = vld [vmem:[%s1702_s6 + $0xc4] ss:$8 sps:$4 sm:$0xff]   ;;  %v1543_v55 = vld [vmem:[%s1702_s6 + $0xc0] ss:$8 sps:$4 sm:$0xff]   ;;  %v1547_v58 = vld [vmem:[%s1702_s6 + $0x1d4] ss:$8 sps:$4 sm:$0xff]   ;;  %v1332_v6 = vcombine.low %v394_v47, %v394_v47  ;;  %v1334_v7 = vcombine.low %v395_v49, %v395_v49 }
  0x2a   : > { %1003 = vmatpush1.bf16.msra.mxu0 %v1495_v19  ;;  %v1541_v54 = vld [vmem:[%s1702_s6 + $0x1c4] ss:$8 sps:$4 sm:$0xff]   ;;  %v1544_v56 = vld [vmem:[%s1702_s6 + $0x1c0] ss:$8 sps:$4 sm:$0xff]   ;;  %v1549_v59 = vld [vmem:[%s1702_s6 + $0xd0] ss:$8 sps:$4 sm:$0xff]  }
  0x2b   : > { %1044 = vmatpush1.bf16.msra.mxu1 %v1496_v20  ;;  %1004 = vmatprep.subr.bf16.mxu0 %v1497_v21  ;;  %v1550_v60 = vld [vmem:[%s1702_s6 + $0x1d0] ss:$8 sps:$4 sm:$0xff]   ;;  %v1551_v61 = vld [vmem:[%s1702_s6 + $0xe4] ss:$8 sps:$4 sm:$0xff]   ;;  %v1555_v63 = vld [vmem:[%s1702_s6 + $0xe0] ss:$8 sps:$4 sm:$0xff]  }
  0x2c   : > { %1045 = vmatprep.subr.bf16.mxu1 %v1499_v22  ;;  %1026 = vmatprep.mubr.bf16.mxu0 %v1333_v48  ;;  %v1553_v62 = vld [vmem:[%s1702_s6 + $0x1e4] ss:$8 sps:$4 sm:$0xff]   ;;  %v1556_v0 = vld [vmem:[%s1702_s6 + $0x1e0] ss:$8 sps:$4 sm:$0xff]   ;;  %v1557_v1 = vld [vmem:[%s1702_s6 + $0xf4] ss:$8 sps:$4 sm:$0xff]  }
  0x2d   : > { %1067 = vmatprep.mubr.bf16.mxu1 %v1335_v52  ;;  %v1559_v2 = vld [vmem:[%s1702_s6 + $0x1f4] ss:$8 sps:$4 sm:$0xff]   ;;  %v1561_v3 = vld [vmem:[%s1702_s6 + $0xf0] ss:$8 sps:$4 sm:$0xff]   ;;  %v1569_v5 = vld [vmem:[%s1702_s6 + $0x204] ss:$8 sps:$4 sm:$0xff]  }
  0x2e   : > { %1005 = vmatpush1.bf16.msra.mxu0 %v1501_v23  ;;  %v1562_v4 = vld [vmem:[%s1702_s6 + $0x1f0] ss:$8 sps:$4 sm:$0xff]   ;;  %v1567_v8 = vld [vmem:[%s1702_s6 + $0x200] ss:$8 sps:$4 sm:$0xff]   ;;  %v1572_v10 = vld [vmem:[%s1702_s6 + $0x214] ss:$8 sps:$4 sm:$0xff]  }
  0x2f   : > { %1046 = vmatpush1.bf16.msra.mxu1 %v1502_v24  ;;  %1006 = vmatprep.subr.bf16.mxu0 %v1503_v25  ;;  %v1774_v9 = vld [vmem:[%s1697_s27 + $0x10] sm:$0xff]  ;;  %v1575_v13 = vld [vmem:[%s1702_s6 + $0x224] ss:$8 sps:$4 sm:$0xff]   ;;  %v1573_v14 = vld [vmem:[%s1702_s6 + $0x220] ss:$8 sps:$4 sm:$0xff]  }
  0x30   : > { %1047 = vmatprep.subr.bf16.mxu1 %v1505_v26  ;;  %v1337_v11 = vcombine.high %v1774_v9, %v1774_v9  ;;  %v1570_v12 = vld [vmem:[%s1702_s6 + $0x210] ss:$8 sps:$4 sm:$0xff]   ;;  %v1578_v15 = vld [vmem:[%s1702_s6 + $0x234] ss:$8 sps:$4 sm:$0xff]   ;;  %v1581_v17 = vld [vmem:[%s1702_s6 + $0x244] ss:$8 sps:$4 sm:$0xff]  }
  0x31   : > { %v1576_v16 = vld [vmem:[%s1702_s6 + $0x230] ss:$8 sps:$4 sm:$0xff]   ;;  %v1579_v18 = vld [vmem:[%s1702_s6 + $0x240] ss:$8 sps:$4 sm:$0xff]   ;;  %v1584_v19 = vld [vmem:[%s1702_s6 + $0x254] ss:$8 sps:$4 sm:$0xff]  }
  0x32   : > { %1007 = vmatpush1.bf16.msra.mxu0 %v1507_v27  ;;  %v1582_v20 = vld [vmem:[%s1702_s6 + $0x250] ss:$8 sps:$4 sm:$0xff]   ;;  %v1587_v21 = vld [vmem:[%s1702_s6 + $0x264] ss:$8 sps:$4 sm:$0xff]   ;;  %v1585_v22 = vld [vmem:[%s1702_s6 + $0x260] ss:$8 sps:$4 sm:$0xff]  }
  0x33   : > { %1048 = vmatpush1.bf16.msra.mxu1 %v1508_v28  ;;  %1008 = vmatprep.subr.bf16.mxu0 %v1509_v29  ;;  %v1590_v23 = vld [vmem:[%s1702_s6 + $0x274] ss:$8 sps:$4 sm:$0xff]   ;;  %v1588_v24 = vld [vmem:[%s1702_s6 + $0x270] ss:$8 sps:$4 sm:$0xff]   ;;  %v1593_v25 = vld [vmem:[%s1702_s6 + $0x284] ss:$8 sps:$4 sm:$0xff]  }
  0x34   : > { %1049 = vmatprep.subr.bf16.mxu1 %v1511_v30  ;;  %v1591_v26 = vld [vmem:[%s1702_s6 + $0x280] ss:$8 sps:$4 sm:$0xff]   ;;  %v1596_v27 = vld [vmem:[%s1702_s6 + $0x294] ss:$8 sps:$4 sm:$0xff]   ;;  %v1594_v28 = vld [vmem:[%s1702_s6 + $0x290] ss:$8 sps:$4 sm:$0xff]  }
  0x35   : > { %v1599_v29 = vld [vmem:[%s1702_s6 + $0x2a4] ss:$8 sps:$4 sm:$0xff]   ;;  %v1597_v30 = vld [vmem:[%s1702_s6 + $0x2a0] ss:$8 sps:$4 sm:$0xff]  }
  0x36   : > { %1009 = vmatpush1.bf16.msra.mxu0 %v1513_v31  ;;  %v1602_v31 = vld [vmem:[%s1702_s6 + $0x2b4] ss:$8 sps:$4 sm:$0xff]   ;;  %v392_v52 = vld [vmem:[#allocation2] sm:$0xff] }
  0x37   : > { %1050 = vmatpush1.bf16.msra.mxu1 %v1514_v32  ;;  %1010 = vmatprep.subr.bf16.mxu0 %v1515_v33  ;;  %v1600_v32 = vld [vmem:[%s1702_s6 + $0x2b0] ss:$8 sps:$4 sm:$0xff]   ;;  %v1605_v33 = vld [vmem:[%s1702_s6 + $0x2c4] ss:$8 sps:$4 sm:$0xff]  }
  0x38   : > { %1051 = vmatprep.subr.bf16.mxu1 %v1517_v34  ;;  %v1603_v34 = vld [vmem:[%s1702_s6 + $0x2c0] ss:$8 sps:$4 sm:$0xff]  }
  0x3a   : > { %1011 = vmatpush1.bf16.msra.mxu0 %v1519_v35  ;;  %v1608_v35 = vld [vmem:[%s1702_s6 + $0x2d4] ss:$8 sps:$4 sm:$0xff]  }
  0x3b   : > { %1052 = vmatpush1.bf16.msra.mxu1 %v1520_v36  ;;  %1012 = vmatprep.subr.bf16.mxu0 %v1521_v37  ;;  %v1606_v36 = vld [vmem:[%s1702_s6 + $0x2d0] ss:$8 sps:$4 sm:$0xff]   ;;  %v1611_v37 = vld [vmem:[%s1702_s6 + $0x2e4] ss:$8 sps:$4 sm:$0xff]  }
  0x3c   : > { %1053 = vmatprep.subr.bf16.mxu1 %v1523_v38  ;;  %v1609_v38 = vld [vmem:[%s1702_s6 + $0x2e0] ss:$8 sps:$4 sm:$0xff]  }
  0x3e   : > { %1013 = vmatpush1.bf16.msra.mxu0 %v1525_v39  ;;  %v1614_v39 = vld [vmem:[%s1702_s6 + $0x2f4] ss:$8 sps:$4 sm:$0xff]  }
  0x3f   : > { %1054 = vmatpush1.bf16.msra.mxu1 %v1526_v40  ;;  %1014 = vmatprep.subr.bf16.mxu0 %v1527_v41  ;;  %v1612_v40 = vld [vmem:[%s1702_s6 + $0x2f0] ss:$8 sps:$4 sm:$0xff]   ;;  %v1336_v41 = vcombine.low %v1774_v9, %v1774_v9 }
  0x40   : > { %1055 = vmatprep.subr.bf16.mxu1 %v1529_v42 }
  0x42   : > { %1015 = vmatpush1.bf16.msra.mxu0 %v1531_v43 }
  0x43   : > { %1056 = vmatpush1.bf16.msra.mxu1 %v1532_v44  ;;  %1016 = vmatprep.subr.bf16.mxu0 %v1533_v45 }
  0x44   : > { %1057 = vmatprep.subr.bf16.mxu1 %v1535_v46 }
  0x46   : > { %1017 = vmatpush1.bf16.msra.mxu0 %v1537_v50 }
  0x47   : > { %1058 = vmatpush1.bf16.msra.mxu1 %v1538_v51  ;;  %1018 = vmatprep.subr.bf16.mxu0 %v1539_v53 }
  0x48   : > { %1059 = vmatprep.subr.bf16.mxu1 %v1541_v54 }
  0x4a   : > { %1019 = vmatpush1.bf16.msra.mxu0 %v1543_v55  ;;  %v393_v55 = vld [vmem:[#allocation2 + $0x8] sm:$0xff] }
  0x4b   : > { %1060 = vmatpush1.bf16.msra.mxu1 %v1544_v56  ;;  %1020 = vmatprep.subr.bf16.mxu0 %v1545_v57 }
  0x4c   : > { %1061 = vmatprep.subr.bf16.mxu1 %v1547_v58 }
  0x4e   : > { %1021 = vmatpush1.bf16.msra.mxu0 %v1549_v59 }
  0x4f   : > { %1062 = vmatpush1.bf16.msra.mxu1 %v1550_v60  ;;  %1022 = vmatprep.subr.bf16.mxu0 %v1551_v61 }
  0x50   : > { %1063 = vmatprep.subr.bf16.mxu1 %v1553_v62  ;;  %v1129_v62 = vlaneseq (!%p1434_p7) }
  0x52   : > { %1023 = vmatpush1.bf16.msra.mxu0 %v1555_v63  ;;  %v1130_v63 = vshrl.u32 (!%p1434_p7), %v1129_v62, 7 }
  0x53   : > { %1064 = vmatpush1.bf16.msra.mxu1 %v1556_v0  ;;  %1024 = vmatprep.subr.bf16.mxu0 %v1557_v1  ;;  %v1127_v0 = vld [vmem:[%s1834_s2] sm:$0x3] (!%p1434_p7) }
  0x54   : > { %1065 = vmatprep.subr.bf16.mxu1 %v1559_v2  ;;  %v1141_v1 = vld [vmem:[%s1835_s3] sm:$0x3] (!%p1434_p7)  ;;  %v1131_v2 = vsub.s32 (!%p1434_p7), 0, %v1130_v63 }
  0x56   : > { %1025 = vmatpush1.bf16.msra.mxu0 %v1561_v3  ;;  %v1135_v3 = vsub.s32 (!%p1434_p7), 1, %v1130_v63  ;;  %v1146_v9 = vrot.slane (!%p1434_p7), %v1141_v1, %v1131_v2 }
  0x57   : > { %1066 = vmatpush1.bf16.msra.mxu1 %v1562_v4  ;;  %1076 = vmatprep.subr.bf16.mxu0 %v1569_v5 }
  0x59   : > { %1027 = vmatmul.mubr.bf16.vlgmr.msra.gmra.mrb[0].mxu0 %v1332_v6  ;;  %v1155_v6 = vld [vmem:[%s1836_s4] sm:$0xff] (!%p1434_p7) }
  0x5a   : > { %1068 = vmatmul.mubr.bf16.vlgmr.msra.gmra.mrb[0].mxu1 %v1334_v7  ;;  %1077 = vmatpush1.bf16.msra.mxu0 %v1567_v8  ;;  %v1132_v7 = vrot.slane (!%p1434_p7), %v1127_v0, %v1131_v2  ;;  %v1136_v8 = vrot.slane (!%p1434_p7), %v1127_v0, %v1135_v3 }
  0x5b   : > { %1108 = vmatprep.mubr.bf16.mxu0 %v1337_v11  ;;  %1078 = vmatprep.subr.bf16.mxu0 %v1572_v10  ;;  %v1150_v10 = vrot.slane (!%p1434_p7), %v1141_v1, %v1135_v3 }
  0x5e   : > { %1079 = vmatpush1.bf16.msra.mxu0 %v1570_v12 }
  0x5f   : > { %1080 = vmatprep.subr.bf16.mxu0 %v1575_v13  ;;  %v1156_v13 = vunpack.c.l.bf16 (!%p1434_p7), %v1155_v6 }
  0x62   : > { %1081 = vmatpush1.bf16.msra.mxu0 %v1573_v14  ;;  %v1157_v14 = vunpack.c.h.bf16 (!%p1434_p7), %v1155_v6 }
  0x63   : > { %1082 = vmatprep.subr.bf16.mxu0 %v1578_v15 }
  0x66   : > { %1083 = vmatpush1.bf16.msra.mxu0 %v1576_v16 }
  0x67   : > { %1084 = vmatprep.subr.bf16.mxu0 %v1581_v17 }
  0x6a   : > { %1085 = vmatpush1.bf16.msra.mxu0 %v1579_v18 }
  0x6b   : > { %1086 = vmatprep.subr.bf16.mxu0 %v1584_v19 }
  0x6e   : > { %1087 = vmatpush1.bf16.msra.mxu0 %v1582_v20 }
  0x6f   : > { %1088 = vmatprep.subr.bf16.mxu0 %v1587_v21 }
  0x72   : > { %1089 = vmatpush1.bf16.msra.mxu0 %v1585_v22 }
  0x73   : > { %1090 = vmatprep.subr.bf16.mxu0 %v1590_v23 }
  0x76   : > { %1091 = vmatpush1.bf16.msra.mxu0 %v1588_v24 }
  0x77   : > { %1092 = vmatprep.subr.bf16.mxu0 %v1593_v25 }
  0x7a   : > { %1093 = vmatpush1.bf16.msra.mxu0 %v1591_v26 }
  0x7b   : > { %1094 = vmatprep.subr.bf16.mxu0 %v1596_v27 }
  0x7e   : > { %1095 = vmatpush1.bf16.msra.mxu0 %v1594_v28 }
  0x7f   : > { %1096 = vmatprep.subr.bf16.mxu0 %v1599_v29 }
  0x82   : > { %1097 = vmatpush1.bf16.msra.mxu0 %v1597_v30 }
  0x83   : > { %1098 = vmatprep.subr.bf16.mxu0 %v1602_v31 }
  0x86   : > { %1099 = vmatpush1.bf16.msra.mxu0 %v1600_v32 }
  0x87   : > { %1100 = vmatprep.subr.bf16.mxu0 %v1605_v33 }
  0x8a   : > { %1101 = vmatpush1.bf16.msra.mxu0 %v1603_v34 }
  0x8b   : > { %1102 = vmatprep.subr.bf16.mxu0 %v1608_v35 }
  0x8e   : > { %1103 = vmatpush1.bf16.msra.mxu0 %v1606_v36 }
  0x8f   : > { %1104 = vmatprep.subr.bf16.mxu0 %v1611_v37 }
  0x92   : > { %1105 = vmatpush1.bf16.msra.mxu0 %v1609_v38 }
  0x93   : > { %1106 = vmatprep.subr.bf16.mxu0 %v1614_v39 }
  0x96   : > { %1107 = vmatpush1.bf16.msra.mxu0 %v1612_v40 }
  0x99   : > { %1109 = vmatmul.mubr.bf16.vlgmr.msra.gmra.mrb[4].mxu0 %v1336_v41 }
 0x12c   : > { %v1028_v42 = vpop.f32.mrb[0].mxu0 }
 0x12d   : > { %v1069_v43 = vpop.f32.mrb[0].mxu1  ;;  %v1030_v45 = vpop.f32.mrb[1].mxu0 }
 0x12e   : > { %v1070_v44 = vadd.f32 %v1069_v43, %v1028_v42  ;;  %v1071_v46 = vpop.f32.mrb[1].mxu1  ;;  %v1032_v48 = vpop.f32.mrb[2].mxu0 }
 0x12f   : > { %v1072_v47 = vadd.f32 %v1071_v46, %v1030_v45  ;;  %v1073_v49 = vpop.f32.mrb[2].mxu1  ;;  %v1033_v50 = vpop.f32.mrb[3].mxu0 }
 0x130   : > { %v1074_v51 = vpop.f32.mrb[3].mxu1 }
 0x16c   : > { %v1110_v53 = vpop.f32.mrb[4].mxu0  ;;  %1124 = sbr.rel (%p1434_p7) target bundleno = 389 (0x185), region = 48 }
 0x16d   : > { %v1111_v54 = vadd.f32 %v1110_v53, %v1070_v44  ;;  %v1112_v56 = vpop.f32.mrb[5].mxu0 }
 0x16e   : > { %v1113_v57 = vadd.f32 %v1112_v56, %v1072_v47  ;;  %v1114_v58 = vpop.f32.mrb[6].mxu0 }
 0x16f   : > { %v1117_v59 = vadd.f32 %v1111_v54, %v392_v52  ;;  %v1115_v60 = vpop.f32.mrb[7].mxu0 }
 0x170   : > { %v1118_v61 = vadd.f32 %v1113_v57, %v393_v55 }
 0x171   : > { %1119 = vst [vmem:[#allocation2] sm:$0xff] %v1117_v59 }
 0x172   : > { %1120 = vst [vmem:[#allocation2 + $0x8] sm:$0xff] %v1118_v61 }
 0x178   : > { %v1125_v4 = vld [vmem:[#allocation2] sm:$0xff] }
 0x179   : > { %v1126_v5 = vld [vmem:[#allocation2 + $0x8] sm:$0xff]  ;;  %v1139_v11 = vmul.f32 %v1132_v7, %v1125_v4 }
 0x17a   : > { %v1140_v12 = vmul.f32 %v1136_v8, %v1126_v5 }
 0x17b   : > { %v1153_v15 = vadd.f32 %v1146_v9, %v1139_v11 }
 0x17c   : > { %v1154_v16 = vadd.f32 %v1150_v10, %v1140_v12 }
 0x17d   : > { %v1158_v17 = vadd.f32 %v1156_v13, %v1153_v15 }
 0x17e   : > { %v1159_v18 = vadd.f32 %v1157_v14, %v1154_v16 }
 0x17f   : > { %v1160_v19 = vmax.f32 %v1158_v17, 0.0 }
 0x180   : > { %v1161_v20 = vmax.f32 %v1159_v18, 0.0 }
 0x182   : > { %v1441_v21 = vpack.c.bf16 %v1161_v20, %v1160_v19 }
 0x184   : > { %1170 = vst [vmem:[%s1837_s5] sm:$0xff] %v1441_v21 }
 0x185 PF: > { %s15_s20 = sadd.s32 1, %s1639_s20   ;;  %s1838_s18 = smov %s1635_s19 }
 0x186   : > { %p12_p8 = scmp.ge.s32.totalorder %s15_s20, 5   ;;  %s1839_s19 = smov %s1841_s21 }
 0x188   :  { %14 = sbr.rel (!%p12_p8) target bundleno = 2 (0x2), region = 90 }

// kernel: res18_feature_forward.37
= control target key start
LH: loop header
LB: loop body
LE: loop exit
PB: predicated region body
PF: predicated region fallthrough
CT: control target
= control target key end

     0   :  { %s1577_s15 = smov 0   ;;  %s1579_s16 = smov 0   ;;  %s1734_s0 = inlined_call_operand.vmem [shape: bf16[8,2304], index: 0, kind: input, shape index: {}]   ;;  %s1735_s1 = inlined_call_operand.vmem [shape: bf16[2304,256], index: 1, kind: input, shape index: {}]   ;;  %s1736_s2 = inlined_call_operand.vmem [shape: f32[1,256], index: 2, kind: input, shape index: {}]   ;;  %s1737_s3 = inlined_call_operand.vmem [shape: f32[1,256], index: 3, kind: input, shape index: {}]   ;;  %s1738_s4 = inlined_call_operand.vmem [shape: bf16[8,256], index: 4, kind: output, shape index: {}]  }
   0x1   :  { %s1581_s17 = smov 0  }
   0x2 LB: > { %s26_s18 = sadd.s32 1, %s1545_s16  ;;  %p1237_p0 = scmp.ge.s32.totalorder %s1549_s17, 1  ;;  %s1549_s17 = sphi %s1581_s17, %s14_s17   ;;  %s1545_s16 = sphi %s1579_s16, %s1740_s16   ;;  %s1541_s15 = sphi %s1577_s15, %s1739_s15  }
   0x3   : > { %p27_p1 = scmp.ge.s32.totalorder %s26_s18, 3  ;;  %p229_p2 = scmp.lt.s32.totalorder %s1549_s17, 4 }
   0x5   : > { %s1742_s18 = smov (%p27_p1, %s26_s18), 0  ;;  %p230_p3 = pnand %p1237_p0, %p229_p2 }
   0x6   : > { %s281_s19 = smul.u32 (!%p230_p3), 6, %s1541_s15  ;;  %p1241_p6 = scmp.ne.s32.totalorder (!%p230_p3), %s1541_s15, 0 }
   0x7   : > { %233 = sbr.rel (%p230_p3) target bundleno = 387 (0x183), region = 36 }
   0x8   : > { %s291_s20 = smul.u32 (!%p230_p3), 96, %s1541_s15  ;;  %p284_p4 = scmp.lt.s32.totalorder (!%p230_p3), %s281_s19, 17 }
   0xa   : > { %p293_p5 = scmp.lt.s32.totalorder (!%p230_p3), %s291_s20, 287 }
   0xe   : > { %s1744_s19 = smov (!%p284_p4, %s281_s19), 17  ;;  %s1746_s20 = smov (!%p293_p5, %s291_s20), 287 }
   0xf   : > { %s1238_s21 = sshll.u32 %s1744_s19, 2  ;;  %s1350_s25 = sshll.u32 %s1746_s20, 3  ;;  %v1551_v0 = vmov (!%p1241_p6), 0.0  }
  0x10   : > { %s1602_s24 = scalar_lea.vmem %s1734_s0, %s1238_s21  ;;  %s1607_s28 = scalar_lea.vmem %s1735_s1, %s1350_s25  ;;  %327 = vst [vmem:[#allocation2] sm:$0xff] (!%p1241_p6), %v1551_v0  ;;  %328 = vst [vmem:[#allocation2 + $0x8] sm:$0xff] (!%p1241_p6), %v1551_v0 }
  0x11   : > { %326 = sbr.rel (%p1241_p6) target bundleno = 24 (0x18), region = 40 }
  0x18 PF: > { %v1377_v1 = vld [vmem:[%s1607_s28 + $0x4] ss:$8 sps:$4 sm:$0xff]   ;;  %v1381_v3 = vld [vmem:[%s1607_s28] ss:$8 sps:$4 sm:$0xff]   ;;  %v1383_v5 = vld [vmem:[%s1607_s28 + $0x14] ss:$8 sps:$4 sm:$0xff]  }
  0x19   : > { %v1379_v2 = vld [vmem:[%s1607_s28 + $0x104] ss:$8 sps:$4 sm:$0xff]   ;;  %931 = vmatprep.subr.bf16.mxu0 %v1377_v1  ;;  %v1382_v4 = vld [vmem:[%s1607_s28 + $0x100] ss:$8 sps:$4 sm:$0xff]   ;;  %v1385_v6 = vld [vmem:[%s1607_s28 + $0x114] ss:$8 sps:$4 sm:$0xff]  }
  0x1a   : > { %972 = vmatprep.subr.bf16.mxu1 %v1379_v2  ;;  %932 = vmatpush1.bf16.msra.mxu0 %v1381_v3  ;;  %v1387_v7 = vld [vmem:[%s1607_s28 + $0x10] ss:$8 sps:$4 sm:$0xff]   ;;  %v1389_v9 = vld [vmem:[%s1607_s28 + $0x24] ss:$8 sps:$4 sm:$0xff]   ;;  %v1393_v11 = vld [vmem:[%s1607_s28 + $0x20] ss:$8 sps:$4 sm:$0xff]  }
  0x1b   : > { %973 = vmatpush1.bf16.msra.mxu1 %v1382_v4  ;;  %933 = vmatprep.subr.bf16.mxu0 %v1383_v5  ;;  %v1388_v8 = vld [vmem:[%s1607_s28 + $0x110] ss:$8 sps:$4 sm:$0xff]   ;;  %v1391_v10 = vld [vmem:[%s1607_s28 + $0x124] ss:$8 sps:$4 sm:$0xff]   ;;  %v1394_v12 = vld [vmem:[%s1607_s28 + $0x120] ss:$8 sps:$4 sm:$0xff]  }
  0x1c   : > { %974 = vmatprep.subr.bf16.mxu1 %v1385_v6  ;;  %v1395_v13 = vld [vmem:[%s1607_s28 + $0x34] ss:$8 sps:$4 sm:$0xff]   ;;  %v1399_v15 = vld [vmem:[%s1607_s28 + $0x30] ss:$8 sps:$4 sm:$0xff]   ;;  %v1401_v17 = vld [vmem:[%s1607_s28 + $0x44] ss:$8 sps:$4 sm:$0xff]  }
  0x1d   : > { %v1397_v14 = vld [vmem:[%s1607_s28 + $0x134] ss:$8 sps:$4 sm:$0xff]   ;;  %v1400_v16 = vld [vmem:[%s1607_s28 + $0x130] ss:$8 sps:$4 sm:$0xff]   ;;  %v1403_v18 = vld [vmem:[%s1607_s28 + $0x144] ss:$8 sps:$4 sm:$0xff]  }
  0x1e   : > { %934 = vmatpush1.bf16.msra.mxu0 %v1387_v7  ;;  %v1405_v19 = vld [vmem:[%s1607_s28 + $0x40] ss:$8 sps:$4 sm:$0xff]   ;;  %v1407_v21 = vld [vmem:[%s1607_s28 + $0x54] ss:$8 sps:$4 sm:$0xff]   ;;  %v1411_v23 = vld [vmem:[%s1607_s28 + $0x50] ss:$8 sps:$4 sm:$0xff]  }
  0x1f   : > { %975 = vmatpush1.bf16.msra.mxu1 %v1388_v8  ;;  %935 = vmatprep.subr.bf16.mxu0 %v1389_v9  ;;  %v1406_v20 = vld [vmem:[%s1607_s28 + $0x140] ss:$8 sps:$4 sm:$0xff]   ;;  %v1409_v22 = vld [vmem:[%s1607_s28 + $0x154] ss:$8 sps:$4 sm:$0xff]   ;;  %v1412_v24 = vld [vmem:[%s1607_s28 + $0x150] ss:$8 sps:$4 sm:$0xff]  }
  0x20   : > { %976 = vmatprep.subr.bf16.mxu1 %v1391_v10  ;;  %v1413_v25 = vld [vmem:[%s1607_s28 + $0x64] ss:$8 sps:$4 sm:$0xff]   ;;  %v1417_v27 = vld [vmem:[%s1607_s28 + $0x60] ss:$8 sps:$4 sm:$0xff]   ;;  %v1419_v29 = vld [vmem:[%s1607_s28 + $0x74] ss:$8 sps:$4 sm:$0xff]  }
  0x21   : > { %v1415_v26 = vld [vmem:[%s1607_s28 + $0x164] ss:$8 sps:$4 sm:$0xff]   ;;  %v1418_v28 = vld [vmem:[%s1607_s28 + $0x160] ss:$8 sps:$4 sm:$0xff]   ;;  %v1421_v30 = vld [vmem:[%s1607_s28 + $0x174] ss:$8 sps:$4 sm:$0xff]  }
  0x22   : > { %936 = vmatpush1.bf16.msra.mxu0 %v1393_v11  ;;  %v1423_v31 = vld [vmem:[%s1607_s28 + $0x70] ss:$8 sps:$4 sm:$0xff]   ;;  %v1425_v33 = vld [vmem:[%s1607_s28 + $0x84] ss:$8 sps:$4 sm:$0xff]   ;;  %v1429_v35 = vld [vmem:[%s1607_s28 + $0x80] ss:$8 sps:$4 sm:$0xff]  }
  0x23   : > { %977 = vmatpush1.bf16.msra.mxu1 %v1394_v12  ;;  %937 = vmatprep.subr.bf16.mxu0 %v1395_v13  ;;  %v1424_v32 = vld [vmem:[%s1607_s28 + $0x170] ss:$8 sps:$4 sm:$0xff]   ;;  %v1427_v34 = vld [vmem:[%s1607_s28 + $0x184] ss:$8 sps:$4 sm:$0xff]   ;;  %v1430_v36 = vld [vmem:[%s1607_s28 + $0x180] ss:$8 sps:$4 sm:$0xff]  }
  0x24   : > { %978 = vmatprep.subr.bf16.mxu1 %v1397_v14  ;;  %v1431_v37 = vld [vmem:[%s1607_s28 + $0x94] ss:$8 sps:$4 sm:$0xff]   ;;  %v1435_v39 = vld [vmem:[%s1607_s28 + $0x90] ss:$8 sps:$4 sm:$0xff]   ;;  %v1437_v41 = vld [vmem:[%s1607_s28 + $0xa4] ss:$8 sps:$4 sm:$0xff]  }
  0x25   : > { %v1433_v38 = vld [vmem:[%s1607_s28 + $0x194] ss:$8 sps:$4 sm:$0xff]   ;;  %v1436_v40 = vld [vmem:[%s1607_s28 + $0x190] ss:$8 sps:$4 sm:$0xff]   ;;  %v1439_v42 = vld [vmem:[%s1607_s28 + $0x1a4] ss:$8 sps:$4 sm:$0xff]  }
  0x26   : > { %938 = vmatpush1.bf16.msra.mxu0 %v1399_v15  ;;  %v1441_v43 = vld [vmem:[%s1607_s28 + $0xa0] ss:$8 sps:$4 sm:$0xff]   ;;  %v1443_v45 = vld [vmem:[%s1607_s28 + $0xb4] ss:$8 sps:$4 sm:$0xff]   ;;  %v1447_v50 = vld [vmem:[%s1607_s28 + $0xb0] ss:$8 sps:$4 sm:$0xff]  }
  0x27   : > { %979 = vmatpush1.bf16.msra.mxu1 %v1400_v16  ;;  %939 = vmatprep.subr.bf16.mxu0 %v1401_v17  ;;  %v1442_v44 = vld [vmem:[%s1607_s28 + $0x1a0] ss:$8 sps:$4 sm:$0xff]   ;;  %v1445_v46 = vld [vmem:[%s1607_s28 + $0x1b4] ss:$8 sps:$4 sm:$0xff]   ;;  %v1448_v51 = vld [vmem:[%s1607_s28 + $0x1b0] ss:$8 sps:$4 sm:$0xff]  }
  0x28   : > { %980 = vmatprep.subr.bf16.mxu1 %v1403_v18  ;;  %v331_v47 = vld [vmem:[%s1602_s24] sm:$0xff]  ;;  %v332_v49 = vld [vmem:[%s1602_s24 + $0x8] sm:$0xff]  ;;  %v1455_v57 = vld [vmem:[%s1607_s28 + $0xd4] ss:$8 sps:$4 sm:$0xff]   ;;  %p1344_p7 = scmp.ne.s32.totalorder %s1541_s15, 2 }
  0x29   : > { %v1243_v48 = vcombine.high %v331_v47, %v331_v47  ;;  %v1245_v52 = vcombine.high %v332_v49, %v332_v49  ;;  %v1449_v53 = vld [vmem:[%s1607_s28 + $0xc4] ss:$8 sps:$4 sm:$0xff]   ;;  %v1453_v55 = vld [vmem:[%s1607_s28 + $0xc0] ss:$8 sps:$4 sm:$0xff]   ;;  %v1457_v58 = vld [vmem:[%s1607_s28 + $0x1d4] ss:$8 sps:$4 sm:$0xff]   ;;  %v1242_v6 = vcombine.low %v331_v47, %v331_v47  ;;  %v1244_v7 = vcombine.low %v332_v49, %v332_v49 }
  0x2a   : > { %940 = vmatpush1.bf16.msra.mxu0 %v1405_v19  ;;  %v1451_v54 = vld [vmem:[%s1607_s28 + $0x1c4] ss:$8 sps:$4 sm:$0xff]   ;;  %v1454_v56 = vld [vmem:[%s1607_s28 + $0x1c0] ss:$8 sps:$4 sm:$0xff]   ;;  %v1459_v59 = vld [vmem:[%s1607_s28 + $0xd0] ss:$8 sps:$4 sm:$0xff]  }
  0x2b   : > { %981 = vmatpush1.bf16.msra.mxu1 %v1406_v20  ;;  %941 = vmatprep.subr.bf16.mxu0 %v1407_v21  ;;  %v1460_v60 = vld [vmem:[%s1607_s28 + $0x1d0] ss:$8 sps:$4 sm:$0xff]   ;;  %v1461_v61 = vld [vmem:[%s1607_s28 + $0xe4] ss:$8 sps:$4 sm:$0xff]   ;;  %v1465_v63 = vld [vmem:[%s1607_s28 + $0xe0] ss:$8 sps:$4 sm:$0xff]  }
  0x2c   : > { %982 = vmatprep.subr.bf16.mxu1 %v1409_v22  ;;  %963 = vmatprep.mubr.bf16.mxu0 %v1243_v48  ;;  %v1463_v62 = vld [vmem:[%s1607_s28 + $0x1e4] ss:$8 sps:$4 sm:$0xff]   ;;  %v1466_v0 = vld [vmem:[%s1607_s28 + $0x1e0] ss:$8 sps:$4 sm:$0xff]   ;;  %v1467_v1 = vld [vmem:[%s1607_s28 + $0xf4] ss:$8 sps:$4 sm:$0xff]  }
  0x2d   : > { %1004 = vmatprep.mubr.bf16.mxu1 %v1245_v52  ;;  %v1469_v2 = vld [vmem:[%s1607_s28 + $0x1f4] ss:$8 sps:$4 sm:$0xff]   ;;  %v1471_v3 = vld [vmem:[%s1607_s28 + $0xf0] ss:$8 sps:$4 sm:$0xff]   ;;  %v1479_v5 = vld [vmem:[%s1607_s28 + $0x204] ss:$8 sps:$4 sm:$0xff]  }
  0x2e   : > { %942 = vmatpush1.bf16.msra.mxu0 %v1411_v23  ;;  %v1472_v4 = vld [vmem:[%s1607_s28 + $0x1f0] ss:$8 sps:$4 sm:$0xff]   ;;  %v1477_v8 = vld [vmem:[%s1607_s28 + $0x200] ss:$8 sps:$4 sm:$0xff]   ;;  %v1482_v10 = vld [vmem:[%s1607_s28 + $0x214] ss:$8 sps:$4 sm:$0xff]  }
  0x2f   : > { %983 = vmatpush1.bf16.msra.mxu1 %v1412_v24  ;;  %943 = vmatprep.subr.bf16.mxu0 %v1413_v25  ;;  %v1679_v9 = vld [vmem:[%s1602_s24 + $0x10] sm:$0xff]  ;;  %v1485_v13 = vld [vmem:[%s1607_s28 + $0x224] ss:$8 sps:$4 sm:$0xff]   ;;  %v1483_v14 = vld [vmem:[%s1607_s28 + $0x220] ss:$8 sps:$4 sm:$0xff]  }
  0x30   : > { %984 = vmatprep.subr.bf16.mxu1 %v1415_v26  ;;  %v1247_v11 = vcombine.high %v1679_v9, %v1679_v9  ;;  %v1480_v12 = vld [vmem:[%s1607_s28 + $0x210] ss:$8 sps:$4 sm:$0xff]   ;;  %v1488_v15 = vld [vmem:[%s1607_s28 + $0x234] ss:$8 sps:$4 sm:$0xff]   ;;  %v1491_v17 = vld [vmem:[%s1607_s28 + $0x244] ss:$8 sps:$4 sm:$0xff]  }
  0x31   : > { %v1486_v16 = vld [vmem:[%s1607_s28 + $0x230] ss:$8 sps:$4 sm:$0xff]   ;;  %v1489_v18 = vld [vmem:[%s1607_s28 + $0x240] ss:$8 sps:$4 sm:$0xff]   ;;  %v1494_v19 = vld [vmem:[%s1607_s28 + $0x254] ss:$8 sps:$4 sm:$0xff]  }
  0x32   : > { %944 = vmatpush1.bf16.msra.mxu0 %v1417_v27  ;;  %v1492_v20 = vld [vmem:[%s1607_s28 + $0x250] ss:$8 sps:$4 sm:$0xff]   ;;  %v1497_v21 = vld [vmem:[%s1607_s28 + $0x264] ss:$8 sps:$4 sm:$0xff]   ;;  %v1495_v22 = vld [vmem:[%s1607_s28 + $0x260] ss:$8 sps:$4 sm:$0xff]  }
  0x33   : > { %985 = vmatpush1.bf16.msra.mxu1 %v1418_v28  ;;  %945 = vmatprep.subr.bf16.mxu0 %v1419_v29  ;;  %v1500_v23 = vld [vmem:[%s1607_s28 + $0x274] ss:$8 sps:$4 sm:$0xff]   ;;  %v1498_v24 = vld [vmem:[%s1607_s28 + $0x270] ss:$8 sps:$4 sm:$0xff]   ;;  %v1503_v25 = vld [vmem:[%s1607_s28 + $0x284] ss:$8 sps:$4 sm:$0xff]  }
  0x34   : > { %986 = vmatprep.subr.bf16.mxu1 %v1421_v30  ;;  %v1501_v26 = vld [vmem:[%s1607_s28 + $0x280] ss:$8 sps:$4 sm:$0xff]   ;;  %v1506_v27 = vld [vmem:[%s1607_s28 + $0x294] ss:$8 sps:$4 sm:$0xff]   ;;  %v1504_v28 = vld [vmem:[%s1607_s28 + $0x290] ss:$8 sps:$4 sm:$0xff]  }
  0x35   : > { %v1509_v29 = vld [vmem:[%s1607_s28 + $0x2a4] ss:$8 sps:$4 sm:$0xff]   ;;  %v1507_v30 = vld [vmem:[%s1607_s28 + $0x2a0] ss:$8 sps:$4 sm:$0xff]  }
  0x36   : > { %946 = vmatpush1.bf16.msra.mxu0 %v1423_v31  ;;  %v1512_v31 = vld [vmem:[%s1607_s28 + $0x2b4] ss:$8 sps:$4 sm:$0xff]   ;;  %v329_v52 = vld [vmem:[#allocation2] sm:$0xff] }
  0x37   : > { %987 = vmatpush1.bf16.msra.mxu1 %v1424_v32  ;;  %947 = vmatprep.subr.bf16.mxu0 %v1425_v33  ;;  %v1510_v32 = vld [vmem:[%s1607_s28 + $0x2b0] ss:$8 sps:$4 sm:$0xff]   ;;  %v1515_v33 = vld [vmem:[%s1607_s28 + $0x2c4] ss:$8 sps:$4 sm:$0xff]  }
  0x38   : > { %988 = vmatprep.subr.bf16.mxu1 %v1427_v34  ;;  %v1513_v34 = vld [vmem:[%s1607_s28 + $0x2c0] ss:$8 sps:$4 sm:$0xff]  }
  0x3a   : > { %948 = vmatpush1.bf16.msra.mxu0 %v1429_v35  ;;  %v1518_v35 = vld [vmem:[%s1607_s28 + $0x2d4] ss:$8 sps:$4 sm:$0xff]  }
  0x3b   : > { %989 = vmatpush1.bf16.msra.mxu1 %v1430_v36  ;;  %949 = vmatprep.subr.bf16.mxu0 %v1431_v37  ;;  %v1516_v36 = vld [vmem:[%s1607_s28 + $0x2d0] ss:$8 sps:$4 sm:$0xff]   ;;  %v1521_v37 = vld [vmem:[%s1607_s28 + $0x2e4] ss:$8 sps:$4 sm:$0xff]  }
  0x3c   : > { %990 = vmatprep.subr.bf16.mxu1 %v1433_v38  ;;  %v1519_v38 = vld [vmem:[%s1607_s28 + $0x2e0] ss:$8 sps:$4 sm:$0xff]  }
  0x3e   : > { %950 = vmatpush1.bf16.msra.mxu0 %v1435_v39  ;;  %v1524_v39 = vld [vmem:[%s1607_s28 + $0x2f4] ss:$8 sps:$4 sm:$0xff]  }
  0x3f   : > { %991 = vmatpush1.bf16.msra.mxu1 %v1436_v40  ;;  %951 = vmatprep.subr.bf16.mxu0 %v1437_v41  ;;  %v1522_v40 = vld [vmem:[%s1607_s28 + $0x2f0] ss:$8 sps:$4 sm:$0xff]   ;;  %v1246_v41 = vcombine.low %v1679_v9, %v1679_v9 }
  0x40   : > { %992 = vmatprep.subr.bf16.mxu1 %v1439_v42 }
  0x42   : > { %952 = vmatpush1.bf16.msra.mxu0 %v1441_v43 }
  0x43   : > { %993 = vmatpush1.bf16.msra.mxu1 %v1442_v44  ;;  %953 = vmatprep.subr.bf16.mxu0 %v1443_v45 }
  0x44   : > { %994 = vmatprep.subr.bf16.mxu1 %v1445_v46 }
  0x46   : > { %954 = vmatpush1.bf16.msra.mxu0 %v1447_v50 }
  0x47   : > { %995 = vmatpush1.bf16.msra.mxu1 %v1448_v51  ;;  %955 = vmatprep.subr.bf16.mxu0 %v1449_v53 }
  0x48   : > { %996 = vmatprep.subr.bf16.mxu1 %v1451_v54 }
  0x4a   : > { %956 = vmatpush1.bf16.msra.mxu0 %v1453_v55  ;;  %v330_v55 = vld [vmem:[#allocation2 + $0x8] sm:$0xff] }
  0x4b   : > { %997 = vmatpush1.bf16.msra.mxu1 %v1454_v56  ;;  %957 = vmatprep.subr.bf16.mxu0 %v1455_v57 }
  0x4c   : > { %998 = vmatprep.subr.bf16.mxu1 %v1457_v58 }
  0x4e   : > { %958 = vmatpush1.bf16.msra.mxu0 %v1459_v59 }
  0x4f   : > { %999 = vmatpush1.bf16.msra.mxu1 %v1460_v60  ;;  %959 = vmatprep.subr.bf16.mxu0 %v1461_v61 }
  0x50   : > { %1000 = vmatprep.subr.bf16.mxu1 %v1463_v62  ;;  %v1066_v62 = vlaneseq (!%p1344_p7) }
  0x52   : > { %960 = vmatpush1.bf16.msra.mxu0 %v1465_v63  ;;  %v1067_v63 = vshrl.u32 (!%p1344_p7), %v1066_v62, 7 }
  0x53   : > { %1001 = vmatpush1.bf16.msra.mxu1 %v1466_v0  ;;  %961 = vmatprep.subr.bf16.mxu0 %v1467_v1  ;;  %v1064_v0 = vld [vmem:[%s1736_s2] sm:$0x3] (!%p1344_p7) }
  0x54   : > { %1002 = vmatprep.subr.bf16.mxu1 %v1469_v2  ;;  %v1078_v1 = vld [vmem:[%s1737_s3] sm:$0x3] (!%p1344_p7)  ;;  %v1068_v2 = vsub.s32 (!%p1344_p7), 0, %v1067_v63 }
  0x56   : > { %962 = vmatpush1.bf16.msra.mxu0 %v1471_v3  ;;  %v1072_v3 = vsub.s32 (!%p1344_p7), 1, %v1067_v63 }
  0x57   : > { %1003 = vmatpush1.bf16.msra.mxu1 %v1472_v4  ;;  %1013 = vmatprep.subr.bf16.mxu0 %v1479_v5 }
  0x58   : > { %v1087_v9 = vrot.slane (!%p1344_p7), %v1078_v1, %v1072_v3 }
  0x59   : > { %964 = vmatmul.mubr.bf16.vlgmr.msra.gmra.mrb[0].mxu0 %v1242_v6  ;;  %v1069_v6 = vrot.slane (!%p1344_p7), %v1064_v0, %v1068_v2 }
  0x5a   : > { %1005 = vmatmul.mubr.bf16.vlgmr.msra.gmra.mrb[0].mxu1 %v1244_v7  ;;  %1014 = vmatpush1.bf16.msra.mxu0 %v1477_v8  ;;  %v1073_v7 = vrot.slane (!%p1344_p7), %v1064_v0, %v1072_v3  ;;  %v1083_v8 = vrot.slane (!%p1344_p7), %v1078_v1, %v1068_v2 }
  0x5b   : > { %1045 = vmatprep.mubr.bf16.mxu0 %v1247_v11  ;;  %1015 = vmatprep.subr.bf16.mxu0 %v1482_v10 }
  0x5e   : > { %1016 = vmatpush1.bf16.msra.mxu0 %v1480_v12 }
  0x5f   : > { %1017 = vmatprep.subr.bf16.mxu0 %v1485_v13 }
  0x62   : > { %1018 = vmatpush1.bf16.msra.mxu0 %v1483_v14 }
  0x63   : > { %1019 = vmatprep.subr.bf16.mxu0 %v1488_v15 }
  0x66   : > { %1020 = vmatpush1.bf16.msra.mxu0 %v1486_v16 }
  0x67   : > { %1021 = vmatprep.subr.bf16.mxu0 %v1491_v17 }
  0x6a   : > { %1022 = vmatpush1.bf16.msra.mxu0 %v1489_v18 }
  0x6b   : > { %1023 = vmatprep.subr.bf16.mxu0 %v1494_v19 }
  0x6e   : > { %1024 = vmatpush1.bf16.msra.mxu0 %v1492_v20 }
  0x6f   : > { %1025 = vmatprep.subr.bf16.mxu0 %v1497_v21 }
  0x72   : > { %1026 = vmatpush1.bf16.msra.mxu0 %v1495_v22 }
  0x73   : > { %1027 = vmatprep.subr.bf16.mxu0 %v1500_v23 }
  0x76   : > { %1028 = vmatpush1.bf16.msra.mxu0 %v1498_v24 }
  0x77   : > { %1029 = vmatprep.subr.bf16.mxu0 %v1503_v25 }
  0x7a   : > { %1030 = vmatpush1.bf16.msra.mxu0 %v1501_v26 }
  0x7b   : > { %1031 = vmatprep.subr.bf16.mxu0 %v1506_v27 }
  0x7e   : > { %1032 = vmatpush1.bf16.msra.mxu0 %v1504_v28 }
  0x7f   : > { %1033 = vmatprep.subr.bf16.mxu0 %v1509_v29 }
  0x82   : > { %1034 = vmatpush1.bf16.msra.mxu0 %v1507_v30 }
  0x83   : > { %1035 = vmatprep.subr.bf16.mxu0 %v1512_v31 }
  0x86   : > { %1036 = vmatpush1.bf16.msra.mxu0 %v1510_v32 }
  0x87   : > { %1037 = vmatprep.subr.bf16.mxu0 %v1515_v33 }
  0x8a   : > { %1038 = vmatpush1.bf16.msra.mxu0 %v1513_v34 }
  0x8b   : > { %1039 = vmatprep.subr.bf16.mxu0 %v1518_v35 }
  0x8e   : > { %1040 = vmatpush1.bf16.msra.mxu0 %v1516_v36 }
  0x8f   : > { %1041 = vmatprep.subr.bf16.mxu0 %v1521_v37 }
  0x92   : > { %1042 = vmatpush1.bf16.msra.mxu0 %v1519_v38 }
  0x93   : > { %1043 = vmatprep.subr.bf16.mxu0 %v1524_v39 }
  0x96   : > { %1044 = vmatpush1.bf16.msra.mxu0 %v1522_v40 }
  0x99   : > { %1046 = vmatmul.mubr.bf16.vlgmr.msra.gmra.mrb[4].mxu0 %v1246_v41 }
 0x12c   : > { %v965_v42 = vpop.f32.mrb[0].mxu0 }
 0x12d   : > { %v1006_v43 = vpop.f32.mrb[0].mxu1  ;;  %v967_v45 = vpop.f32.mrb[1].mxu0 }
 0x12e   : > { %v1007_v44 = vadd.f32 %v1006_v43, %v965_v42  ;;  %v1008_v46 = vpop.f32.mrb[1].mxu1  ;;  %v969_v48 = vpop.f32.mrb[2].mxu0 }
 0x12f   : > { %v1009_v47 = vadd.f32 %v1008_v46, %v967_v45  ;;  %v1010_v49 = vpop.f32.mrb[2].mxu1  ;;  %v970_v50 = vpop.f32.mrb[3].mxu0 }
 0x130   : > { %v1011_v51 = vpop.f32.mrb[3].mxu1 }
 0x16c   : > { %v1047_v53 = vpop.f32.mrb[4].mxu0  ;;  %1061 = sbr.rel (%p1344_p7) target bundleno = 387 (0x183), region = 44 }
 0x16d   : > { %v1048_v54 = vadd.f32 %v1047_v53, %v1007_v44  ;;  %v1049_v56 = vpop.f32.mrb[5].mxu0 }
 0x16e   : > { %v1050_v57 = vadd.f32 %v1049_v56, %v1009_v47  ;;  %v1051_v58 = vpop.f32.mrb[6].mxu0 }
 0x16f   : > { %v1054_v59 = vadd.f32 %v1048_v54, %v329_v52  ;;  %v1052_v60 = vpop.f32.mrb[7].mxu0 }
 0x170   : > { %v1055_v61 = vadd.f32 %v1050_v57, %v330_v55 }
 0x171   : > { %1056 = vst [vmem:[#allocation2] sm:$0xff] %v1054_v59 }
 0x172   : > { %1057 = vst [vmem:[#allocation2 + $0x8] sm:$0xff] %v1055_v61 }
 0x178   : > { %v1062_v4 = vld [vmem:[#allocation2] sm:$0xff] }
 0x179   : > { %v1063_v5 = vld [vmem:[#allocation2 + $0x8] sm:$0xff]  ;;  %v1076_v10 = vmul.f32 %v1069_v6, %v1062_v4 }
 0x17a   : > { %v1077_v11 = vmul.f32 %v1073_v7, %v1063_v5 }
 0x17b   : > { %v1090_v12 = vadd.f32 %v1083_v8, %v1076_v10 }
 0x17c   : > { %v1091_v13 = vadd.f32 %v1087_v9, %v1077_v11 }
 0x17d   : > { %v1092_v14 = vmax.f32 %v1090_v12, 0.0 }
 0x17e   : > { %v1093_v15 = vmax.f32 %v1091_v13, 0.0 }
 0x180   : > { %v1351_v16 = vpack.c.bf16 %v1093_v15, %v1092_v14 }
 0x182   : > { %1102 = vst [vmem:[%s1738_s4] sm:$0xff] %v1351_v16 }
 0x183 PF: > { %s14_s17 = sadd.s32 1, %s1549_s17   ;;  %s1739_s15 = smov %s1545_s16 }
 0x184   : > { %p11_p8 = scmp.ge.s32.totalorder %s14_s17, 5   ;;  %s1740_s16 = smov %s1742_s18 }
 0x186   :  { %13 = sbr.rel (!%p11_p8) target bundleno = 2 (0x2), region = 83 }

// kernel: res18_feature_forward.40
= control target key start
LH: loop header
LB: loop body
LE: loop exit
PB: predicated region body
PF: predicated region fallthrough
CT: control target
= control target key end

     0   :  { %s2049_s15 = smov 0   ;;  %s2051_s16 = smov 0   ;;  %s2472_s0 = inlined_call_operand.vmem [shape: bf16[8,2304], index: 0, kind: input, shape index: {}]   ;;  %s2473_s1 = inlined_call_operand.vmem [shape: bf16[2304,512], index: 1, kind: input, shape index: {}]   ;;  %s2474_s2 = inlined_call_operand.vmem [shape: f32[1,512], index: 2, kind: input, shape index: {}]   ;;  %s2475_s3 = inlined_call_operand.vmem [shape: f32[1,512], index: 3, kind: input, shape index: {}]   ;;  %s2476_s4 = inlined_call_operand.vmem [shape: bf16[8,512], index: 4, kind: output, shape index: {}]  }
   0x1   :  { %s2053_s17 = smov 0   ;;  %s2055_s18 = smov 0  }
   0x2   :  { %s2057_s19 = smov 0   ;;  %s2059_s20 = smov 0  }
   0x3   :  { %s2061_s21 = smov 0  }
   0x4 LB: > { %s26_s22 = sadd.s32 1, %s2013_s19  ;;  %s33_s23 = sadd.s32 1, %s2017_s20  ;;  %s2021_s21 = sphi %s2061_s21, %s14_s21   ;;  %s2017_s20 = sphi %s2059_s20, %s2482_s20   ;;  %s2013_s19 = sphi %s2057_s19, %s2481_s19   ;;  %s2009_s18 = sphi %s2055_s18, %s2480_s18   ;;  %s2005_s17 = sphi %s2053_s17, %s2479_s17   ;;  %s2001_s16 = sphi %s2051_s16, %s2478_s16   ;;  %s1997_s15 = sphi %s2049_s15, %s2477_s15  }
   0x5   : > { %p27_p0 = scmp.ge.s32.totalorder %s26_s22, 3  ;;  %p77_p1 = scmp.ne.s32.totalorder %s2001_s16, %s1997_s15 }
   0x6   : > { %p78_p2 = scmp.eq.s32.totalorder %s2021_s21, 0  ;;  %s70_s27 = sadd.s32 1, %s2001_s16 }
   0x7   : > { %s2484_s22 = smov (%p27_p0, %s26_s22), 0  ;;  %s2486_s23 = smov (!%p27_p0, %s33_s23), %s2017_s20 }
   0x8   : > { %p79_p3 = por %p78_p2, %p77_p1  ;;  %p35_p4 = scmp.ge.s32.totalorder %s2486_s23, 2 }
   0x9   : > { %s65_s24 = ssub.s32 %s2013_s19, %s2484_s22  ;;  %p1639_p6 = scmp.ge.s32.totalorder %s2021_s21, 6 }
   0xa   : > { %s2488_s23 = smov (%p35_p4, %s2486_s23), 0 }
   0xb   : > { %s66_s25 = ssub.s32 %s2017_s20, %s2488_s23  ;;  %183 = sbr.rel (%p1639_p6) target bundleno = 74 (0x4a), region = 16 }
   0xc   : > { %s67_s26 = sor.u32 %s66_s25, %s65_s24 }
   0xd   : > { %p68_p5 = scmp.eq.s32.totalorder %s67_s26, 0 }
   0xf   : > { %s2100_s28 = scalar_select %p68_p5, %s2001_s16, %s70_s27  }
  0x12   : > { %199 = sbr.rel (!%p79_p3) target bundleno = 74 (0x4a), region = 24  ;;  %s201_s29 = sand.u32 (%p79_p3), 1, %s2001_s16  }
  0x13   : > { %s1758_s30 = smul.u32 (%p79_p3), 768, %s201_s29  ;;  %s1640_s5 = sshll.u32 (%p79_p3), %s2017_s20, 1 }
  0x14   : > { %s1756_s6 = smul.u32 (%p79_p3), 384, %s2013_s19 }
  0x15   : > { %s2114_s12 = scalar_lea.vmem (%p79_p3), [#allocation3], %s1758_s30 }
  0x16   : > { %s207_s7 = sadd.s32 (%p79_p3), %s1756_s6, %s1640_s5 }
  0x17   : > { %s1642_s8 = sshll.u32 (%p79_p3), %s207_s7, 2 }
  0x18   : > { %s2109_s11 = scalar_lea.vmem (%p79_p3), %s2473_s1, %s1642_s8 }
  0x19   : > { %v427_v0 = vld [vmem:[%s2109_s11] sm:$0xff]  ;;  %v429_v1 = vld [vmem:[%s2109_s11 + $0x10] sm:$0xff] }
  0x1a   : > { %v431_v2 = vld [vmem:[%s2109_s11 + $0x20] sm:$0xff]  ;;  %428 = vst [vmem:[%s2114_s12] sm:$0xff] %v427_v0  ;;  %430 = vst [vmem:[%s2114_s12 + $0x8] sm:$0xff] %v429_v1  ;;  %v433_v3 = vld [vmem:[%s2109_s11 + $0x30] sm:$0xff] }
  0x1b   : > { %432 = vst [vmem:[%s2114_s12 + $0x10] sm:$0xff] %v431_v2  ;;  %v435_v4 = vld [vmem:[%s2109_s11 + $0x40] sm:$0xff]  ;;  %v437_v5 = vld [vmem:[%s2109_s11 + $0x50] sm:$0xff]  ;;  %434 = vst [vmem:[%s2114_s12 + $0x18] sm:$0xff] %v433_v3 }
  0x1c   : > { %436 = vst [vmem:[%s2114_s12 + $0x20] sm:$0xff] %v435_v4  ;;  %438 = vst [vmem:[%s2114_s12 + $0x28] sm:$0xff] %v437_v5  ;;  %v439_v6 = vld [vmem:[%s2109_s11 + $0x60] sm:$0xff]  ;;  %v441_v7 = vld [vmem:[%s2109_s11 + $0x70] sm:$0xff] }
  0x1d   : > { %v443_v8 = vld [vmem:[%s2109_s11 + $0x80] sm:$0xff]  ;;  %440 = vst [vmem:[%s2114_s12 + $0x30] sm:$0xff] %v439_v6  ;;  %442 = vst [vmem:[%s2114_s12 + $0x38] sm:$0xff] %v441_v7  ;;  %v445_v9 = vld [vmem:[%s2109_s11 + $0x90] sm:$0xff] }
  0x1e   : > { %444 = vst [vmem:[%s2114_s12 + $0x40] sm:$0xff] %v443_v8  ;;  %v447_v10 = vld [vmem:[%s2109_s11 + $0xa0] sm:$0xff]  ;;  %v449_v11 = vld [vmem:[%s2109_s11 + $0xb0] sm:$0xff]  ;;  %446 = vst [vmem:[%s2114_s12 + $0x48] sm:$0xff] %v445_v9 }
  0x1f   : > { %448 = vst [vmem:[%s2114_s12 + $0x50] sm:$0xff] %v447_v10  ;;  %450 = vst [vmem:[%s2114_s12 + $0x58] sm:$0xff] %v449_v11  ;;  %v451_v12 = vld [vmem:[%s2109_s11 + $0xc0] sm:$0xff]  ;;  %v453_v13 = vld [vmem:[%s2109_s11 + $0xd0] sm:$0xff] }
  0x20   : > { %v455_v14 = vld [vmem:[%s2109_s11 + $0xe0] sm:$0xff]  ;;  %452 = vst [vmem:[%s2114_s12 + $0x60] sm:$0xff] %v451_v12  ;;  %454 = vst [vmem:[%s2114_s12 + $0x68] sm:$0xff] %v453_v13  ;;  %v457_v15 = vld [vmem:[%s2109_s11 + $0xf0] sm:$0xff] }
  0x21   : > { %456 = vst [vmem:[%s2114_s12 + $0x70] sm:$0xff] %v455_v14  ;;  %v459_v16 = vld [vmem:[%s2109_s11 + $0x100] sm:$0xff]  ;;  %v461_v17 = vld [vmem:[%s2109_s11 + $0x110] sm:$0xff]  ;;  %458 = vst [vmem:[%s2114_s12 + $0x78] sm:$0xff] %v457_v15 }
  0x22   : > { %460 = vst [vmem:[%s2114_s12 + $0x80] sm:$0xff] %v459_v16  ;;  %462 = vst [vmem:[%s2114_s12 + $0x88] sm:$0xff] %v461_v17  ;;  %v463_v18 = vld [vmem:[%s2109_s11 + $0x120] sm:$0xff]  ;;  %v465_v19 = vld [vmem:[%s2109_s11 + $0x130] sm:$0xff] }
  0x23   : > { %v467_v20 = vld [vmem:[%s2109_s11 + $0x140] sm:$0xff]  ;;  %464 = vst [vmem:[%s2114_s12 + $0x90] sm:$0xff] %v463_v18  ;;  %466 = vst [vmem:[%s2114_s12 + $0x98] sm:$0xff] %v465_v19  ;;  %v469_v21 = vld [vmem:[%s2109_s11 + $0x150] sm:$0xff] }
  0x24   : > { %468 = vst [vmem:[%s2114_s12 + $0xa0] sm:$0xff] %v467_v20  ;;  %v471_v22 = vld [vmem:[%s2109_s11 + $0x160] sm:$0xff]  ;;  %v473_v23 = vld [vmem:[%s2109_s11 + $0x170] sm:$0xff]  ;;  %470 = vst [vmem:[%s2114_s12 + $0xa8] sm:$0xff] %v469_v21 }
  0x25   : > { %472 = vst [vmem:[%s2114_s12 + $0xb0] sm:$0xff] %v471_v22  ;;  %474 = vst [vmem:[%s2114_s12 + $0xb8] sm:$0xff] %v473_v23  ;;  %v475_v24 = vld [vmem:[%s2109_s11 + $0x180] sm:$0xff]  ;;  %v477_v25 = vld [vmem:[%s2109_s11 + $0x190] sm:$0xff] }
  0x26   : > { %v479_v26 = vld [vmem:[%s2109_s11 + $0x1a0] sm:$0xff]  ;;  %476 = vst [vmem:[%s2114_s12 + $0xc0] sm:$0xff] %v475_v24  ;;  %478 = vst [vmem:[%s2114_s12 + $0xc8] sm:$0xff] %v477_v25  ;;  %v481_v27 = vld [vmem:[%s2109_s11 + $0x1b0] sm:$0xff] }
  0x27   : > { %480 = vst [vmem:[%s2114_s12 + $0xd0] sm:$0xff] %v479_v26  ;;  %v483_v28 = vld [vmem:[%s2109_s11 + $0x1c0] sm:$0xff]  ;;  %v485_v29 = vld [vmem:[%s2109_s11 + $0x1d0] sm:$0xff]  ;;  %482 = vst [vmem:[%s2114_s12 + $0xd8] sm:$0xff] %v481_v27 }
  0x28   : > { %484 = vst [vmem:[%s2114_s12 + $0xe0] sm:$0xff] %v483_v28  ;;  %486 = vst [vmem:[%s2114_s12 + $0xe8] sm:$0xff] %v485_v29  ;;  %v487_v30 = vld [vmem:[%s2109_s11 + $0x1e0] sm:$0xff]  ;;  %v489_v31 = vld [vmem:[%s2109_s11 + $0x1f0] sm:$0xff] }
  0x29   : > { %v491_v32 = vld [vmem:[%s2109_s11 + $0x200] sm:$0xff]  ;;  %488 = vst [vmem:[%s2114_s12 + $0xf0] sm:$0xff] %v487_v30  ;;  %490 = vst [vmem:[%s2114_s12 + $0xf8] sm:$0xff] %v489_v31  ;;  %v493_v33 = vld [vmem:[%s2109_s11 + $0x210] sm:$0xff] }
  0x2a   : > { %492 = vst [vmem:[%s2114_s12 + $0x100] sm:$0xff] %v491_v32  ;;  %v495_v34 = vld [vmem:[%s2109_s11 + $0x220] sm:$0xff]  ;;  %v497_v35 = vld [vmem:[%s2109_s11 + $0x230] sm:$0xff]  ;;  %494 = vst [vmem:[%s2114_s12 + $0x108] sm:$0xff] %v493_v33 }
  0x2b   : > { %496 = vst [vmem:[%s2114_s12 + $0x110] sm:$0xff] %v495_v34  ;;  %498 = vst [vmem:[%s2114_s12 + $0x118] sm:$0xff] %v497_v35  ;;  %v499_v36 = vld [vmem:[%s2109_s11 + $0x240] sm:$0xff]  ;;  %v501_v37 = vld [vmem:[%s2109_s11 + $0x250] sm:$0xff] }
  0x2c   : > { %v503_v38 = vld [vmem:[%s2109_s11 + $0x260] sm:$0xff]  ;;  %500 = vst [vmem:[%s2114_s12 + $0x120] sm:$0xff] %v499_v36  ;;  %502 = vst [vmem:[%s2114_s12 + $0x128] sm:$0xff] %v501_v37  ;;  %v505_v39 = vld [vmem:[%s2109_s11 + $0x270] sm:$0xff] }
  0x2d   : > { %504 = vst [vmem:[%s2114_s12 + $0x130] sm:$0xff] %v503_v38  ;;  %v507_v40 = vld [vmem:[%s2109_s11 + $0x280] sm:$0xff]  ;;  %v509_v41 = vld [vmem:[%s2109_s11 + $0x290] sm:$0xff]  ;;  %506 = vst [vmem:[%s2114_s12 + $0x138] sm:$0xff] %v505_v39 }
  0x2e   : > { %508 = vst [vmem:[%s2114_s12 + $0x140] sm:$0xff] %v507_v40  ;;  %510 = vst [vmem:[%s2114_s12 + $0x148] sm:$0xff] %v509_v41  ;;  %v511_v42 = vld [vmem:[%s2109_s11 + $0x2a0] sm:$0xff]  ;;  %v513_v43 = vld [vmem:[%s2109_s11 + $0x2b0] sm:$0xff] }
  0x2f   : > { %v515_v44 = vld [vmem:[%s2109_s11 + $0x2c0] sm:$0xff]  ;;  %512 = vst [vmem:[%s2114_s12 + $0x150] sm:$0xff] %v511_v42  ;;  %514 = vst [vmem:[%s2114_s12 + $0x158] sm:$0xff] %v513_v43  ;;  %v517_v45 = vld [vmem:[%s2109_s11 + $0x2d0] sm:$0xff] }
  0x30   : > { %516 = vst [vmem:[%s2114_s12 + $0x160] sm:$0xff] %v515_v44  ;;  %v519_v46 = vld [vmem:[%s2109_s11 + $0x2e0] sm:$0xff]  ;;  %v521_v47 = vld [vmem:[%s2109_s11 + $0x2f0] sm:$0xff]  ;;  %518 = vst [vmem:[%s2114_s12 + $0x168] sm:$0xff] %v517_v45 }
  0x31   : > { %520 = vst [vmem:[%s2114_s12 + $0x170] sm:$0xff] %v519_v46  ;;  %522 = vst [vmem:[%s2114_s12 + $0x178] sm:$0xff] %v521_v47  ;;  %v523_v48 = vld [vmem:[%s2109_s11 + $0x300] sm:$0xff]  ;;  %v525_v49 = vld [vmem:[%s2109_s11 + $0x310] sm:$0xff] }
  0x32   : > { %v527_v50 = vld [vmem:[%s2109_s11 + $0x320] sm:$0xff]  ;;  %524 = vst [vmem:[%s2114_s12 + $0x180] sm:$0xff] %v523_v48  ;;  %526 = vst [vmem:[%s2114_s12 + $0x188] sm:$0xff] %v525_v49  ;;  %v529_v51 = vld [vmem:[%s2109_s11 + $0x330] sm:$0xff] }
  0x33   : > { %528 = vst [vmem:[%s2114_s12 + $0x190] sm:$0xff] %v527_v50  ;;  %v531_v52 = vld [vmem:[%s2109_s11 + $0x340] sm:$0xff]  ;;  %v533_v53 = vld [vmem:[%s2109_s11 + $0x350] sm:$0xff]  ;;  %530 = vst [vmem:[%s2114_s12 + $0x198] sm:$0xff] %v529_v51 }
  0x34   : > { %532 = vst [vmem:[%s2114_s12 + $0x1a0] sm:$0xff] %v531_v52  ;;  %534 = vst [vmem:[%s2114_s12 + $0x1a8] sm:$0xff] %v533_v53  ;;  %v535_v54 = vld [vmem:[%s2109_s11 + $0x360] sm:$0xff]  ;;  %v537_v55 = vld [vmem:[%s2109_s11 + $0x370] sm:$0xff] }
  0x35   : > { %v539_v56 = vld [vmem:[%s2109_s11 + $0x380] sm:$0xff]  ;;  %536 = vst [vmem:[%s2114_s12 + $0x1b0] sm:$0xff] %v535_v54  ;;  %538 = vst [vmem:[%s2114_s12 + $0x1b8] sm:$0xff] %v537_v55  ;;  %v541_v57 = vld [vmem:[%s2109_s11 + $0x390] sm:$0xff] }
  0x36   : > { %540 = vst [vmem:[%s2114_s12 + $0x1c0] sm:$0xff] %v539_v56  ;;  %v543_v58 = vld [vmem:[%s2109_s11 + $0x3a0] sm:$0xff]  ;;  %v545_v59 = vld [vmem:[%s2109_s11 + $0x3b0] sm:$0xff]  ;;  %542 = vst [vmem:[%s2114_s12 + $0x1c8] sm:$0xff] %v541_v57 }
  0x37   : > { %544 = vst [vmem:[%s2114_s12 + $0x1d0] sm:$0xff] %v543_v58  ;;  %546 = vst [vmem:[%s2114_s12 + $0x1d8] sm:$0xff] %v545_v59  ;;  %v547_v60 = vld [vmem:[%s2109_s11 + $0x3c0] sm:$0xff]  ;;  %v549_v61 = vld [vmem:[%s2109_s11 + $0x3d0] sm:$0xff] }
  0x38   : > { %v551_v62 = vld [vmem:[%s2109_s11 + $0x3e0] sm:$0xff]  ;;  %548 = vst [vmem:[%s2114_s12 + $0x1e0] sm:$0xff] %v547_v60  ;;  %550 = vst [vmem:[%s2114_s12 + $0x1e8] sm:$0xff] %v549_v61  ;;  %v553_v63 = vld [vmem:[%s2109_s11 + $0x3f0] sm:$0xff] }
  0x39   : > { %552 = vst [vmem:[%s2114_s12 + $0x1f0] sm:$0xff] %v551_v62  ;;  %v555_v0 = vld [vmem:[%s2109_s11 + $0x400] sm:$0xff]  ;;  %v557_v1 = vld [vmem:[%s2109_s11 + $0x410] sm:$0xff]  ;;  %554 = vst [vmem:[%s2114_s12 + $0x1f8] sm:$0xff] %v553_v63 }
  0x3a   : > { %556 = vst [vmem:[%s2114_s12 + $0x200] sm:$0xff] %v555_v0  ;;  %558 = vst [vmem:[%s2114_s12 + $0x208] sm:$0xff] %v557_v1  ;;  %v559_v2 = vld [vmem:[%s2109_s11 + $0x420] sm:$0xff]  ;;  %v561_v3 = vld [vmem:[%s2109_s11 + $0x430] sm:$0xff] }
  0x3b   : > { %v563_v4 = vld [vmem:[%s2109_s11 + $0x440] sm:$0xff]  ;;  %560 = vst [vmem:[%s2114_s12 + $0x210] sm:$0xff] %v559_v2  ;;  %562 = vst [vmem:[%s2114_s12 + $0x218] sm:$0xff] %v561_v3  ;;  %v565_v5 = vld [vmem:[%s2109_s11 + $0x450] sm:$0xff] }
  0x3c   : > { %564 = vst [vmem:[%s2114_s12 + $0x220] sm:$0xff] %v563_v4  ;;  %v567_v6 = vld [vmem:[%s2109_s11 + $0x460] sm:$0xff]  ;;  %v569_v7 = vld [vmem:[%s2109_s11 + $0x470] sm:$0xff]  ;;  %566 = vst [vmem:[%s2114_s12 + $0x228] sm:$0xff] %v565_v5 }
  0x3d   : > { %568 = vst [vmem:[%s2114_s12 + $0x230] sm:$0xff] %v567_v6  ;;  %570 = vst [vmem:[%s2114_s12 + $0x238] sm:$0xff] %v569_v7  ;;  %v571_v8 = vld [vmem:[%s2109_s11 + $0x480] sm:$0xff]  ;;  %v573_v9 = vld [vmem:[%s2109_s11 + $0x490] sm:$0xff] }
  0x3e   : > { %v575_v10 = vld [vmem:[%s2109_s11 + $0x4a0] sm:$0xff]  ;;  %572 = vst [vmem:[%s2114_s12 + $0x240] sm:$0xff] %v571_v8  ;;  %574 = vst [vmem:[%s2114_s12 + $0x248] sm:$0xff] %v573_v9  ;;  %v577_v11 = vld [vmem:[%s2109_s11 + $0x4b0] sm:$0xff] }
  0x3f   : > { %576 = vst [vmem:[%s2114_s12 + $0x250] sm:$0xff] %v575_v10  ;;  %v579_v12 = vld [vmem:[%s2109_s11 + $0x4c0] sm:$0xff]  ;;  %v581_v13 = vld [vmem:[%s2109_s11 + $0x4d0] sm:$0xff]  ;;  %578 = vst [vmem:[%s2114_s12 + $0x258] sm:$0xff] %v577_v11 }
  0x40   : > { %580 = vst [vmem:[%s2114_s12 + $0x260] sm:$0xff] %v579_v12  ;;  %582 = vst [vmem:[%s2114_s12 + $0x268] sm:$0xff] %v581_v13  ;;  %v583_v14 = vld [vmem:[%s2109_s11 + $0x4e0] sm:$0xff]  ;;  %v585_v15 = vld [vmem:[%s2109_s11 + $0x4f0] sm:$0xff] }
  0x41   : > { %v587_v16 = vld [vmem:[%s2109_s11 + $0x500] sm:$0xff]  ;;  %584 = vst [vmem:[%s2114_s12 + $0x270] sm:$0xff] %v583_v14  ;;  %586 = vst [vmem:[%s2114_s12 + $0x278] sm:$0xff] %v585_v15  ;;  %v589_v17 = vld [vmem:[%s2109_s11 + $0x510] sm:$0xff] }
  0x42   : > { %588 = vst [vmem:[%s2114_s12 + $0x280] sm:$0xff] %v587_v16  ;;  %v591_v18 = vld [vmem:[%s2109_s11 + $0x520] sm:$0xff]  ;;  %v593_v19 = vld [vmem:[%s2109_s11 + $0x530] sm:$0xff]  ;;  %590 = vst [vmem:[%s2114_s12 + $0x288] sm:$0xff] %v589_v17 }
  0x43   : > { %592 = vst [vmem:[%s2114_s12 + $0x290] sm:$0xff] %v591_v18  ;;  %594 = vst [vmem:[%s2114_s12 + $0x298] sm:$0xff] %v593_v19  ;;  %v595_v20 = vld [vmem:[%s2109_s11 + $0x540] sm:$0xff]  ;;  %v597_v21 = vld [vmem:[%s2109_s11 + $0x550] sm:$0xff] }
  0x44   : > { %v599_v22 = vld [vmem:[%s2109_s11 + $0x560] sm:$0xff]  ;;  %596 = vst [vmem:[%s2114_s12 + $0x2a0] sm:$0xff] %v595_v20  ;;  %598 = vst [vmem:[%s2114_s12 + $0x2a8] sm:$0xff] %v597_v21  ;;  %v601_v23 = vld [vmem:[%s2109_s11 + $0x570] sm:$0xff] }
  0x45   : > { %600 = vst [vmem:[%s2114_s12 + $0x2b0] sm:$0xff] %v599_v22  ;;  %v603_v24 = vld [vmem:[%s2109_s11 + $0x580] sm:$0xff]  ;;  %v605_v25 = vld [vmem:[%s2109_s11 + $0x590] sm:$0xff]  ;;  %602 = vst [vmem:[%s2114_s12 + $0x2b8] sm:$0xff] %v601_v23 }
  0x46   : > { %604 = vst [vmem:[%s2114_s12 + $0x2c0] sm:$0xff] %v603_v24  ;;  %606 = vst [vmem:[%s2114_s12 + $0x2c8] sm:$0xff] %v605_v25  ;;  %v607_v26 = vld [vmem:[%s2109_s11 + $0x5a0] sm:$0xff]  ;;  %v609_v27 = vld [vmem:[%s2109_s11 + $0x5b0] sm:$0xff] }
  0x47   : > { %v611_v28 = vld [vmem:[%s2109_s11 + $0x5c0] sm:$0xff]  ;;  %608 = vst [vmem:[%s2114_s12 + $0x2d0] sm:$0xff] %v607_v26  ;;  %610 = vst [vmem:[%s2114_s12 + $0x2d8] sm:$0xff] %v609_v27  ;;  %v613_v29 = vld [vmem:[%s2109_s11 + $0x5d0] sm:$0xff] }
  0x48   : > { %612 = vst [vmem:[%s2114_s12 + $0x2e0] sm:$0xff] %v611_v28  ;;  %v615_v30 = vld [vmem:[%s2109_s11 + $0x5e0] sm:$0xff]  ;;  %v617_v31 = vld [vmem:[%s2109_s11 + $0x5f0] sm:$0xff]  ;;  %614 = vst [vmem:[%s2114_s12 + $0x2e8] sm:$0xff] %v613_v29 }
  0x49   : > { %616 = vst [vmem:[%s2114_s12 + $0x2f0] sm:$0xff] %v615_v30  ;;  %618 = vst [vmem:[%s2114_s12 + $0x2f8] sm:$0xff] %v617_v31 }
  0x4a PF: > { %p1643_p7 = scmp.ge.s32.totalorder %s2021_s21, 1  ;;  %p639_p8 = scmp.lt.s32.totalorder %s2021_s21, 7 }
  0x4c   : > { %p640_p9 = pnand %p1643_p7, %p639_p8 }
  0x4d   : > { %s646_s13 = sand.u32 (!%p640_p9), 1, %s1997_s15   ;;  %s692_s14 = smul.u32 (!%p640_p9), 6, %s2005_s17 }
  0x4e   : > { %643 = sbr.rel (%p640_p9) target bundleno = 458 (0x1ca), region = 70  ;;  %s1645_s25 = sshll.u32 (!%p640_p9), %s2009_s18, 1 }
  0x4f   : > { %s1759_s24 = smul.u32 (!%p640_p9), 768, %s646_s13  ;;  %p695_p10 = scmp.lt.s32.totalorder (!%p640_p9), %s692_s14, 17 }
  0x50   : > { %p705_p11 = scmp.lt.s32.totalorder (!%p640_p9), %s1645_s25, 3  ;;  %p1649_p12 = scmp.ne.s32.totalorder (!%p640_p9), %s2005_s17, 0 }
  0x51   : > { %s2331_s13 = scalar_lea.vmem (!%p640_p9), [#allocation3], %s1759_s24 }
  0x55   : > { %s2490_s14 = smov (!%p695_p10, %s692_s14), 17  ;;  %s2492_s25 = smov (!%p705_p11, %s1645_s25), 3 }
  0x56   : > { %s1644_s26 = sshll.u32 %s2490_s14, 2  ;;  %s707_s15 = scalar_lea.vmem %s2474_s2, %s2492_s25  ;;  %v2023_v32 = vmov (!%p1649_p12), 0.0  }
  0x57   : > { %s2315_s30 = scalar_lea.vmem %s2472_s0, %s1644_s26  ;;  %s712_s8 = scalar_lea.vmem %s2475_s3, %s2492_s25  ;;  %728 = vst [vmem:[#allocation2] sm:$0xff] (!%p1649_p12), %v2023_v32  ;;  %729 = vst [vmem:[#allocation2 + $0x8] sm:$0xff] (!%p1649_p12), %v2023_v32 }
  0x58   : > { %s1648_s9 = sshll.u32 %s2492_s25, 2  ;;  %727 = sbr.rel (%p1649_p12) target bundleno = 95 (0x5f), region = 78 }
  0x59   : > { %s2329_s12 = scalar_lea.vmem %s2476_s4, %s1648_s9 }
  0x5f PF: > { %v1817_v33 = vld [vmem:[%s2331_s13 + $0x4] ss:$8 sps:$4 sm:$0xff]   ;;  %v1821_v35 = vld [vmem:[%s2331_s13] ss:$8 sps:$4 sm:$0xff]   ;;  %v1823_v37 = vld [vmem:[%s2331_s13 + $0x14] ss:$8 sps:$4 sm:$0xff]  }
  0x60   : > { %v1819_v34 = vld [vmem:[%s2331_s13 + $0x104] ss:$8 sps:$4 sm:$0xff]   ;;  %1332 = vmatprep.subr.bf16.mxu0 %v1817_v33  ;;  %v1822_v36 = vld [vmem:[%s2331_s13 + $0x100] ss:$8 sps:$4 sm:$0xff]   ;;  %v1825_v38 = vld [vmem:[%s2331_s13 + $0x114] ss:$8 sps:$4 sm:$0xff]  }
  0x61   : > { %1373 = vmatprep.subr.bf16.mxu1 %v1819_v34  ;;  %1333 = vmatpush1.bf16.msra.mxu0 %v1821_v35  ;;  %v1827_v39 = vld [vmem:[%s2331_s13 + $0x10] ss:$8 sps:$4 sm:$0xff]   ;;  %v1829_v41 = vld [vmem:[%s2331_s13 + $0x24] ss:$8 sps:$4 sm:$0xff]   ;;  %v1833_v43 = vld [vmem:[%s2331_s13 + $0x20] ss:$8 sps:$4 sm:$0xff]  }
  0x62   : > { %1374 = vmatpush1.bf16.msra.mxu1 %v1822_v36  ;;  %1334 = vmatprep.subr.bf16.mxu0 %v1823_v37  ;;  %v1828_v40 = vld [vmem:[%s2331_s13 + $0x110] ss:$8 sps:$4 sm:$0xff]   ;;  %v1831_v42 = vld [vmem:[%s2331_s13 + $0x124] ss:$8 sps:$4 sm:$0xff]   ;;  %v1834_v44 = vld [vmem:[%s2331_s13 + $0x120] ss:$8 sps:$4 sm:$0xff]  }
  0x63   : > { %1375 = vmatprep.subr.bf16.mxu1 %v1825_v38  ;;  %v1835_v45 = vld [vmem:[%s2331_s13 + $0x34] ss:$8 sps:$4 sm:$0xff]   ;;  %v1839_v47 = vld [vmem:[%s2331_s13 + $0x30] ss:$8 sps:$4 sm:$0xff]   ;;  %v1841_v49 = vld [vmem:[%s2331_s13 + $0x44] ss:$8 sps:$4 sm:$0xff]  }
  0x64   : > { %v1837_v46 = vld [vmem:[%s2331_s13 + $0x134] ss:$8 sps:$4 sm:$0xff]   ;;  %v1840_v48 = vld [vmem:[%s2331_s13 + $0x130] ss:$8 sps:$4 sm:$0xff]   ;;  %v1843_v50 = vld [vmem:[%s2331_s13 + $0x144] ss:$8 sps:$4 sm:$0xff]  }
  0x65   : > { %1335 = vmatpush1.bf16.msra.mxu0 %v1827_v39  ;;  %v1845_v51 = vld [vmem:[%s2331_s13 + $0x40] ss:$8 sps:$4 sm:$0xff]   ;;  %v1847_v53 = vld [vmem:[%s2331_s13 + $0x54] ss:$8 sps:$4 sm:$0xff]   ;;  %v1851_v55 = vld [vmem:[%s2331_s13 + $0x50] ss:$8 sps:$4 sm:$0xff]  }
  0x66   : > { %1376 = vmatpush1.bf16.msra.mxu1 %v1828_v40  ;;  %1336 = vmatprep.subr.bf16.mxu0 %v1829_v41  ;;  %v1846_v52 = vld [vmem:[%s2331_s13 + $0x140] ss:$8 sps:$4 sm:$0xff]   ;;  %v1849_v54 = vld [vmem:[%s2331_s13 + $0x154] ss:$8 sps:$4 sm:$0xff]   ;;  %v1852_v56 = vld [vmem:[%s2331_s13 + $0x150] ss:$8 sps:$4 sm:$0xff]  }
  0x67   : > { %1377 = vmatprep.subr.bf16.mxu1 %v1831_v42  ;;  %v1853_v57 = vld [vmem:[%s2331_s13 + $0x64] ss:$8 sps:$4 sm:$0xff]   ;;  %v1857_v59 = vld [vmem:[%s2331_s13 + $0x60] ss:$8 sps:$4 sm:$0xff]   ;;  %v1859_v61 = vld [vmem:[%s2331_s13 + $0x74] ss:$8 sps:$4 sm:$0xff]  }
  0x68   : > { %v1855_v58 = vld [vmem:[%s2331_s13 + $0x164] ss:$8 sps:$4 sm:$0xff]   ;;  %v1858_v60 = vld [vmem:[%s2331_s13 + $0x160] ss:$8 sps:$4 sm:$0xff]   ;;  %v1861_v62 = vld [vmem:[%s2331_s13 + $0x174] ss:$8 sps:$4 sm:$0xff]  }
  0x69   : > { %1337 = vmatpush1.bf16.msra.mxu0 %v1833_v43  ;;  %v1863_v63 = vld [vmem:[%s2331_s13 + $0x70] ss:$8 sps:$4 sm:$0xff]   ;;  %v1865_v1 = vld [vmem:[%s2331_s13 + $0x84] ss:$8 sps:$4 sm:$0xff]   ;;  %v1869_v3 = vld [vmem:[%s2331_s13 + $0x80] ss:$8 sps:$4 sm:$0xff]  }
  0x6a   : > { %1378 = vmatpush1.bf16.msra.mxu1 %v1834_v44  ;;  %1338 = vmatprep.subr.bf16.mxu0 %v1835_v45  ;;  %v1864_v0 = vld [vmem:[%s2331_s13 + $0x170] ss:$8 sps:$4 sm:$0xff]   ;;  %v1867_v2 = vld [vmem:[%s2331_s13 + $0x184] ss:$8 sps:$4 sm:$0xff]   ;;  %v1870_v4 = vld [vmem:[%s2331_s13 + $0x180] ss:$8 sps:$4 sm:$0xff]  }
  0x6b   : > { %1379 = vmatprep.subr.bf16.mxu1 %v1837_v46  ;;  %v1871_v5 = vld [vmem:[%s2331_s13 + $0x94] ss:$8 sps:$4 sm:$0xff]   ;;  %v1875_v7 = vld [vmem:[%s2331_s13 + $0x90] ss:$8 sps:$4 sm:$0xff]   ;;  %v1877_v9 = vld [vmem:[%s2331_s13 + $0xa4] ss:$8 sps:$4 sm:$0xff]  }
  0x6c   : > { %v1873_v6 = vld [vmem:[%s2331_s13 + $0x194] ss:$8 sps:$4 sm:$0xff]   ;;  %v1876_v8 = vld [vmem:[%s2331_s13 + $0x190] ss:$8 sps:$4 sm:$0xff]   ;;  %v1879_v10 = vld [vmem:[%s2331_s13 + $0x1a4] ss:$8 sps:$4 sm:$0xff]  }
  0x6d   : > { %1339 = vmatpush1.bf16.msra.mxu0 %v1839_v47  ;;  %v1881_v11 = vld [vmem:[%s2331_s13 + $0xa0] ss:$8 sps:$4 sm:$0xff]   ;;  %v1883_v13 = vld [vmem:[%s2331_s13 + $0xb4] ss:$8 sps:$4 sm:$0xff]   ;;  %v1887_v18 = vld [vmem:[%s2331_s13 + $0xb0] ss:$8 sps:$4 sm:$0xff]  }
  0x6e   : > { %1380 = vmatpush1.bf16.msra.mxu1 %v1840_v48  ;;  %1340 = vmatprep.subr.bf16.mxu0 %v1841_v49  ;;  %v1882_v12 = vld [vmem:[%s2331_s13 + $0x1a0] ss:$8 sps:$4 sm:$0xff]   ;;  %v1885_v14 = vld [vmem:[%s2331_s13 + $0x1b4] ss:$8 sps:$4 sm:$0xff]   ;;  %v1888_v19 = vld [vmem:[%s2331_s13 + $0x1b0] ss:$8 sps:$4 sm:$0xff]  }
  0x6f   : > { %1381 = vmatprep.subr.bf16.mxu1 %v1843_v50  ;;  %v732_v15 = vld [vmem:[%s2315_s30] sm:$0xff]  ;;  %v733_v17 = vld [vmem:[%s2315_s30 + $0x8] sm:$0xff]  ;;  %v1889_v21 = vld [vmem:[%s2331_s13 + $0xc4] ss:$8 sps:$4 sm:$0xff]   ;;  %p1752_p13 = scmp.ne.s32.totalorder %s2005_s17, 2 }
  0x70   : > { %v1651_v16 = vcombine.high %v732_v15, %v732_v15  ;;  %v1653_v20 = vcombine.high %v733_v17, %v733_v17  ;;  %v1891_v22 = vld [vmem:[%s2331_s13 + $0x1c4] ss:$8 sps:$4 sm:$0xff]   ;;  %v1893_v23 = vld [vmem:[%s2331_s13 + $0xc0] ss:$8 sps:$4 sm:$0xff]   ;;  %v1895_v25 = vld [vmem:[%s2331_s13 + $0xd4] ss:$8 sps:$4 sm:$0xff]   ;;  %v1650_v38 = vcombine.low %v732_v15, %v732_v15  ;;  %v1652_v39 = vcombine.low %v733_v17, %v733_v17 }
  0x71   : > { %1341 = vmatpush1.bf16.msra.mxu0 %v1845_v51  ;;  %v1894_v24 = vld [vmem:[%s2331_s13 + $0x1c0] ss:$8 sps:$4 sm:$0xff]   ;;  %v1897_v26 = vld [vmem:[%s2331_s13 + $0x1d4] ss:$8 sps:$4 sm:$0xff]   ;;  %v1899_v27 = vld [vmem:[%s2331_s13 + $0xd0] ss:$8 sps:$4 sm:$0xff]  }
  0x72   : > { %1382 = vmatpush1.bf16.msra.mxu1 %v1846_v52  ;;  %1342 = vmatprep.subr.bf16.mxu0 %v1847_v53  ;;  %v1900_v28 = vld [vmem:[%s2331_s13 + $0x1d0] ss:$8 sps:$4 sm:$0xff]   ;;  %v1901_v29 = vld [vmem:[%s2331_s13 + $0xe4] ss:$8 sps:$4 sm:$0xff]   ;;  %v1905_v31 = vld [vmem:[%s2331_s13 + $0xe0] ss:$8 sps:$4 sm:$0xff]  }
  0x73   : > { %1383 = vmatprep.subr.bf16.mxu1 %v1849_v54  ;;  %1364 = vmatprep.mubr.bf16.mxu0 %v1651_v16  ;;  %v1903_v30 = vld [vmem:[%s2331_s13 + $0x1e4] ss:$8 sps:$4 sm:$0xff]   ;;  %v1906_v32 = vld [vmem:[%s2331_s13 + $0x1e0] ss:$8 sps:$4 sm:$0xff]   ;;  %v1907_v33 = vld [vmem:[%s2331_s13 + $0xf4] ss:$8 sps:$4 sm:$0xff]  }
  0x74   : > { %1405 = vmatprep.mubr.bf16.mxu1 %v1653_v20  ;;  %v1909_v34 = vld [vmem:[%s2331_s13 + $0x1f4] ss:$8 sps:$4 sm:$0xff]   ;;  %v1911_v35 = vld [vmem:[%s2331_s13 + $0xf0] ss:$8 sps:$4 sm:$0xff]   ;;  %v1919_v37 = vld [vmem:[%s2331_s13 + $0x204] ss:$8 sps:$4 sm:$0xff]  }
  0x75   : > { %1343 = vmatpush1.bf16.msra.mxu0 %v1851_v55  ;;  %v1912_v36 = vld [vmem:[%s2331_s13 + $0x1f0] ss:$8 sps:$4 sm:$0xff]   ;;  %v1917_v40 = vld [vmem:[%s2331_s13 + $0x200] ss:$8 sps:$4 sm:$0xff]   ;;  %v1922_v42 = vld [vmem:[%s2331_s13 + $0x214] ss:$8 sps:$4 sm:$0xff]  }
  0x76   : > { %1384 = vmatpush1.bf16.msra.mxu1 %v1852_v56  ;;  %1344 = vmatprep.subr.bf16.mxu0 %v1853_v57  ;;  %v2403_v41 = vld [vmem:[%s2315_s30 + $0x10] sm:$0xff]  ;;  %v1920_v44 = vld [vmem:[%s2331_s13 + $0x210] ss:$8 sps:$4 sm:$0xff]   ;;  %v1928_v47 = vld [vmem:[%s2331_s13 + $0x234] ss:$8 sps:$4 sm:$0xff]  }
  0x77   : > { %1385 = vmatprep.subr.bf16.mxu1 %v1855_v58  ;;  %v1655_v43 = vcombine.high %v2403_v41, %v2403_v41  ;;  %v1925_v45 = vld [vmem:[%s2331_s13 + $0x224] ss:$8 sps:$4 sm:$0xff]   ;;  %v1923_v46 = vld [vmem:[%s2331_s13 + $0x220] ss:$8 sps:$4 sm:$0xff]   ;;  %v1926_v48 = vld [vmem:[%s2331_s13 + $0x230] ss:$8 sps:$4 sm:$0xff]  }
  0x78   : > { %v1931_v49 = vld [vmem:[%s2331_s13 + $0x244] ss:$8 sps:$4 sm:$0xff]   ;;  %v1929_v50 = vld [vmem:[%s2331_s13 + $0x240] ss:$8 sps:$4 sm:$0xff]   ;;  %v1934_v51 = vld [vmem:[%s2331_s13 + $0x254] ss:$8 sps:$4 sm:$0xff]  }
  0x79   : > { %1345 = vmatpush1.bf16.msra.mxu0 %v1857_v59  ;;  %v1932_v52 = vld [vmem:[%s2331_s13 + $0x250] ss:$8 sps:$4 sm:$0xff]   ;;  %v1937_v53 = vld [vmem:[%s2331_s13 + $0x264] ss:$8 sps:$4 sm:$0xff]   ;;  %v1935_v54 = vld [vmem:[%s2331_s13 + $0x260] ss:$8 sps:$4 sm:$0xff]  }
  0x7a   : > { %1386 = vmatpush1.bf16.msra.mxu1 %v1858_v60  ;;  %1346 = vmatprep.subr.bf16.mxu0 %v1859_v61  ;;  %v1940_v55 = vld [vmem:[%s2331_s13 + $0x274] ss:$8 sps:$4 sm:$0xff]   ;;  %v1938_v56 = vld [vmem:[%s2331_s13 + $0x270] ss:$8 sps:$4 sm:$0xff]   ;;  %v1943_v57 = vld [vmem:[%s2331_s13 + $0x284] ss:$8 sps:$4 sm:$0xff]  }
  0x7b   : > { %1387 = vmatprep.subr.bf16.mxu1 %v1861_v62  ;;  %v1941_v58 = vld [vmem:[%s2331_s13 + $0x280] ss:$8 sps:$4 sm:$0xff]   ;;  %v1946_v59 = vld [vmem:[%s2331_s13 + $0x294] ss:$8 sps:$4 sm:$0xff]   ;;  %v1944_v60 = vld [vmem:[%s2331_s13 + $0x290] ss:$8 sps:$4 sm:$0xff]  }
  0x7c   : > { %v1949_v61 = vld [vmem:[%s2331_s13 + $0x2a4] ss:$8 sps:$4 sm:$0xff]   ;;  %v1947_v62 = vld [vmem:[%s2331_s13 + $0x2a0] ss:$8 sps:$4 sm:$0xff]   ;;  %v730_v20 = vld [vmem:[#allocation2] sm:$0xff] }
  0x7d   : > { %1347 = vmatpush1.bf16.msra.mxu0 %v1863_v63  ;;  %v1952_v63 = vld [vmem:[%s2331_s13 + $0x2b4] ss:$8 sps:$4 sm:$0xff]  }
  0x7e   : > { %1388 = vmatpush1.bf16.msra.mxu1 %v1864_v0  ;;  %1348 = vmatprep.subr.bf16.mxu0 %v1865_v1  ;;  %v1950_v0 = vld [vmem:[%s2331_s13 + $0x2b0] ss:$8 sps:$4 sm:$0xff]   ;;  %v1955_v1 = vld [vmem:[%s2331_s13 + $0x2c4] ss:$8 sps:$4 sm:$0xff]  }
  0x7f   : > { %1389 = vmatprep.subr.bf16.mxu1 %v1867_v2  ;;  %v1953_v2 = vld [vmem:[%s2331_s13 + $0x2c0] ss:$8 sps:$4 sm:$0xff]  }
  0x81   : > { %1349 = vmatpush1.bf16.msra.mxu0 %v1869_v3  ;;  %v1958_v3 = vld [vmem:[%s2331_s13 + $0x2d4] ss:$8 sps:$4 sm:$0xff]  }
  0x82   : > { %1390 = vmatpush1.bf16.msra.mxu1 %v1870_v4  ;;  %1350 = vmatprep.subr.bf16.mxu0 %v1871_v5  ;;  %v1956_v4 = vld [vmem:[%s2331_s13 + $0x2d0] ss:$8 sps:$4 sm:$0xff]   ;;  %v1961_v5 = vld [vmem:[%s2331_s13 + $0x2e4] ss:$8 sps:$4 sm:$0xff]  }
  0x83   : > { %1391 = vmatprep.subr.bf16.mxu1 %v1873_v6  ;;  %v1959_v6 = vld [vmem:[%s2331_s13 + $0x2e0] ss:$8 sps:$4 sm:$0xff]  }
  0x85   : > { %1351 = vmatpush1.bf16.msra.mxu0 %v1875_v7  ;;  %v1964_v7 = vld [vmem:[%s2331_s13 + $0x2f4] ss:$8 sps:$4 sm:$0xff]  }
  0x86   : > { %1392 = vmatpush1.bf16.msra.mxu1 %v1876_v8  ;;  %1352 = vmatprep.subr.bf16.mxu0 %v1877_v9  ;;  %v1962_v8 = vld [vmem:[%s2331_s13 + $0x2f0] ss:$8 sps:$4 sm:$0xff]   ;;  %v1654_v9 = vcombine.low %v2403_v41, %v2403_v41 }
  0x87   : > { %1393 = vmatprep.subr.bf16.mxu1 %v1879_v10 }
  0x89   : > { %1353 = vmatpush1.bf16.msra.mxu0 %v1881_v11 }
  0x8a   : > { %1394 = vmatpush1.bf16.msra.mxu1 %v1882_v12  ;;  %1354 = vmatprep.subr.bf16.mxu0 %v1883_v13 }
  0x8b   : > { %1395 = vmatprep.subr.bf16.mxu1 %v1885_v14 }
  0x8d   : > { %1355 = vmatpush1.bf16.msra.mxu0 %v1887_v18 }
  0x8e   : > { %1396 = vmatpush1.bf16.msra.mxu1 %v1888_v19  ;;  %1356 = vmatprep.subr.bf16.mxu0 %v1889_v21 }
  0x8f   : > { %1397 = vmatprep.subr.bf16.mxu1 %v1891_v22 }
  0x91   : > { %1357 = vmatpush1.bf16.msra.mxu0 %v1893_v23  ;;  %v731_v23 = vld [vmem:[#allocation2 + $0x8] sm:$0xff] }
  0x92   : > { %1398 = vmatpush1.bf16.msra.mxu1 %v1894_v24  ;;  %1358 = vmatprep.subr.bf16.mxu0 %v1895_v25 }
  0x93   : > { %1399 = vmatprep.subr.bf16.mxu1 %v1897_v26 }
  0x95   : > { %1359 = vmatpush1.bf16.msra.mxu0 %v1899_v27 }
  0x96   : > { %1400 = vmatpush1.bf16.msra.mxu1 %v1900_v28  ;;  %1360 = vmatprep.subr.bf16.mxu0 %v1901_v29 }
  0x97   : > { %1401 = vmatprep.subr.bf16.mxu1 %v1903_v30  ;;  %v1467_v30 = vlaneseq (!%p1752_p13) }
  0x99   : > { %1361 = vmatpush1.bf16.msra.mxu0 %v1905_v31  ;;  %v1468_v31 = vshrl.u32 (!%p1752_p13), %v1467_v30, 7 }
  0x9a   : > { %1402 = vmatpush1.bf16.msra.mxu1 %v1906_v32  ;;  %1362 = vmatprep.subr.bf16.mxu0 %v1907_v33  ;;  %v1465_v32 = vld [vmem:[%s707_s15] sm:$0x3] (!%p1752_p13) }
  0x9b   : > { %1403 = vmatprep.subr.bf16.mxu1 %v1909_v34  ;;  %v1479_v33 = vld [vmem:[%s712_s8] sm:$0x3] (!%p1752_p13)  ;;  %v1469_v34 = vsub.s32 (!%p1752_p13), 0, %v1468_v31 }
  0x9d   : > { %1363 = vmatpush1.bf16.msra.mxu0 %v1911_v35  ;;  %v1473_v35 = vsub.s32 (!%p1752_p13), 1, %v1468_v31 }
  0x9e   : > { %1404 = vmatpush1.bf16.msra.mxu1 %v1912_v36  ;;  %1414 = vmatprep.subr.bf16.mxu0 %v1919_v37 }
  0x9f   : > { %v1488_v41 = vrot.slane (!%p1752_p13), %v1479_v33, %v1473_v35 }
  0xa0   : > { %1365 = vmatmul.mubr.bf16.vlgmr.msra.gmra.mrb[0].mxu0 %v1650_v38  ;;  %v1470_v38 = vrot.slane (!%p1752_p13), %v1465_v32, %v1469_v34 }
  0xa1   : > { %1406 = vmatmul.mubr.bf16.vlgmr.msra.gmra.mrb[0].mxu1 %v1652_v39  ;;  %1415 = vmatpush1.bf16.msra.mxu0 %v1917_v40  ;;  %v1474_v39 = vrot.slane (!%p1752_p13), %v1465_v32, %v1473_v35  ;;  %v1484_v40 = vrot.slane (!%p1752_p13), %v1479_v33, %v1469_v34 }
  0xa2   : > { %1446 = vmatprep.mubr.bf16.mxu0 %v1655_v43  ;;  %1416 = vmatprep.subr.bf16.mxu0 %v1922_v42 }
  0xa5   : > { %1417 = vmatpush1.bf16.msra.mxu0 %v1920_v44 }
  0xa6   : > { %1418 = vmatprep.subr.bf16.mxu0 %v1925_v45 }
  0xa9   : > { %1419 = vmatpush1.bf16.msra.mxu0 %v1923_v46 }
  0xaa   : > { %1420 = vmatprep.subr.bf16.mxu0 %v1928_v47 }
  0xad   : > { %1421 = vmatpush1.bf16.msra.mxu0 %v1926_v48 }
  0xae   : > { %1422 = vmatprep.subr.bf16.mxu0 %v1931_v49 }
  0xb1   : > { %1423 = vmatpush1.bf16.msra.mxu0 %v1929_v50 }
  0xb2   : > { %1424 = vmatprep.subr.bf16.mxu0 %v1934_v51 }
  0xb5   : > { %1425 = vmatpush1.bf16.msra.mxu0 %v1932_v52 }
  0xb6   : > { %1426 = vmatprep.subr.bf16.mxu0 %v1937_v53 }
  0xb9   : > { %1427 = vmatpush1.bf16.msra.mxu0 %v1935_v54 }
  0xba   : > { %1428 = vmatprep.subr.bf16.mxu0 %v1940_v55 }
  0xbd   : > { %1429 = vmatpush1.bf16.msra.mxu0 %v1938_v56 }
  0xbe   : > { %1430 = vmatprep.subr.bf16.mxu0 %v1943_v57 }
  0xc1   : > { %1431 = vmatpush1.bf16.msra.mxu0 %v1941_v58 }
  0xc2   : > { %1432 = vmatprep.subr.bf16.mxu0 %v1946_v59 }
  0xc5   : > { %1433 = vmatpush1.bf16.msra.mxu0 %v1944_v60 }
  0xc6   : > { %1434 = vmatprep.subr.bf16.mxu0 %v1949_v61 }
  0xc9   : > { %1435 = vmatpush1.bf16.msra.mxu0 %v1947_v62 }
  0xca   : > { %1436 = vmatprep.subr.bf16.mxu0 %v1952_v63 }
  0xcd   : > { %1437 = vmatpush1.bf16.msra.mxu0 %v1950_v0 }
  0xce   : > { %1438 = vmatprep.subr.bf16.mxu0 %v1955_v1 }
  0xd1   : > { %1439 = vmatpush1.bf16.msra.mxu0 %v1953_v2 }
  0xd2   : > { %1440 = vmatprep.subr.bf16.mxu0 %v1958_v3 }
  0xd5   : > { %1441 = vmatpush1.bf16.msra.mxu0 %v1956_v4 }
  0xd6   : > { %1442 = vmatprep.subr.bf16.mxu0 %v1961_v5 }
  0xd9   : > { %1443 = vmatpush1.bf16.msra.mxu0 %v1959_v6 }
  0xda   : > { %1444 = vmatprep.subr.bf16.mxu0 %v1964_v7 }
  0xdd   : > { %1445 = vmatpush1.bf16.msra.mxu0 %v1962_v8 }
  0xe0   : > { %1447 = vmatmul.mubr.bf16.vlgmr.msra.gmra.mrb[4].mxu0 %v1654_v9 }
 0x173   : > { %v1366_v10 = vpop.f32.mrb[0].mxu0 }
 0x174   : > { %v1407_v11 = vpop.f32.mrb[0].mxu1  ;;  %v1368_v13 = vpop.f32.mrb[1].mxu0 }
 0x175   : > { %v1408_v12 = vadd.f32 %v1407_v11, %v1366_v10  ;;  %v1409_v14 = vpop.f32.mrb[1].mxu1  ;;  %v1370_v16 = vpop.f32.mrb[2].mxu0 }
 0x176   : > { %v1410_v15 = vadd.f32 %v1409_v14, %v1368_v13  ;;  %v1411_v17 = vpop.f32.mrb[2].mxu1  ;;  %v1371_v18 = vpop.f32.mrb[3].mxu0 }
 0x177   : > { %v1412_v19 = vpop.f32.mrb[3].mxu1 }
 0x1b3   : > { %v1448_v21 = vpop.f32.mrb[4].mxu0  ;;  %1462 = sbr.rel (%p1752_p13) target bundleno = 458 (0x1ca), region = 82 }
 0x1b4   : > { %v1449_v22 = vadd.f32 %v1448_v21, %v1408_v12  ;;  %v1450_v24 = vpop.f32.mrb[5].mxu0 }
 0x1b5   : > { %v1451_v25 = vadd.f32 %v1450_v24, %v1410_v15  ;;  %v1452_v26 = vpop.f32.mrb[6].mxu0 }
 0x1b6   : > { %v1455_v27 = vadd.f32 %v1449_v22, %v730_v20  ;;  %v1453_v28 = vpop.f32.mrb[7].mxu0 }
 0x1b7   : > { %v1456_v29 = vadd.f32 %v1451_v25, %v731_v23 }
 0x1b8   : > { %1457 = vst [vmem:[#allocation2] sm:$0xff] %v1455_v27 }
 0x1b9   : > { %1458 = vst [vmem:[#allocation2 + $0x8] sm:$0xff] %v1456_v29 }
 0x1bf   : > { %v1463_v36 = vld [vmem:[#allocation2] sm:$0xff] }
 0x1c0   : > { %v1464_v37 = vld [vmem:[#allocation2 + $0x8] sm:$0xff]  ;;  %v1477_v42 = vmul.f32 %v1470_v38, %v1463_v36 }
 0x1c1   : > { %v1478_v43 = vmul.f32 %v1474_v39, %v1464_v37 }
 0x1c2   : > { %v1491_v44 = vadd.f32 %v1484_v40, %v1477_v42 }
 0x1c3   : > { %v1492_v45 = vadd.f32 %v1488_v41, %v1478_v43 }
 0x1c4   : > { %v1493_v46 = vmax.f32 %v1491_v44, 0.0 }
 0x1c5   : > { %v1494_v47 = vmax.f32 %v1492_v45, 0.0 }
 0x1c7   : > { %v1757_v48 = vpack.c.bf16 %v1494_v47, %v1493_v46 }
 0x1c9   : > { %1503 = vst [vmem:[%s2329_s12] sm:$0xff] %v1757_v48 }
 0x1ca PF: > { %s14_s21 = sadd.s32 1, %s2021_s21   ;;  %s2477_s15 = smov %s2001_s16 }
 0x1cb   : > { %p11_p0 = scmp.ge.s32.totalorder %s14_s21, 8   ;;  %s2478_s16 = smov %s2100_s28 }
 0x1cc   : > { %s2479_s17 = smov %s2013_s19  ;;  %s2480_s18 = smov %s2017_s20 }
 0x1cd   : > { %s2481_s19 = smov %s2484_s22  ;;  %s2482_s20 = smov %s2488_s23 }
 0x1ce   :  { %13 = sbr.rel (!%p11_p0) target bundleno = 4 (0x4), region = 126 }

// kernel: res18_feature_forward.39
= control target key start
LH: loop header
LB: loop body
LE: loop exit
PB: predicated region body
PF: predicated region fallthrough
CT: control target
= control target key end

     0   :  { %s1103_s15 = smov 0   ;;  %s1105_s16 = smov 0   ;;  %s1285_s0 = inlined_call_operand.vmem [shape: bf16[8,256], index: 0, kind: input, shape index: {}]   ;;  %s1286_s1 = inlined_call_operand.vmem [shape: bf16[256,512], index: 1, kind: input, shape index: {}]   ;;  %s1287_s2 = inlined_call_operand.vmem [shape: f32[1,512], index: 2, kind: input, shape index: {}]   ;;  %s1288_s3 = inlined_call_operand.vmem [shape: f32[1,512], index: 3, kind: input, shape index: {}]   ;;  %s1289_s4 = inlined_call_operand.vmem [shape: bf16[8,512], index: 4, kind: output, shape index: {}]  }
   0x1   :  { %s1107_s17 = smov 0   ;;  %s1109_s18 = smov 0  }
   0x2   :  { %s1111_s19 = smov 0  }
   0x3 LB: > { %s33_s20 = sadd.s32 1, %s1072_s18  ;;  %p77_p1 = scmp.ne.s32.totalorder %s1064_s16, %s1060_s15  ;;  %s1076_s19 = sphi %s1111_s19, %s14_s19   ;;  %s1072_s18 = sphi %s1109_s18, %s1293_s18   ;;  %s1068_s17 = sphi %s1107_s17, %s1292_s17   ;;  %s1064_s16 = sphi %s1105_s16, %s1291_s16   ;;  %s1060_s15 = sphi %s1103_s15, %s1290_s15  }
   0x4   : > { %p35_p0 = scmp.ge.s32.totalorder %s33_s20, 2  ;;  %p78_p2 = scmp.eq.s32.totalorder %s1076_s19, 0 }
   0x5   : > { %s70_s22 = sadd.s32 1, %s1064_s16  ;;  %p899_p5 = scmp.ge.s32.totalorder %s1076_s19, 2 }
   0x6   : > { %s1295_s20 = smov (%p35_p0, %s33_s20), 0  ;;  %p79_p3 = por %p78_p2, %p77_p1 }
   0x7   : > { %s66_s21 = ssub.s32 %s1072_s18, %s1295_s20  ;;  %196 = sbr.rel (%p899_p5) target bundleno = 34 (0x22), region = 20 }
   0x8   : > { %p68_p4 = scmp.eq.s32.totalorder %s66_s21, 0 }
   0xa   : > { %s1138_s23 = scalar_select %p68_p4, %s1064_s16, %s70_s22  }
   0xe   : > { %199 = sbr.rel (!%p79_p3) target bundleno = 34 (0x22), region = 24  ;;  %s201_s24 = sand.u32 (%p79_p3), 1, %s1064_s16  }
   0xf   : > { %s946_s25 = sshll.u32 (%p79_p3), %s1072_s18, 3  ;;  %s900_s26 = sshll.u32 (%p79_p3), %s201_s24, 8 }
  0x10   : > { %s1146_s29 = scalar_lea.vmem (%p79_p3), %s1286_s1, %s946_s25  ;;  %s1151_s30 = scalar_lea.vmem (%p79_p3), [#allocation3], %s900_s26 }
  0x11   : > { %v299_v0 = vld [vmem:[%s1146_s29] sm:$0xff] (%p79_p3)  ;;  %v301_v1 = vld [vmem:[%s1146_s29 + $0x10] sm:$0xff] (%p79_p3) }
  0x12   : > { %v303_v2 = vld [vmem:[%s1146_s29 + $0x20] sm:$0xff] (%p79_p3)  ;;  %300 = vst [vmem:[%s1151_s30] sm:$0xff] (%p79_p3), %v299_v0  ;;  %302 = vst [vmem:[%s1151_s30 + $0x8] sm:$0xff] (%p79_p3), %v301_v1  ;;  %v305_v3 = vld [vmem:[%s1146_s29 + $0x30] sm:$0xff] (%p79_p3) }
  0x13   : > { %304 = vst [vmem:[%s1151_s30 + $0x10] sm:$0xff] (%p79_p3), %v303_v2  ;;  %v307_v4 = vld [vmem:[%s1146_s29 + $0x40] sm:$0xff] (%p79_p3)  ;;  %v309_v5 = vld [vmem:[%s1146_s29 + $0x50] sm:$0xff] (%p79_p3)  ;;  %306 = vst [vmem:[%s1151_s30 + $0x18] sm:$0xff] (%p79_p3), %v305_v3 }
  0x14   : > { %308 = vst [vmem:[%s1151_s30 + $0x20] sm:$0xff] (%p79_p3), %v307_v4  ;;  %310 = vst [vmem:[%s1151_s30 + $0x28] sm:$0xff] (%p79_p3), %v309_v5  ;;  %v311_v6 = vld [vmem:[%s1146_s29 + $0x60] sm:$0xff] (%p79_p3)  ;;  %v313_v7 = vld [vmem:[%s1146_s29 + $0x70] sm:$0xff] (%p79_p3) }
  0x15   : > { %v315_v8 = vld [vmem:[%s1146_s29 + $0x80] sm:$0xff]  ;;  %312 = vst [vmem:[%s1151_s30 + $0x30] sm:$0xff] %v311_v6  ;;  %314 = vst [vmem:[%s1151_s30 + $0x38] sm:$0xff] %v313_v7  ;;  %v317_v9 = vld [vmem:[%s1146_s29 + $0x90] sm:$0xff] }
  0x16   : > { %316 = vst [vmem:[%s1151_s30 + $0x40] sm:$0xff] %v315_v8  ;;  %v319_v10 = vld [vmem:[%s1146_s29 + $0xa0] sm:$0xff]  ;;  %v321_v11 = vld [vmem:[%s1146_s29 + $0xb0] sm:$0xff]  ;;  %318 = vst [vmem:[%s1151_s30 + $0x48] sm:$0xff] %v317_v9 }
  0x17   : > { %320 = vst [vmem:[%s1151_s30 + $0x50] sm:$0xff] %v319_v10  ;;  %322 = vst [vmem:[%s1151_s30 + $0x58] sm:$0xff] %v321_v11  ;;  %v323_v12 = vld [vmem:[%s1146_s29 + $0xc0] sm:$0xff]  ;;  %v325_v13 = vld [vmem:[%s1146_s29 + $0xd0] sm:$0xff] }
  0x18   : > { %v327_v14 = vld [vmem:[%s1146_s29 + $0xe0] sm:$0xff]  ;;  %324 = vst [vmem:[%s1151_s30 + $0x60] sm:$0xff] %v323_v12  ;;  %326 = vst [vmem:[%s1151_s30 + $0x68] sm:$0xff] %v325_v13  ;;  %v329_v15 = vld [vmem:[%s1146_s29 + $0xf0] sm:$0xff] }
  0x19   : > { %328 = vst [vmem:[%s1151_s30 + $0x70] sm:$0xff] %v327_v14  ;;  %v331_v16 = vld [vmem:[%s1146_s29 + $0x100] sm:$0xff]  ;;  %v333_v17 = vld [vmem:[%s1146_s29 + $0x110] sm:$0xff]  ;;  %330 = vst [vmem:[%s1151_s30 + $0x78] sm:$0xff] %v329_v15 }
  0x1a   : > { %332 = vst [vmem:[%s1151_s30 + $0x80] sm:$0xff] %v331_v16  ;;  %334 = vst [vmem:[%s1151_s30 + $0x88] sm:$0xff] %v333_v17  ;;  %v335_v18 = vld [vmem:[%s1146_s29 + $0x120] sm:$0xff]  ;;  %v337_v19 = vld [vmem:[%s1146_s29 + $0x130] sm:$0xff] }
  0x1b   : > { %v339_v20 = vld [vmem:[%s1146_s29 + $0x140] sm:$0xff]  ;;  %336 = vst [vmem:[%s1151_s30 + $0x90] sm:$0xff] %v335_v18  ;;  %338 = vst [vmem:[%s1151_s30 + $0x98] sm:$0xff] %v337_v19  ;;  %v341_v21 = vld [vmem:[%s1146_s29 + $0x150] sm:$0xff] }
  0x1c   : > { %340 = vst [vmem:[%s1151_s30 + $0xa0] sm:$0xff] %v339_v20  ;;  %v343_v22 = vld [vmem:[%s1146_s29 + $0x160] sm:$0xff]  ;;  %v345_v23 = vld [vmem:[%s1146_s29 + $0x170] sm:$0xff]  ;;  %342 = vst [vmem:[%s1151_s30 + $0xa8] sm:$0xff] %v341_v21 }
  0x1d   : > { %344 = vst [vmem:[%s1151_s30 + $0xb0] sm:$0xff] %v343_v22  ;;  %346 = vst [vmem:[%s1151_s30 + $0xb8] sm:$0xff] %v345_v23  ;;  %v347_v24 = vld [vmem:[%s1146_s29 + $0x180] sm:$0xff]  ;;  %v349_v25 = vld [vmem:[%s1146_s29 + $0x190] sm:$0xff] }
  0x1e   : > { %v351_v26 = vld [vmem:[%s1146_s29 + $0x1a0] sm:$0xff]  ;;  %348 = vst [vmem:[%s1151_s30 + $0xc0] sm:$0xff] %v347_v24  ;;  %350 = vst [vmem:[%s1151_s30 + $0xc8] sm:$0xff] %v349_v25  ;;  %v353_v27 = vld [vmem:[%s1146_s29 + $0x1b0] sm:$0xff] }
  0x1f   : > { %352 = vst [vmem:[%s1151_s30 + $0xd0] sm:$0xff] %v351_v26  ;;  %v355_v28 = vld [vmem:[%s1146_s29 + $0x1c0] sm:$0xff]  ;;  %v357_v29 = vld [vmem:[%s1146_s29 + $0x1d0] sm:$0xff]  ;;  %354 = vst [vmem:[%s1151_s30 + $0xd8] sm:$0xff] %v353_v27 }
  0x20   : > { %356 = vst [vmem:[%s1151_s30 + $0xe0] sm:$0xff] %v355_v28  ;;  %358 = vst [vmem:[%s1151_s30 + $0xe8] sm:$0xff] %v357_v29  ;;  %v359_v30 = vld [vmem:[%s1146_s29 + $0x1e0] sm:$0xff]  ;;  %v361_v31 = vld [vmem:[%s1146_s29 + $0x1f0] sm:$0xff] }
  0x21   : > { %360 = vst [vmem:[%s1151_s30 + $0xf0] sm:$0xff] %v359_v30  ;;  %362 = vst [vmem:[%s1151_s30 + $0xf8] sm:$0xff] %v361_v31 }
  0x22 PF: > { %p903_p6 = scmp.ge.s32.totalorder %s1076_s19, 1  ;;  %p383_p7 = scmp.lt.s32.totalorder %s1076_s19, 3 }
  0x24   : > { %p384_p8 = pnand %p903_p6, %p383_p7 }
  0x25   : > { %s390_s5 = sand.u32 (!%p384_p8), 1, %s1060_s15   ;;  %v1220_v32 = vld [vmem:[%s1285_s0] sm:$0xff] (!%p384_p8)  ;;  %s905_s10 = sshll.u32 (!%p384_p8), %s1068_s17, 1  ;;  %v728_v3 = vlaneseq (!%p384_p8) }
  0x26   : > { %387 = sbr.rel (%p384_p8) target bundleno = 325 (0x145), region = 70  ;;  %s904_s8 = sshll.u32 (!%p384_p8), %s390_s5, 8  ;;  %v910_v33 = vcombine.high (!%p384_p8), %v1220_v32, %v1220_v32  ;;  %v909_v2 = vcombine.low (!%p384_p8), %v1220_v32, %v1220_v32 }
  0x27   : > { %s1224_s9 = scalar_lea.vmem (!%p384_p8), [#allocation3], %s904_s8  ;;  %p449_p9 = scmp.lt.s32.totalorder (!%p384_p8), %s905_s10, 3  ;;  %v729_v4 = vshrl.u32 (!%p384_p8), %v728_v3, 7 }
  0x28   : > { %v988_v34 = vld [vmem:[%s1224_s9 + $0x4] ss:$8 sps:$4 sm:$0xff] (!%p384_p8)   ;;  %708 = vmatprep.mubr.bf16.mxu0 (!%p384_p8), %v910_v33  ;;  %v990_v35 = vld [vmem:[%s1224_s9] ss:$8 sps:$4 sm:$0xff] (!%p384_p8)   ;;  %v991_v36 = vld [vmem:[%s1224_s9 + $0x14] ss:$8 sps:$4 sm:$0xff] (!%p384_p8)  }
  0x29   : > { %676 = vmatprep.subr.bf16.mxu0 (!%p384_p8), %v988_v34  ;;  %v993_v37 = vld [vmem:[%s1224_s9 + $0x10] ss:$8 sps:$4 sm:$0xff] (!%p384_p8)   ;;  %v994_v38 = vld [vmem:[%s1224_s9 + $0x24] ss:$8 sps:$4 sm:$0xff] (!%p384_p8)   ;;  %v996_v39 = vld [vmem:[%s1224_s9 + $0x20] ss:$8 sps:$4 sm:$0xff] (!%p384_p8)  }
  0x2a   : > { %677 = vmatpush1.bf16.msra.mxu0 (!%p384_p8), %v990_v35  ;;  %v997_v40 = vld [vmem:[%s1224_s9 + $0x34] ss:$8 sps:$4 sm:$0xff] (!%p384_p8)   ;;  %v999_v41 = vld [vmem:[%s1224_s9 + $0x30] ss:$8 sps:$4 sm:$0xff] (!%p384_p8)   ;;  %v1000_v42 = vld [vmem:[%s1224_s9 + $0x44] ss:$8 sps:$4 sm:$0xff] (!%p384_p8)  }
  0x2b   : > { %678 = vmatprep.subr.bf16.mxu0 (!%p384_p8), %v991_v36  ;;  %v1002_v43 = vld [vmem:[%s1224_s9 + $0x40] ss:$8 sps:$4 sm:$0xff] (!%p384_p8)   ;;  %v1003_v44 = vld [vmem:[%s1224_s9 + $0x54] ss:$8 sps:$4 sm:$0xff] (!%p384_p8)   ;;  %v1005_v45 = vld [vmem:[%s1224_s9 + $0x50] ss:$8 sps:$4 sm:$0xff] (!%p384_p8)  }
  0x2c   : > { %v1006_v46 = vld [vmem:[%s1224_s9 + $0x64] ss:$8 sps:$4 sm:$0xff] (!%p384_p8)   ;;  %v1008_v47 = vld [vmem:[%s1224_s9 + $0x60] ss:$8 sps:$4 sm:$0xff] (!%p384_p8)   ;;  %v1009_v48 = vld [vmem:[%s1224_s9 + $0x74] ss:$8 sps:$4 sm:$0xff] (!%p384_p8)  }
  0x2d   : > { %v1011_v49 = vld [vmem:[%s1224_s9 + $0x70] ss:$8 sps:$4 sm:$0xff]   ;;  %v1012_v50 = vld [vmem:[%s1224_s9 + $0x84] ss:$8 sps:$4 sm:$0xff]   ;;  %v1014_v51 = vld [vmem:[%s1224_s9 + $0x80] ss:$8 sps:$4 sm:$0xff]  }
  0x2e   : > { %679 = vmatpush1.bf16.msra.mxu0 %v993_v37  ;;  %v1015_v52 = vld [vmem:[%s1224_s9 + $0x94] ss:$8 sps:$4 sm:$0xff]   ;;  %v1017_v53 = vld [vmem:[%s1224_s9 + $0x90] ss:$8 sps:$4 sm:$0xff]   ;;  %v1018_v54 = vld [vmem:[%s1224_s9 + $0xa4] ss:$8 sps:$4 sm:$0xff]  }
  0x2f   : > { %680 = vmatprep.subr.bf16.mxu0 %v994_v38  ;;  %v1020_v55 = vld [vmem:[%s1224_s9 + $0xa0] ss:$8 sps:$4 sm:$0xff]   ;;  %v1021_v56 = vld [vmem:[%s1224_s9 + $0xb4] ss:$8 sps:$4 sm:$0xff]   ;;  %v1023_v57 = vld [vmem:[%s1224_s9 + $0xb0] ss:$8 sps:$4 sm:$0xff]  }
  0x30   : > { %v1024_v58 = vld [vmem:[%s1224_s9 + $0xc4] ss:$8 sps:$4 sm:$0xff]   ;;  %v1026_v59 = vld [vmem:[%s1224_s9 + $0xc0] ss:$8 sps:$4 sm:$0xff]   ;;  %v1027_v60 = vld [vmem:[%s1224_s9 + $0xd4] ss:$8 sps:$4 sm:$0xff]  }
  0x31   : > { %v1029_v61 = vld [vmem:[%s1224_s9 + $0xd0] ss:$8 sps:$4 sm:$0xff]   ;;  %v1030_v62 = vld [vmem:[%s1224_s9 + $0xe4] ss:$8 sps:$4 sm:$0xff]   ;;  %v1032_v63 = vld [vmem:[%s1224_s9 + $0xe0] ss:$8 sps:$4 sm:$0xff]  }
  0x32   : > { %681 = vmatpush1.bf16.msra.mxu0 %v996_v39  ;;  %v1033_v0 = vld [vmem:[%s1224_s9 + $0xf4] ss:$8 sps:$4 sm:$0xff]   ;;  %v1035_v1 = vld [vmem:[%s1224_s9 + $0xf0] ss:$8 sps:$4 sm:$0xff]   ;;  %s1297_s10 = smov (!%p449_p9, %s905_s10), 3  ;;  %v730_v5 = vsub.s32 0, %v729_v4 }
  0x33   : > { %682 = vmatprep.subr.bf16.mxu0 %v997_v40  ;;  %s451_s13 = scalar_lea.vmem %s1287_s2, %s1297_s10  ;;  %s456_s21 = scalar_lea.vmem %s1288_s3, %s1297_s10  ;;  %v734_v7 = vsub.s32 1, %v729_v4 }
  0x34   : > { %v726_v6 = vld [vmem:[%s451_s13] sm:$0x3]  ;;  %s908_s17 = sshll.u32 %s1297_s10, 2 }
  0x35   : > { %v740_v8 = vld [vmem:[%s456_s21] sm:$0x3]  ;;  %v731_v9 = vrot.slane %v726_v6, %v730_v5  ;;  %v735_v10 = vrot.slane %v726_v6, %v734_v7  ;;  %s466_s25 = scalar_lea.vmem %s1289_s4, %s908_s17 }
  0x36   : > { %683 = vmatpush1.bf16.msra.mxu0 %v999_v41  ;;  %v745_v11 = vrot.slane %v740_v8, %v730_v5  ;;  %v749_v13 = vrot.slane %v740_v8, %v734_v7 }
  0x37   : > { %684 = vmatprep.subr.bf16.mxu0 %v1000_v42 }
  0x3a   : > { %685 = vmatpush1.bf16.msra.mxu0 %v1002_v43 }
  0x3b   : > { %686 = vmatprep.subr.bf16.mxu0 %v1003_v44 }
  0x3e   : > { %687 = vmatpush1.bf16.msra.mxu0 %v1005_v45 }
  0x3f   : > { %688 = vmatprep.subr.bf16.mxu0 %v1006_v46 }
  0x42   : > { %689 = vmatpush1.bf16.msra.mxu0 %v1008_v47 }
  0x43   : > { %690 = vmatprep.subr.bf16.mxu0 %v1009_v48 }
  0x46   : > { %691 = vmatpush1.bf16.msra.mxu0 %v1011_v49 }
  0x47   : > { %692 = vmatprep.subr.bf16.mxu0 %v1012_v50 }
  0x4a   : > { %693 = vmatpush1.bf16.msra.mxu0 %v1014_v51 }
  0x4b   : > { %694 = vmatprep.subr.bf16.mxu0 %v1015_v52 }
  0x4e   : > { %695 = vmatpush1.bf16.msra.mxu0 %v1017_v53 }
  0x4f   : > { %696 = vmatprep.subr.bf16.mxu0 %v1018_v54 }
  0x52   : > { %697 = vmatpush1.bf16.msra.mxu0 %v1020_v55 }
  0x53   : > { %698 = vmatprep.subr.bf16.mxu0 %v1021_v56 }
  0x56   : > { %699 = vmatpush1.bf16.msra.mxu0 %v1023_v57 }
  0x57   : > { %700 = vmatprep.subr.bf16.mxu0 %v1024_v58 }
  0x5a   : > { %701 = vmatpush1.bf16.msra.mxu0 %v1026_v59 }
  0x5b   : > { %702 = vmatprep.subr.bf16.mxu0 %v1027_v60 }
  0x5e   : > { %703 = vmatpush1.bf16.msra.mxu0 %v1029_v61 }
  0x5f   : > { %704 = vmatprep.subr.bf16.mxu0 %v1030_v62 }
  0x62   : > { %705 = vmatpush1.bf16.msra.mxu0 %v1032_v63 }
  0x63   : > { %706 = vmatprep.subr.bf16.mxu0 %v1033_v0 }
  0x66   : > { %707 = vmatpush1.bf16.msra.mxu0 %v1035_v1 }
  0x69   : > { %709 = vmatmul.mubr.bf16.vlgmr.msra.gmra.mrb[0].mxu0 %v909_v2 }
 0x13c   : > { %v710_v12 = vpop.f32.mrb[0].mxu0 }
 0x13d   : > { %v738_v14 = vmul.f32 %v731_v9, %v710_v12  ;;  %v712_v15 = vpop.f32.mrb[1].mxu0 }
 0x13e   : > { %v739_v16 = vmul.f32 %v735_v10, %v712_v15  ;;  %v714_v17 = vpop.f32.mrb[2].mxu0 }
 0x13f   : > { %v752_v18 = vadd.f32 %v745_v11, %v738_v14  ;;  %v715_v19 = vpop.f32.mrb[3].mxu0 }
 0x140   : > { %v753_v20 = vadd.f32 %v749_v13, %v739_v16 }
 0x142   : > { %v947_v21 = vpack.c.bf16 %v753_v20, %v752_v18 }
 0x144   : > { %762 = vst [vmem:[%s466_s25] sm:$0xff] %v947_v21 }
 0x145 PF: > { %s14_s19 = sadd.s32 1, %s1076_s19   ;;  %s1290_s15 = smov %s1064_s16 }
 0x146   : > { %p11_p10 = scmp.ge.s32.totalorder %s14_s19, 4   ;;  %s1291_s16 = smov %s1138_s23 }
 0x147   : > { %s1292_s17 = smov %s1072_s18  ;;  %s1293_s18 = smov %s1295_s20 }
 0x148   :  { %13 = sbr.rel (!%p11_p10) target bundleno = 3 (0x3), region = 126 }

// kernel: res18_feature_forward.41
= control target key start
LH: loop header
LB: loop body
LE: loop exit
PB: predicated region body
PF: predicated region fallthrough
CT: control target
= control target key end

     0   :  { %s2571_s0 = inlined_call_operand.vmem [shape: bf16[8,4608], index: 0, kind: input, shape index: {}]   ;;  %s2572_s1 = inlined_call_operand.vmem [shape: bf16[4608,512], index: 1, kind: input, shape index: {}]   ;;  %s2573_s2 = inlined_call_operand.vmem [shape: f32[1,512], index: 2, kind: input, shape index: {}]   ;;  %s2574_s3 = inlined_call_operand.vmem [shape: f32[1,512], index: 3, kind: input, shape index: {}]   ;;  %s2575_s4 = inlined_call_operand.vmem [shape: bf16[8,512], index: 4, kind: input, shape index: {}]   ;;  %s2576_s5 = inlined_call_operand.vmem [shape: bf16[8,512], index: 5, kind: output, shape index: {}]  }
   0x1   :  { %2577 = sst [smem:[#allocation4_spill]] %s2572_s1 }
   0x2   :  { %s2142_s18 = smov 0   ;;  %s2144_s19 = smov 0  }
   0x3   :  { %s2146_s20 = smov 0   ;;  %s2148_s21 = smov 0  }
   0x4   :  { %s2150_s22 = smov 0   ;;  %s2152_s23 = smov 0  }
   0x5   :  { %s2154_s24 = smov 0  }
   0x6 LB: > { %s27_s25 = sadd.s32 1, %s2101_s22  ;;  %s34_s26 = sadd.s32 1, %s2105_s23  ;;  %s2109_s24 = sphi %s2154_s24, %s15_s24   ;;  %s2105_s23 = sphi %s2152_s23, %s2584_s23   ;;  %s2101_s22 = sphi %s2150_s22, %s2583_s22   ;;  %s2097_s21 = sphi %s2148_s21, %s2582_s21   ;;  %s2093_s20 = sphi %s2146_s20, %s2581_s20   ;;  %s2089_s19 = sphi %s2144_s19, %s2580_s19   ;;  %s2085_s18 = sphi %s2142_s18, %s2579_s18  }
   0x7   : > { %p28_p0 = scmp.ge.s32.totalorder %s27_s25, 6  ;;  %p78_p1 = scmp.ne.s32.totalorder %s2089_s19, %s2085_s18 }
   0x8   : > { %p79_p2 = scmp.eq.s32.totalorder %s2109_s24, 0  ;;  %s71_s30 = sadd.s32 1, %s2089_s19 }
   0x9   : > { %s2586_s25 = smov (%p28_p0, %s27_s25), 0  ;;  %s2588_s26 = smov (!%p28_p0, %s34_s26), %s2105_s23 }
   0xa   : > { %p80_p3 = por %p79_p2, %p78_p1  ;;  %p36_p4 = scmp.ge.s32.totalorder %s2588_s26, 2 }
   0xb   : > { %s66_s27 = ssub.s32 %s2101_s22, %s2586_s25  ;;  %p1725_p6 = scmp.ge.s32.totalorder %s2109_s24, 12 }
   0xc   : > { %s2590_s26 = smov (%p36_p4, %s2588_s26), 0 }
   0xd   : > { %s67_s28 = ssub.s32 %s2105_s23, %s2590_s26  ;;  %212 = sbr.rel (%p1725_p6) target bundleno = 78 (0x4e), region = 16 }
   0xe   : > { %s68_s29 = sor.u32 %s67_s28, %s66_s27 }
   0xf   : > { %p69_p5 = scmp.eq.s32.totalorder %s68_s29, 0 }
  0x11   : > { %s2193_s6 = scalar_select %p69_p5, %s2089_s19, %s71_s30  }
  0x14   : > { %228 = sbr.rel (!%p80_p3) target bundleno = 78 (0x4e), region = 24  ;;  %s230_s7 = sand.u32 (%p80_p3), 1, %s2089_s19  }
  0x15   : > { %s1846_s8 = smul.u32 (%p80_p3), 768, %s230_s7  ;;  %s1726_s9 = sshll.u32 (%p80_p3), %s2105_s23, 1 }
  0x16   : > { %s1844_s10 = smul.u32 (%p80_p3), 384, %s2101_s22  ;;  %s2578_s1 = sld [smem:[#allocation4_spill]] (%p80_p3) }
  0x17   : > { %s2207_s16 = scalar_lea.vmem (%p80_p3), [#allocation3], %s1846_s8 }
  0x18   : > { %s236_s11 = sadd.s32 (%p80_p3), %s1844_s10, %s1726_s9 }
  0x19   : > { %s1728_s12 = sshll.u32 (%p80_p3), %s236_s11, 2 }
  0x1c   : > { %s2202_s15 = scalar_lea.vmem %s2578_s1, %s1728_s12 }
  0x1d   : > { %v456_v0 = vld [vmem:[%s2202_s15] sm:$0xff]  ;;  %v458_v1 = vld [vmem:[%s2202_s15 + $0x10] sm:$0xff] }
  0x1e   : > { %v460_v2 = vld [vmem:[%s2202_s15 + $0x20] sm:$0xff]  ;;  %457 = vst [vmem:[%s2207_s16] sm:$0xff] %v456_v0  ;;  %459 = vst [vmem:[%s2207_s16 + $0x8] sm:$0xff] %v458_v1  ;;  %v462_v3 = vld [vmem:[%s2202_s15 + $0x30] sm:$0xff] }
  0x1f   : > { %461 = vst [vmem:[%s2207_s16 + $0x10] sm:$0xff] %v460_v2  ;;  %v464_v4 = vld [vmem:[%s2202_s15 + $0x40] sm:$0xff]  ;;  %v466_v5 = vld [vmem:[%s2202_s15 + $0x50] sm:$0xff]  ;;  %463 = vst [vmem:[%s2207_s16 + $0x18] sm:$0xff] %v462_v3 }
  0x20   : > { %465 = vst [vmem:[%s2207_s16 + $0x20] sm:$0xff] %v464_v4  ;;  %467 = vst [vmem:[%s2207_s16 + $0x28] sm:$0xff] %v466_v5  ;;  %v468_v6 = vld [vmem:[%s2202_s15 + $0x60] sm:$0xff]  ;;  %v470_v7 = vld [vmem:[%s2202_s15 + $0x70] sm:$0xff] }
  0x21   : > { %v472_v8 = vld [vmem:[%s2202_s15 + $0x80] sm:$0xff]  ;;  %469 = vst [vmem:[%s2207_s16 + $0x30] sm:$0xff] %v468_v6  ;;  %471 = vst [vmem:[%s2207_s16 + $0x38] sm:$0xff] %v470_v7  ;;  %v474_v9 = vld [vmem:[%s2202_s15 + $0x90] sm:$0xff] }
  0x22   : > { %473 = vst [vmem:[%s2207_s16 + $0x40] sm:$0xff] %v472_v8  ;;  %v476_v10 = vld [vmem:[%s2202_s15 + $0xa0] sm:$0xff]  ;;  %v478_v11 = vld [vmem:[%s2202_s15 + $0xb0] sm:$0xff]  ;;  %475 = vst [vmem:[%s2207_s16 + $0x48] sm:$0xff] %v474_v9 }
  0x23   : > { %477 = vst [vmem:[%s2207_s16 + $0x50] sm:$0xff] %v476_v10  ;;  %479 = vst [vmem:[%s2207_s16 + $0x58] sm:$0xff] %v478_v11  ;;  %v480_v12 = vld [vmem:[%s2202_s15 + $0xc0] sm:$0xff]  ;;  %v482_v13 = vld [vmem:[%s2202_s15 + $0xd0] sm:$0xff] }
  0x24   : > { %v484_v14 = vld [vmem:[%s2202_s15 + $0xe0] sm:$0xff]  ;;  %481 = vst [vmem:[%s2207_s16 + $0x60] sm:$0xff] %v480_v12  ;;  %483 = vst [vmem:[%s2207_s16 + $0x68] sm:$0xff] %v482_v13  ;;  %v486_v15 = vld [vmem:[%s2202_s15 + $0xf0] sm:$0xff] }
  0x25   : > { %485 = vst [vmem:[%s2207_s16 + $0x70] sm:$0xff] %v484_v14  ;;  %v488_v16 = vld [vmem:[%s2202_s15 + $0x100] sm:$0xff]  ;;  %v490_v17 = vld [vmem:[%s2202_s15 + $0x110] sm:$0xff]  ;;  %487 = vst [vmem:[%s2207_s16 + $0x78] sm:$0xff] %v486_v15 }
  0x26   : > { %489 = vst [vmem:[%s2207_s16 + $0x80] sm:$0xff] %v488_v16  ;;  %491 = vst [vmem:[%s2207_s16 + $0x88] sm:$0xff] %v490_v17  ;;  %v492_v18 = vld [vmem:[%s2202_s15 + $0x120] sm:$0xff]  ;;  %v494_v19 = vld [vmem:[%s2202_s15 + $0x130] sm:$0xff] }
  0x27   : > { %v496_v20 = vld [vmem:[%s2202_s15 + $0x140] sm:$0xff]  ;;  %493 = vst [vmem:[%s2207_s16 + $0x90] sm:$0xff] %v492_v18  ;;  %495 = vst [vmem:[%s2207_s16 + $0x98] sm:$0xff] %v494_v19  ;;  %v498_v21 = vld [vmem:[%s2202_s15 + $0x150] sm:$0xff] }
  0x28   : > { %497 = vst [vmem:[%s2207_s16 + $0xa0] sm:$0xff] %v496_v20  ;;  %v500_v22 = vld [vmem:[%s2202_s15 + $0x160] sm:$0xff]  ;;  %v502_v23 = vld [vmem:[%s2202_s15 + $0x170] sm:$0xff]  ;;  %499 = vst [vmem:[%s2207_s16 + $0xa8] sm:$0xff] %v498_v21 }
  0x29   : > { %501 = vst [vmem:[%s2207_s16 + $0xb0] sm:$0xff] %v500_v22  ;;  %503 = vst [vmem:[%s2207_s16 + $0xb8] sm:$0xff] %v502_v23  ;;  %v504_v24 = vld [vmem:[%s2202_s15 + $0x180] sm:$0xff]  ;;  %v506_v25 = vld [vmem:[%s2202_s15 + $0x190] sm:$0xff] }
  0x2a   : > { %v508_v26 = vld [vmem:[%s2202_s15 + $0x1a0] sm:$0xff]  ;;  %505 = vst [vmem:[%s2207_s16 + $0xc0] sm:$0xff] %v504_v24  ;;  %507 = vst [vmem:[%s2207_s16 + $0xc8] sm:$0xff] %v506_v25  ;;  %v510_v27 = vld [vmem:[%s2202_s15 + $0x1b0] sm:$0xff] }
  0x2b   : > { %509 = vst [vmem:[%s2207_s16 + $0xd0] sm:$0xff] %v508_v26  ;;  %v512_v28 = vld [vmem:[%s2202_s15 + $0x1c0] sm:$0xff]  ;;  %v514_v29 = vld [vmem:[%s2202_s15 + $0x1d0] sm:$0xff]  ;;  %511 = vst [vmem:[%s2207_s16 + $0xd8] sm:$0xff] %v510_v27 }
  0x2c   : > { %513 = vst [vmem:[%s2207_s16 + $0xe0] sm:$0xff] %v512_v28  ;;  %515 = vst [vmem:[%s2207_s16 + $0xe8] sm:$0xff] %v514_v29  ;;  %v516_v30 = vld [vmem:[%s2202_s15 + $0x1e0] sm:$0xff]  ;;  %v518_v31 = vld [vmem:[%s2202_s15 + $0x1f0] sm:$0xff] }
  0x2d   : > { %v520_v32 = vld [vmem:[%s2202_s15 + $0x200] sm:$0xff]  ;;  %517 = vst [vmem:[%s2207_s16 + $0xf0] sm:$0xff] %v516_v30  ;;  %519 = vst [vmem:[%s2207_s16 + $0xf8] sm:$0xff] %v518_v31  ;;  %v522_v33 = vld [vmem:[%s2202_s15 + $0x210] sm:$0xff] }
  0x2e   : > { %521 = vst [vmem:[%s2207_s16 + $0x100] sm:$0xff] %v520_v32  ;;  %v524_v34 = vld [vmem:[%s2202_s15 + $0x220] sm:$0xff]  ;;  %v526_v35 = vld [vmem:[%s2202_s15 + $0x230] sm:$0xff]  ;;  %523 = vst [vmem:[%s2207_s16 + $0x108] sm:$0xff] %v522_v33 }
  0x2f   : > { %525 = vst [vmem:[%s2207_s16 + $0x110] sm:$0xff] %v524_v34  ;;  %527 = vst [vmem:[%s2207_s16 + $0x118] sm:$0xff] %v526_v35  ;;  %v528_v36 = vld [vmem:[%s2202_s15 + $0x240] sm:$0xff]  ;;  %v530_v37 = vld [vmem:[%s2202_s15 + $0x250] sm:$0xff] }
  0x30   : > { %v532_v38 = vld [vmem:[%s2202_s15 + $0x260] sm:$0xff]  ;;  %529 = vst [vmem:[%s2207_s16 + $0x120] sm:$0xff] %v528_v36  ;;  %531 = vst [vmem:[%s2207_s16 + $0x128] sm:$0xff] %v530_v37  ;;  %v534_v39 = vld [vmem:[%s2202_s15 + $0x270] sm:$0xff] }
  0x31   : > { %533 = vst [vmem:[%s2207_s16 + $0x130] sm:$0xff] %v532_v38  ;;  %v536_v40 = vld [vmem:[%s2202_s15 + $0x280] sm:$0xff]  ;;  %v538_v41 = vld [vmem:[%s2202_s15 + $0x290] sm:$0xff]  ;;  %535 = vst [vmem:[%s2207_s16 + $0x138] sm:$0xff] %v534_v39 }
  0x32   : > { %537 = vst [vmem:[%s2207_s16 + $0x140] sm:$0xff] %v536_v40  ;;  %539 = vst [vmem:[%s2207_s16 + $0x148] sm:$0xff] %v538_v41  ;;  %v540_v42 = vld [vmem:[%s2202_s15 + $0x2a0] sm:$0xff]  ;;  %v542_v43 = vld [vmem:[%s2202_s15 + $0x2b0] sm:$0xff] }
  0x33   : > { %v544_v44 = vld [vmem:[%s2202_s15 + $0x2c0] sm:$0xff]  ;;  %541 = vst [vmem:[%s2207_s16 + $0x150] sm:$0xff] %v540_v42  ;;  %543 = vst [vmem:[%s2207_s16 + $0x158] sm:$0xff] %v542_v43  ;;  %v546_v45 = vld [vmem:[%s2202_s15 + $0x2d0] sm:$0xff] }
  0x34   : > { %545 = vst [vmem:[%s2207_s16 + $0x160] sm:$0xff] %v544_v44  ;;  %v548_v46 = vld [vmem:[%s2202_s15 + $0x2e0] sm:$0xff]  ;;  %v550_v47 = vld [vmem:[%s2202_s15 + $0x2f0] sm:$0xff]  ;;  %547 = vst [vmem:[%s2207_s16 + $0x168] sm:$0xff] %v546_v45 }
  0x35   : > { %549 = vst [vmem:[%s2207_s16 + $0x170] sm:$0xff] %v548_v46  ;;  %551 = vst [vmem:[%s2207_s16 + $0x178] sm:$0xff] %v550_v47  ;;  %v552_v48 = vld [vmem:[%s2202_s15 + $0x300] sm:$0xff]  ;;  %v554_v49 = vld [vmem:[%s2202_s15 + $0x310] sm:$0xff] }
  0x36   : > { %v556_v50 = vld [vmem:[%s2202_s15 + $0x320] sm:$0xff]  ;;  %553 = vst [vmem:[%s2207_s16 + $0x180] sm:$0xff] %v552_v48  ;;  %555 = vst [vmem:[%s2207_s16 + $0x188] sm:$0xff] %v554_v49  ;;  %v558_v51 = vld [vmem:[%s2202_s15 + $0x330] sm:$0xff] }
  0x37   : > { %557 = vst [vmem:[%s2207_s16 + $0x190] sm:$0xff] %v556_v50  ;;  %v560_v52 = vld [vmem:[%s2202_s15 + $0x340] sm:$0xff]  ;;  %v562_v53 = vld [vmem:[%s2202_s15 + $0x350] sm:$0xff]  ;;  %559 = vst [vmem:[%s2207_s16 + $0x198] sm:$0xff] %v558_v51 }
  0x38   : > { %561 = vst [vmem:[%s2207_s16 + $0x1a0] sm:$0xff] %v560_v52  ;;  %563 = vst [vmem:[%s2207_s16 + $0x1a8] sm:$0xff] %v562_v53  ;;  %v564_v54 = vld [vmem:[%s2202_s15 + $0x360] sm:$0xff]  ;;  %v566_v55 = vld [vmem:[%s2202_s15 + $0x370] sm:$0xff] }
  0x39   : > { %v568_v56 = vld [vmem:[%s2202_s15 + $0x380] sm:$0xff]  ;;  %565 = vst [vmem:[%s2207_s16 + $0x1b0] sm:$0xff] %v564_v54  ;;  %567 = vst [vmem:[%s2207_s16 + $0x1b8] sm:$0xff] %v566_v55  ;;  %v570_v57 = vld [vmem:[%s2202_s15 + $0x390] sm:$0xff] }
  0x3a   : > { %569 = vst [vmem:[%s2207_s16 + $0x1c0] sm:$0xff] %v568_v56  ;;  %v572_v58 = vld [vmem:[%s2202_s15 + $0x3a0] sm:$0xff]  ;;  %v574_v59 = vld [vmem:[%s2202_s15 + $0x3b0] sm:$0xff]  ;;  %571 = vst [vmem:[%s2207_s16 + $0x1c8] sm:$0xff] %v570_v57 }
  0x3b   : > { %573 = vst [vmem:[%s2207_s16 + $0x1d0] sm:$0xff] %v572_v58  ;;  %575 = vst [vmem:[%s2207_s16 + $0x1d8] sm:$0xff] %v574_v59  ;;  %v576_v60 = vld [vmem:[%s2202_s15 + $0x3c0] sm:$0xff]  ;;  %v578_v61 = vld [vmem:[%s2202_s15 + $0x3d0] sm:$0xff] }
  0x3c   : > { %v580_v62 = vld [vmem:[%s2202_s15 + $0x3e0] sm:$0xff]  ;;  %577 = vst [vmem:[%s2207_s16 + $0x1e0] sm:$0xff] %v576_v60  ;;  %579 = vst [vmem:[%s2207_s16 + $0x1e8] sm:$0xff] %v578_v61  ;;  %v582_v63 = vld [vmem:[%s2202_s15 + $0x3f0] sm:$0xff] }
  0x3d   : > { %581 = vst [vmem:[%s2207_s16 + $0x1f0] sm:$0xff] %v580_v62  ;;  %v584_v0 = vld [vmem:[%s2202_s15 + $0x400] sm:$0xff]  ;;  %v586_v1 = vld [vmem:[%s2202_s15 + $0x410] sm:$0xff]  ;;  %583 = vst [vmem:[%s2207_s16 + $0x1f8] sm:$0xff] %v582_v63 }
  0x3e   : > { %585 = vst [vmem:[%s2207_s16 + $0x200] sm:$0xff] %v584_v0  ;;  %587 = vst [vmem:[%s2207_s16 + $0x208] sm:$0xff] %v586_v1  ;;  %v588_v2 = vld [vmem:[%s2202_s15 + $0x420] sm:$0xff]  ;;  %v590_v3 = vld [vmem:[%s2202_s15 + $0x430] sm:$0xff] }
  0x3f   : > { %v592_v4 = vld [vmem:[%s2202_s15 + $0x440] sm:$0xff]  ;;  %589 = vst [vmem:[%s2207_s16 + $0x210] sm:$0xff] %v588_v2  ;;  %591 = vst [vmem:[%s2207_s16 + $0x218] sm:$0xff] %v590_v3  ;;  %v594_v5 = vld [vmem:[%s2202_s15 + $0x450] sm:$0xff] }
  0x40   : > { %593 = vst [vmem:[%s2207_s16 + $0x220] sm:$0xff] %v592_v4  ;;  %v596_v6 = vld [vmem:[%s2202_s15 + $0x460] sm:$0xff]  ;;  %v598_v7 = vld [vmem:[%s2202_s15 + $0x470] sm:$0xff]  ;;  %595 = vst [vmem:[%s2207_s16 + $0x228] sm:$0xff] %v594_v5 }
  0x41   : > { %597 = vst [vmem:[%s2207_s16 + $0x230] sm:$0xff] %v596_v6  ;;  %599 = vst [vmem:[%s2207_s16 + $0x238] sm:$0xff] %v598_v7  ;;  %v600_v8 = vld [vmem:[%s2202_s15 + $0x480] sm:$0xff]  ;;  %v602_v9 = vld [vmem:[%s2202_s15 + $0x490] sm:$0xff] }
  0x42   : > { %v604_v10 = vld [vmem:[%s2202_s15 + $0x4a0] sm:$0xff]  ;;  %601 = vst [vmem:[%s2207_s16 + $0x240] sm:$0xff] %v600_v8  ;;  %603 = vst [vmem:[%s2207_s16 + $0x248] sm:$0xff] %v602_v9  ;;  %v606_v11 = vld [vmem:[%s2202_s15 + $0x4b0] sm:$0xff] }
  0x43   : > { %605 = vst [vmem:[%s2207_s16 + $0x250] sm:$0xff] %v604_v10  ;;  %v608_v12 = vld [vmem:[%s2202_s15 + $0x4c0] sm:$0xff]  ;;  %v610_v13 = vld [vmem:[%s2202_s15 + $0x4d0] sm:$0xff]  ;;  %607 = vst [vmem:[%s2207_s16 + $0x258] sm:$0xff] %v606_v11 }
  0x44   : > { %609 = vst [vmem:[%s2207_s16 + $0x260] sm:$0xff] %v608_v12  ;;  %611 = vst [vmem:[%s2207_s16 + $0x268] sm:$0xff] %v610_v13  ;;  %v612_v14 = vld [vmem:[%s2202_s15 + $0x4e0] sm:$0xff]  ;;  %v614_v15 = vld [vmem:[%s2202_s15 + $0x4f0] sm:$0xff] }
  0x45   : > { %v616_v16 = vld [vmem:[%s2202_s15 + $0x500] sm:$0xff]  ;;  %613 = vst [vmem:[%s2207_s16 + $0x270] sm:$0xff] %v612_v14  ;;  %615 = vst [vmem:[%s2207_s16 + $0x278] sm:$0xff] %v614_v15  ;;  %v618_v17 = vld [vmem:[%s2202_s15 + $0x510] sm:$0xff] }
  0x46   : > { %617 = vst [vmem:[%s2207_s16 + $0x280] sm:$0xff] %v616_v16  ;;  %v620_v18 = vld [vmem:[%s2202_s15 + $0x520] sm:$0xff]  ;;  %v622_v19 = vld [vmem:[%s2202_s15 + $0x530] sm:$0xff]  ;;  %619 = vst [vmem:[%s2207_s16 + $0x288] sm:$0xff] %v618_v17 }
  0x47   : > { %621 = vst [vmem:[%s2207_s16 + $0x290] sm:$0xff] %v620_v18  ;;  %623 = vst [vmem:[%s2207_s16 + $0x298] sm:$0xff] %v622_v19  ;;  %v624_v20 = vld [vmem:[%s2202_s15 + $0x540] sm:$0xff]  ;;  %v626_v21 = vld [vmem:[%s2202_s15 + $0x550] sm:$0xff] }
  0x48   : > { %v628_v22 = vld [vmem:[%s2202_s15 + $0x560] sm:$0xff]  ;;  %625 = vst [vmem:[%s2207_s16 + $0x2a0] sm:$0xff] %v624_v20  ;;  %627 = vst [vmem:[%s2207_s16 + $0x2a8] sm:$0xff] %v626_v21  ;;  %v630_v23 = vld [vmem:[%s2202_s15 + $0x570] sm:$0xff] }
  0x49   : > { %629 = vst [vmem:[%s2207_s16 + $0x2b0] sm:$0xff] %v628_v22  ;;  %v632_v24 = vld [vmem:[%s2202_s15 + $0x580] sm:$0xff]  ;;  %v634_v25 = vld [vmem:[%s2202_s15 + $0x590] sm:$0xff]  ;;  %631 = vst [vmem:[%s2207_s16 + $0x2b8] sm:$0xff] %v630_v23 }
  0x4a   : > { %633 = vst [vmem:[%s2207_s16 + $0x2c0] sm:$0xff] %v632_v24  ;;  %635 = vst [vmem:[%s2207_s16 + $0x2c8] sm:$0xff] %v634_v25  ;;  %v636_v26 = vld [vmem:[%s2202_s15 + $0x5a0] sm:$0xff]  ;;  %v638_v27 = vld [vmem:[%s2202_s15 + $0x5b0] sm:$0xff] }
  0x4b   : > { %v640_v28 = vld [vmem:[%s2202_s15 + $0x5c0] sm:$0xff]  ;;  %637 = vst [vmem:[%s2207_s16 + $0x2d0] sm:$0xff] %v636_v26  ;;  %639 = vst [vmem:[%s2207_s16 + $0x2d8] sm:$0xff] %v638_v27  ;;  %v642_v29 = vld [vmem:[%s2202_s15 + $0x5d0] sm:$0xff] }
  0x4c   : > { %641 = vst [vmem:[%s2207_s16 + $0x2e0] sm:$0xff] %v640_v28  ;;  %v644_v30 = vld [vmem:[%s2202_s15 + $0x5e0] sm:$0xff]  ;;  %v646_v31 = vld [vmem:[%s2202_s15 + $0x5f0] sm:$0xff]  ;;  %643 = vst [vmem:[%s2207_s16 + $0x2e8] sm:$0xff] %v642_v29 }
  0x4d   : > { %645 = vst [vmem:[%s2207_s16 + $0x2f0] sm:$0xff] %v644_v30  ;;  %647 = vst [vmem:[%s2207_s16 + $0x2f8] sm:$0xff] %v646_v31 }
  0x4e PF: > { %p1729_p7 = scmp.ge.s32.totalorder %s2109_s24, 1  ;;  %p681_p8 = scmp.lt.s32.totalorder %s2109_s24, 13 }
  0x50   : > { %p682_p9 = pnand %p1729_p7, %p681_p8 }
  0x51   : > { %s688_s17 = sand.u32 (!%p682_p9), 1, %s2085_s18   ;;  %s745_s27 = smul.u32 (!%p682_p9), 6, %s2093_s20 }
  0x52   : > { %685 = sbr.rel (%p682_p9) target bundleno = 466 (0x1d2), region = 74  ;;  %s1731_s29 = sshll.u32 (!%p682_p9), %s2097_s21, 1 }
  0x53   : > { %s1847_s28 = smul.u32 (!%p682_p9), 768, %s688_s17  ;;  %p748_p10 = scmp.lt.s32.totalorder (!%p682_p9), %s745_s27, 35 }
  0x54   : > { %p758_p11 = scmp.lt.s32.totalorder (!%p682_p9), %s1731_s29, 3  ;;  %p1737_p12 = scmp.ne.s32.totalorder (!%p682_p9), %s2093_s20, 0 }
  0x59   : > { %s2592_s27 = smov (!%p748_p10, %s745_s27), 35  ;;  %s2594_s29 = smov (!%p758_p11, %s1731_s29), 3 }
  0x5a   : > { %s1730_s30 = sshll.u32 %s2592_s27, 2  ;;  %s760_s18 = scalar_lea.vmem %s2573_s2, %s2594_s29  ;;  %v2111_v32 = vmov (!%p1737_p12), 0.0  }
  0x5b   : > { %s2408_s9 = scalar_lea.vmem %s2571_s0, %s1730_s30  ;;  %s765_s13 = scalar_lea.vmem %s2574_s3, %s2594_s29  ;;  %791 = vst [vmem:[#allocation2] sm:$0xff] (!%p1737_p12), %v2111_v32  ;;  %792 = vst [vmem:[#allocation2 + $0x8] sm:$0xff] (!%p1737_p12), %v2111_v32 }
  0x5c   : > { %s1734_s14 = sshll.u32 %s2594_s29, 2  ;;  %s2429_s30 = scalar_lea.vmem [#allocation3], %s1847_s28 }
  0x5d   : > { %s2422_s17 = scalar_lea.vmem %s2575_s4, %s1734_s14  ;;  %s2427_s7 = scalar_lea.vmem %s2576_s5, %s1734_s14 }
  0x5e   : > { %790 = sbr.rel (%p1737_p12) target bundleno = 101 (0x65), region = 82 }
  0x65 PF: > { %v1905_v33 = vld [vmem:[%s2429_s30 + $0x4] ss:$8 sps:$4 sm:$0xff]   ;;  %v1909_v35 = vld [vmem:[%s2429_s30] ss:$8 sps:$4 sm:$0xff]   ;;  %v1911_v37 = vld [vmem:[%s2429_s30 + $0x14] ss:$8 sps:$4 sm:$0xff]  }
  0x66   : > { %v1907_v34 = vld [vmem:[%s2429_s30 + $0x104] ss:$8 sps:$4 sm:$0xff]   ;;  %1395 = vmatprep.subr.bf16.mxu0 %v1905_v33  ;;  %v1910_v36 = vld [vmem:[%s2429_s30 + $0x100] ss:$8 sps:$4 sm:$0xff]   ;;  %v1913_v38 = vld [vmem:[%s2429_s30 + $0x114] ss:$8 sps:$4 sm:$0xff]  }
  0x67   : > { %1436 = vmatprep.subr.bf16.mxu1 %v1907_v34  ;;  %1396 = vmatpush1.bf16.msra.mxu0 %v1909_v35  ;;  %v1915_v39 = vld [vmem:[%s2429_s30 + $0x10] ss:$8 sps:$4 sm:$0xff]   ;;  %v1917_v41 = vld [vmem:[%s2429_s30 + $0x24] ss:$8 sps:$4 sm:$0xff]   ;;  %v1921_v43 = vld [vmem:[%s2429_s30 + $0x20] ss:$8 sps:$4 sm:$0xff]  }
  0x68   : > { %1437 = vmatpush1.bf16.msra.mxu1 %v1910_v36  ;;  %1397 = vmatprep.subr.bf16.mxu0 %v1911_v37  ;;  %v1916_v40 = vld [vmem:[%s2429_s30 + $0x110] ss:$8 sps:$4 sm:$0xff]   ;;  %v1919_v42 = vld [vmem:[%s2429_s30 + $0x124] ss:$8 sps:$4 sm:$0xff]   ;;  %v1922_v44 = vld [vmem:[%s2429_s30 + $0x120] ss:$8 sps:$4 sm:$0xff]  }
  0x69   : > { %1438 = vmatprep.subr.bf16.mxu1 %v1913_v38  ;;  %v1923_v45 = vld [vmem:[%s2429_s30 + $0x34] ss:$8 sps:$4 sm:$0xff]   ;;  %v1927_v47 = vld [vmem:[%s2429_s30 + $0x30] ss:$8 sps:$4 sm:$0xff]   ;;  %v1929_v49 = vld [vmem:[%s2429_s30 + $0x44] ss:$8 sps:$4 sm:$0xff]  }
  0x6a   : > { %v1925_v46 = vld [vmem:[%s2429_s30 + $0x134] ss:$8 sps:$4 sm:$0xff]   ;;  %v1928_v48 = vld [vmem:[%s2429_s30 + $0x130] ss:$8 sps:$4 sm:$0xff]   ;;  %v1931_v50 = vld [vmem:[%s2429_s30 + $0x144] ss:$8 sps:$4 sm:$0xff]  }
  0x6b   : > { %1398 = vmatpush1.bf16.msra.mxu0 %v1915_v39  ;;  %v1933_v51 = vld [vmem:[%s2429_s30 + $0x40] ss:$8 sps:$4 sm:$0xff]   ;;  %v1935_v53 = vld [vmem:[%s2429_s30 + $0x54] ss:$8 sps:$4 sm:$0xff]   ;;  %v1939_v55 = vld [vmem:[%s2429_s30 + $0x50] ss:$8 sps:$4 sm:$0xff]  }
  0x6c   : > { %1439 = vmatpush1.bf16.msra.mxu1 %v1916_v40  ;;  %1399 = vmatprep.subr.bf16.mxu0 %v1917_v41  ;;  %v1934_v52 = vld [vmem:[%s2429_s30 + $0x140] ss:$8 sps:$4 sm:$0xff]   ;;  %v1937_v54 = vld [vmem:[%s2429_s30 + $0x154] ss:$8 sps:$4 sm:$0xff]   ;;  %v1940_v56 = vld [vmem:[%s2429_s30 + $0x150] ss:$8 sps:$4 sm:$0xff]  }
  0x6d   : > { %1440 = vmatprep.subr.bf16.mxu1 %v1919_v42  ;;  %v1941_v57 = vld [vmem:[%s2429_s30 + $0x64] ss:$8 sps:$4 sm:$0xff]   ;;  %v1945_v59 = vld [vmem:[%s2429_s30 + $0x60] ss:$8 sps:$4 sm:$0xff]   ;;  %v1947_v61 = vld [vmem:[%s2429_s30 + $0x74] ss:$8 sps:$4 sm:$0xff]  }
  0x6e   : > { %v1943_v58 = vld [vmem:[%s2429_s30 + $0x164] ss:$8 sps:$4 sm:$0xff]   ;;  %v1946_v60 = vld [vmem:[%s2429_s30 + $0x160] ss:$8 sps:$4 sm:$0xff]   ;;  %v1949_v62 = vld [vmem:[%s2429_s30 + $0x174] ss:$8 sps:$4 sm:$0xff]  }
  0x6f   : > { %1400 = vmatpush1.bf16.msra.mxu0 %v1921_v43  ;;  %v1951_v63 = vld [vmem:[%s2429_s30 + $0x70] ss:$8 sps:$4 sm:$0xff]   ;;  %v1953_v1 = vld [vmem:[%s2429_s30 + $0x84] ss:$8 sps:$4 sm:$0xff]   ;;  %v1957_v3 = vld [vmem:[%s2429_s30 + $0x80] ss:$8 sps:$4 sm:$0xff]  }
  0x70   : > { %1441 = vmatpush1.bf16.msra.mxu1 %v1922_v44  ;;  %1401 = vmatprep.subr.bf16.mxu0 %v1923_v45  ;;  %v1952_v0 = vld [vmem:[%s2429_s30 + $0x170] ss:$8 sps:$4 sm:$0xff]   ;;  %v1955_v2 = vld [vmem:[%s2429_s30 + $0x184] ss:$8 sps:$4 sm:$0xff]   ;;  %v1958_v4 = vld [vmem:[%s2429_s30 + $0x180] ss:$8 sps:$4 sm:$0xff]  }
  0x71   : > { %1442 = vmatprep.subr.bf16.mxu1 %v1925_v46  ;;  %v1959_v5 = vld [vmem:[%s2429_s30 + $0x94] ss:$8 sps:$4 sm:$0xff]   ;;  %v1963_v7 = vld [vmem:[%s2429_s30 + $0x90] ss:$8 sps:$4 sm:$0xff]   ;;  %v1965_v9 = vld [vmem:[%s2429_s30 + $0xa4] ss:$8 sps:$4 sm:$0xff]  }
  0x72   : > { %v1961_v6 = vld [vmem:[%s2429_s30 + $0x194] ss:$8 sps:$4 sm:$0xff]   ;;  %v1964_v8 = vld [vmem:[%s2429_s30 + $0x190] ss:$8 sps:$4 sm:$0xff]   ;;  %v1967_v10 = vld [vmem:[%s2429_s30 + $0x1a4] ss:$8 sps:$4 sm:$0xff]  }
  0x73   : > { %1402 = vmatpush1.bf16.msra.mxu0 %v1927_v47  ;;  %v1969_v11 = vld [vmem:[%s2429_s30 + $0xa0] ss:$8 sps:$4 sm:$0xff]   ;;  %v1971_v13 = vld [vmem:[%s2429_s30 + $0xb4] ss:$8 sps:$4 sm:$0xff]   ;;  %v1975_v18 = vld [vmem:[%s2429_s30 + $0xb0] ss:$8 sps:$4 sm:$0xff]  }
  0x74   : > { %1443 = vmatpush1.bf16.msra.mxu1 %v1928_v48  ;;  %1403 = vmatprep.subr.bf16.mxu0 %v1929_v49  ;;  %v1970_v12 = vld [vmem:[%s2429_s30 + $0x1a0] ss:$8 sps:$4 sm:$0xff]   ;;  %v1973_v14 = vld [vmem:[%s2429_s30 + $0x1b4] ss:$8 sps:$4 sm:$0xff]   ;;  %v1976_v19 = vld [vmem:[%s2429_s30 + $0x1b0] ss:$8 sps:$4 sm:$0xff]  }
  0x75   : > { %1444 = vmatprep.subr.bf16.mxu1 %v1931_v50  ;;  %v795_v15 = vld [vmem:[%s2408_s9] sm:$0xff]  ;;  %v796_v17 = vld [vmem:[%s2408_s9 + $0x8] sm:$0xff]  ;;  %v1977_v21 = vld [vmem:[%s2429_s30 + $0xc4] ss:$8 sps:$4 sm:$0xff]   ;;  %p1840_p13 = scmp.ne.s32.totalorder %s2093_s20, 5 }
  0x76   : > { %v1739_v16 = vcombine.high %v795_v15, %v795_v15  ;;  %v1741_v20 = vcombine.high %v796_v17, %v796_v17  ;;  %v1979_v22 = vld [vmem:[%s2429_s30 + $0x1c4] ss:$8 sps:$4 sm:$0xff]   ;;  %v1981_v23 = vld [vmem:[%s2429_s30 + $0xc0] ss:$8 sps:$4 sm:$0xff]   ;;  %v1983_v25 = vld [vmem:[%s2429_s30 + $0xd4] ss:$8 sps:$4 sm:$0xff]   ;;  %v1738_v38 = vcombine.low %v795_v15, %v795_v15  ;;  %v1740_v39 = vcombine.low %v796_v17, %v796_v17 }
  0x77   : > { %1404 = vmatpush1.bf16.msra.mxu0 %v1933_v51  ;;  %v1982_v24 = vld [vmem:[%s2429_s30 + $0x1c0] ss:$8 sps:$4 sm:$0xff]   ;;  %v1985_v26 = vld [vmem:[%s2429_s30 + $0x1d4] ss:$8 sps:$4 sm:$0xff]   ;;  %v1987_v27 = vld [vmem:[%s2429_s30 + $0xd0] ss:$8 sps:$4 sm:$0xff]  }
  0x78   : > { %1445 = vmatpush1.bf16.msra.mxu1 %v1934_v52  ;;  %1405 = vmatprep.subr.bf16.mxu0 %v1935_v53  ;;  %v1988_v28 = vld [vmem:[%s2429_s30 + $0x1d0] ss:$8 sps:$4 sm:$0xff]   ;;  %v1989_v29 = vld [vmem:[%s2429_s30 + $0xe4] ss:$8 sps:$4 sm:$0xff]   ;;  %v1993_v31 = vld [vmem:[%s2429_s30 + $0xe0] ss:$8 sps:$4 sm:$0xff]  }
  0x79   : > { %1446 = vmatprep.subr.bf16.mxu1 %v1937_v54  ;;  %1427 = vmatprep.mubr.bf16.mxu0 %v1739_v16  ;;  %v1991_v30 = vld [vmem:[%s2429_s30 + $0x1e4] ss:$8 sps:$4 sm:$0xff]   ;;  %v1994_v32 = vld [vmem:[%s2429_s30 + $0x1e0] ss:$8 sps:$4 sm:$0xff]   ;;  %v1995_v33 = vld [vmem:[%s2429_s30 + $0xf4] ss:$8 sps:$4 sm:$0xff]  }
  0x7a   : > { %1468 = vmatprep.mubr.bf16.mxu1 %v1741_v20  ;;  %v1997_v34 = vld [vmem:[%s2429_s30 + $0x1f4] ss:$8 sps:$4 sm:$0xff]   ;;  %v1999_v35 = vld [vmem:[%s2429_s30 + $0xf0] ss:$8 sps:$4 sm:$0xff]   ;;  %v2007_v37 = vld [vmem:[%s2429_s30 + $0x204] ss:$8 sps:$4 sm:$0xff]  }
  0x7b   : > { %1406 = vmatpush1.bf16.msra.mxu0 %v1939_v55  ;;  %v2000_v36 = vld [vmem:[%s2429_s30 + $0x1f0] ss:$8 sps:$4 sm:$0xff]   ;;  %v2005_v40 = vld [vmem:[%s2429_s30 + $0x200] ss:$8 sps:$4 sm:$0xff]   ;;  %v2010_v42 = vld [vmem:[%s2429_s30 + $0x214] ss:$8 sps:$4 sm:$0xff]  }
  0x7c   : > { %1447 = vmatpush1.bf16.msra.mxu1 %v1940_v56  ;;  %1407 = vmatprep.subr.bf16.mxu0 %v1941_v57  ;;  %v2501_v41 = vld [vmem:[%s2408_s9 + $0x10] sm:$0xff]  ;;  %v2008_v44 = vld [vmem:[%s2429_s30 + $0x210] ss:$8 sps:$4 sm:$0xff]   ;;  %v2016_v47 = vld [vmem:[%s2429_s30 + $0x234] ss:$8 sps:$4 sm:$0xff]  }
  0x7d   : > { %1448 = vmatprep.subr.bf16.mxu1 %v1943_v58  ;;  %v1743_v43 = vcombine.high %v2501_v41, %v2501_v41  ;;  %v2013_v45 = vld [vmem:[%s2429_s30 + $0x224] ss:$8 sps:$4 sm:$0xff]   ;;  %v2011_v46 = vld [vmem:[%s2429_s30 + $0x220] ss:$8 sps:$4 sm:$0xff]   ;;  %v2014_v48 = vld [vmem:[%s2429_s30 + $0x230] ss:$8 sps:$4 sm:$0xff]  }
  0x7e   : > { %v2019_v49 = vld [vmem:[%s2429_s30 + $0x244] ss:$8 sps:$4 sm:$0xff]   ;;  %v2017_v50 = vld [vmem:[%s2429_s30 + $0x240] ss:$8 sps:$4 sm:$0xff]   ;;  %v2022_v51 = vld [vmem:[%s2429_s30 + $0x254] ss:$8 sps:$4 sm:$0xff]  }
  0x7f   : > { %1408 = vmatpush1.bf16.msra.mxu0 %v1945_v59  ;;  %v2020_v52 = vld [vmem:[%s2429_s30 + $0x250] ss:$8 sps:$4 sm:$0xff]   ;;  %v2025_v53 = vld [vmem:[%s2429_s30 + $0x264] ss:$8 sps:$4 sm:$0xff]   ;;  %v2023_v54 = vld [vmem:[%s2429_s30 + $0x260] ss:$8 sps:$4 sm:$0xff]  }
  0x80   : > { %1449 = vmatpush1.bf16.msra.mxu1 %v1946_v60  ;;  %1409 = vmatprep.subr.bf16.mxu0 %v1947_v61  ;;  %v2028_v55 = vld [vmem:[%s2429_s30 + $0x274] ss:$8 sps:$4 sm:$0xff]   ;;  %v2026_v56 = vld [vmem:[%s2429_s30 + $0x270] ss:$8 sps:$4 sm:$0xff]   ;;  %v2031_v57 = vld [vmem:[%s2429_s30 + $0x284] ss:$8 sps:$4 sm:$0xff]  }
  0x81   : > { %1450 = vmatprep.subr.bf16.mxu1 %v1949_v62  ;;  %v2029_v58 = vld [vmem:[%s2429_s30 + $0x280] ss:$8 sps:$4 sm:$0xff]   ;;  %v2034_v59 = vld [vmem:[%s2429_s30 + $0x294] ss:$8 sps:$4 sm:$0xff]   ;;  %v2032_v60 = vld [vmem:[%s2429_s30 + $0x290] ss:$8 sps:$4 sm:$0xff]  }
  0x82   : > { %v2037_v61 = vld [vmem:[%s2429_s30 + $0x2a4] ss:$8 sps:$4 sm:$0xff]   ;;  %v2035_v62 = vld [vmem:[%s2429_s30 + $0x2a0] ss:$8 sps:$4 sm:$0xff]   ;;  %v793_v20 = vld [vmem:[#allocation2] sm:$0xff] }
  0x83   : > { %1410 = vmatpush1.bf16.msra.mxu0 %v1951_v63  ;;  %v2040_v63 = vld [vmem:[%s2429_s30 + $0x2b4] ss:$8 sps:$4 sm:$0xff]  }
  0x84   : > { %1451 = vmatpush1.bf16.msra.mxu1 %v1952_v0  ;;  %1411 = vmatprep.subr.bf16.mxu0 %v1953_v1  ;;  %v2038_v0 = vld [vmem:[%s2429_s30 + $0x2b0] ss:$8 sps:$4 sm:$0xff]   ;;  %v2043_v1 = vld [vmem:[%s2429_s30 + $0x2c4] ss:$8 sps:$4 sm:$0xff]  }
  0x85   : > { %1452 = vmatprep.subr.bf16.mxu1 %v1955_v2  ;;  %v2041_v2 = vld [vmem:[%s2429_s30 + $0x2c0] ss:$8 sps:$4 sm:$0xff]  }
  0x87   : > { %1412 = vmatpush1.bf16.msra.mxu0 %v1957_v3  ;;  %v2046_v3 = vld [vmem:[%s2429_s30 + $0x2d4] ss:$8 sps:$4 sm:$0xff]  }
  0x88   : > { %1453 = vmatpush1.bf16.msra.mxu1 %v1958_v4  ;;  %1413 = vmatprep.subr.bf16.mxu0 %v1959_v5  ;;  %v2044_v4 = vld [vmem:[%s2429_s30 + $0x2d0] ss:$8 sps:$4 sm:$0xff]   ;;  %v2049_v5 = vld [vmem:[%s2429_s30 + $0x2e4] ss:$8 sps:$4 sm:$0xff]  }
  0x89   : > { %1454 = vmatprep.subr.bf16.mxu1 %v1961_v6  ;;  %v2047_v6 = vld [vmem:[%s2429_s30 + $0x2e0] ss:$8 sps:$4 sm:$0xff]  }
  0x8b   : > { %1414 = vmatpush1.bf16.msra.mxu0 %v1963_v7  ;;  %v2052_v7 = vld [vmem:[%s2429_s30 + $0x2f4] ss:$8 sps:$4 sm:$0xff]  }
  0x8c   : > { %1455 = vmatpush1.bf16.msra.mxu1 %v1964_v8  ;;  %1415 = vmatprep.subr.bf16.mxu0 %v1965_v9  ;;  %v2050_v8 = vld [vmem:[%s2429_s30 + $0x2f0] ss:$8 sps:$4 sm:$0xff]   ;;  %v1742_v9 = vcombine.low %v2501_v41, %v2501_v41 }
  0x8d   : > { %1456 = vmatprep.subr.bf16.mxu1 %v1967_v10 }
  0x8f   : > { %1416 = vmatpush1.bf16.msra.mxu0 %v1969_v11 }
  0x90   : > { %1457 = vmatpush1.bf16.msra.mxu1 %v1970_v12  ;;  %1417 = vmatprep.subr.bf16.mxu0 %v1971_v13 }
  0x91   : > { %1458 = vmatprep.subr.bf16.mxu1 %v1973_v14 }
  0x93   : > { %1418 = vmatpush1.bf16.msra.mxu0 %v1975_v18 }
  0x94   : > { %1459 = vmatpush1.bf16.msra.mxu1 %v1976_v19  ;;  %1419 = vmatprep.subr.bf16.mxu0 %v1977_v21 }
  0x95   : > { %1460 = vmatprep.subr.bf16.mxu1 %v1979_v22 }
  0x97   : > { %1420 = vmatpush1.bf16.msra.mxu0 %v1981_v23  ;;  %v794_v23 = vld [vmem:[#allocation2 + $0x8] sm:$0xff] }
  0x98   : > { %1461 = vmatpush1.bf16.msra.mxu1 %v1982_v24  ;;  %1421 = vmatprep.subr.bf16.mxu0 %v1983_v25 }
  0x99   : > { %1462 = vmatprep.subr.bf16.mxu1 %v1985_v26 }
  0x9b   : > { %1422 = vmatpush1.bf16.msra.mxu0 %v1987_v27 }
  0x9c   : > { %1463 = vmatpush1.bf16.msra.mxu1 %v1988_v28  ;;  %1423 = vmatprep.subr.bf16.mxu0 %v1989_v29 }
  0x9d   : > { %1464 = vmatprep.subr.bf16.mxu1 %v1991_v30  ;;  %v1530_v30 = vlaneseq (!%p1840_p13) }
  0x9f   : > { %1424 = vmatpush1.bf16.msra.mxu0 %v1993_v31  ;;  %v1531_v31 = vshrl.u32 (!%p1840_p13), %v1530_v30, 7 }
  0xa0   : > { %1465 = vmatpush1.bf16.msra.mxu1 %v1994_v32  ;;  %1425 = vmatprep.subr.bf16.mxu0 %v1995_v33  ;;  %v1528_v32 = vld [vmem:[%s760_s18] sm:$0x3] (!%p1840_p13) }
  0xa1   : > { %1466 = vmatprep.subr.bf16.mxu1 %v1997_v34  ;;  %v1542_v33 = vld [vmem:[%s765_s13] sm:$0x3] (!%p1840_p13)  ;;  %v1532_v34 = vsub.s32 (!%p1840_p13), 0, %v1531_v31 }
  0xa3   : > { %1426 = vmatpush1.bf16.msra.mxu0 %v1999_v35  ;;  %v1536_v35 = vsub.s32 (!%p1840_p13), 1, %v1531_v31  ;;  %v1547_v41 = vrot.slane (!%p1840_p13), %v1542_v33, %v1532_v34 }
  0xa4   : > { %1467 = vmatpush1.bf16.msra.mxu1 %v2000_v36  ;;  %1477 = vmatprep.subr.bf16.mxu0 %v2007_v37 }
  0xa6   : > { %1428 = vmatmul.mubr.bf16.vlgmr.msra.gmra.mrb[0].mxu0 %v1738_v38  ;;  %v1556_v38 = vld [vmem:[%s2422_s17] sm:$0xff] (!%p1840_p13) }
  0xa7   : > { %1469 = vmatmul.mubr.bf16.vlgmr.msra.gmra.mrb[0].mxu1 %v1740_v39  ;;  %1478 = vmatpush1.bf16.msra.mxu0 %v2005_v40  ;;  %v1533_v39 = vrot.slane (!%p1840_p13), %v1528_v32, %v1532_v34  ;;  %v1537_v40 = vrot.slane (!%p1840_p13), %v1528_v32, %v1536_v35 }
  0xa8   : > { %1509 = vmatprep.mubr.bf16.mxu0 %v1743_v43  ;;  %1479 = vmatprep.subr.bf16.mxu0 %v2010_v42  ;;  %v1551_v42 = vrot.slane (!%p1840_p13), %v1542_v33, %v1536_v35 }
  0xab   : > { %1480 = vmatpush1.bf16.msra.mxu0 %v2008_v44 }
  0xac   : > { %1481 = vmatprep.subr.bf16.mxu0 %v2013_v45  ;;  %v1557_v45 = vunpack.c.l.bf16 (!%p1840_p13), %v1556_v38 }
  0xaf   : > { %1482 = vmatpush1.bf16.msra.mxu0 %v2011_v46  ;;  %v1558_v46 = vunpack.c.h.bf16 (!%p1840_p13), %v1556_v38 }
  0xb0   : > { %1483 = vmatprep.subr.bf16.mxu0 %v2016_v47 }
  0xb3   : > { %1484 = vmatpush1.bf16.msra.mxu0 %v2014_v48 }
  0xb4   : > { %1485 = vmatprep.subr.bf16.mxu0 %v2019_v49 }
  0xb7   : > { %1486 = vmatpush1.bf16.msra.mxu0 %v2017_v50 }
  0xb8   : > { %1487 = vmatprep.subr.bf16.mxu0 %v2022_v51 }
  0xbb   : > { %1488 = vmatpush1.bf16.msra.mxu0 %v2020_v52 }
  0xbc   : > { %1489 = vmatprep.subr.bf16.mxu0 %v2025_v53 }
  0xbf   : > { %1490 = vmatpush1.bf16.msra.mxu0 %v2023_v54 }
  0xc0   : > { %1491 = vmatprep.subr.bf16.mxu0 %v2028_v55 }
  0xc3   : > { %1492 = vmatpush1.bf16.msra.mxu0 %v2026_v56 }
  0xc4   : > { %1493 = vmatprep.subr.bf16.mxu0 %v2031_v57 }
  0xc7   : > { %1494 = vmatpush1.bf16.msra.mxu0 %v2029_v58 }
  0xc8   : > { %1495 = vmatprep.subr.bf16.mxu0 %v2034_v59 }
  0xcb   : > { %1496 = vmatpush1.bf16.msra.mxu0 %v2032_v60 }
  0xcc   : > { %1497 = vmatprep.subr.bf16.mxu0 %v2037_v61 }
  0xcf   : > { %1498 = vmatpush1.bf16.msra.mxu0 %v2035_v62 }
  0xd0   : > { %1499 = vmatprep.subr.bf16.mxu0 %v2040_v63 }
  0xd3   : > { %1500 = vmatpush1.bf16.msra.mxu0 %v2038_v0 }
  0xd4   : > { %1501 = vmatprep.subr.bf16.mxu0 %v2043_v1 }
  0xd7   : > { %1502 = vmatpush1.bf16.msra.mxu0 %v2041_v2 }
  0xd8   : > { %1503 = vmatprep.subr.bf16.mxu0 %v2046_v3 }
  0xdb   : > { %1504 = vmatpush1.bf16.msra.mxu0 %v2044_v4 }
  0xdc   : > { %1505 = vmatprep.subr.bf16.mxu0 %v2049_v5 }
  0xdf   : > { %1506 = vmatpush1.bf16.msra.mxu0 %v2047_v6 }
  0xe0   : > { %1507 = vmatprep.subr.bf16.mxu0 %v2052_v7 }
  0xe3   : > { %1508 = vmatpush1.bf16.msra.mxu0 %v2050_v8 }
  0xe6   : > { %1510 = vmatmul.mubr.bf16.vlgmr.msra.gmra.mrb[4].mxu0 %v1742_v9 }
 0x179   : > { %v1429_v10 = vpop.f32.mrb[0].mxu0 }
 0x17a   : > { %v1470_v11 = vpop.f32.mrb[0].mxu1  ;;  %v1431_v13 = vpop.f32.mrb[1].mxu0 }
 0x17b   : > { %v1471_v12 = vadd.f32 %v1470_v11, %v1429_v10  ;;  %v1472_v14 = vpop.f32.mrb[1].mxu1  ;;  %v1433_v16 = vpop.f32.mrb[2].mxu0 }
 0x17c   : > { %v1473_v15 = vadd.f32 %v1472_v14, %v1431_v13  ;;  %v1474_v17 = vpop.f32.mrb[2].mxu1  ;;  %v1434_v18 = vpop.f32.mrb[3].mxu0 }
 0x17d   : > { %v1475_v19 = vpop.f32.mrb[3].mxu1 }
 0x1b9   : > { %v1511_v21 = vpop.f32.mrb[4].mxu0  ;;  %1525 = sbr.rel (%p1840_p13) target bundleno = 466 (0x1d2), region = 86 }
 0x1ba   : > { %v1512_v22 = vadd.f32 %v1511_v21, %v1471_v12  ;;  %v1513_v24 = vpop.f32.mrb[5].mxu0 }
 0x1bb   : > { %v1514_v25 = vadd.f32 %v1513_v24, %v1473_v15  ;;  %v1515_v26 = vpop.f32.mrb[6].mxu0 }
 0x1bc   : > { %v1518_v27 = vadd.f32 %v1512_v22, %v793_v20  ;;  %v1516_v28 = vpop.f32.mrb[7].mxu0 }
 0x1bd   : > { %v1519_v29 = vadd.f32 %v1514_v25, %v794_v23 }
 0x1be   : > { %1520 = vst [vmem:[#allocation2] sm:$0xff] %v1518_v27 }
 0x1bf   : > { %1521 = vst [vmem:[#allocation2 + $0x8] sm:$0xff] %v1519_v29 }
 0x1c5   : > { %v1526_v36 = vld [vmem:[#allocation2] sm:$0xff] }
 0x1c6   : > { %v1527_v37 = vld [vmem:[#allocation2 + $0x8] sm:$0xff]  ;;  %v1540_v43 = vmul.f32 %v1533_v39, %v1526_v36 }
 0x1c7   : > { %v1541_v44 = vmul.f32 %v1537_v40, %v1527_v37 }
 0x1c8   : > { %v1554_v47 = vadd.f32 %v1547_v41, %v1540_v43 }
 0x1c9   : > { %v1555_v48 = vadd.f32 %v1551_v42, %v1541_v44 }
 0x1ca   : > { %v1559_v49 = vadd.f32 %v1557_v45, %v1554_v47 }
 0x1cb   : > { %v1560_v50 = vadd.f32 %v1558_v46, %v1555_v48 }
 0x1cc   : > { %v1561_v51 = vmax.f32 %v1559_v49, 0.0 }
 0x1cd   : > { %v1562_v52 = vmax.f32 %v1560_v50, 0.0 }
 0x1cf   : > { %v1845_v53 = vpack.c.bf16 %v1562_v52, %v1561_v51 }
 0x1d1   : > { %1571 = vst [vmem:[%s2427_s7] sm:$0xff] %v1845_v53 }
 0x1d2 PF: > { %s15_s24 = sadd.s32 1, %s2109_s24   ;;  %s2579_s18 = smov %s2089_s19 }
 0x1d3   : > { %p12_p0 = scmp.ge.s32.totalorder %s15_s24, 14   ;;  %s2580_s19 = smov %s2193_s6 }
 0x1d4   : > { %s2581_s20 = smov %s2101_s22  ;;  %s2582_s21 = smov %s2105_s23 }
 0x1d5   : > { %s2583_s22 = smov %s2586_s25  ;;  %s2584_s23 = smov %s2590_s26 }
 0x1d6   :  { %14 = sbr.rel (!%p12_p0) target bundleno = 6 (0x6), region = 133 }

// kernel: res18_feature_forward.42
= control target key start
LH: loop header
LB: loop body
LE: loop exit
PB: predicated region body
PF: predicated region fallthrough
CT: control target
= control target key end

     0   :  { %s2049_s15 = smov 0   ;;  %s2051_s16 = smov 0   ;;  %s2472_s0 = inlined_call_operand.vmem [shape: bf16[8,4608], index: 0, kind: input, shape index: {}]   ;;  %s2473_s1 = inlined_call_operand.vmem [shape: bf16[4608,512], index: 1, kind: input, shape index: {}]   ;;  %s2474_s2 = inlined_call_operand.vmem [shape: f32[1,512], index: 2, kind: input, shape index: {}]   ;;  %s2475_s3 = inlined_call_operand.vmem [shape: f32[1,512], index: 3, kind: input, shape index: {}]   ;;  %s2476_s4 = inlined_call_operand.vmem [shape: bf16[8,512], index: 4, kind: output, shape index: {}]  }
   0x1   :  { %s2053_s17 = smov 0   ;;  %s2055_s18 = smov 0  }
   0x2   :  { %s2057_s19 = smov 0   ;;  %s2059_s20 = smov 0  }
   0x3   :  { %s2061_s21 = smov 0  }
   0x4 LB: > { %s26_s22 = sadd.s32 1, %s2013_s19  ;;  %s33_s23 = sadd.s32 1, %s2017_s20  ;;  %s2021_s21 = sphi %s2061_s21, %s14_s21   ;;  %s2017_s20 = sphi %s2059_s20, %s2482_s20   ;;  %s2013_s19 = sphi %s2057_s19, %s2481_s19   ;;  %s2009_s18 = sphi %s2055_s18, %s2480_s18   ;;  %s2005_s17 = sphi %s2053_s17, %s2479_s17   ;;  %s2001_s16 = sphi %s2051_s16, %s2478_s16   ;;  %s1997_s15 = sphi %s2049_s15, %s2477_s15  }
   0x5   : > { %p27_p0 = scmp.ge.s32.totalorder %s26_s22, 6  ;;  %p77_p1 = scmp.ne.s32.totalorder %s2001_s16, %s1997_s15 }
   0x6   : > { %p78_p2 = scmp.eq.s32.totalorder %s2021_s21, 0  ;;  %s70_s27 = sadd.s32 1, %s2001_s16 }
   0x7   : > { %s2484_s22 = smov (%p27_p0, %s26_s22), 0  ;;  %s2486_s23 = smov (!%p27_p0, %s33_s23), %s2017_s20 }
   0x8   : > { %p79_p3 = por %p78_p2, %p77_p1  ;;  %p35_p4 = scmp.ge.s32.totalorder %s2486_s23, 2 }
   0x9   : > { %s65_s24 = ssub.s32 %s2013_s19, %s2484_s22  ;;  %p1639_p6 = scmp.ge.s32.totalorder %s2021_s21, 12 }
   0xa   : > { %s2488_s23 = smov (%p35_p4, %s2486_s23), 0 }
   0xb   : > { %s66_s25 = ssub.s32 %s2017_s20, %s2488_s23  ;;  %183 = sbr.rel (%p1639_p6) target bundleno = 74 (0x4a), region = 16 }
   0xc   : > { %s67_s26 = sor.u32 %s66_s25, %s65_s24 }
   0xd   : > { %p68_p5 = scmp.eq.s32.totalorder %s67_s26, 0 }
   0xf   : > { %s2100_s28 = scalar_select %p68_p5, %s2001_s16, %s70_s27  }
  0x12   : > { %199 = sbr.rel (!%p79_p3) target bundleno = 74 (0x4a), region = 24  ;;  %s201_s29 = sand.u32 (%p79_p3), 1, %s2001_s16  }
  0x13   : > { %s1758_s30 = smul.u32 (%p79_p3), 768, %s201_s29  ;;  %s1640_s5 = sshll.u32 (%p79_p3), %s2017_s20, 1 }
  0x14   : > { %s1756_s6 = smul.u32 (%p79_p3), 384, %s2013_s19 }
  0x15   : > { %s2114_s12 = scalar_lea.vmem (%p79_p3), [#allocation3], %s1758_s30 }
  0x16   : > { %s207_s7 = sadd.s32 (%p79_p3), %s1756_s6, %s1640_s5 }
  0x17   : > { %s1642_s8 = sshll.u32 (%p79_p3), %s207_s7, 2 }
  0x18   : > { %s2109_s11 = scalar_lea.vmem (%p79_p3), %s2473_s1, %s1642_s8 }
  0x19   : > { %v427_v0 = vld [vmem:[%s2109_s11] sm:$0xff]  ;;  %v429_v1 = vld [vmem:[%s2109_s11 + $0x10] sm:$0xff] }
  0x1a   : > { %v431_v2 = vld [vmem:[%s2109_s11 + $0x20] sm:$0xff]  ;;  %428 = vst [vmem:[%s2114_s12] sm:$0xff] %v427_v0  ;;  %430 = vst [vmem:[%s2114_s12 + $0x8] sm:$0xff] %v429_v1  ;;  %v433_v3 = vld [vmem:[%s2109_s11 + $0x30] sm:$0xff] }
  0x1b   : > { %432 = vst [vmem:[%s2114_s12 + $0x10] sm:$0xff] %v431_v2  ;;  %v435_v4 = vld [vmem:[%s2109_s11 + $0x40] sm:$0xff]  ;;  %v437_v5 = vld [vmem:[%s2109_s11 + $0x50] sm:$0xff]  ;;  %434 = vst [vmem:[%s2114_s12 + $0x18] sm:$0xff] %v433_v3 }
  0x1c   : > { %436 = vst [vmem:[%s2114_s12 + $0x20] sm:$0xff] %v435_v4  ;;  %438 = vst [vmem:[%s2114_s12 + $0x28] sm:$0xff] %v437_v5  ;;  %v439_v6 = vld [vmem:[%s2109_s11 + $0x60] sm:$0xff]  ;;  %v441_v7 = vld [vmem:[%s2109_s11 + $0x70] sm:$0xff] }
  0x1d   : > { %v443_v8 = vld [vmem:[%s2109_s11 + $0x80] sm:$0xff]  ;;  %440 = vst [vmem:[%s2114_s12 + $0x30] sm:$0xff] %v439_v6  ;;  %442 = vst [vmem:[%s2114_s12 + $0x38] sm:$0xff] %v441_v7  ;;  %v445_v9 = vld [vmem:[%s2109_s11 + $0x90] sm:$0xff] }
  0x1e   : > { %444 = vst [vmem:[%s2114_s12 + $0x40] sm:$0xff] %v443_v8  ;;  %v447_v10 = vld [vmem:[%s2109_s11 + $0xa0] sm:$0xff]  ;;  %v449_v11 = vld [vmem:[%s2109_s11 + $0xb0] sm:$0xff]  ;;  %446 = vst [vmem:[%s2114_s12 + $0x48] sm:$0xff] %v445_v9 }
  0x1f   : > { %448 = vst [vmem:[%s2114_s12 + $0x50] sm:$0xff] %v447_v10  ;;  %450 = vst [vmem:[%s2114_s12 + $0x58] sm:$0xff] %v449_v11  ;;  %v451_v12 = vld [vmem:[%s2109_s11 + $0xc0] sm:$0xff]  ;;  %v453_v13 = vld [vmem:[%s2109_s11 + $0xd0] sm:$0xff] }
  0x20   : > { %v455_v14 = vld [vmem:[%s2109_s11 + $0xe0] sm:$0xff]  ;;  %452 = vst [vmem:[%s2114_s12 + $0x60] sm:$0xff] %v451_v12  ;;  %454 = vst [vmem:[%s2114_s12 + $0x68] sm:$0xff] %v453_v13  ;;  %v457_v15 = vld [vmem:[%s2109_s11 + $0xf0] sm:$0xff] }
  0x21   : > { %456 = vst [vmem:[%s2114_s12 + $0x70] sm:$0xff] %v455_v14  ;;  %v459_v16 = vld [vmem:[%s2109_s11 + $0x100] sm:$0xff]  ;;  %v461_v17 = vld [vmem:[%s2109_s11 + $0x110] sm:$0xff]  ;;  %458 = vst [vmem:[%s2114_s12 + $0x78] sm:$0xff] %v457_v15 }
  0x22   : > { %460 = vst [vmem:[%s2114_s12 + $0x80] sm:$0xff] %v459_v16  ;;  %462 = vst [vmem:[%s2114_s12 + $0x88] sm:$0xff] %v461_v17  ;;  %v463_v18 = vld [vmem:[%s2109_s11 + $0x120] sm:$0xff]  ;;  %v465_v19 = vld [vmem:[%s2109_s11 + $0x130] sm:$0xff] }
  0x23   : > { %v467_v20 = vld [vmem:[%s2109_s11 + $0x140] sm:$0xff]  ;;  %464 = vst [vmem:[%s2114_s12 + $0x90] sm:$0xff] %v463_v18  ;;  %466 = vst [vmem:[%s2114_s12 + $0x98] sm:$0xff] %v465_v19  ;;  %v469_v21 = vld [vmem:[%s2109_s11 + $0x150] sm:$0xff] }
  0x24   : > { %468 = vst [vmem:[%s2114_s12 + $0xa0] sm:$0xff] %v467_v20  ;;  %v471_v22 = vld [vmem:[%s2109_s11 + $0x160] sm:$0xff]  ;;  %v473_v23 = vld [vmem:[%s2109_s11 + $0x170] sm:$0xff]  ;;  %470 = vst [vmem:[%s2114_s12 + $0xa8] sm:$0xff] %v469_v21 }
  0x25   : > { %472 = vst [vmem:[%s2114_s12 + $0xb0] sm:$0xff] %v471_v22  ;;  %474 = vst [vmem:[%s2114_s12 + $0xb8] sm:$0xff] %v473_v23  ;;  %v475_v24 = vld [vmem:[%s2109_s11 + $0x180] sm:$0xff]  ;;  %v477_v25 = vld [vmem:[%s2109_s11 + $0x190] sm:$0xff] }
  0x26   : > { %v479_v26 = vld [vmem:[%s2109_s11 + $0x1a0] sm:$0xff]  ;;  %476 = vst [vmem:[%s2114_s12 + $0xc0] sm:$0xff] %v475_v24  ;;  %478 = vst [vmem:[%s2114_s12 + $0xc8] sm:$0xff] %v477_v25  ;;  %v481_v27 = vld [vmem:[%s2109_s11 + $0x1b0] sm:$0xff] }
  0x27   : > { %480 = vst [vmem:[%s2114_s12 + $0xd0] sm:$0xff] %v479_v26  ;;  %v483_v28 = vld [vmem:[%s2109_s11 + $0x1c0] sm:$0xff]  ;;  %v485_v29 = vld [vmem:[%s2109_s11 + $0x1d0] sm:$0xff]  ;;  %482 = vst [vmem:[%s2114_s12 + $0xd8] sm:$0xff] %v481_v27 }
  0x28   : > { %484 = vst [vmem:[%s2114_s12 + $0xe0] sm:$0xff] %v483_v28  ;;  %486 = vst [vmem:[%s2114_s12 + $0xe8] sm:$0xff] %v485_v29  ;;  %v487_v30 = vld [vmem:[%s2109_s11 + $0x1e0] sm:$0xff]  ;;  %v489_v31 = vld [vmem:[%s2109_s11 + $0x1f0] sm:$0xff] }
  0x29   : > { %v491_v32 = vld [vmem:[%s2109_s11 + $0x200] sm:$0xff]  ;;  %488 = vst [vmem:[%s2114_s12 + $0xf0] sm:$0xff] %v487_v30  ;;  %490 = vst [vmem:[%s2114_s12 + $0xf8] sm:$0xff] %v489_v31  ;;  %v493_v33 = vld [vmem:[%s2109_s11 + $0x210] sm:$0xff] }
  0x2a   : > { %492 = vst [vmem:[%s2114_s12 + $0x100] sm:$0xff] %v491_v32  ;;  %v495_v34 = vld [vmem:[%s2109_s11 + $0x220] sm:$0xff]  ;;  %v497_v35 = vld [vmem:[%s2109_s11 + $0x230] sm:$0xff]  ;;  %494 = vst [vmem:[%s2114_s12 + $0x108] sm:$0xff] %v493_v33 }
  0x2b   : > { %496 = vst [vmem:[%s2114_s12 + $0x110] sm:$0xff] %v495_v34  ;;  %498 = vst [vmem:[%s2114_s12 + $0x118] sm:$0xff] %v497_v35  ;;  %v499_v36 = vld [vmem:[%s2109_s11 + $0x240] sm:$0xff]  ;;  %v501_v37 = vld [vmem:[%s2109_s11 + $0x250] sm:$0xff] }
  0x2c   : > { %v503_v38 = vld [vmem:[%s2109_s11 + $0x260] sm:$0xff]  ;;  %500 = vst [vmem:[%s2114_s12 + $0x120] sm:$0xff] %v499_v36  ;;  %502 = vst [vmem:[%s2114_s12 + $0x128] sm:$0xff] %v501_v37  ;;  %v505_v39 = vld [vmem:[%s2109_s11 + $0x270] sm:$0xff] }
  0x2d   : > { %504 = vst [vmem:[%s2114_s12 + $0x130] sm:$0xff] %v503_v38  ;;  %v507_v40 = vld [vmem:[%s2109_s11 + $0x280] sm:$0xff]  ;;  %v509_v41 = vld [vmem:[%s2109_s11 + $0x290] sm:$0xff]  ;;  %506 = vst [vmem:[%s2114_s12 + $0x138] sm:$0xff] %v505_v39 }
  0x2e   : > { %508 = vst [vmem:[%s2114_s12 + $0x140] sm:$0xff] %v507_v40  ;;  %510 = vst [vmem:[%s2114_s12 + $0x148] sm:$0xff] %v509_v41  ;;  %v511_v42 = vld [vmem:[%s2109_s11 + $0x2a0] sm:$0xff]  ;;  %v513_v43 = vld [vmem:[%s2109_s11 + $0x2b0] sm:$0xff] }
  0x2f   : > { %v515_v44 = vld [vmem:[%s2109_s11 + $0x2c0] sm:$0xff]  ;;  %512 = vst [vmem:[%s2114_s12 + $0x150] sm:$0xff] %v511_v42  ;;  %514 = vst [vmem:[%s2114_s12 + $0x158] sm:$0xff] %v513_v43  ;;  %v517_v45 = vld [vmem:[%s2109_s11 + $0x2d0] sm:$0xff] }
  0x30   : > { %516 = vst [vmem:[%s2114_s12 + $0x160] sm:$0xff] %v515_v44  ;;  %v519_v46 = vld [vmem:[%s2109_s11 + $0x2e0] sm:$0xff]  ;;  %v521_v47 = vld [vmem:[%s2109_s11 + $0x2f0] sm:$0xff]  ;;  %518 = vst [vmem:[%s2114_s12 + $0x168] sm:$0xff] %v517_v45 }
  0x31   : > { %520 = vst [vmem:[%s2114_s12 + $0x170] sm:$0xff] %v519_v46  ;;  %522 = vst [vmem:[%s2114_s12 + $0x178] sm:$0xff] %v521_v47  ;;  %v523_v48 = vld [vmem:[%s2109_s11 + $0x300] sm:$0xff]  ;;  %v525_v49 = vld [vmem:[%s2109_s11 + $0x310] sm:$0xff] }
  0x32   : > { %v527_v50 = vld [vmem:[%s2109_s11 + $0x320] sm:$0xff]  ;;  %524 = vst [vmem:[%s2114_s12 + $0x180] sm:$0xff] %v523_v48  ;;  %526 = vst [vmem:[%s2114_s12 + $0x188] sm:$0xff] %v525_v49  ;;  %v529_v51 = vld [vmem:[%s2109_s11 + $0x330] sm:$0xff] }
  0x33   : > { %528 = vst [vmem:[%s2114_s12 + $0x190] sm:$0xff] %v527_v50  ;;  %v531_v52 = vld [vmem:[%s2109_s11 + $0x340] sm:$0xff]  ;;  %v533_v53 = vld [vmem:[%s2109_s11 + $0x350] sm:$0xff]  ;;  %530 = vst [vmem:[%s2114_s12 + $0x198] sm:$0xff] %v529_v51 }
  0x34   : > { %532 = vst [vmem:[%s2114_s12 + $0x1a0] sm:$0xff] %v531_v52  ;;  %534 = vst [vmem:[%s2114_s12 + $0x1a8] sm:$0xff] %v533_v53  ;;  %v535_v54 = vld [vmem:[%s2109_s11 + $0x360] sm:$0xff]  ;;  %v537_v55 = vld [vmem:[%s2109_s11 + $0x370] sm:$0xff] }
  0x35   : > { %v539_v56 = vld [vmem:[%s2109_s11 + $0x380] sm:$0xff]  ;;  %536 = vst [vmem:[%s2114_s12 + $0x1b0] sm:$0xff] %v535_v54  ;;  %538 = vst [vmem:[%s2114_s12 + $0x1b8] sm:$0xff] %v537_v55  ;;  %v541_v57 = vld [vmem:[%s2109_s11 + $0x390] sm:$0xff] }
  0x36   : > { %540 = vst [vmem:[%s2114_s12 + $0x1c0] sm:$0xff] %v539_v56  ;;  %v543_v58 = vld [vmem:[%s2109_s11 + $0x3a0] sm:$0xff]  ;;  %v545_v59 = vld [vmem:[%s2109_s11 + $0x3b0] sm:$0xff]  ;;  %542 = vst [vmem:[%s2114_s12 + $0x1c8] sm:$0xff] %v541_v57 }
  0x37   : > { %544 = vst [vmem:[%s2114_s12 + $0x1d0] sm:$0xff] %v543_v58  ;;  %546 = vst [vmem:[%s2114_s12 + $0x1d8] sm:$0xff] %v545_v59  ;;  %v547_v60 = vld [vmem:[%s2109_s11 + $0x3c0] sm:$0xff]  ;;  %v549_v61 = vld [vmem:[%s2109_s11 + $0x3d0] sm:$0xff] }
  0x38   : > { %v551_v62 = vld [vmem:[%s2109_s11 + $0x3e0] sm:$0xff]  ;;  %548 = vst [vmem:[%s2114_s12 + $0x1e0] sm:$0xff] %v547_v60  ;;  %550 = vst [vmem:[%s2114_s12 + $0x1e8] sm:$0xff] %v549_v61  ;;  %v553_v63 = vld [vmem:[%s2109_s11 + $0x3f0] sm:$0xff] }
  0x39   : > { %552 = vst [vmem:[%s2114_s12 + $0x1f0] sm:$0xff] %v551_v62  ;;  %v555_v0 = vld [vmem:[%s2109_s11 + $0x400] sm:$0xff]  ;;  %v557_v1 = vld [vmem:[%s2109_s11 + $0x410] sm:$0xff]  ;;  %554 = vst [vmem:[%s2114_s12 + $0x1f8] sm:$0xff] %v553_v63 }
  0x3a   : > { %556 = vst [vmem:[%s2114_s12 + $0x200] sm:$0xff] %v555_v0  ;;  %558 = vst [vmem:[%s2114_s12 + $0x208] sm:$0xff] %v557_v1  ;;  %v559_v2 = vld [vmem:[%s2109_s11 + $0x420] sm:$0xff]  ;;  %v561_v3 = vld [vmem:[%s2109_s11 + $0x430] sm:$0xff] }
  0x3b   : > { %v563_v4 = vld [vmem:[%s2109_s11 + $0x440] sm:$0xff]  ;;  %560 = vst [vmem:[%s2114_s12 + $0x210] sm:$0xff] %v559_v2  ;;  %562 = vst [vmem:[%s2114_s12 + $0x218] sm:$0xff] %v561_v3  ;;  %v565_v5 = vld [vmem:[%s2109_s11 + $0x450] sm:$0xff] }
  0x3c   : > { %564 = vst [vmem:[%s2114_s12 + $0x220] sm:$0xff] %v563_v4  ;;  %v567_v6 = vld [vmem:[%s2109_s11 + $0x460] sm:$0xff]  ;;  %v569_v7 = vld [vmem:[%s2109_s11 + $0x470] sm:$0xff]  ;;  %566 = vst [vmem:[%s2114_s12 + $0x228] sm:$0xff] %v565_v5 }
  0x3d   : > { %568 = vst [vmem:[%s2114_s12 + $0x230] sm:$0xff] %v567_v6  ;;  %570 = vst [vmem:[%s2114_s12 + $0x238] sm:$0xff] %v569_v7  ;;  %v571_v8 = vld [vmem:[%s2109_s11 + $0x480] sm:$0xff]  ;;  %v573_v9 = vld [vmem:[%s2109_s11 + $0x490] sm:$0xff] }
  0x3e   : > { %v575_v10 = vld [vmem:[%s2109_s11 + $0x4a0] sm:$0xff]  ;;  %572 = vst [vmem:[%s2114_s12 + $0x240] sm:$0xff] %v571_v8  ;;  %574 = vst [vmem:[%s2114_s12 + $0x248] sm:$0xff] %v573_v9  ;;  %v577_v11 = vld [vmem:[%s2109_s11 + $0x4b0] sm:$0xff] }
  0x3f   : > { %576 = vst [vmem:[%s2114_s12 + $0x250] sm:$0xff] %v575_v10  ;;  %v579_v12 = vld [vmem:[%s2109_s11 + $0x4c0] sm:$0xff]  ;;  %v581_v13 = vld [vmem:[%s2109_s11 + $0x4d0] sm:$0xff]  ;;  %578 = vst [vmem:[%s2114_s12 + $0x258] sm:$0xff] %v577_v11 }
  0x40   : > { %580 = vst [vmem:[%s2114_s12 + $0x260] sm:$0xff] %v579_v12  ;;  %582 = vst [vmem:[%s2114_s12 + $0x268] sm:$0xff] %v581_v13  ;;  %v583_v14 = vld [vmem:[%s2109_s11 + $0x4e0] sm:$0xff]  ;;  %v585_v15 = vld [vmem:[%s2109_s11 + $0x4f0] sm:$0xff] }
  0x41   : > { %v587_v16 = vld [vmem:[%s2109_s11 + $0x500] sm:$0xff]  ;;  %584 = vst [vmem:[%s2114_s12 + $0x270] sm:$0xff] %v583_v14  ;;  %586 = vst [vmem:[%s2114_s12 + $0x278] sm:$0xff] %v585_v15  ;;  %v589_v17 = vld [vmem:[%s2109_s11 + $0x510] sm:$0xff] }
  0x42   : > { %588 = vst [vmem:[%s2114_s12 + $0x280] sm:$0xff] %v587_v16  ;;  %v591_v18 = vld [vmem:[%s2109_s11 + $0x520] sm:$0xff]  ;;  %v593_v19 = vld [vmem:[%s2109_s11 + $0x530] sm:$0xff]  ;;  %590 = vst [vmem:[%s2114_s12 + $0x288] sm:$0xff] %v589_v17 }
  0x43   : > { %592 = vst [vmem:[%s2114_s12 + $0x290] sm:$0xff] %v591_v18  ;;  %594 = vst [vmem:[%s2114_s12 + $0x298] sm:$0xff] %v593_v19  ;;  %v595_v20 = vld [vmem:[%s2109_s11 + $0x540] sm:$0xff]  ;;  %v597_v21 = vld [vmem:[%s2109_s11 + $0x550] sm:$0xff] }
  0x44   : > { %v599_v22 = vld [vmem:[%s2109_s11 + $0x560] sm:$0xff]  ;;  %596 = vst [vmem:[%s2114_s12 + $0x2a0] sm:$0xff] %v595_v20  ;;  %598 = vst [vmem:[%s2114_s12 + $0x2a8] sm:$0xff] %v597_v21  ;;  %v601_v23 = vld [vmem:[%s2109_s11 + $0x570] sm:$0xff] }
  0x45   : > { %600 = vst [vmem:[%s2114_s12 + $0x2b0] sm:$0xff] %v599_v22  ;;  %v603_v24 = vld [vmem:[%s2109_s11 + $0x580] sm:$0xff]  ;;  %v605_v25 = vld [vmem:[%s2109_s11 + $0x590] sm:$0xff]  ;;  %602 = vst [vmem:[%s2114_s12 + $0x2b8] sm:$0xff] %v601_v23 }
  0x46   : > { %604 = vst [vmem:[%s2114_s12 + $0x2c0] sm:$0xff] %v603_v24  ;;  %606 = vst [vmem:[%s2114_s12 + $0x2c8] sm:$0xff] %v605_v25  ;;  %v607_v26 = vld [vmem:[%s2109_s11 + $0x5a0] sm:$0xff]  ;;  %v609_v27 = vld [vmem:[%s2109_s11 + $0x5b0] sm:$0xff] }
  0x47   : > { %v611_v28 = vld [vmem:[%s2109_s11 + $0x5c0] sm:$0xff]  ;;  %608 = vst [vmem:[%s2114_s12 + $0x2d0] sm:$0xff] %v607_v26  ;;  %610 = vst [vmem:[%s2114_s12 + $0x2d8] sm:$0xff] %v609_v27  ;;  %v613_v29 = vld [vmem:[%s2109_s11 + $0x5d0] sm:$0xff] }
  0x48   : > { %612 = vst [vmem:[%s2114_s12 + $0x2e0] sm:$0xff] %v611_v28  ;;  %v615_v30 = vld [vmem:[%s2109_s11 + $0x5e0] sm:$0xff]  ;;  %v617_v31 = vld [vmem:[%s2109_s11 + $0x5f0] sm:$0xff]  ;;  %614 = vst [vmem:[%s2114_s12 + $0x2e8] sm:$0xff] %v613_v29 }
  0x49   : > { %616 = vst [vmem:[%s2114_s12 + $0x2f0] sm:$0xff] %v615_v30  ;;  %618 = vst [vmem:[%s2114_s12 + $0x2f8] sm:$0xff] %v617_v31 }
  0x4a PF: > { %p1643_p7 = scmp.ge.s32.totalorder %s2021_s21, 1  ;;  %p639_p8 = scmp.lt.s32.totalorder %s2021_s21, 13 }
  0x4c   : > { %p640_p9 = pnand %p1643_p7, %p639_p8 }
  0x4d   : > { %s646_s13 = sand.u32 (!%p640_p9), 1, %s1997_s15   ;;  %s692_s14 = smul.u32 (!%p640_p9), 6, %s2005_s17 }
  0x4e   : > { %643 = sbr.rel (%p640_p9) target bundleno = 458 (0x1ca), region = 70  ;;  %s1645_s25 = sshll.u32 (!%p640_p9), %s2009_s18, 1 }
  0x4f   : > { %s1759_s24 = smul.u32 (!%p640_p9), 768, %s646_s13  ;;  %p695_p10 = scmp.lt.s32.totalorder (!%p640_p9), %s692_s14, 35 }
  0x50   : > { %p705_p11 = scmp.lt.s32.totalorder (!%p640_p9), %s1645_s25, 3  ;;  %p1649_p12 = scmp.ne.s32.totalorder (!%p640_p9), %s2005_s17, 0 }
  0x51   : > { %s2331_s13 = scalar_lea.vmem (!%p640_p9), [#allocation3], %s1759_s24 }
  0x55   : > { %s2490_s14 = smov (!%p695_p10, %s692_s14), 35  ;;  %s2492_s25 = smov (!%p705_p11, %s1645_s25), 3 }
  0x56   : > { %s1644_s26 = sshll.u32 %s2490_s14, 2  ;;  %s707_s15 = scalar_lea.vmem %s2474_s2, %s2492_s25  ;;  %v2023_v32 = vmov (!%p1649_p12), 0.0  }
  0x57   : > { %s2315_s30 = scalar_lea.vmem %s2472_s0, %s1644_s26  ;;  %s712_s8 = scalar_lea.vmem %s2475_s3, %s2492_s25  ;;  %728 = vst [vmem:[#allocation2] sm:$0xff] (!%p1649_p12), %v2023_v32  ;;  %729 = vst [vmem:[#allocation2 + $0x8] sm:$0xff] (!%p1649_p12), %v2023_v32 }
  0x58   : > { %s1648_s9 = sshll.u32 %s2492_s25, 2  ;;  %727 = sbr.rel (%p1649_p12) target bundleno = 95 (0x5f), region = 78 }
  0x59   : > { %s2329_s12 = scalar_lea.vmem %s2476_s4, %s1648_s9 }
  0x5f PF: > { %v1817_v33 = vld [vmem:[%s2331_s13 + $0x4] ss:$8 sps:$4 sm:$0xff]   ;;  %v1821_v35 = vld [vmem:[%s2331_s13] ss:$8 sps:$4 sm:$0xff]   ;;  %v1823_v37 = vld [vmem:[%s2331_s13 + $0x14] ss:$8 sps:$4 sm:$0xff]  }
  0x60   : > { %v1819_v34 = vld [vmem:[%s2331_s13 + $0x104] ss:$8 sps:$4 sm:$0xff]   ;;  %1332 = vmatprep.subr.bf16.mxu0 %v1817_v33  ;;  %v1822_v36 = vld [vmem:[%s2331_s13 + $0x100] ss:$8 sps:$4 sm:$0xff]   ;;  %v1825_v38 = vld [vmem:[%s2331_s13 + $0x114] ss:$8 sps:$4 sm:$0xff]  }
  0x61   : > { %1373 = vmatprep.subr.bf16.mxu1 %v1819_v34  ;;  %1333 = vmatpush1.bf16.msra.mxu0 %v1821_v35  ;;  %v1827_v39 = vld [vmem:[%s2331_s13 + $0x10] ss:$8 sps:$4 sm:$0xff]   ;;  %v1829_v41 = vld [vmem:[%s2331_s13 + $0x24] ss:$8 sps:$4 sm:$0xff]   ;;  %v1833_v43 = vld [vmem:[%s2331_s13 + $0x20] ss:$8 sps:$4 sm:$0xff]  }
  0x62   : > { %1374 = vmatpush1.bf16.msra.mxu1 %v1822_v36  ;;  %1334 = vmatprep.subr.bf16.mxu0 %v1823_v37  ;;  %v1828_v40 = vld [vmem:[%s2331_s13 + $0x110] ss:$8 sps:$4 sm:$0xff]   ;;  %v1831_v42 = vld [vmem:[%s2331_s13 + $0x124] ss:$8 sps:$4 sm:$0xff]   ;;  %v1834_v44 = vld [vmem:[%s2331_s13 + $0x120] ss:$8 sps:$4 sm:$0xff]  }
  0x63   : > { %1375 = vmatprep.subr.bf16.mxu1 %v1825_v38  ;;  %v1835_v45 = vld [vmem:[%s2331_s13 + $0x34] ss:$8 sps:$4 sm:$0xff]   ;;  %v1839_v47 = vld [vmem:[%s2331_s13 + $0x30] ss:$8 sps:$4 sm:$0xff]   ;;  %v1841_v49 = vld [vmem:[%s2331_s13 + $0x44] ss:$8 sps:$4 sm:$0xff]  }
  0x64   : > { %v1837_v46 = vld [vmem:[%s2331_s13 + $0x134] ss:$8 sps:$4 sm:$0xff]   ;;  %v1840_v48 = vld [vmem:[%s2331_s13 + $0x130] ss:$8 sps:$4 sm:$0xff]   ;;  %v1843_v50 = vld [vmem:[%s2331_s13 + $0x144] ss:$8 sps:$4 sm:$0xff]  }
  0x65   : > { %1335 = vmatpush1.bf16.msra.mxu0 %v1827_v39  ;;  %v1845_v51 = vld [vmem:[%s2331_s13 + $0x40] ss:$8 sps:$4 sm:$0xff]   ;;  %v1847_v53 = vld [vmem:[%s2331_s13 + $0x54] ss:$8 sps:$4 sm:$0xff]   ;;  %v1851_v55 = vld [vmem:[%s2331_s13 + $0x50] ss:$8 sps:$4 sm:$0xff]  }
  0x66   : > { %1376 = vmatpush1.bf16.msra.mxu1 %v1828_v40  ;;  %1336 = vmatprep.subr.bf16.mxu0 %v1829_v41  ;;  %v1846_v52 = vld [vmem:[%s2331_s13 + $0x140] ss:$8 sps:$4 sm:$0xff]   ;;  %v1849_v54 = vld [vmem:[%s2331_s13 + $0x154] ss:$8 sps:$4 sm:$0xff]   ;;  %v1852_v56 = vld [vmem:[%s2331_s13 + $0x150] ss:$8 sps:$4 sm:$0xff]  }
  0x67   : > { %1377 = vmatprep.subr.bf16.mxu1 %v1831_v42  ;;  %v1853_v57 = vld [vmem:[%s2331_s13 + $0x64] ss:$8 sps:$4 sm:$0xff]   ;;  %v1857_v59 = vld [vmem:[%s2331_s13 + $0x60] ss:$8 sps:$4 sm:$0xff]   ;;  %v1859_v61 = vld [vmem:[%s2331_s13 + $0x74] ss:$8 sps:$4 sm:$0xff]  }
  0x68   : > { %v1855_v58 = vld [vmem:[%s2331_s13 + $0x164] ss:$8 sps:$4 sm:$0xff]   ;;  %v1858_v60 = vld [vmem:[%s2331_s13 + $0x160] ss:$8 sps:$4 sm:$0xff]   ;;  %v1861_v62 = vld [vmem:[%s2331_s13 + $0x174] ss:$8 sps:$4 sm:$0xff]  }
  0x69   : > { %1337 = vmatpush1.bf16.msra.mxu0 %v1833_v43  ;;  %v1863_v63 = vld [vmem:[%s2331_s13 + $0x70] ss:$8 sps:$4 sm:$0xff]   ;;  %v1865_v1 = vld [vmem:[%s2331_s13 + $0x84] ss:$8 sps:$4 sm:$0xff]   ;;  %v1869_v3 = vld [vmem:[%s2331_s13 + $0x80] ss:$8 sps:$4 sm:$0xff]  }
  0x6a   : > { %1378 = vmatpush1.bf16.msra.mxu1 %v1834_v44  ;;  %1338 = vmatprep.subr.bf16.mxu0 %v1835_v45  ;;  %v1864_v0 = vld [vmem:[%s2331_s13 + $0x170] ss:$8 sps:$4 sm:$0xff]   ;;  %v1867_v2 = vld [vmem:[%s2331_s13 + $0x184] ss:$8 sps:$4 sm:$0xff]   ;;  %v1870_v4 = vld [vmem:[%s2331_s13 + $0x180] ss:$8 sps:$4 sm:$0xff]  }
  0x6b   : > { %1379 = vmatprep.subr.bf16.mxu1 %v1837_v46  ;;  %v1871_v5 = vld [vmem:[%s2331_s13 + $0x94] ss:$8 sps:$4 sm:$0xff]   ;;  %v1875_v7 = vld [vmem:[%s2331_s13 + $0x90] ss:$8 sps:$4 sm:$0xff]   ;;  %v1877_v9 = vld [vmem:[%s2331_s13 + $0xa4] ss:$8 sps:$4 sm:$0xff]  }
  0x6c   : > { %v1873_v6 = vld [vmem:[%s2331_s13 + $0x194] ss:$8 sps:$4 sm:$0xff]   ;;  %v1876_v8 = vld [vmem:[%s2331_s13 + $0x190] ss:$8 sps:$4 sm:$0xff]   ;;  %v1879_v10 = vld [vmem:[%s2331_s13 + $0x1a4] ss:$8 sps:$4 sm:$0xff]  }
  0x6d   : > { %1339 = vmatpush1.bf16.msra.mxu0 %v1839_v47  ;;  %v1881_v11 = vld [vmem:[%s2331_s13 + $0xa0] ss:$8 sps:$4 sm:$0xff]   ;;  %v1883_v13 = vld [vmem:[%s2331_s13 + $0xb4] ss:$8 sps:$4 sm:$0xff]   ;;  %v1887_v18 = vld [vmem:[%s2331_s13 + $0xb0] ss:$8 sps:$4 sm:$0xff]  }
  0x6e   : > { %1380 = vmatpush1.bf16.msra.mxu1 %v1840_v48  ;;  %1340 = vmatprep.subr.bf16.mxu0 %v1841_v49  ;;  %v1882_v12 = vld [vmem:[%s2331_s13 + $0x1a0] ss:$8 sps:$4 sm:$0xff]   ;;  %v1885_v14 = vld [vmem:[%s2331_s13 + $0x1b4] ss:$8 sps:$4 sm:$0xff]   ;;  %v1888_v19 = vld [vmem:[%s2331_s13 + $0x1b0] ss:$8 sps:$4 sm:$0xff]  }
  0x6f   : > { %1381 = vmatprep.subr.bf16.mxu1 %v1843_v50  ;;  %v732_v15 = vld [vmem:[%s2315_s30] sm:$0xff]  ;;  %v733_v17 = vld [vmem:[%s2315_s30 + $0x8] sm:$0xff]  ;;  %v1889_v21 = vld [vmem:[%s2331_s13 + $0xc4] ss:$8 sps:$4 sm:$0xff]   ;;  %p1752_p13 = scmp.ne.s32.totalorder %s2005_s17, 5 }
  0x70   : > { %v1651_v16 = vcombine.high %v732_v15, %v732_v15  ;;  %v1653_v20 = vcombine.high %v733_v17, %v733_v17  ;;  %v1891_v22 = vld [vmem:[%s2331_s13 + $0x1c4] ss:$8 sps:$4 sm:$0xff]   ;;  %v1893_v23 = vld [vmem:[%s2331_s13 + $0xc0] ss:$8 sps:$4 sm:$0xff]   ;;  %v1895_v25 = vld [vmem:[%s2331_s13 + $0xd4] ss:$8 sps:$4 sm:$0xff]   ;;  %v1650_v38 = vcombine.low %v732_v15, %v732_v15  ;;  %v1652_v39 = vcombine.low %v733_v17, %v733_v17 }
  0x71   : > { %1341 = vmatpush1.bf16.msra.mxu0 %v1845_v51  ;;  %v1894_v24 = vld [vmem:[%s2331_s13 + $0x1c0] ss:$8 sps:$4 sm:$0xff]   ;;  %v1897_v26 = vld [vmem:[%s2331_s13 + $0x1d4] ss:$8 sps:$4 sm:$0xff]   ;;  %v1899_v27 = vld [vmem:[%s2331_s13 + $0xd0] ss:$8 sps:$4 sm:$0xff]  }
  0x72   : > { %1382 = vmatpush1.bf16.msra.mxu1 %v1846_v52  ;;  %1342 = vmatprep.subr.bf16.mxu0 %v1847_v53  ;;  %v1900_v28 = vld [vmem:[%s2331_s13 + $0x1d0] ss:$8 sps:$4 sm:$0xff]   ;;  %v1901_v29 = vld [vmem:[%s2331_s13 + $0xe4] ss:$8 sps:$4 sm:$0xff]   ;;  %v1905_v31 = vld [vmem:[%s2331_s13 + $0xe0] ss:$8 sps:$4 sm:$0xff]  }
  0x73   : > { %1383 = vmatprep.subr.bf16.mxu1 %v1849_v54  ;;  %1364 = vmatprep.mubr.bf16.mxu0 %v1651_v16  ;;  %v1903_v30 = vld [vmem:[%s2331_s13 + $0x1e4] ss:$8 sps:$4 sm:$0xff]   ;;  %v1906_v32 = vld [vmem:[%s2331_s13 + $0x1e0] ss:$8 sps:$4 sm:$0xff]   ;;  %v1907_v33 = vld [vmem:[%s2331_s13 + $0xf4] ss:$8 sps:$4 sm:$0xff]  }
  0x74   : > { %1405 = vmatprep.mubr.bf16.mxu1 %v1653_v20  ;;  %v1909_v34 = vld [vmem:[%s2331_s13 + $0x1f4] ss:$8 sps:$4 sm:$0xff]   ;;  %v1911_v35 = vld [vmem:[%s2331_s13 + $0xf0] ss:$8 sps:$4 sm:$0xff]   ;;  %v1919_v37 = vld [vmem:[%s2331_s13 + $0x204] ss:$8 sps:$4 sm:$0xff]  }
  0x75   : > { %1343 = vmatpush1.bf16.msra.mxu0 %v1851_v55  ;;  %v1912_v36 = vld [vmem:[%s2331_s13 + $0x1f0] ss:$8 sps:$4 sm:$0xff]   ;;  %v1917_v40 = vld [vmem:[%s2331_s13 + $0x200] ss:$8 sps:$4 sm:$0xff]   ;;  %v1922_v42 = vld [vmem:[%s2331_s13 + $0x214] ss:$8 sps:$4 sm:$0xff]  }
  0x76   : > { %1384 = vmatpush1.bf16.msra.mxu1 %v1852_v56  ;;  %1344 = vmatprep.subr.bf16.mxu0 %v1853_v57  ;;  %v2403_v41 = vld [vmem:[%s2315_s30 + $0x10] sm:$0xff]  ;;  %v1920_v44 = vld [vmem:[%s2331_s13 + $0x210] ss:$8 sps:$4 sm:$0xff]   ;;  %v1928_v47 = vld [vmem:[%s2331_s13 + $0x234] ss:$8 sps:$4 sm:$0xff]  }
  0x77   : > { %1385 = vmatprep.subr.bf16.mxu1 %v1855_v58  ;;  %v1655_v43 = vcombine.high %v2403_v41, %v2403_v41  ;;  %v1925_v45 = vld [vmem:[%s2331_s13 + $0x224] ss:$8 sps:$4 sm:$0xff]   ;;  %v1923_v46 = vld [vmem:[%s2331_s13 + $0x220] ss:$8 sps:$4 sm:$0xff]   ;;  %v1926_v48 = vld [vmem:[%s2331_s13 + $0x230] ss:$8 sps:$4 sm:$0xff]  }
  0x78   : > { %v1931_v49 = vld [vmem:[%s2331_s13 + $0x244] ss:$8 sps:$4 sm:$0xff]   ;;  %v1929_v50 = vld [vmem:[%s2331_s13 + $0x240] ss:$8 sps:$4 sm:$0xff]   ;;  %v1934_v51 = vld [vmem:[%s2331_s13 + $0x254] ss:$8 sps:$4 sm:$0xff]  }
  0x79   : > { %1345 = vmatpush1.bf16.msra.mxu0 %v1857_v59  ;;  %v1932_v52 = vld [vmem:[%s2331_s13 + $0x250] ss:$8 sps:$4 sm:$0xff]   ;;  %v1937_v53 = vld [vmem:[%s2331_s13 + $0x264] ss:$8 sps:$4 sm:$0xff]   ;;  %v1935_v54 = vld [vmem:[%s2331_s13 + $0x260] ss:$8 sps:$4 sm:$0xff]  }
  0x7a   : > { %1386 = vmatpush1.bf16.msra.mxu1 %v1858_v60  ;;  %1346 = vmatprep.subr.bf16.mxu0 %v1859_v61  ;;  %v1940_v55 = vld [vmem:[%s2331_s13 + $0x274] ss:$8 sps:$4 sm:$0xff]   ;;  %v1938_v56 = vld [vmem:[%s2331_s13 + $0x270] ss:$8 sps:$4 sm:$0xff]   ;;  %v1943_v57 = vld [vmem:[%s2331_s13 + $0x284] ss:$8 sps:$4 sm:$0xff]  }
  0x7b   : > { %1387 = vmatprep.subr.bf16.mxu1 %v1861_v62  ;;  %v1941_v58 = vld [vmem:[%s2331_s13 + $0x280] ss:$8 sps:$4 sm:$0xff]   ;;  %v1946_v59 = vld [vmem:[%s2331_s13 + $0x294] ss:$8 sps:$4 sm:$0xff]   ;;  %v1944_v60 = vld [vmem:[%s2331_s13 + $0x290] ss:$8 sps:$4 sm:$0xff]  }
  0x7c   : > { %v1949_v61 = vld [vmem:[%s2331_s13 + $0x2a4] ss:$8 sps:$4 sm:$0xff]   ;;  %v1947_v62 = vld [vmem:[%s2331_s13 + $0x2a0] ss:$8 sps:$4 sm:$0xff]   ;;  %v730_v20 = vld [vmem:[#allocation2] sm:$0xff] }
  0x7d   : > { %1347 = vmatpush1.bf16.msra.mxu0 %v1863_v63  ;;  %v1952_v63 = vld [vmem:[%s2331_s13 + $0x2b4] ss:$8 sps:$4 sm:$0xff]  }
  0x7e   : > { %1388 = vmatpush1.bf16.msra.mxu1 %v1864_v0  ;;  %1348 = vmatprep.subr.bf16.mxu0 %v1865_v1  ;;  %v1950_v0 = vld [vmem:[%s2331_s13 + $0x2b0] ss:$8 sps:$4 sm:$0xff]   ;;  %v1955_v1 = vld [vmem:[%s2331_s13 + $0x2c4] ss:$8 sps:$4 sm:$0xff]  }
  0x7f   : > { %1389 = vmatprep.subr.bf16.mxu1 %v1867_v2  ;;  %v1953_v2 = vld [vmem:[%s2331_s13 + $0x2c0] ss:$8 sps:$4 sm:$0xff]  }
  0x81   : > { %1349 = vmatpush1.bf16.msra.mxu0 %v1869_v3  ;;  %v1958_v3 = vld [vmem:[%s2331_s13 + $0x2d4] ss:$8 sps:$4 sm:$0xff]  }
  0x82   : > { %1390 = vmatpush1.bf16.msra.mxu1 %v1870_v4  ;;  %1350 = vmatprep.subr.bf16.mxu0 %v1871_v5  ;;  %v1956_v4 = vld [vmem:[%s2331_s13 + $0x2d0] ss:$8 sps:$4 sm:$0xff]   ;;  %v1961_v5 = vld [vmem:[%s2331_s13 + $0x2e4] ss:$8 sps:$4 sm:$0xff]  }
  0x83   : > { %1391 = vmatprep.subr.bf16.mxu1 %v1873_v6  ;;  %v1959_v6 = vld [vmem:[%s2331_s13 + $0x2e0] ss:$8 sps:$4 sm:$0xff]  }
  0x85   : > { %1351 = vmatpush1.bf16.msra.mxu0 %v1875_v7  ;;  %v1964_v7 = vld [vmem:[%s2331_s13 + $0x2f4] ss:$8 sps:$4 sm:$0xff]  }
  0x86   : > { %1392 = vmatpush1.bf16.msra.mxu1 %v1876_v8  ;;  %1352 = vmatprep.subr.bf16.mxu0 %v1877_v9  ;;  %v1962_v8 = vld [vmem:[%s2331_s13 + $0x2f0] ss:$8 sps:$4 sm:$0xff]   ;;  %v1654_v9 = vcombine.low %v2403_v41, %v2403_v41 }
  0x87   : > { %1393 = vmatprep.subr.bf16.mxu1 %v1879_v10 }
  0x89   : > { %1353 = vmatpush1.bf16.msra.mxu0 %v1881_v11 }
  0x8a   : > { %1394 = vmatpush1.bf16.msra.mxu1 %v1882_v12  ;;  %1354 = vmatprep.subr.bf16.mxu0 %v1883_v13 }
  0x8b   : > { %1395 = vmatprep.subr.bf16.mxu1 %v1885_v14 }
  0x8d   : > { %1355 = vmatpush1.bf16.msra.mxu0 %v1887_v18 }
  0x8e   : > { %1396 = vmatpush1.bf16.msra.mxu1 %v1888_v19  ;;  %1356 = vmatprep.subr.bf16.mxu0 %v1889_v21 }
  0x8f   : > { %1397 = vmatprep.subr.bf16.mxu1 %v1891_v22 }
  0x91   : > { %1357 = vmatpush1.bf16.msra.mxu0 %v1893_v23  ;;  %v731_v23 = vld [vmem:[#allocation2 + $0x8] sm:$0xff] }
  0x92   : > { %1398 = vmatpush1.bf16.msra.mxu1 %v1894_v24  ;;  %1358 = vmatprep.subr.bf16.mxu0 %v1895_v25 }
  0x93   : > { %1399 = vmatprep.subr.bf16.mxu1 %v1897_v26 }
  0x95   : > { %1359 = vmatpush1.bf16.msra.mxu0 %v1899_v27 }
  0x96   : > { %1400 = vmatpush1.bf16.msra.mxu1 %v1900_v28  ;;  %1360 = vmatprep.subr.bf16.mxu0 %v1901_v29 }
  0x97   : > { %1401 = vmatprep.subr.bf16.mxu1 %v1903_v30  ;;  %v1467_v30 = vlaneseq (!%p1752_p13) }
  0x99   : > { %1361 = vmatpush1.bf16.msra.mxu0 %v1905_v31  ;;  %v1468_v31 = vshrl.u32 (!%p1752_p13), %v1467_v30, 7 }
  0x9a   : > { %1402 = vmatpush1.bf16.msra.mxu1 %v1906_v32  ;;  %1362 = vmatprep.subr.bf16.mxu0 %v1907_v33  ;;  %v1465_v32 = vld [vmem:[%s707_s15] sm:$0x3] (!%p1752_p13) }
  0x9b   : > { %1403 = vmatprep.subr.bf16.mxu1 %v1909_v34  ;;  %v1479_v33 = vld [vmem:[%s712_s8] sm:$0x3] (!%p1752_p13)  ;;  %v1469_v34 = vsub.s32 (!%p1752_p13), 0, %v1468_v31 }
  0x9d   : > { %1363 = vmatpush1.bf16.msra.mxu0 %v1911_v35  ;;  %v1473_v35 = vsub.s32 (!%p1752_p13), 1, %v1468_v31 }
  0x9e   : > { %1404 = vmatpush1.bf16.msra.mxu1 %v1912_v36  ;;  %1414 = vmatprep.subr.bf16.mxu0 %v1919_v37 }
  0x9f   : > { %v1488_v41 = vrot.slane (!%p1752_p13), %v1479_v33, %v1473_v35 }
  0xa0   : > { %1365 = vmatmul.mubr.bf16.vlgmr.msra.gmra.mrb[0].mxu0 %v1650_v38  ;;  %v1470_v38 = vrot.slane (!%p1752_p13), %v1465_v32, %v1469_v34 }
  0xa1   : > { %1406 = vmatmul.mubr.bf16.vlgmr.msra.gmra.mrb[0].mxu1 %v1652_v39  ;;  %1415 = vmatpush1.bf16.msra.mxu0 %v1917_v40  ;;  %v1474_v39 = vrot.slane (!%p1752_p13), %v1465_v32, %v1473_v35  ;;  %v1484_v40 = vrot.slane (!%p1752_p13), %v1479_v33, %v1469_v34 }
  0xa2   : > { %1446 = vmatprep.mubr.bf16.mxu0 %v1655_v43  ;;  %1416 = vmatprep.subr.bf16.mxu0 %v1922_v42 }
  0xa5   : > { %1417 = vmatpush1.bf16.msra.mxu0 %v1920_v44 }
  0xa6   : > { %1418 = vmatprep.subr.bf16.mxu0 %v1925_v45 }
  0xa9   : > { %1419 = vmatpush1.bf16.msra.mxu0 %v1923_v46 }
  0xaa   : > { %1420 = vmatprep.subr.bf16.mxu0 %v1928_v47 }
  0xad   : > { %1421 = vmatpush1.bf16.msra.mxu0 %v1926_v48 }
  0xae   : > { %1422 = vmatprep.subr.bf16.mxu0 %v1931_v49 }
  0xb1   : > { %1423 = vmatpush1.bf16.msra.mxu0 %v1929_v50 }
  0xb2   : > { %1424 = vmatprep.subr.bf16.mxu0 %v1934_v51 }
  0xb5   : > { %1425 = vmatpush1.bf16.msra.mxu0 %v1932_v52 }
  0xb6   : > { %1426 = vmatprep.subr.bf16.mxu0 %v1937_v53 }
  0xb9   : > { %1427 = vmatpush1.bf16.msra.mxu0 %v1935_v54 }
  0xba   : > { %1428 = vmatprep.subr.bf16.mxu0 %v1940_v55 }
  0xbd   : > { %1429 = vmatpush1.bf16.msra.mxu0 %v1938_v56 }
  0xbe   : > { %1430 = vmatprep.subr.bf16.mxu0 %v1943_v57 }
  0xc1   : > { %1431 = vmatpush1.bf16.msra.mxu0 %v1941_v58 }
  0xc2   : > { %1432 = vmatprep.subr.bf16.mxu0 %v1946_v59 }
  0xc5   : > { %1433 = vmatpush1.bf16.msra.mxu0 %v1944_v60 }
  0xc6   : > { %1434 = vmatprep.subr.bf16.mxu0 %v1949_v61 }
  0xc9   : > { %1435 = vmatpush1.bf16.msra.mxu0 %v1947_v62 }
  0xca   : > { %1436 = vmatprep.subr.bf16.mxu0 %v1952_v63 }
  0xcd   : > { %1437 = vmatpush1.bf16.msra.mxu0 %v1950_v0 }
  0xce   : > { %1438 = vmatprep.subr.bf16.mxu0 %v1955_v1 }
  0xd1   : > { %1439 = vmatpush1.bf16.msra.mxu0 %v1953_v2 }
  0xd2   : > { %1440 = vmatprep.subr.bf16.mxu0 %v1958_v3 }
  0xd5   : > { %1441 = vmatpush1.bf16.msra.mxu0 %v1956_v4 }
  0xd6   : > { %1442 = vmatprep.subr.bf16.mxu0 %v1961_v5 }
  0xd9   : > { %1443 = vmatpush1.bf16.msra.mxu0 %v1959_v6 }
  0xda   : > { %1444 = vmatprep.subr.bf16.mxu0 %v1964_v7 }
  0xdd   : > { %1445 = vmatpush1.bf16.msra.mxu0 %v1962_v8 }
  0xe0   : > { %1447 = vmatmul.mubr.bf16.vlgmr.msra.gmra.mrb[4].mxu0 %v1654_v9 }
 0x173   : > { %v1366_v10 = vpop.f32.mrb[0].mxu0 }
 0x174   : > { %v1407_v11 = vpop.f32.mrb[0].mxu1  ;;  %v1368_v13 = vpop.f32.mrb[1].mxu0 }
 0x175   : > { %v1408_v12 = vadd.f32 %v1407_v11, %v1366_v10  ;;  %v1409_v14 = vpop.f32.mrb[1].mxu1  ;;  %v1370_v16 = vpop.f32.mrb[2].mxu0 }
 0x176   : > { %v1410_v15 = vadd.f32 %v1409_v14, %v1368_v13  ;;  %v1411_v17 = vpop.f32.mrb[2].mxu1  ;;  %v1371_v18 = vpop.f32.mrb[3].mxu0 }
 0x177   : > { %v1412_v19 = vpop.f32.mrb[3].mxu1 }
 0x1b3   : > { %v1448_v21 = vpop.f32.mrb[4].mxu0  ;;  %1462 = sbr.rel (%p1752_p13) target bundleno = 458 (0x1ca), region = 82 }
 0x1b4   : > { %v1449_v22 = vadd.f32 %v1448_v21, %v1408_v12  ;;  %v1450_v24 = vpop.f32.mrb[5].mxu0 }
 0x1b5   : > { %v1451_v25 = vadd.f32 %v1450_v24, %v1410_v15  ;;  %v1452_v26 = vpop.f32.mrb[6].mxu0 }
 0x1b6   : > { %v1455_v27 = vadd.f32 %v1449_v22, %v730_v20  ;;  %v1453_v28 = vpop.f32.mrb[7].mxu0 }
 0x1b7   : > { %v1456_v29 = vadd.f32 %v1451_v25, %v731_v23 }
 0x1b8   : > { %1457 = vst [vmem:[#allocation2] sm:$0xff] %v1455_v27 }
 0x1b9   : > { %1458 = vst [vmem:[#allocation2 + $0x8] sm:$0xff] %v1456_v29 }
 0x1bf   : > { %v1463_v36 = vld [vmem:[#allocation2] sm:$0xff] }
 0x1c0   : > { %v1464_v37 = vld [vmem:[#allocation2 + $0x8] sm:$0xff]  ;;  %v1477_v42 = vmul.f32 %v1470_v38, %v1463_v36 }
 0x1c1   : > { %v1478_v43 = vmul.f32 %v1474_v39, %v1464_v37 }
 0x1c2   : > { %v1491_v44 = vadd.f32 %v1484_v40, %v1477_v42 }
 0x1c3   : > { %v1492_v45 = vadd.f32 %v1488_v41, %v1478_v43 }
 0x1c4   : > { %v1493_v46 = vmax.f32 %v1491_v44, 0.0 }
 0x1c5   : > { %v1494_v47 = vmax.f32 %v1492_v45, 0.0 }
 0x1c7   : > { %v1757_v48 = vpack.c.bf16 %v1494_v47, %v1493_v46 }
 0x1c9   : > { %1503 = vst [vmem:[%s2329_s12] sm:$0xff] %v1757_v48 }
 0x1ca PF: > { %s14_s21 = sadd.s32 1, %s2021_s21   ;;  %s2477_s15 = smov %s2001_s16 }
 0x1cb   : > { %p11_p0 = scmp.ge.s32.totalorder %s14_s21, 14   ;;  %s2478_s16 = smov %s2100_s28 }
 0x1cc   : > { %s2479_s17 = smov %s2013_s19  ;;  %s2480_s18 = smov %s2017_s20 }
 0x1cd   : > { %s2481_s19 = smov %s2484_s22  ;;  %s2482_s20 = smov %s2488_s23 }
 0x1ce   :  { %13 = sbr.rel (!%p11_p0) target bundleno = 4 (0x4), region = 126 }

// kernel: res18_feature_forward.44
= control target key start
LH: loop header
LB: loop body
LE: loop exit
PB: predicated region body
PF: predicated region fallthrough
CT: control target
= control target key end

     0   :  { %vm21_vm0 = vcmask 1041409   ;;  %vm23_vm1 = vcmask 1043459   ;;  %vm25_vm2 = vcmask 1045509   ;;  %vm27_vm3 = vcmask 1047559   ;;  %s55_s0 = inlined_call_operand.vmem [shape: bf16[2,1,512], index: 0, kind: input, shape index: {}]   ;;  %s56_s1 = inlined_call_operand.vmem [shape: f32[2,512], index: 1, kind: output, shape index: {}]  }
   0x1   :  { %v36_v0 = vld [vmem:[%s55_s0] sm:$0xff]  }
   0x2   :  { %v37_v1 = vunpack.c.l.bf16 %v36_v0  ;;  %v38_v2 = vunpack.c.h.bf16 %v36_v0 }
   0x4   :  { %v20_v3 = vrot.slane %v38_v2, 7 }
   0x6   :  { %v22_v4 = vsel %vm21_vm0, %v20_v3, %v37_v1 }
   0x7   :  { %v24_v5 = vsel %vm23_vm1, %v20_v3, %v22_v4 }
   0x8   :  { %v26_v6 = vsel %vm25_vm2, %v20_v3, %v24_v5 }
   0x9   :  { %v28_v7 = vsel %vm27_vm3, %v20_v3, %v26_v6 }
   0xa   :  { %30 = vst [vmem:[%s56_s1] sm:$0xff] %v28_v7 }

// kernel: res18_feature_forward.45
= control target key start
LH: loop header
LB: loop body
LE: loop exit
PB: predicated region body
PF: predicated region fallthrough
CT: control target
= control target key end

     0   :  { %v468_v47 = vmov 1983009808   ;;  %v94_v49 = vlaneseq  ;;  %s711_s0 = inlined_call_operand.vmem [shape: f32[2,512], index: 0, kind: input, shape index: {}]   ;;  %s712_s1 = inlined_call_operand.vmem [shape: f32[512,8], index: 1, kind: input, shape index: {}]   ;;  %s713_s2 = inlined_call_operand.vmem [shape: f32[1,8], index: 2, kind: input, shape index: {}]   ;;  %s714_s3 = inlined_call_operand.vmem [shape: f32[2,1], index: 3, kind: output, shape index: {0}]   ;;  %s715_s4 = inlined_call_operand.hbm [shape: f32[2,7], index: 4, kind: output, shape index: {1}]  }
   0x1   :  { %v34_v0 = vld [vmem:[%s712_s1 + $0x80] sm:$0xff]  ;;  %v35_v1 = vld [vmem:[%s712_s1 + $0x88] sm:$0xff]  ;;  %v36_v11 = vld [vmem:[%s712_s1 + $0x90] sm:$0xff]  ;;  %v92_v48 = vunpack.c.l.s4 %v468_v47 }
   0x2   :  { %v18_v2 = vld [vmem:[%s712_s1] sm:$0xff]  ;;  %v366_v3 = vpack.c.bf16 %v35_v1, %v34_v0  ;;  %v19_v4 = vld [vmem:[%s712_s1 + $0x8] sm:$0xff]  ;;  %v37_v13 = vld [vmem:[%s712_s1 + $0x98] sm:$0xff]  ;;  %v95_v0 = vshrl.u32 %v94_v49, 7 }
   0x3   :  { %v66_v5 = vld [vmem:[%s712_s1 + $0x180] sm:$0xff]  ;;  %v67_v6 = vld [vmem:[%s712_s1 + $0x188] sm:$0xff]  ;;  %v368_v7 = vpack.c.bf16 %v19_v4, %v18_v2  ;;  %v20_v14 = vld [vmem:[%s712_s1 + $0x10] sm:$0xff]  ;;  %v370_v16 = vpack.c.bf16 %v37_v13, %v36_v11  ;;  %v93_v63 = vunpack.c.0.s8 %v92_v48 }
   0x4   :  { %v398_v8 = vpack.c.bf16 %v67_v6, %v66_v5  ;;  %v50_v9 = vld [vmem:[%s712_s1 + $0x100] sm:$0xff]  ;;  %v51_v10 = vld [vmem:[%s712_s1 + $0x108] sm:$0xff]  ;;  %367 = vmatprep.subr.bf16.mxu0 %v366_v3  ;;  %v21_v15 = vld [vmem:[%s712_s1 + $0x18] sm:$0xff] }
   0x5   :  { %v400_v12 = vpack.c.bf16 %v51_v10, %v50_v9  ;;  %369 = vmatpush3.bf16.msra.mxu0 %v368_v7  ;;  %v372_v17 = vpack.c.bf16 %v21_v15, %v20_v14  ;;  %v68_v18 = vld [vmem:[%s712_s1 + $0x190] sm:$0xff]  ;;  %v69_v19 = vld [vmem:[%s712_s1 + $0x198] sm:$0xff]  ;;  %v38_v23 = vld [vmem:[%s712_s1 + $0xa0] sm:$0xff]  ;;  %v96_v13 = vsub.s32 %v93_v63, %v95_v0 }
   0x6   :  { %399 = vmatprep.subr.bf16.mxu1 %v398_v8  ;;  %v52_v20 = vld [vmem:[%s712_s1 + $0x110] sm:$0xff]  ;;  %v402_v21 = vpack.c.bf16 %v69_v19, %v68_v18  ;;  %v53_v22 = vld [vmem:[%s712_s1 + $0x118] sm:$0xff]  ;;  %v39_v24 = vld [vmem:[%s712_s1 + $0xa8] sm:$0xff]  ;;  %371 = vmatprep.subr.bf16.mxu0 %v370_v16 }
   0x7   :  { %401 = vmatpush3.bf16.msra.mxu1 %v400_v12  ;;  %v404_v25 = vpack.c.bf16 %v53_v22, %v52_v20  ;;  %v374_v26 = vpack.c.bf16 %v39_v24, %v38_v23  ;;  %v22_v27 = vld [vmem:[%s712_s1 + $0x20] sm:$0xff]  ;;  %v23_v28 = vld [vmem:[%s712_s1 + $0x28] sm:$0xff]  ;;  %v40_v35 = vld [vmem:[%s712_s1 + $0xb0] sm:$0xff] }
   0x8   :  { %v70_v29 = vld [vmem:[%s712_s1 + $0x1a0] sm:$0xff]  ;;  %403 = vmatprep.subr.bf16.mxu1 %v402_v21  ;;  %v71_v30 = vld [vmem:[%s712_s1 + $0x1a8] sm:$0xff]  ;;  %v376_v33 = vpack.c.bf16 %v23_v28, %v22_v27  ;;  %v41_v36 = vld [vmem:[%s712_s1 + $0xb8] sm:$0xff] }
   0x9   :  { %v54_v31 = vld [vmem:[%s712_s1 + $0x120] sm:$0xff]  ;;  %v55_v32 = vld [vmem:[%s712_s1 + $0x128] sm:$0xff]  ;;  %373 = vmatpush3.bf16.msra.mxu0 %v372_v17  ;;  %v406_v34 = vpack.c.bf16 %v71_v30, %v70_v29  ;;  %v24_v37 = vld [vmem:[%s712_s1 + $0x30] sm:$0xff]  ;;  %v378_v39 = vpack.c.bf16 %v41_v36, %v40_v35 }
   0xa   :  { %375 = vmatprep.subr.bf16.mxu0 %v374_v26  ;;  %v408_v38 = vpack.c.bf16 %v55_v32, %v54_v31  ;;  %v25_v40 = vld [vmem:[%s712_s1 + $0x38] sm:$0xff]  ;;  %v72_v41 = vld [vmem:[%s712_s1 + $0x1b0] sm:$0xff]  ;;  %v42_v46 = vld [vmem:[%s712_s1 + $0xc0] sm:$0xff] }
   0xb   :  { %405 = vmatpush3.bf16.msra.mxu1 %v404_v25  ;;  %v73_v42 = vld [vmem:[%s712_s1 + $0x1b8] sm:$0xff]  ;;  %v56_v44 = vld [vmem:[%s712_s1 + $0x130] sm:$0xff]  ;;  %v43_v50 = vld [vmem:[%s712_s1 + $0xc8] sm:$0xff]  ;;  %v380_v51 = vpack.c.bf16 %v25_v40, %v24_v37 }
   0xc   :  { %407 = vmatprep.subr.bf16.mxu1 %v406_v34  ;;  %v410_v43 = vpack.c.bf16 %v73_v42, %v72_v41  ;;  %v57_v45 = vld [vmem:[%s712_s1 + $0x138] sm:$0xff]  ;;  %v74_v52 = vld [vmem:[%s712_s1 + $0x1c0] sm:$0xff]  ;;  %v75_v53 = vld [vmem:[%s712_s1 + $0x1c8] sm:$0xff]  ;;  %v382_v55 = vpack.c.bf16 %v43_v50, %v42_v46 }
   0xd   :  { %377 = vmatpush3.bf16.msra.mxu0 %v376_v33  ;;  %v412_v54 = vpack.c.bf16 %v57_v45, %v56_v44  ;;  %v26_v56 = vld [vmem:[%s712_s1 + $0x40] sm:$0xff]  ;;  %v27_v57 = vld [vmem:[%s712_s1 + $0x48] sm:$0xff]  ;;  %v414_v59 = vpack.c.bf16 %v75_v53, %v74_v52  ;;  %v44_v61 = vld [vmem:[%s712_s1 + $0xd0] sm:$0xff] }
   0xe   :  { %379 = vmatprep.subr.bf16.mxu0 %v378_v39  ;;  %v58_v58 = vld [vmem:[%s712_s1 + $0x140] sm:$0xff]  ;;  %v59_v60 = vld [vmem:[%s712_s1 + $0x148] sm:$0xff]  ;;  %v45_v62 = vld [vmem:[%s712_s1 + $0xd8] sm:$0xff]  ;;  %v384_v3 = vpack.c.bf16 %v27_v57, %v26_v56 }
   0xf   :  { %409 = vmatpush3.bf16.msra.mxu1 %v408_v38  ;;  %v76_v1 = vld [vmem:[%s712_s1 + $0x1d0] sm:$0xff]  ;;  %v77_v2 = vld [vmem:[%s712_s1 + $0x1d8] sm:$0xff]  ;;  %v416_v4 = vpack.c.bf16 %v59_v60, %v58_v58  ;;  %v386_v5 = vpack.c.bf16 %v45_v62, %v44_v61  ;;  %v46_v11 = vld [vmem:[%s712_s1 + $0xe0] sm:$0xff] }
  0x10   :  { %411 = vmatprep.subr.bf16.mxu1 %v410_v43  ;;  %v28_v6 = vld [vmem:[%s712_s1 + $0x50] sm:$0xff]  ;;  %v29_v7 = vld [vmem:[%s712_s1 + $0x58] sm:$0xff]  ;;  %v418_v9 = vpack.c.bf16 %v77_v2, %v76_v1  ;;  %v47_v12 = vld [vmem:[%s712_s1 + $0xe8] sm:$0xff] }
  0x11   :  { %381 = vmatpush3.bf16.msra.mxu0 %v380_v51  ;;  %v60_v8 = vld [vmem:[%s712_s1 + $0x150] sm:$0xff]  ;;  %v61_v10 = vld [vmem:[%s712_s1 + $0x158] sm:$0xff]  ;;  %v78_v14 = vld [vmem:[%s712_s1 + $0x1e0] sm:$0xff]  ;;  %v388_v16 = vpack.c.bf16 %v29_v7, %v28_v6  ;;  %v390_v20 = vpack.c.bf16 %v47_v12, %v46_v11 }
  0x12   :  { %383 = vmatprep.subr.bf16.mxu0 %v382_v55  ;;  %v79_v15 = vld [vmem:[%s712_s1 + $0x1e8] sm:$0xff]  ;;  %v30_v17 = vld [vmem:[%s712_s1 + $0x60] sm:$0xff]  ;;  %v420_v19 = vpack.c.bf16 %v61_v10, %v60_v8 }
  0x13   :  { %413 = vmatpush3.bf16.msra.mxu1 %v412_v54  ;;  %v31_v18 = vld [vmem:[%s712_s1 + $0x68] sm:$0xff]  ;;  %v62_v21 = vld [vmem:[%s712_s1 + $0x160] sm:$0xff] }
  0x14   :  { %415 = vmatprep.subr.bf16.mxu1 %v414_v59  ;;  %v17_v22 = vld [vmem:[%s711_s0] sm:$0xff] }
  0x15   :  { %385 = vmatpush3.bf16.msra.mxu0 %v384_v3 }
  0x16   :  { %387 = vmatprep.subr.bf16.mxu0 %v386_v5 }
  0x17   :  { %417 = vmatpush3.bf16.msra.mxu1 %v416_v4 }
  0x18   :  { %10 = vsyncpa [#allocation3], 0  ;;  %419 = vmatprep.subr.bf16.mxu1 %v418_v9  ;;  %v422_v23 = vpack.c.bf16 %v79_v15, %v78_v14  ;;  %v63_v24 = vld [vmem:[%s712_s1 + $0x168] sm:$0xff]  ;;  %v48_v25 = vld [vmem:[%s712_s1 + $0xf0] sm:$0xff]  ;;  %v97_v27 = vrot.slane %v17_v22, %v96_v13  ;;  %v90_v28 = vcombine.high %v17_v22, %v17_v22  ;;  %v392_v31 = vpack.c.bf16 %v31_v18, %v30_v17 }
  0x19   :  { %v49_v26 = vld [vmem:[%s712_s1 + $0xf8] sm:$0xff]  ;;  %v80_v29 = vld [vmem:[%s712_s1 + $0x1f0] sm:$0xff]  ;;  %389 = vmatpush3.bf16.msra.mxu0 %v388_v16  ;;  %v424_v34 = vpack.c.bf16 %v63_v24, %v62_v21  ;;  %v469_v44 = vmov 7   ;;  %v295_v46 = vld [vmem:[%s713_s2] ss:$0 sm:$0xff]  ;;  %s471_s2 = smov [#allocation2]  }
  0x1a   :  { %v81_v30 = vld [vmem:[%s712_s1 + $0x1f8] sm:$0xff]  ;;  %v105_v32 = vcombine.high %v97_v27, %v97_v27  ;;  %v104_v33 = vrot.slane %v90_v28, %v96_v13  ;;  %391 = vmatprep.subr.bf16.mxu0 %v390_v20  ;;  %v394_v35 = vpack.c.bf16 %v49_v26, %v48_v25  ;;  %v32_v36 = vld [vmem:[%s712_s1 + $0x70] sm:$0xff]  ;;  %434 = vset.pattern.permute.xlu0 %v469_v44  ;;  %s285_s16 = sshll.u32 %s471_s2, 4  ;;  %vm275_vm1 = vcmask 50176   ;;  %s286_s16 = int_to_ptr.vmem [resolvable:$true] %s285_s16 }
  0x1b   :  { %421 = vmatpush3.bf16.msra.mxu1 %v420_v19  ;;  %v33_v37 = vld [vmem:[%s712_s1 + $0x78] sm:$0xff]  ;;  %v426_v38 = vpack.c.bf16 %v81_v30, %v80_v29  ;;  %v64_v39 = vld [vmem:[%s712_s1 + $0x170] sm:$0xff]  ;;  %vm268_vm2 = vcmask 1024   ;;  %s444_s17 = scalar_lea.vmem %s286_s16, 32  ;;  %p449_p1 = scmp.lt.s32.totalorder %s286_s16, %s286_s16 }
  0x1c   :  { %423 = vmatprep.subr.bf16.mxu1 %v422_v23  ;;  %v65_v40 = vld [vmem:[%s712_s1 + $0x178] sm:$0xff]  ;;  %175 = vmatprep.mubr.f32.mxu0 %v105_v32  ;;  %v106_v41 = vcombine.high %v104_v33, %v104_v33  ;;  %v396_v42 = vpack.c.bf16 %v33_v37, %v32_v36  ;;  %s470_s1 = smov 121   ;;  %p445_p0 = scmp.ne.s32.totalorder %s286_s16, %s444_s17 }
  0x1d   :  { %393 = vmatpush3.bf16.msra.mxu0 %v392_v31  ;;  %v428_v43 = vpack.c.bf16 %v65_v40, %v64_v39  ;;  %p450_p2 = scmp.lt.s32.totalorder %s444_s17, %s444_s17 }
  0x1e   :  { %245 = vmatprep.mubr.f32.mxu1 %v106_v41  ;;  %395 = vmatprep.subr.bf16.mxu0 %v394_v35 }
  0x1f   :  { %425 = vmatpush3.bf16.msra.mxu1 %v424_v34  ;;  %p451_p3 = por %p450_p2, %p449_p1 }
  0x20   :  { %427 = vmatprep.subr.bf16.mxu1 %v426_v38 }
  0x21   :  { %397 = vmatpush3.bf16.msra.mxu0 %v396_v42  ;;  %p452_p4 = pnand %p451_p3, %p445_p0 }
  0x23   :  { %429 = vmatpush3.bf16.msra.mxu1 %v428_v43 }
  0x24   :  { %176 = vmatmul.mubr.f32.vlgmr.msra.gmra.mrb[0].mxu0 %v97_v27 }
  0x26   :  { %246 = vmatmul.mubr.f32.vlgmr.msra.gmra.mrb[0].mxu1 %v104_v33 }
  0xf7   :  { %v328_v45 = vpop.f32.mrb[0].mxu0 }
  0xf8   :  { %v329_v47 = vpop.f32.mrb[1].mxu0 }
  0xf9   :  { %v363_v48 = vpop.f32.mrb[0].mxu1  ;;  %v330_v49 = vadd.f32 %v329_v47, %v328_v45 }
  0xfa   :  { %v364_v50 = vpop.f32.mrb[1].mxu1 }
  0xfb   :  { %v365_v51 = vadd.f32 %v364_v50, %v363_v48  ;;  %v178_v52 = vadd.f32 %v330_v49, %v295_v46 }
  0xfd   :  { %v248_v53 = vadd.f32 %v365_v51, %v178_v52 }
  0xff   :  { %v252_v54 = vsub.f32 0.0, %v248_v53  ;;  %v258_v55 = vmul.f32 1.442695, %v248_v53  ;;  %vm251_vm0 = vcmp.ge.f32.partialorder %v248_v53, 0.0 }
 0x101   :  { %v253_v56 = vmul.f32 1.442695, %v252_v54  ;;  %436 = vpow2.f32 %v258_v55 }
 0x103   :  { %438 = vpow2.f32 %v253_v56 }
 0x10b   :  { %v437_v57 = vpop.eup %436 }
 0x10c   :  { %v260_v58 = vadd.f32 1.0, %v437_v57 }
 0x10d   :  { %v439_v59 = vpop.eup %438 }
 0x10e   :  { %v255_v60 = vadd.f32 1.0, %v439_v59  ;;  %440 = vrcp.f32 %v260_v58 }
 0x110   :  { %442 = vrcp.f32 %v255_v60 }
 0x118   :  { %v441_v61 = vpop.eup %440 }
 0x119   :  { %v262_v62 = vmul.f32 %v441_v61, %v437_v57 }
 0x11a   :  { %v443_v63 = vpop.eup %442 }
 0x11b   :  { %v263_v0 = vsel %vm251_vm0, %v443_v63, %v262_v62 }
 0x11c   :  { %271 = vperm.xlu0 %434, %v263_v0  }
 0x120   :  { %265 = vrot.lane.b32.xlu0 %v263_v0, %s470_s1 }
 0x19b   :  { %v272_v1 = vpop.permute.xlu0 %271 }
 0x19c   :  { %v274_v2 = vmul.f32 %v272_v1, %v248_v53 }
 0x19e   :  { %276 = vst.msk [vmem:[#allocation2] sm:$0x3] %vm275_vm1, %v274_v2 }
 0x19f   :  { %v266_v3 = vpop.permute.xlu0 %265 }
 0x1a0   :  { %455 = shalt.err (!%p452_p4)
}
 0x1a1   :  { %s456_s20 = scalar_lea.hbm %s715_s4, 32 }
 0x1a2   :  { %p457_p5 = scmp.ne.s32.totalorder %s715_s4, %s456_s20  ;;  %p460_p6 = scmp.lt.u32.totalorder %s456_s20, %s715_s4 }
 0x1a4   :  { %p462_p7 = pnand %p460_p6, %p457_p5 }
 0x1a6   :  { %465 = shalt.err (!%p462_p7)
}
 0x1a7   :  { %288 = dma.vmem_to_hbm [thread:$0]  %s286_s16, 32, %s715_s4, [#allocation3]   ;;  %269 = vst.msk [vmem:[%s714_s3] sm:$0x3] %vm268_vm2, %v266_v3 }
 0x1a8   :  { %466 = dma.done.wait [#allocation3], 32  }
 0x1a9   :  { %467 = vsyncadd [#allocation3], 4294967264 }
 0x1aa   :  { %294 = vsyncpa [#allocation3], 1 }

</bundles_post_ra>
